<compile_context>
chip_gen: v7x
topology: tpu7x:2x2x1
jax: 0.10.0
libtpu: 0.0.40
codegen_flags: <defaults>
</compile_context>

<pallas_src>
import functools
import math

import numpy as np
import jax
import jax.numpy as jnp
from jax.experimental import pallas as pl
from jax.experimental.pallas import tpu as pltpu


def _attention_mapping_kernel(w_ref, attr_ref, wk_ref, wqT_ref, wv_ref, o_ref, *, dk):
    """Fused attention_mapping forward for one batch element (grid axis 0 = batch)."""
    d = wqT_ref.shape[0]
    w = w_ref[0]                      # (n, d) f32
    a_row = attr_ref[0]               # (1, d) f32   lane-dense attribute row
    wk = wk_ref[...]                  # (n, 1) f32   k_matrix.weight
    wqT = wqT_ref[...]                # (d, d) f32   q_matrix.weight.T
    wv = wv_ref[...]                  # (d, d) f32   v_matrix.weight (natural orientation)

    # --- q-path collapse:  kq = Wk^T (w Wq^T) = (Wk^T w) Wq^T  (exact algebra) ---
    s_row = jnp.sum(w * wk, axis=0, keepdims=True)                       # (1, d)  VPU reduce
    kq_row = jnp.dot(s_row, wqT, preferred_element_type=jnp.float32)     # (1, d)  MXU GEMV
    kqs_row = kq_row * (1.0 / math.sqrt(dk))                             # fold 1/sqrt(dk) here

    # --- v-path pooled before the matmul; VPU GEMV against natural Wv gives a (d,1) column ---
    wbar_row = jnp.mean(w, axis=0, keepdims=True)                        # (1, d)
    vbar_col = jnp.sum(wbar_row * wv, axis=-1, keepdims=True)            # (d, 1)

    # --- attribute row -> column (i-indexed) via one-hot diagonal reduction (no transpose op) ---
    rows = jax.lax.broadcasted_iota(jnp.int32, (d, d), 0)
    cols = jax.lax.broadcasted_iota(jnp.int32, (d, d), 1)
    a_diag = jnp.where(rows == cols, jnp.broadcast_to(a_row, (d, d)), 0.0)
    a_col = jnp.sum(a_diag, axis=-1, keepdims=True)                      # (d, 1), a_col[i]=a[i]

    # --- exact per-row max of score = outer(a, kqs) from two tiny reductions of kqs ---
    kq_max = jnp.max(kqs_row, axis=-1, keepdims=True)                    # (1, 1)
    kq_min = jnp.min(kqs_row, axis=-1, keepdims=True)                    # (1, 1)
    m_col = jnp.where(a_col >= 0.0, a_col * kq_max, a_col * kq_min)      # (d, 1)

    # --- single pass over the (d, d) scores; `attention` is never materialized ---
    p = jnp.exp(a_col * kqs_row - m_col)                                 # (d, d)  EUP-bound
    denom_col = jnp.sum(p, axis=-1, keepdims=True)                       # (d, 1)
    coeff_col = vbar_col * pl.reciprocal(denom_col, approx=False)        # (d, 1)

    # pooled[j] = sum_i vbar[i] * softmax(score)[i, j]  ==  AvgPool rows of (v @ attention)
    pooled = jnp.sum(p * coeff_col, axis=0, keepdims=True)               # (1, d)

    # LayerNorm([d], elementwise_affine=False), eps = 1e-5 (PyTorch default).
    mu = jnp.mean(pooled, axis=-1, keepdims=True)
    var = jnp.mean(jnp.square(pooled - mu), axis=-1, keepdims=True)
    o_ref[0] = (pooled - mu) * jax.lax.rsqrt(var + 1e-5)


@jax.jit
def attention_mapping_forward(params, w, attribute):
    """w: (B, 18, 512) f32, attribute: (B, 1, 512) f32 -> (B, 1, 512) f32."""
    B, n, d = w.shape
    assert attribute.shape == (B, 1, d), attribute.shape

    w_f = w.astype(jnp.float32)
    attr_f = attribute.astype(jnp.float32)                          # lane-dense, no reshape
    wk_col = params["k_weight"].reshape(n, 1).astype(jnp.float32)   # (n, 1)
    wqT = params["q_weight"].T.astype(jnp.float32)                  # (d, d)
    wv = params["v_weight"].astype(jnp.float32)                     # (d, d) natural orientation

    kernel = functools.partial(_attention_mapping_kernel, dk=float(d))
    return pl.pallas_call(
        kernel,
        out_shape=jax.ShapeDtypeStruct((B, 1, d), jnp.float32),
        grid_spec=pltpu.PrefetchScalarGridSpec(
            num_scalar_prefetch=0,
            grid=(B,),
            in_specs=[
                pl.BlockSpec((1, n, d), lambda b: (b, 0, 0)),   # w          (f32)
                pl.BlockSpec((1, 1, d), lambda b: (b, 0, 0)),   # attribute  (f32, lane-dense)
                pl.BlockSpec((n, 1), lambda b: (0, 0)),         # Wk         (f32)
                pl.BlockSpec((d, d), lambda b: (0, 0)),         # Wq^T       (f32)
                pl.BlockSpec((d, d), lambda b: (0, 0)),         # Wv         (f32)
            ],
            out_specs=pl.BlockSpec((1, 1, d), lambda b: (b, 0, 0)),
        ),
        compiler_params=pltpu.CompilerParams(
            dimension_semantics=("parallel",),
            vmem_limit_bytes=32 * 1024 * 1024,
        ),
    )(w_f, attr_f, wk_col, wqT, wv)


def attention_mapping_reference(params, w, attribute, eps=1e-5):
    """Pure-JAX f32 reference matching the PyTorch module exactly."""
    dk = w.shape[-1]
    q = jnp.matmul(w, params["q_weight"].T)                                 # (B, n, d)
    k = jnp.matmul(jnp.swapaxes(attribute, -2, -1), params["k_weight"].T)   # (B, d, n)
    v = jnp.matmul(w, params["v_weight"].T)                                 # (B, n, d)
    score = jnp.matmul(k, q) / math.sqrt(dk)                                # (B, d, d)
    attention = jax.nn.softmax(score, axis=-1)
    out = jnp.matmul(v, attention)                                          # (B, n, d)
    pooled = jnp.mean(out, axis=1, keepdims=True)                           # AdaptiveAvgPool2d
    mu = jnp.mean(pooled, axis=-1, keepdims=True)
    var = jnp.mean(jnp.square(pooled - mu), axis=-1, keepdims=True)
    return (pooled - mu) / jnp.sqrt(var + eps)


if __name__ == "__main__":
    # Shapes dictated by the module: Linear(512, 512), Linear(1, 18), dk = 512.
    B, n, d = 2, 18, 512

    key = jax.random.PRNGKey(0)
    k1, k2, k3, k4, k5 = jax.random.split(key, 5)
    bound = 1.0 / math.sqrt(d)
    params = {
        # PyTorch nn.Linear default init: U(-1/sqrt(fan_in), 1/sqrt(fan_in)).
        "q_weight": jax.random.uniform(k1, (d, d), jnp.float32, -bound, bound),
        "k_weight": jax.random.uniform(k2, (n, 1), jnp.float32, -1.0, 1.0),
        "v_weight": jax.random.uniform(k3, (d, d), jnp.float32, -bound, bound),
    }
    w = jax.random.normal(k4, (B, n, d), jnp.float32)
    attribute = jax.random.normal(k5, (B, 1, d), jnp.float32)

    out = attention_mapping_forward(params, w, attribute)
    out = jax.block_until_ready(out)

    assert out.shape == (B, 1, d), out.shape
    assert bool(jnp.all(jnp.isfinite(out)))

    # f32 end-to-end now -> much tighter tolerance than the bf16 version.
    ref = attention_mapping_reference(params, w, attribute)
    np.testing.assert_allclose(np.asarray(out), np.asarray(ref), atol=2e-2, rtol=2e-2)

    print("KERNEL_OK")
</pallas_src>

<mosaic_0001>
module attributes {stable_mosaic.version = 11 : i64} {
  func.func @_attention_mapping_kernel(%arg0: i32, %arg1: memref<1x18x512xf32, #tpu.memory_space<vmem>>, %arg2: memref<1x1x512xf32, #tpu.memory_space<vmem>>, %arg3: memref<18x1xf32, #tpu.memory_space<vmem>>, %arg4: memref<512x512xf32, #tpu.memory_space<vmem>>, %arg5: memref<512x512xf32, #tpu.memory_space<vmem>>, %arg6: memref<1x1x512xf32, #tpu.memory_space<vmem>>) attributes {dimension_semantics = [#tpu.dimension_semantics<parallel>], iteration_bounds = array<i64: 2>, scalar_prefetch = 0 : i64, scratch_operands = 0 : i64, tpu.core_type = #tpu.core_type<tc>, window_params = [{transform_indices = @transform_0, window_bounds = array<i64: 1, 18, 512>}, {transform_indices = @transform_1, window_bounds = array<i64: 1, 1, 512>}, {pipeline_mode = #tpu.pipeline_mode<synchronous>, transform_indices = @transform_2, window_bounds = array<i64: 18, 1>}, {pipeline_mode = #tpu.pipeline_mode<synchronous>, transform_indices = @transform_3, window_bounds = array<i64: 512, 512>}, {pipeline_mode = #tpu.pipeline_mode<synchronous>, transform_indices = @transform_4, window_bounds = array<i64: 512, 512>}, {transform_indices = @transform_5, window_bounds = array<i64: 1, 1, 512>}]} {
    %c0 = arith.constant 0 : index
    %c0_0 = arith.constant 0 : index
    %c0_1 = arith.constant 0 : index
    %0 = vector.load %arg1[%c0, %c0_0, %c0_1] : memref<1x18x512xf32, #tpu.memory_space<vmem>>, vector<1x18x512xf32>
    %1 = vector.shape_cast %0 : vector<1x18x512xf32> to vector<18x512xf32>
    %c0_2 = arith.constant 0 : index
    %c0_3 = arith.constant 0 : index
    %c0_4 = arith.constant 0 : index
    %2 = vector.load %arg2[%c0_2, %c0_3, %c0_4] : memref<1x1x512xf32, #tpu.memory_space<vmem>>, vector<1x1x512xf32>
    %3 = vector.shape_cast %2 : vector<1x1x512xf32> to vector<1x512xf32>
    %c0_5 = arith.constant 0 : index
    %c0_6 = arith.constant 0 : index
    %4 = vector.load %arg3[%c0_5, %c0_6] : memref<18x1xf32, #tpu.memory_space<vmem>>, vector<18x1xf32>
    %c0_7 = arith.constant 0 : index
    %c0_8 = arith.constant 0 : index
    %5 = vector.load %arg4[%c0_7, %c0_8] : memref<512x512xf32, #tpu.memory_space<vmem>>, vector<512x512xf32>
    %c0_9 = arith.constant 0 : index
    %c0_10 = arith.constant 0 : index
    %6 = vector.load %arg5[%c0_9, %c0_10] : memref<512x512xf32, #tpu.memory_space<vmem>>, vector<512x512xf32>
    %7 = vector.broadcast %4 : vector<18x1xf32> to vector<18x512xf32>
    %8 = arith.mulf %1, %7 : vector<18x512xf32>
    %cst = arith.constant dense<0.000000e+00> : vector<512xf32>
    %9 = vector.multi_reduction <add>, %8, %cst [0] : vector<18x512xf32> to vector<512xf32>
    %10 = vector.shape_cast %9 : vector<512xf32> to vector<1x512xf32>
    %cst_11 = arith.constant dense<0.000000e+00> : vector<1x512xf32>
    %11 = tpu.matmul %10, %5, %cst_11 {dimension_numbers = #tpu.dot_dimension_numbers<[1], [0], [0], [1], [0, 0, 1, 1], [], []>} : vector<1x512xf32>, vector<512x512xf32>, vector<1x512xf32> -> vector<1x512xf32>
    %cst_12 = arith.constant 0.0441941731 : f32
    %12 = vector.broadcast %cst_12 : f32 to vector<1x512xf32>
    %13 = arith.mulf %11, %12 : vector<1x512xf32>
    %cst_13 = arith.constant dense<0.000000e+00> : vector<512xf32>
    %14 = vector.multi_reduction <add>, %1, %cst_13 [0] : vector<18x512xf32> to vector<512xf32>
    %15 = vector.shape_cast %14 : vector<512xf32> to vector<1x512xf32>
    %cst_14 = arith.constant 1.800000e+01 : f32
    %16 = vector.broadcast %cst_14 : f32 to vector<1x512xf32>
    %17 = arith.divf %15, %16 : vector<1x512xf32>
    %18 = vector.broadcast %17 : vector<1x512xf32> to vector<512x512xf32>
    %19 = arith.mulf %18, %6 : vector<512x512xf32>
    %cst_15 = arith.constant dense<0.000000e+00> : vector<512xf32>
    %20 = vector.multi_reduction <add>, %19, %cst_15 [1] : vector<512x512xf32> to vector<512xf32>
    %21 = vector.shape_cast %20 : vector<512xf32> to vector<512x1xf32>
    %22 = tpu.iota {dimensions = array<i32: 0>} : vector<512x512xi32>
    %23 = tpu.iota {dimensions = array<i32: 1>} : vector<512x512xi32>
    %24 = arith.cmpi eq, %22, %23 : vector<512x512xi32>
    %25 = vector.shape_cast %3 : vector<1x512xf32> to vector<1x512xf32>
    %26 = vector.broadcast %25 : vector<1x512xf32> to vector<512x512xf32>
    %cst_16 = arith.constant 0.000000e+00 : f32
    %27 = vector.broadcast %cst_16 : f32 to vector<512x512xf32>
    %28 = arith.select %24, %26, %27 : vector<512x512xi1>, vector<512x512xf32>
    %cst_17 = arith.constant dense<0.000000e+00> : vector<512xf32>
    %29 = vector.multi_reduction <add>, %28, %cst_17 [1] : vector<512x512xf32> to vector<512xf32>
    %30 = vector.shape_cast %29 : vector<512xf32> to vector<512x1xf32>
    %cst_18 = arith.constant dense<0xFF800000> : vector<1xf32>
    %31 = vector.multi_reduction <maximumf>, %13, %cst_18 [1] : vector<1x512xf32> to vector<1xf32>
    %32 = vector.shape_cast %31 : vector<1xf32> to vector<1x1xf32>
    %cst_19 = arith.constant dense<0x7F800000> : vector<1xf32>
    %33 = vector.multi_reduction <minimumf>, %13, %cst_19 [1] : vector<1x512xf32> to vector<1xf32>
    %34 = vector.shape_cast %33 : vector<1xf32> to vector<1x1xf32>
    %cst_20 = arith.constant 0.000000e+00 : f32
    %35 = vector.broadcast %cst_20 : f32 to vector<512x1xf32>
    %36 = arith.cmpf oge, %30, %35 : vector<512x1xf32>
    %37 = vector.broadcast %32 : vector<1x1xf32> to vector<512x1xf32>
    %38 = arith.mulf %30, %37 : vector<512x1xf32>
    %39 = vector.broadcast %34 : vector<1x1xf32> to vector<512x1xf32>
    %40 = arith.mulf %30, %39 : vector<512x1xf32>
    %41 = arith.select %36, %38, %40 : vector<512x1xi1>, vector<512x1xf32>
    %42 = vector.broadcast %30 : vector<512x1xf32> to vector<512x512xf32>
    %43 = vector.broadcast %13 : vector<1x512xf32> to vector<512x512xf32>
    %44 = arith.mulf %42, %43 : vector<512x512xf32>
    %45 = vector.broadcast %41 : vector<512x1xf32> to vector<512x512xf32>
    %46 = arith.subf %44, %45 : vector<512x512xf32>
    %47 = math.exp %46 : vector<512x512xf32>
    %cst_21 = arith.constant dense<0.000000e+00> : vector<512xf32>
    %48 = vector.multi_reduction <add>, %47, %cst_21 [1] : vector<512x512xf32> to vector<512xf32>
    %49 = vector.shape_cast %48 : vector<512xf32> to vector<512x1xf32>
    %50 = tpu.reciprocal %49 : vector<512x1xf32> -> vector<512x1xf32>
    %51 = arith.mulf %21, %50 : vector<512x1xf32>
    %52 = vector.broadcast %51 : vector<512x1xf32> to vector<512x512xf32>
    %53 = arith.mulf %47, %52 : vector<512x512xf32>
    %cst_22 = arith.constant dense<0.000000e+00> : vector<512xf32>
    %54 = vector.multi_reduction <add>, %53, %cst_22 [0] : vector<512x512xf32> to vector<512xf32>
    %55 = vector.shape_cast %54 : vector<512xf32> to vector<1x512xf32>
    %cst_23 = arith.constant dense<0.000000e+00> : vector<1xf32>
    %56 = vector.multi_reduction <add>, %55, %cst_23 [1] : vector<1x512xf32> to vector<1xf32>
    %57 = vector.shape_cast %56 : vector<1xf32> to vector<1x1xf32>
    %cst_24 = arith.constant 5.120000e+02 : f32
    %58 = vector.broadcast %cst_24 : f32 to vector<1x1xf32>
    %59 = arith.divf %57, %58 : vector<1x1xf32>
    %60 = vector.broadcast %59 : vector<1x1xf32> to vector<1x512xf32>
    %61 = arith.subf %55, %60 : vector<1x512xf32>
    %62 = arith.mulf %61, %61 : vector<1x512xf32>
    %cst_25 = arith.constant dense<0.000000e+00> : vector<1xf32>
    %63 = vector.multi_reduction <add>, %62, %cst_25 [1] : vector<1x512xf32> to vector<1xf32>
    %64 = vector.shape_cast %63 : vector<1xf32> to vector<1x1xf32>
    %cst_26 = arith.constant 5.120000e+02 : f32
    %65 = vector.broadcast %cst_26 : f32 to vector<1x1xf32>
    %66 = arith.divf %64, %65 : vector<1x1xf32>
    %67 = vector.broadcast %59 : vector<1x1xf32> to vector<1x512xf32>
    %68 = arith.subf %55, %67 : vector<1x512xf32>
    %cst_27 = arith.constant 9.99999974E-6 : f32
    %69 = vector.broadcast %cst_27 : f32 to vector<1x1xf32>
    %70 = arith.addf %66, %69 : vector<1x1xf32>
    %71 = math.rsqrt %70 : vector<1x1xf32>
    %72 = vector.broadcast %71 : vector<1x1xf32> to vector<1x512xf32>
    %73 = arith.mulf %68, %72 : vector<1x512xf32>
    %c0_28 = arith.constant 0 : index
    %c0_29 = arith.constant 0 : index
    %c0_30 = arith.constant 0 : index
    %74 = vector.load %arg6[%c0_28, %c0_29, %c0_30] : memref<1x1x512xf32, #tpu.memory_space<vmem>>, vector<1x1x512xf32>
    %75 = vector.shape_cast %74 : vector<1x1x512xf32> to vector<1x512xf32>
    %76 = vector.shape_cast %73 : vector<1x512xf32> to vector<1x1x512xf32>
    tpu.vector_store %arg6[%c0_28, %c0_29, %c0_30], %76 {strides = array<i32>} : memref<1x1x512xf32, #tpu.memory_space<vmem>>, vector<1x1x512xf32>,
    return
  }
  func.func @transform_0(%arg0: i32) -> (i32, i32, i32) {
    %c0_i32 = arith.constant 0 : i32
    %c0_i32_0 = arith.constant 0 : i32
    %c0_i32_1 = arith.constant 0 : i32
    return %arg0, %c0_i32, %c0_i32_0 : i32, i32, i32
  }
  func.func @transform_1(%arg0: i32) -> (i32, i32, i32) {
    %c0_i32 = arith.constant 0 : i32
    %c0_i32_0 = arith.constant 0 : i32
    %c0_i32_1 = arith.constant 0 : i32
    return %arg0, %c0_i32, %c0_i32_0 : i32, i32, i32
  }
  func.func @transform_2(%arg0: i32) -> (i32, i32) {
    %c0_i32 = arith.constant 0 : i32
    %c0_i32_0 = arith.constant 0 : i32
    %c0_i32_1 = arith.constant 0 : i32
    return %c0_i32, %c0_i32_0 : i32, i32
  }
  func.func @transform_3(%arg0: i32) -> (i32, i32) {
    %c0_i32 = arith.constant 0 : i32
    %c0_i32_0 = arith.constant 0 : i32
    %c0_i32_1 = arith.constant 0 : i32
    return %c0_i32, %c0_i32_0 : i32, i32
  }
  func.func @transform_4(%arg0: i32) -> (i32, i32) {
    %c0_i32 = arith.constant 0 : i32
    %c0_i32_0 = arith.constant 0 : i32
    %c0_i32_1 = arith.constant 0 : i32
    return %c0_i32, %c0_i32_0 : i32, i32
  }
  func.func @transform_5(%arg0: i32) -> (i32, i32, i32) {
    %c0_i32 = arith.constant 0 : i32
    %c0_i32_0 = arith.constant 0 : i32
    %c0_i32_1 = arith.constant 0 : i32
    return %arg0, %c0_i32, %c0_i32_0 : i32, i32, i32
  }
}

</mosaic_0001>

<bundles_post_ra>
// kernel: attention_mapping_forward.1
= control target key start
LH: loop header
LB: loop body
LE: loop exit
PB: predicated region body
PF: predicated region fallthrough
CT: control target
= control target key end

     0   :  { %10 = vsyncpa [#allocation3], 0  ;;  %s12338_s0 = inlined_call_operand.vmem [shape: f32[2,18,512], index: 0, kind: input, shape index: {}]   ;;  %s12339_s1 = inlined_call_operand.vmem [shape: f32[2,1,512], index: 1, kind: input, shape index: {}]   ;;  %s12340_s2 = inlined_call_operand.vmem [shape: f32[18,1], index: 2, kind: input, shape index: {}]   ;;  %s12341_s3 = inlined_call_operand.vmem [shape: f32[512,512], index: 3, kind: input, shape index: {}]   ;;  %s12342_s4 = inlined_call_operand.vmem [shape: f32[512,512], index: 4, kind: input, shape index: {}]   ;;  %s12343_s5 = inlined_call_operand.hbm [shape: f32[2,1,512], index: 5, kind: output, shape index: {}]  }
   0x1   :  { %12 = vsyncpa [#allocation3 + $0x1], 0  ;;  %s6166_s18 = smov 0   ;;  %s6168_s19 = smov 0  }
   0x2   :  { %s6170_s20 = smov 0   ;;  %s6172_s21 = smov 0  }
   0x3 LB: > { %s6187_s22 = sadd.s32 4294967295, %s6131_s21   ;;  %s5110_s23 = sadd.s32 4294967294, %s6131_s21   ;;  %s6131_s21 = sphi %s6172_s21, %s14050_s21   ;;  %s6127_s20 = sphi %s6170_s20, %s14049_s20   ;;  %s6123_s19 = sphi %s6168_s19, %s14048_s19   ;;  %s6119_s18 = sphi %s6166_s18, %s14047_s18  }
   0x4   : > { %s6191_s24 = sadd.s32 1, %s6131_s21   ;;  %s140_s25 = sadd.s32 1, %s6127_s20 }
   0x5   : > { %s137_s26 = ssub.s32 %s6131_s21, %s6191_s24  ;;  %p150_p0 = scmp.ne.s32.totalorder %s6127_s20, %s6123_s19 }
   0x6   : > { %p138_p1 = scmp.eq.s32.totalorder %s137_s26, 0  ;;  %p151_p2 = scmp.eq.s32.totalorder %s6187_s22, 1 }
   0x7   : > { %p156_p3 = scmp.ne.s32.totalorder %s6123_s19, %s6119_s18  ;;  %p157_p4 = scmp.eq.s32.totalorder %s5110_s23, 1 }
   0x8   : > { %s6202_s27 = scalar_select %p138_p1, %s6127_s20, %s140_s25  }
   0x9   : > { %p6204_p5 = por %p151_p2, %p150_p0  ;;  %p6208_p6 = por %p157_p4, %p156_p3 }
   0xa   : > { %p5113_p7 = scmp.ge.s32.totalorder %s6131_s21, 1  ;;  %p199_p8 = scmp.lt.s32.totalorder %s6131_s21, 3 }
   0xc   : > { %p200_p9 = pnand %p5113_p7, %p199_p8 }
   0xe   : > { %203 = sbr.rel (%p200_p9) target bundleno = 1625 (0x659), region = 40 }
  0x15   : > { %v253_v0 = vld [vmem:[%s12340_s2] sm:$0xff]  ;;  %v255_v1 = vld [vmem:[%s12340_s2 + $0x10] sm:$0x3]  ;;  %v6133_v2 = vmov 0   ;;  %v254_v3 = vld [vmem:[%s12340_s2 + $0x8] sm:$0xff]  ;;  %p231_p10 = scmp.lt.s32.totalorder %s6187_s22, 1 }
  0x16   : > { %5425 = vset.pattern.permute.xlu0 %v6133_v2  ;;  %5426 = vset.pattern.permute.xlu1 %v6133_v2  ;;  %v257_v4 = vld [vmem:[%s12341_s3 + $0x8] sm:$0xff]  ;;  %v259_v6 = vld [vmem:[%s12341_s3 + $0x18] sm:$0xff]  ;;  %v256_v9 = vld [vmem:[%s12341_s3] sm:$0xff]  ;;  %s228_s14 = sand.u32 1, %s6123_s19   ;;  %s5122_s17 = sshll.u32 %s6187_s22, 6 }
  0x17   : > { %v261_v5 = vld [vmem:[%s12341_s3 + $0x28] sm:$0xff]  ;;  %770 = vperm.xlu0 %5425, %v253_v0   ;;  %780 = vperm.xlu1 %5426, %v255_v1   ;;  %v263_v8 = vld [vmem:[%s12341_s3 + $0x38] sm:$0xff]  ;;  %v260_v10 = vld [vmem:[%s12341_s3 + $0x20] sm:$0xff]  ;;  %s6401_s15 = scalar_select %p231_p10, %s6187_s22, 1 }
  0x18   : > { %v5123_v7 = vpack.c.bf16 %v261_v5, %v257_v4  ;;  %v5251_v11 = vpack.c.bf16 %v263_v8, %v259_v6  ;;  %v5125_v12 = vpack.c.bf16 %v260_v10, %v256_v9  ;;  %v258_v13 = vld [vmem:[%s12341_s3 + $0x10] sm:$0xff]  ;;  %v265_v15 = vld [vmem:[%s12341_s3 + $0x48] sm:$0xff]  ;;  %v267_v18 = vld [vmem:[%s12341_s3 + $0x58] sm:$0xff]  ;;  %s5114_s16 = sshll.u32 %s228_s14, 2  ;;  %s5025_s6 = scalar_lea.sflag [#allocation3], %s228_s14 }
  0x19   : > { %v262_v14 = vld [vmem:[%s12341_s3 + $0x30] sm:$0xff]  ;;  %v269_v17 = vld [vmem:[%s12341_s3 + $0x68] sm:$0xff]  ;;  %v271_v19 = vld [vmem:[%s12341_s3 + $0x78] sm:$0xff]  ;;  %s5116_s26 = sshll.u32 %s6401_s15, 2  ;;  %s5383_s23 = smul.u32 96, %s6401_s15 }
  0x1a   : > { %5124 = vmatprep.subr.bf16.mxu0 %v5123_v7  ;;  %v5253_v16 = vpack.c.bf16 %v262_v14, %v258_v13  ;;  %5252 = vmatprep.subr.bf16.mxu1 %v5251_v11  ;;  %v5127_v20 = vpack.c.bf16 %v269_v17, %v265_v15  ;;  %v5255_v21 = vpack.c.bf16 %v271_v19, %v267_v18  ;;  %v264_v22 = vld [vmem:[%s12341_s3 + $0x40] sm:$0xff]  ;;  %v266_v24 = vld [vmem:[%s12341_s3 + $0x50] sm:$0xff]  ;;  %v273_v27 = vld [vmem:[%s12341_s3 + $0x88] sm:$0xff]  ;;  %v12344_v14 = vlaneseq  ;;  %s239_s9 = scalar_lea.vmem %s12339_s1, %s5116_s26  ;;  %s230_s26 = scalar_lea.vmem [#allocation2], %s5114_s16 }
  0x1b   : > { %5126 = vmatpush1.bf16.msra.mxu0 %v5125_v12  ;;  %v268_v23 = vld [vmem:[%s12341_s3 + $0x60] sm:$0xff]  ;;  %775 = vperm.xlu0 %5425, %v254_v3   ;;  %v270_v26 = vld [vmem:[%s12341_s3 + $0x70] sm:$0xff]  ;;  %v277_v28 = vld [vmem:[%s12341_s3 + $0xa8] sm:$0xff]  ;;  %s6758_s15 = scalar_lea.vmem %s12338_s0, %s5383_s23  ;;  %s5039_s23 = sshll.u32 %s230_s26, 4  ;;  %s12298_s23 = int_to_ptr.vmem [resolvable:$true] %s5039_s23 }
  0x1c   : > { %5254 = vmatpush1.bf16.msra.mxu1 %v5253_v16  ;;  %v5129_v25 = vpack.c.bf16 %v268_v23, %v264_v22  ;;  %5128 = vmatprep.subr.bf16.mxu0 %v5127_v20  ;;  %v5257_v29 = vpack.c.bf16 %v270_v26, %v266_v24  ;;  %v5131_v30 = vpack.c.bf16 %v277_v28, %v273_v27  ;;  %v275_v31 = vld [vmem:[%s12341_s3 + $0x98] sm:$0xff]  ;;  %v272_v33 = vld [vmem:[%s12341_s3 + $0x80] sm:$0xff]  ;;  %v274_v36 = vld [vmem:[%s12341_s3 + $0x90] sm:$0xff]  ;;  %v6410_v27 = vshrl.u32 %v12344_v14, 7  ;;  %s6069_s7 = scalar_lea.vmem %s12298_s23, 64  ;;  %s6135_s22 = smov [#allocation2]  }
  0x1d   : > { %5256 = vmatprep.subr.bf16.mxu1 %v5255_v21  ;;  %v279_v32 = vld [vmem:[%s12341_s3 + $0xb8] sm:$0xff]  ;;  %v276_v35 = vld [vmem:[%s12341_s3 + $0xa0] sm:$0xff]  ;;  %v278_v37 = vld [vmem:[%s12341_s3 + $0xb0] sm:$0xff]  ;;  %p6070_p11 = scmp.ne.s32.totalorder %s12298_s23, %s6069_s7  ;;  %s6073_s8 = sshll.u32 %s6135_s22, 4  ;;  %s6074_s8 = int_to_ptr.vmem [resolvable:$false] %s6073_s8 }
  0x1e   : > { %v5259_v34 = vpack.c.bf16 %v279_v32, %v275_v31  ;;  %v5133_v38 = vpack.c.bf16 %v276_v35, %v272_v33  ;;  %v281_v39 = vld [vmem:[%s12341_s3 + $0xc8] sm:$0xff]  ;;  %v283_v41 = vld [vmem:[%s12341_s3 + $0xd8] sm:$0xff]  ;;  %v5261_v42 = vpack.c.bf16 %v278_v37, %v274_v36  ;;  %v280_v45 = vld [vmem:[%s12341_s3 + $0xc0] sm:$0xff]  ;;  %12679 = vst [vmem:[#allocation5_spill] sm:$0xff] %v6410_v27  ;;  %s6075_s10 = scalar_lea.vmem %s6074_s8, 128  ;;  %p6076_p0 = scmp.lt.s32.totalorder %s12298_s23, %s6074_s8 }
  0x1f   : > { %5130 = vmatpush1.bf16.msra.mxu0 %v5129_v25  ;;  %v285_v40 = vld [vmem:[%s12341_s3 + $0xe8] sm:$0xff]  ;;  %v287_v44 = vld [vmem:[%s12341_s3 + $0xf8] sm:$0xff]  ;;  %v284_v46 = vld [vmem:[%s12341_s3 + $0xe0] sm:$0xff]  ;;  %p6071_p12 = pnand %p6070_p11, %p6204_p5  ;;  %p6077_p1 = scmp.lt.s32.totalorder %s6075_s10, %s6069_s7 }
  0x20   : > { %5258 = vmatpush1.bf16.msra.mxu1 %v5257_v29  ;;  %5132 = vmatprep.subr.bf16.mxu0 %v5131_v30  ;;  %v5135_v43 = vpack.c.bf16 %v285_v40, %v281_v39  ;;  %v5263_v47 = vpack.c.bf16 %v287_v44, %v283_v41  ;;  %v282_v48 = vld [vmem:[%s12341_s3 + $0xd0] sm:$0xff]  ;;  %v289_v50 = vld [vmem:[%s12341_s3 + $0x108] sm:$0xff]  ;;  %v291_v52 = vld [vmem:[%s12341_s3 + $0x118] sm:$0xff]  ;;  %v5137_v54 = vpack.c.bf16 %v284_v46, %v280_v45  ;;  %v6441_v41 = vsub.s32 0, %v6410_v27 }
  0x21   : > { %5260 = vmatprep.subr.bf16.mxu1 %v5259_v34  ;;  %v286_v49 = vld [vmem:[%s12341_s3 + $0xf0] sm:$0xff]  ;;  %v293_v51 = vld [vmem:[%s12341_s3 + $0x128] sm:$0xff]  ;;  %v295_v53 = vld [vmem:[%s12341_s3 + $0x138] sm:$0xff]  ;;  %p6072_p13 = pneg %p6071_p12  ;;  %p6078_p2 = por %p6077_p1, %p6076_p0 }
  0x22   : > { %v5265_v55 = vpack.c.bf16 %v286_v49, %v282_v48  ;;  %v5139_v56 = vpack.c.bf16 %v293_v51, %v289_v50  ;;  %v288_v57 = vld [vmem:[%s12341_s3 + $0x100] sm:$0xff]  ;;  %v290_v59 = vld [vmem:[%s12341_s3 + $0x110] sm:$0xff]  ;;  %v5267_v60 = vpack.c.bf16 %v295_v53, %v291_v52  ;;  %v297_v62 = vld [vmem:[%s12341_s3 + $0x148] sm:$0xff]  ;;  %v1740_v53 = vadd.s32 16, %v6410_v27 }
  0x23   : > { %5134 = vmatpush1.bf16.msra.mxu0 %v5133_v38  ;;  %v292_v58 = vld [vmem:[%s12341_s3 + $0x120] sm:$0xff]  ;;  %v294_v61 = vld [vmem:[%s12341_s3 + $0x130] sm:$0xff]  ;;  %v301_v63 = vld [vmem:[%s12341_s3 + $0x168] sm:$0xff]  ;;  %v6432_v38 = vand.u32 127, %v12344_v14  ;;  %p6079_p3 = pnand %p6078_p2, %p6072_p13 }
  0x24   : > { %5262 = vmatpush1.bf16.msra.mxu1 %v5261_v42  ;;  %5136 = vmatprep.subr.bf16.mxu0 %v5135_v43  ;;  %v299_v0 = vld [vmem:[%s12341_s3 + $0x158] sm:$0xff]  ;;  %v5141_v2 = vpack.c.bf16 %v292_v58, %v288_v57  ;;  %v5269_v3 = vpack.c.bf16 %v294_v61, %v290_v59  ;;  %v5143_v4 = vpack.c.bf16 %v301_v63, %v297_v62  ;;  %v296_v5 = vld [vmem:[%s12341_s3 + $0x140] sm:$0xff]  ;;  %v298_v7 = vld [vmem:[%s12341_s3 + $0x150] sm:$0xff] }
  0x25   : > { %5264 = vmatprep.subr.bf16.mxu1 %v5263_v47  ;;  %v303_v1 = vld [vmem:[%s12341_s3 + $0x178] sm:$0xff]  ;;  %v300_v6 = vld [vmem:[%s12341_s3 + $0x160] sm:$0xff]  ;;  %v302_v9 = vld [vmem:[%s12341_s3 + $0x170] sm:$0xff]  ;;  %vm1807_vm0 = vcmp.eq.s32.totalorder %v6410_v27, %v6432_v38  ;;  %vm1815_vm1 = vcmp.eq.s32.totalorder %v1740_v53, %v6432_v38 }
  0x26   : > { %v5271_v8 = vpack.c.bf16 %v303_v1, %v299_v0  ;;  %v305_v10 = vld [vmem:[%s12341_s3 + $0x188] sm:$0xff]  ;;  %v307_v12 = vld [vmem:[%s12341_s3 + $0x198] sm:$0xff]  ;;  %v5145_v15 = vpack.c.bf16 %v300_v6, %v296_v5  ;;  %v5273_v16 = vpack.c.bf16 %v302_v9, %v298_v7  ;;  %v304_v18 = vld [vmem:[%s12341_s3 + $0x180] sm:$0xff] }
  0x27   : > { %5138 = vmatpush1.bf16.msra.mxu0 %v5137_v54  ;;  %v309_v11 = vld [vmem:[%s12341_s3 + $0x1a8] sm:$0xff]  ;;  %v311_v13 = vld [vmem:[%s12341_s3 + $0x1b8] sm:$0xff]  ;;  %v308_v19 = vld [vmem:[%s12341_s3 + $0x1a0] sm:$0xff] }
  0x28   : > { %5266 = vmatpush1.bf16.msra.mxu1 %v5265_v55  ;;  %5140 = vmatprep.subr.bf16.mxu0 %v5139_v56  ;;  %v5147_v17 = vpack.c.bf16 %v309_v11, %v305_v10  ;;  %v306_v20 = vld [vmem:[%s12341_s3 + $0x190] sm:$0xff]  ;;  %v5275_v21 = vpack.c.bf16 %v311_v13, %v307_v12  ;;  %v313_v23 = vld [vmem:[%s12341_s3 + $0x1c8] sm:$0xff]  ;;  %v315_v25 = vld [vmem:[%s12341_s3 + $0x1d8] sm:$0xff]  ;;  %v5149_v28 = vpack.c.bf16 %v308_v19, %v304_v18  ;;  %v1744_v19 = vadd.s32 48, %v6410_v27 }
  0x29   : > { %5268 = vmatprep.subr.bf16.mxu1 %v5267_v60  ;;  %v310_v22 = vld [vmem:[%s12341_s3 + $0x1b0] sm:$0xff]  ;;  %v317_v24 = vld [vmem:[%s12341_s3 + $0x1e8] sm:$0xff]  ;;  %v319_v26 = vld [vmem:[%s12341_s3 + $0x1f8] sm:$0xff] }
  0x2a   : > { %v5277_v29 = vpack.c.bf16 %v310_v22, %v306_v20  ;;  %v5151_v30 = vpack.c.bf16 %v317_v24, %v313_v23  ;;  %v312_v31 = vld [vmem:[%s12341_s3 + $0x1c0] sm:$0xff]  ;;  %v314_v33 = vld [vmem:[%s12341_s3 + $0x1d0] sm:$0xff]  ;;  %v5279_v34 = vpack.c.bf16 %v319_v26, %v315_v25  ;;  %v321_v36 = vld [vmem:[%s12341_s3 + $0x208] sm:$0xff]  ;;  %vm1831_vm3 = vcmp.eq.s32.totalorder %v1744_v19, %v6432_v38 }
  0x2b   : > { %5142 = vmatpush1.bf16.msra.mxu0 %v5141_v2  ;;  %v316_v32 = vld [vmem:[%s12341_s3 + $0x1e0] sm:$0xff]  ;;  %v318_v35 = vld [vmem:[%s12341_s3 + $0x1f0] sm:$0xff]  ;;  %v325_v37 = vld [vmem:[%s12341_s3 + $0x228] sm:$0xff] }
  0x2c   : > { %5270 = vmatpush1.bf16.msra.mxu1 %v5269_v3  ;;  %5144 = vmatprep.subr.bf16.mxu0 %v5143_v4  ;;  %v323_v39 = vld [vmem:[%s12341_s3 + $0x218] sm:$0xff]  ;;  %v5153_v42 = vpack.c.bf16 %v316_v32, %v312_v31  ;;  %v320_v43 = vld [vmem:[%s12341_s3 + $0x200] sm:$0xff]  ;;  %v5281_v44 = vpack.c.bf16 %v318_v35, %v314_v33  ;;  %v5155_v45 = vpack.c.bf16 %v325_v37, %v321_v36  ;;  %v322_v47 = vld [vmem:[%s12341_s3 + $0x210] sm:$0xff]  ;;  %v1742_v4 = vadd.s32 32, %v6410_v27 }
  0x2d   : > { %5272 = vmatprep.subr.bf16.mxu1 %v5271_v8  ;;  %v327_v40 = vld [vmem:[%s12341_s3 + $0x238] sm:$0xff]  ;;  %v324_v46 = vld [vmem:[%s12341_s3 + $0x220] sm:$0xff]  ;;  %v326_v48 = vld [vmem:[%s12341_s3 + $0x230] sm:$0xff] }
  0x2e   : > { %v5283_v49 = vpack.c.bf16 %v327_v40, %v323_v39  ;;  %v329_v50 = vld [vmem:[%s12341_s3 + $0x248] sm:$0xff]  ;;  %v6464_v52 = vld [vmem:[%s239_s9] sm:$0xf]  ;;  %v331_v54 = vld [vmem:[%s12341_s3 + $0x258] sm:$0xff]  ;;  %v5157_v57 = vpack.c.bf16 %v324_v46, %v320_v43  ;;  %v5285_v58 = vpack.c.bf16 %v326_v48, %v322_v47  ;;  %vm1823_vm2 = vcmp.eq.s32.totalorder %v1742_v4, %v6432_v38 }
  0x2f   : > { %5146 = vmatpush1.bf16.msra.mxu0 %v5145_v15  ;;  %v333_v51 = vld [vmem:[%s12341_s3 + $0x268] sm:$0xff]  ;;  %v335_v55 = vld [vmem:[%s12341_s3 + $0x278] sm:$0xff]  ;;  %v6477_v56 = vrot.slane %v6464_v52, %v6441_v41  ;;  %v328_v60 = vld [vmem:[%s12341_s3 + $0x240] sm:$0xff] }
  0x30   : > { %5274 = vmatpush1.bf16.msra.mxu1 %v5273_v16  ;;  %5148 = vmatprep.subr.bf16.mxu0 %v5147_v17  ;;  %v5159_v59 = vpack.c.bf16 %v333_v51, %v329_v50  ;;  %v332_v61 = vld [vmem:[%s12341_s3 + $0x260] sm:$0xff]  ;;  %v330_v62 = vld [vmem:[%s12341_s3 + $0x250] sm:$0xff]  ;;  %v5287_v0 = vpack.c.bf16 %v335_v55, %v331_v54  ;;  %v337_v2 = vld [vmem:[%s12341_s3 + $0x288] sm:$0xff]  ;;  %v1748_v50 = vadd.s32 80, %v6410_v27  ;;  %v1739_v55 = vadd.s32 8, %v6410_v27 }
  0x31   : > { %5276 = vmatprep.subr.bf16.mxu1 %v5275_v21  ;;  %v2084_v63 = vsel %vm1807_vm0, %v6477_v56, 0.0  ;;  %v334_v1 = vld [vmem:[%s12341_s3 + $0x270] sm:$0xff]  ;;  %v341_v3 = vld [vmem:[%s12341_s3 + $0x2a8] sm:$0xff]  ;;  %v339_v5 = vld [vmem:[%s12341_s3 + $0x298] sm:$0xff]  ;;  %v5161_v7 = vpack.c.bf16 %v332_v61, %v328_v60  ;;  %v2092_v13 = vsel %vm1815_vm1, %v6477_v56, 0.0 }
  0x32   : > { %v343_v6 = vld [vmem:[%s12341_s3 + $0x2b8] sm:$0xff]  ;;  %v5289_v8 = vpack.c.bf16 %v334_v1, %v330_v62  ;;  %v5163_v9 = vpack.c.bf16 %v341_v3, %v337_v2  ;;  %v336_v10 = vld [vmem:[%s12341_s3 + $0x280] sm:$0xff]  ;;  %v338_v12 = vld [vmem:[%s12341_s3 + $0x290] sm:$0xff]  ;;  %vm1847_vm5 = vcmp.eq.s32.totalorder %v1748_v50, %v6432_v38  ;;  %v1750_v3 = vadd.s32 96, %v6410_v27 }
  0x33   : > { %5150 = vmatpush1.bf16.msra.mxu0 %v5149_v28  ;;  %v340_v11 = vld [vmem:[%s12341_s3 + $0x2a0] sm:$0xff]  ;;  %v5291_v15 = vpack.c.bf16 %v343_v6, %v339_v5  ;;  %v342_v16 = vld [vmem:[%s12341_s3 + $0x2b0] sm:$0xff]  ;;  %v345_v17 = vld [vmem:[%s12341_s3 + $0x2c8] sm:$0xff]  ;;  %vm1811_vm6 = vcmp.eq.s32.totalorder %v1739_v55, %v6432_v38 }
  0x34   : > { %5278 = vmatpush1.bf16.msra.mxu1 %v5277_v29  ;;  %5152 = vmatprep.subr.bf16.mxu0 %v5151_v30  ;;  %v349_v18 = vld [vmem:[%s12341_s3 + $0x2e8] sm:$0xff]  ;;  %v347_v20 = vld [vmem:[%s12341_s3 + $0x2d8] sm:$0xff]  ;;  %v5165_v22 = vpack.c.bf16 %v340_v11, %v336_v10  ;;  %v5293_v23 = vpack.c.bf16 %v342_v16, %v338_v12  ;;  %v344_v25 = vld [vmem:[%s12341_s3 + $0x2c0] sm:$0xff]  ;;  %v2100_v29 = vsel %vm1823_vm2, %v6477_v56, 0.0  ;;  %vm1855_vm7 = vcmp.eq.s32.totalorder %v1750_v3, %v6432_v38 }
  0x35   : > { %5280 = vmatprep.subr.bf16.mxu1 %v5279_v34  ;;  %v351_v21 = vld [vmem:[%s12341_s3 + $0x2f8] sm:$0xff]  ;;  %v5167_v24 = vpack.c.bf16 %v349_v18, %v345_v17  ;;  %v348_v26 = vld [vmem:[%s12341_s3 + $0x2e0] sm:$0xff]  ;;  %v346_v28 = vld [vmem:[%s12341_s3 + $0x2d0] sm:$0xff]  ;;  %v1746_v34 = vadd.s32 64, %v6410_v27  ;;  %v1762_v3 = vadd.s32 192, %v6410_v27 }
  0x36   : > { %v5295_v30 = vpack.c.bf16 %v351_v21, %v347_v20  ;;  %v350_v31 = vld [vmem:[%s12341_s3 + $0x2f0] sm:$0xff]  ;;  %v353_v32 = vld [vmem:[%s12341_s3 + $0x308] sm:$0xff]  ;;  %v355_v35 = vld [vmem:[%s12341_s3 + $0x318] sm:$0xff]  ;;  %v5169_v37 = vpack.c.bf16 %v348_v26, %v344_v25  ;;  %v1752_v20 = vadd.s32 112, %v6410_v27  ;;  %v2070_v25 = vsub.s32 1, %v6410_v27 }
  0x37   : > { %5154 = vmatpush1.bf16.msra.mxu0 %v5153_v42  ;;  %v357_v33 = vld [vmem:[%s12341_s3 + $0x328] sm:$0xff]  ;;  %v359_v36 = vld [vmem:[%s12341_s3 + $0x338] sm:$0xff]  ;;  %v5297_v39 = vpack.c.bf16 %v350_v31, %v346_v28  ;;  %v352_v42 = vld [vmem:[%s12341_s3 + $0x300] sm:$0xff]  ;;  %vm1839_vm4 = vcmp.eq.s32.totalorder %v1746_v34, %v6432_v38  ;;  %v1745_v28 = vadd.s32 56, %v6410_v27  ;;  %v2132_v34 = vsel %vm1855_vm7, %v6477_v56, 0.0 }
  0x38   : > { %5282 = vmatpush1.bf16.msra.mxu1 %v5281_v44  ;;  %5156 = vmatprep.subr.bf16.mxu0 %v5155_v45  ;;  %v5171_v40 = vpack.c.bf16 %v357_v33, %v353_v32  ;;  %v356_v43 = vld [vmem:[%s12341_s3 + $0x320] sm:$0xff]  ;;  %v354_v44 = vld [vmem:[%s12341_s3 + $0x310] sm:$0xff]  ;;  %v2108_v45 = vsel %vm1831_vm3, %v6477_v56, 0.0  ;;  %v5299_v46 = vpack.c.bf16 %v359_v36, %v355_v35  ;;  %v361_v48 = vld [vmem:[%s12341_s3 + $0x348] sm:$0xff]  ;;  %v2116_v62 = vsel %vm1839_vm4, %v6477_v56, 0.0 }
  0x39   : > { %5284 = vmatprep.subr.bf16.mxu1 %v5283_v49  ;;  %v358_v47 = vld [vmem:[%s12341_s3 + $0x330] sm:$0xff]  ;;  %v365_v49 = vld [vmem:[%s12341_s3 + $0x368] sm:$0xff]  ;;  %v363_v51 = vld [vmem:[%s12341_s3 + $0x358] sm:$0xff]  ;;  %v5173_v54 = vpack.c.bf16 %v356_v43, %v352_v42  ;;  %vm1863_vm10 = vcmp.eq.s32.totalorder %v1752_v20, %v6432_v38  ;;  %v6677_v42 = vadd.s32 128, %v6432_v38  ;;  %vm1835_vm11 = vcmp.eq.s32.totalorder %v1745_v28, %v6432_v38 }
  0x3a   : > { %2343 = vadd.xlane.f32.xlu0 %v2084_v63  ;;  %v367_v53 = vld [vmem:[%s12341_s3 + $0x378] sm:$0xff]  ;;  %v364_v60 = vld [vmem:[%s12341_s3 + $0x360] sm:$0xff]  ;;  %v362_v61 = vld [vmem:[%s12341_s3 + $0x350] sm:$0xff]  ;;  %v2112_v55 = vsel %vm1835_vm11, %v6477_v56, 0.0  ;;  %v1770_v20 = vadd.s32 256, %v6410_v27 }
  0x3b   : > { %5158 = vmatpush1.bf16.msra.mxu0 %v5157_v57  ;;  %v5301_v57 = vpack.c.bf16 %v358_v47, %v354_v44  ;;  %v5303_v63 = vpack.c.bf16 %v367_v53, %v363_v51  ;;  %v369_v1 = vld [vmem:[%s12341_s3 + $0x388] sm:$0xff]  ;;  %v371_v4 = vld [vmem:[%s12341_s3 + $0x398] sm:$0xff]  ;;  %v368_v10 = vld [vmem:[%s12341_s3 + $0x380] sm:$0xff]  ;;  %v1747_v47 = vadd.s32 72, %v6410_v27  ;;  %v2140_v51 = vsel %vm1863_vm10, %v6477_v56, 0.0 }
  0x3c   : > { %5286 = vmatpush1.bf16.msra.mxu1 %v5285_v58  ;;  %5160 = vmatprep.subr.bf16.mxu0 %v5159_v59  ;;  %v5175_v58 = vpack.c.bf16 %v365_v49, %v361_v48  ;;  %v360_v59 = vld [vmem:[%s12341_s3 + $0x340] sm:$0xff]  ;;  %v373_v2 = vld [vmem:[%s12341_s3 + $0x3a8] sm:$0xff]  ;;  %v375_v5 = vld [vmem:[%s12341_s3 + $0x3b8] sm:$0xff]  ;;  %v6689_v48 = vrot.slane %v6464_v52, %v2070_v25  ;;  %vm1904_vm4 = vcmp.eq.s32.totalorder %v1762_v3, %v6677_v42  ;;  %v1778_v3 = vadd.s32 320, %v6410_v27 }
  0x3d   : > { %5288 = vmatprep.subr.bf16.mxu1 %v5287_v0  ;;  %v366_v0 = vld [vmem:[%s12341_s3 + $0x370] sm:$0xff]  ;;  %v5177_v6 = vpack.c.bf16 %v364_v60, %v360_v59  ;;  %v372_v11 = vld [vmem:[%s12341_s3 + $0x3a0] sm:$0xff]  ;;  %v5307_v16 = vpack.c.bf16 %v375_v5, %v371_v4  ;;  %v377_v18 = vld [vmem:[%s12341_s3 + $0x3c8] sm:$0xff]  ;;  %vm1843_vm13 = vcmp.eq.s32.totalorder %v1747_v47, %v6432_v38  ;;  %v1758_v59 = vadd.s32 160, %v6410_v27 }
  0x3e   : > { %2353 = vadd.xlane.f32.xlu0 %v2092_v13  ;;  %v370_v12 = vld [vmem:[%s12341_s3 + $0x390] sm:$0xff]  ;;  %v2124_v13 = vsel %vm1847_vm5, %v6477_v56, 0.0  ;;  %v381_v19 = vld [vmem:[%s12341_s3 + $0x3e8] sm:$0xff]  ;;  %v379_v21 = vld [vmem:[%s12341_s3 + $0x3d8] sm:$0xff]  ;;  %v5181_v26 = vpack.c.bf16 %v372_v11, %v368_v10  ;;  %v2120_v60 = vsel %vm1843_vm13, %v6477_v56, 0.0  ;;  %v1755_v5 = vadd.s32 136, %v6410_v27 }
  0x3f   : > { %5162 = vmatpush1.bf16.msra.mxu0 %v5161_v7  ;;  %v1741_v7 = vadd.s32 24, %v6410_v27  ;;  %v374_v17 = vld [vmem:[%s12341_s3 + $0x3b0] sm:$0xff]  ;;  %v376_v31 = vld [vmem:[%s12341_s3 + $0x3c0] sm:$0xff]  ;;  %v387_v43 = vld [vmem:[%s12341_s3 + $0x418] sm:$0xff]  ;;  %vm1888_vm0 = vcmp.eq.s32.totalorder %v1758_v59, %v6677_v42  ;;  %v2181_v10 = vsel %vm1904_vm4, %v6689_v48, 0.0  ;;  %v1766_v11 = vadd.s32 224, %v6410_v27 }
  0x40   : > { %5290 = vmatpush1.bf16.msra.mxu1 %v5289_v8  ;;  %5164 = vmatprep.subr.bf16.mxu0 %v5163_v9  ;;  %v5305_v8 = vpack.c.bf16 %v366_v0, %v362_v61  ;;  %v5179_v9 = vpack.c.bf16 %v373_v2, %v369_v1  ;;  %v380_v32 = vld [vmem:[%s12341_s3 + $0x3e0] sm:$0xff]  ;;  %v378_v33 = vld [vmem:[%s12341_s3 + $0x3d0] sm:$0xff]  ;;  %v391_v44 = vld [vmem:[%s12341_s3 + $0x438] sm:$0xff]  ;;  %v1751_v61 = vadd.s32 104, %v6410_v27  ;;  %v1753_v1 = vadd.s32 120, %v6410_v27 }
  0x41   : > { %5292 = vmatprep.subr.bf16.mxu1 %v5291_v15  ;;  %v2088_v15 = vsel %vm1811_vm6, %v6477_v56, 0.0  ;;  %vm1819_vm8 = vcmp.eq.s32.totalorder %v1741_v7, %v6432_v38  ;;  %v382_v36 = vld [vmem:[%s12341_s3 + $0x3f0] sm:$0xff]  ;;  %v5315_v53 = vpack.c.bf16 %v391_v44, %v387_v43  ;;  %v2165_v2 = vsel %vm1888_vm0, %v6689_v48, 0.0  ;;  %v6793_v47 = vld [vmem:[%s6758_s15 + $0x48] sm:$0x3] }
  0x42   : > { %2363 = vadd.xlane.f32.xlu0 %v2100_v29  ;;  %2348 = vadd.xlane.f32.xlu1 %v2088_v15  ;;  %v5309_v29 = vpack.c.bf16 %v374_v17, %v370_v12  ;;  %v5313_v49 = vpack.c.bf16 %v382_v36, %v378_v33  ;;  %vm1859_vm1 = vcmp.eq.s32.totalorder %v1751_v61, %v6432_v38  ;;  %v1764_v7 = vadd.s32 208, %v6410_v27  ;;  %v6765_v33 = vld [vmem:[%s6758_s15] sm:$0xff]  ;;  %v6773_v36 = vld [vmem:[%s6758_s15 + $0x8] sm:$0xff]  ;;  %v6785_v44 = vld [vmem:[%s6758_s15 + $0x10] sm:$0xff] }
  0x43   : > { %5166 = vmatpush1.bf16.msra.mxu0 %v5165_v22  ;;  %v383_v22 = vld [vmem:[%s12341_s3 + $0x3f8] sm:$0xff]  ;;  %v2136_v4 = vsel %vm1859_vm1, %v6477_v56, 0.0  ;;  %vm1867_vm3 = vcmp.eq.s32.totalorder %v1753_v1, %v6432_v38  ;;  %vm1876_vm5 = vcmp.eq.s32.totalorder %v1755_v5, %v6677_v42  ;;  %v1768_v15 = vadd.s32 240, %v6410_v27 }
  0x44   : > { %5294 = vmatpush1.bf16.msra.mxu1 %v5293_v23  ;;  %5168 = vmatprep.subr.bf16.mxu0 %v5167_v24  ;;  %v2096_v23 = vsel %vm1819_vm8, %v6477_v56, 0.0  ;;  %v1743_v24 = vadd.s32 40, %v6410_v27  ;;  %v5311_v35 = vpack.c.bf16 %v383_v22, %v379_v21  ;;  %vm1912_vm6 = vcmp.eq.s32.totalorder %v1764_v7, %v6677_v42 }
  0x45   : > { %5296 = vmatprep.subr.bf16.mxu1 %v5295_v30  ;;  %v5183_v30 = vpack.c.bf16 %v381_v19, %v377_v18  ;;  %v2153_v12 = vsel %vm1876_vm5, %v6689_v48, 0.0  ;;  %vm1920_vm8 = vcmp.eq.s32.totalorder %v1766_v11, %v6677_v42  ;;  %v1761_v17 = vadd.s32 184, %v6410_v27 }
  0x46   : > { %2373 = vadd.xlane.f32.xlu0 %v2108_v45  ;;  %vm1827_vm9 = vcmp.eq.s32.totalorder %v1743_v24, %v6432_v38  ;;  %2358 = vadd.xlane.f32.xlu1 %v2096_v23  ;;  %v2074_v18 = vsub.s32 2, %v6410_v27  ;;  %v2197_v19 = vsel %vm1920_vm8, %v6689_v48, 0.0  ;;  %vm1928_vm10 = vcmp.eq.s32.totalorder %v1768_v15, %v6677_v42 }
  0x47   : > { %5170 = vmatpush1.bf16.msra.mxu0 %v5169_v37  ;;  %v385_v37 = vld [vmem:[%s12341_s3 + $0x408] sm:$0xff]  ;;  %v2104_v45 = vsel %vm1827_vm9, %v6477_v56, 0.0  ;;  %v6740_v21 = vadd.s32 256, %v6432_v38  ;;  %vm1900_vm11 = vcmp.eq.s32.totalorder %v1761_v17, %v6677_v42  ;;  %v1763_v23 = vadd.s32 200, %v6410_v27 }
  0x48   : > { %5298 = vmatpush1.bf16.msra.mxu1 %v5297_v39  ;;  %5172 = vmatprep.subr.bf16.mxu0 %v5171_v40  ;;  %v389_v39 = vld [vmem:[%s12341_s3 + $0x428] sm:$0xff]  ;;  %v1754_v40 = vadd.s32 128, %v6410_v27  ;;  %v6747_v24 = vrot.slane %v6464_v52, %v2074_v18  ;;  %v2205_v25 = vsel %vm1928_vm10, %v6689_v48, 0.0  ;;  %v2177_v28 = vsel %vm1900_vm11, %v6689_v48, 0.0 }
  0x49   : > { %5300 = vmatprep.subr.bf16.mxu1 %v5299_v46  ;;  %v5185_v46 = vpack.c.bf16 %v380_v32, %v376_v31  ;;  %v5187_v50 = vpack.c.bf16 %v389_v39, %v385_v37  ;;  %vm1908_vm13 = vcmp.eq.s32.totalorder %v1763_v23, %v6677_v42  ;;  %v1774_v31 = vadd.s32 288, %v6410_v27  ;;  %v6776_v37 = vld [vmem:[%s6758_s15 + $0x28] sm:$0xff] }
  0x4a   : > { %2383 = vadd.xlane.f32.xlu0 %v2116_v62  ;;  %vm1872_vm12 = vcmp.eq.s32.totalorder %v1754_v40, %v6677_v42  ;;  %2368 = vadd.xlane.f32.xlu1 %v2104_v45  ;;  %v2185_v32 = vsel %vm1908_vm13, %v6689_v48, 0.0  ;;  %vm796_vm0 = vcmask 1041408   ;;  %v6781_v40 = vld [vmem:[%s6758_s15 + $0x40] sm:$0x3]  ;;  %v6788_v45 = vld [vmem:[%s6758_s15 + $0x30] sm:$0xff]  ;;  %vm1969_vm5 = vcmp.eq.s32.totalorder %v1778_v3, %v6740_v21 }
  0x4b   : > { %5174 = vmatpush1.bf16.msra.mxu0 %v5173_v54  ;;  %v1756_v54 = vadd.s32 144, %v6410_v27  ;;  %vm1953_vm1 = vcmp.eq.s32.totalorder %v1774_v31, %v6740_v21  ;;  %v1780_v11 = vadd.s32 336, %v6410_v27  ;;  %v1782_v18 = vadd.s32 352, %v6410_v27 }
  0x4c   : > { %5302 = vmatpush1.bf16.msra.mxu1 %v5301_v57  ;;  %5176 = vmatprep.subr.bf16.mxu0 %v5175_v58  ;;  %v1749_v57 = vadd.s32 88, %v6410_v27  ;;  %v2149_v58 = vsel %vm1872_vm12, %v6689_v48, 0.0  ;;  %vm1937_vm12 = vcmp.eq.s32.totalorder %v1770_v20, %v6740_v21  ;;  %v1777_v31 = vadd.s32 312, %v6410_v27 }
  0x4d   : > { %5304 = vmatprep.subr.bf16.mxu1 %v5303_v63  ;;  %vm1880_vm14 = vcmp.eq.s32.totalorder %v1756_v54, %v6677_v42  ;;  %v1760_v63 = vadd.s32 176, %v6410_v27  ;;  %v1130_v54 = vsel %vm796_vm0, %v6793_v47, 0.0  ;;  %v1789_v3 = vadd.s32 408, %v6410_v27 }
  0x4e   : > { %2393 = vadd.xlane.f32.xlu0 %v2124_v13  ;;  %2378 = vadd.xlane.f32.xlu1 %v2112_v55  ;;  %vm1851_vm15 = vcmp.eq.s32.totalorder %v1749_v57, %v6432_v38  ;;  %v2157_v62 = vsel %vm1880_vm14, %v6689_v48, 0.0  ;;  %v1759_v13 = vadd.s32 168, %v6410_v27  ;;  %v6810_v57 = vld [vmem:[%s6758_s15 + $0x18] sm:$0xff] }
  0x4f   : > { %5178 = vmatpush1.bf16.msra.mxu0 %v5177_v6  ;;  %v2128_v0 = vsel %vm1851_vm15, %v6477_v56, 0.0  ;;  %vm1896_vm2 = vcmp.eq.s32.totalorder %v1760_v63, %v6677_v42 }
  0x50   : > { %5306 = vmatpush1.bf16.msra.mxu1 %v5305_v8  ;;  %5180 = vmatprep.subr.bf16.mxu0 %v5179_v9  ;;  %v2173_v6 = vsel %vm1896_vm2, %v6689_v48, 0.0  ;;  %v2144_v8 = vsel %vm1867_vm3, %v6477_v56, 0.0  ;;  %v1757_v9 = vadd.s32 152, %v6410_v27  ;;  %v2189_v56 = vsel %vm1912_vm6, %v6689_v48, 0.0 }
  0x51   : > { %5308 = vmatprep.subr.bf16.mxu1 %v5307_v16  ;;  %vm1892_vm9 = vcmp.eq.s32.totalorder %v1759_v13, %v6677_v42 }
  0x52   : > { %2403 = vadd.xlane.f32.xlu0 %v2132_v34  ;;  %2388 = vadd.xlane.f32.xlu1 %v2120_v60  ;;  %vm1884_vm7 = vcmp.eq.s32.totalorder %v1757_v9, %v6677_v42  ;;  %v2169_v22 = vsel %vm1892_vm9, %v6689_v48, 0.0  ;;  %v6768_v34 = vld [vmem:[%s6758_s15 + $0x20] sm:$0xff]  ;;  %v1769_v60 = vadd.s32 248, %v6410_v27  ;;  %vm1985_vm9 = vcmp.eq.s32.totalorder %v1782_v18, %v6740_v21 }
  0x53   : > { %5182 = vmatpush1.bf16.msra.mxu0 %v5181_v26  ;;  %v2161_v16 = vsel %vm1884_vm7, %v6689_v48, 0.0  ;;  %v1772_v26 = vadd.s32 272, %v6410_v27  ;;  %v1120_v39 = vadd.f32 %v6768_v34, %v6765_v33  ;;  %vm1977_vm7 = vcmp.eq.s32.totalorder %v1780_v11, %v6740_v21 }
  0x54   : > { %5310 = vmatpush1.bf16.msra.mxu1 %v5309_v29  ;;  %5184 = vmatprep.subr.bf16.mxu0 %v5183_v30  ;;  %v1765_v29 = vadd.s32 216, %v6410_v27  ;;  %v2214_v30 = vsel %vm1937_vm12, %v6747_v24, 0.0  ;;  %vm1932_vm4 = vcmp.eq.s32.totalorder %v1769_v60, %v6677_v42  ;;  %vm1965_vm12 = vcmp.eq.s32.totalorder %v1777_v31, %v6740_v21 }
  0x55   : > { %5312 = vmatprep.subr.bf16.mxu1 %v5311_v35  ;;  %vm1945_vm14 = vcmp.eq.s32.totalorder %v1772_v26, %v6740_v21  ;;  %v1767_v35 = vadd.s32 232, %v6410_v27  ;;  %v2209_v13 = vsel %vm1932_vm4, %v6689_v48, 0.0 }
  0x56   : > { %2413 = vadd.xlane.f32.xlu0 %v2140_v51  ;;  %2398 = vadd.xlane.f32.xlu1 %v2128_v0  ;;  %vm1916_vm15 = vcmp.eq.s32.totalorder %v1765_v29, %v6677_v42  ;;  %v2222_v43 = vsel %vm1945_vm14, %v6747_v24, 0.0  ;;  %v1138_v51 = vadd.f32 %v6788_v45, %v6785_v44  ;;  %v2230_v0 = vsel %vm1953_vm1, %v6747_v24, 0.0 }
  0x57   : > { %5186 = vmatpush1.bf16.msra.mxu0 %v5185_v46  ;;  %v1129_v46 = vadd.f32 %v6776_v37, %v6773_v36  ;;  %v2193_v55 = vsel %vm1916_vm15, %v6689_v48, 0.0  ;;  %vm1924_vm2 = vcmp.eq.s32.totalorder %v1767_v35, %v6677_v42  ;;  %v1773_v42 = vadd.s32 280, %v6410_v27 }
  0x58   : > { %5314 = vmatpush1.bf16.msra.mxu1 %v5313_v49  ;;  %5188 = vmatprep.subr.bf16.mxu0 %v5187_v50  ;;  %v1121_v49 = vsel %vm796_vm0, %v6781_v40, 0.0  ;;  %v1776_v50 = vadd.s32 304, %v6410_v27  ;;  %v2201_v5 = vsel %vm1924_vm2, %v6689_v48, 0.0  ;;  %v1775_v48 = vadd.s32 296, %v6410_v27 }
  0x59   : > { %5316 = vmatprep.subr.bf16.mxu1 %v5315_v53  ;;  %v6802_v53 = vld [vmem:[%s6758_s15 + $0x50] sm:$0x3]  ;;  %v1122_v63 = vadd.f32 %v1121_v49, %v1120_v39  ;;  %v1131_v1 = vadd.f32 %v1130_v54, %v1129_v46  ;;  %vm1949_vm8 = vcmp.eq.s32.totalorder %v1773_v42, %v6740_v21  ;;  %v1786_v49 = vadd.s32 384, %v6410_v27 }
  0x5a   : > { %2423 = vadd.xlane.f32.xlu0 %v2149_v58  ;;  %2408 = vadd.xlane.f32.xlu1 %v2136_v4  ;;  %v6813_v58 = vld [vmem:[%s6758_s15 + $0x38] sm:$0xff]  ;;  %v1139_v59 = vsel %vm796_vm0, %v6802_v53, 0.0  ;;  %vm1961_vm3 = vcmp.eq.s32.totalorder %v1776_v50, %v6740_v21  ;;  %vm1957_vm10 = vcmp.eq.s32.totalorder %v1775_v48, %v6740_v21  ;;  %v6857_v50 = vadd.s32 384, %v6432_v38 }
  0x5b   : > { %v1147_v61 = vadd.f32 %v6813_v58, %v6810_v57  ;;  %v1140_v4 = vadd.f32 %v1139_v59, %v1138_v51  ;;  %v1123_v7 = vrot.slane %v1122_v63, 4  ;;  %v2238_v9 = vsel %vm1961_vm3, %v6747_v24, 0.0 }
  0x5c   : > { %v2234_v54 = vsel %vm1957_vm10, %v6747_v24, 0.0  ;;  %v1779_v59 = vadd.s32 328, %v6410_v27  ;;  %vm2002_vm13 = vcmp.eq.s32.totalorder %v1786_v49, %v6857_v50  ;;  %vm2014_vm1 = vcmp.eq.s32.totalorder %v1789_v3, %v6857_v50 }
  0x5d   : > { %v1791_v49 = vadd.s32 424, %v6410_v27 }
  0x5e   : > { %2433 = vadd.xlane.f32.xlu0 %v2157_v62  ;;  %2418 = vadd.xlane.f32.xlu1 %v2144_v8  ;;  %v6822_v62 = vld [vmem:[%s6758_s15 + $0x58] sm:$0x3]  ;;  %vm1973_vm15 = vcmp.eq.s32.totalorder %v1779_v59, %v6740_v21  ;;  %s12296_s15 = scalar_lea.hbm %s12343_s5, %s5122_s17 }
  0x62   : > { %2443 = vadd.xlane.f32.xlu0 %v2165_v2  ;;  %2428 = vadd.xlane.f32.xlu1 %v2153_v12  ;;  %v1148_v2 = vsel %vm796_vm0, %v6822_v62, 0.0  ;;  %v1141_v12 = vrot.slane %v1140_v4, 4 }
  0x63   : > { %v1149_v8 = vadd.f32 %v1148_v2, %v1147_v61  ;;  %v2242_v2 = vsel %vm1965_vm12, %v6747_v24, 0.0 }
  0x65   : > { %v1150_v15 = vrot.slane %v1149_v8, 4 }
  0x66   : > { %2453 = vadd.xlane.f32.xlu0 %v2173_v6  ;;  %2438 = vadd.xlane.f32.xlu1 %v2161_v16  ;;  %v1771_v6 = vadd.s32 264, %v6410_v27  ;;  %v2246_v16 = vsel %vm1969_vm5, %v6747_v24, 0.0 }
  0x67   : > { %v1151_v23 = vadd.f32 %v1150_v15, %v1149_v8 }
  0x68   : > { %vm1941_vm6 = vcmp.eq.s32.totalorder %v1771_v6, %v6740_v21 }
  0x69   : > { %v2218_v20 = vsel %vm1941_vm6, %v6747_v24, 0.0  ;;  %v1152_v39 = vrot.slane %v1151_v23, 2  ;;  %vm2022_vm6 = vcmp.eq.s32.totalorder %v1791_v49, %v6857_v50  ;;  %v520_v49 = vld [vmem:[%s12342_s4 + $0x40] sm:$0xff] }
  0x6a   : > { %2463 = vadd.xlane.f32.xlu0 %v2181_v10  ;;  %2448 = vadd.xlane.f32.xlu1 %v2169_v22  ;;  %v1132_v10 = vrot.slane %v1131_v1, 4 }
  0x6c   : > { %v1133_v17 = vadd.f32 %v1132_v10, %v1131_v1 }
  0x6e   : > { %2473 = vadd.xlane.f32.xlu0 %v2189_v56  ;;  %2458 = vadd.xlane.f32.xlu1 %v2177_v28  ;;  %v1124_v56 = vadd.f32 %v1123_v7, %v1122_v63  ;;  %v1134_v26 = vrot.slane %v1133_v17, 2  ;;  %v1784_v28 = vadd.s32 368, %v6410_v27  ;;  %v1153_v63 = vadd.f32 %v1152_v39, %v1151_v23  ;;  %v517_v39 = vld [vmem:[%s12342_s4 + $0x28] sm:$0xff] }
  0x70   : > { %v1125_v22 = vrot.slane %v1124_v56, 2  ;;  %v1135_v46 = vadd.f32 %v1134_v26, %v1133_v17  ;;  %vm1993_vm11 = vcmp.eq.s32.totalorder %v1784_v28, %v6740_v21  ;;  %v1154_v7 = vrot.slane %v1153_v63, 1 }
  0x71   : > { %v1785_v28 = vadd.s32 376, %v6410_v27 }
  0x72   : > { %2483 = vadd.xlane.f32.xlu0 %v2197_v19  ;;  %2468 = vadd.xlane.f32.xlu1 %v2185_v32  ;;  %v1142_v19 = vadd.f32 %v1141_v12, %v1140_v4  ;;  %v2078_v32 = vsub.s32 3, %v6410_v27  ;;  %v1126_v35 = vadd.f32 %v1125_v22, %v1124_v56  ;;  %v1136_v1 = vrot.slane %v1135_v46, 1 }
  0x73   : > { %v2250_v56 = vsel %vm1973_vm15, %v6747_v24, 0.0  ;;  %vm1997_vm5 = vcmp.eq.s32.totalorder %v1785_v28, %v6740_v21 }
  0x74   : > { %v1143_v29 = vrot.slane %v1142_v19, 2  ;;  %v6864_v60 = vrot.slane %v6464_v52, %v2078_v32  ;;  %v1127_v61 = vrot.slane %v1126_v35, 1  ;;  %v1781_v52 = vadd.s32 344, %v6410_v27 }
  0x75   : > { %v1137_v12 = vadd.f32 %v1136_v1, %v1135_v46 }
  0x76   : > { %2493 = vadd.xlane.f32.xlu0 %v2205_v25  ;;  %2478 = vadd.xlane.f32.xlu1 %v2193_v55  ;;  %v2254_v25 = vsel %vm1977_vm7, %v6747_v24, 0.0  ;;  %v1144_v51 = vadd.f32 %v1143_v29, %v1142_v19  ;;  %v1788_v55 = vadd.s32 400, %v6410_v27  ;;  %v1128_v6 = vadd.f32 %v1127_v61, %v1126_v35  ;;  %v6911_v19 = vld [vmem:[%s12341_s3 + $0x420] sm:$0xff] }
  0x77   : > { %v2279_v8 = vsel %vm2002_vm13, %v6864_v60, 0.0  ;;  %vm1981_vm2 = vcmp.eq.s32.totalorder %v1781_v52, %v6740_v21  ;;  %v2291_v32 = vsel %vm2014_vm1, %v6864_v60, 0.0  ;;  %v516_v35 = vld [vmem:[%s12342_s4 + $0x20] sm:$0xff]  ;;  %v6935_v46 = vmul.f32 0.055555556, %v1137_v12 }
  0x78   : > { %v1145_v38 = vrot.slane %v1144_v51, 1  ;;  %vm2010_vm14 = vcmp.eq.s32.totalorder %v1788_v55, %v6857_v50  ;;  %v2258_v23 = vsel %vm1981_vm2, %v6747_v24, 0.0  ;;  %v512_v61 = vld [vmem:[%s12342_s4] sm:$0xff] }
  0x79   : > { %v2287_v42 = vsel %vm2010_vm14, %v6864_v60, 0.0  ;;  %12681 = vst [vmem:[#allocation7_spill] sm:$0xff] %v6935_v46 }
  0x7a   : > { %2503 = vadd.xlane.f32.xlu0 %v2214_v30  ;;  %2488 = vadd.xlane.f32.xlu1 %v2201_v5  ;;  %v2226_v30 = vsel %vm1949_vm8, %v6747_v24, 0.0 }
  0x7e   : > { %2513 = vadd.xlane.f32.xlu0 %v2222_v43  ;;  %2498 = vadd.xlane.f32.xlu1 %v2209_v13  ;;  %v2262_v43 = vsel %vm1985_vm9, %v6747_v24, 0.0  ;;  %v1146_v13 = vadd.f32 %v1145_v38, %v1144_v51  ;;  %v1166_v38 = vmul.f32 %v6935_v46, %v517_v39 }
  0x82   : > { %2523 = vadd.xlane.f32.xlu0 %v2230_v0  ;;  %2508 = vadd.xlane.f32.xlu1 %v2218_v20  ;;  %v2270_v0 = vsel %vm1993_vm11, %v6747_v24, 0.0 }
  0x86   : > { %2533 = vadd.xlane.f32.xlu0 %v2238_v9  ;;  %2518 = vadd.xlane.f32.xlu1 %v2226_v30 }
  0x8a   : > { %2543 = vadd.xlane.f32.xlu0 %v2246_v16  ;;  %2528 = vadd.xlane.f32.xlu1 %v2234_v54 }
  0x8e   : > { %2553 = vadd.xlane.f32.xlu0 %v2254_v25  ;;  %2538 = vadd.xlane.f32.xlu1 %v2242_v2  ;;  %v1155_v25 = vadd.f32 %v1154_v7, %v1153_v63  ;;  %v513_v63 = vld [vmem:[%s12342_s4 + $0x8] sm:$0xff]  ;;  %v518_v7 = vld [vmem:[%s12342_s4 + $0x30] sm:$0xff] }
  0x92   : > { %2563 = vadd.xlane.f32.xlu0 %v2262_v43  ;;  %2548 = vadd.xlane.f32.xlu1 %v2250_v56  ;;  %v6933_v43 = vmul.f32 0.055555556, %v1128_v6  ;;  %v6971_v56 = vld [vmem:[%s12341_s3 + $0x430] sm:$0xff] }
  0x94   : > { %12680 = vst [vmem:[#allocation6_spill] sm:$0xff] %v6933_v43  ;;  %v1165_v1 = vmul.f32 %v6933_v43, %v516_v35 }
  0x96   : > { %v6870_v4 = vpop.permute.xlu0 %770  ;;  %v6872_v5 = vpop.permute.xlu1 %780  ;;  %2573 = vadd.xlane.f32.xlu0 %v2270_v0  ;;  %2558 = vadd.xlane.f32.xlu1 %v2258_v23  ;;  %v1787_v0 = vadd.s32 392, %v6410_v27  ;;  %v7015_v23 = vld [vmem:[%s12341_s3 + $0x478] sm:$0xff] }
  0x97   : > { %v791_v9 = vmul.f32 %v6872_v5, %v6781_v40  ;;  %v792_v10 = vmul.f32 %v6872_v5, %v6793_v47  ;;  %v794_v11 = vmul.f32 %v6872_v5, %v6822_v62  ;;  %v783_v15 = vmul.f32 %v6870_v4, %v6765_v33 }
  0x98   : > { %v784_v40 = vmul.f32 %v6870_v4, %v6773_v36  ;;  %v1783_v47 = vadd.s32 360, %v6410_v27  ;;  %v786_v62 = vmul.f32 %v6870_v4, %v6810_v57  ;;  %v6906_v36 = vld [vmem:[%s12341_s3 + $0x400] sm:$0xff]  ;;  %vm2006_vm7 = vcmp.eq.s32.totalorder %v1787_v0, %v6857_v50 }
  0x99   : > { %v797_v57 = vsel %vm796_vm0, %v791_v9, 0.0  ;;  %v806_v20 = vsel %vm796_vm0, %v792_v10, 0.0  ;;  %v5189_v26 = vpack.c.bf16 %v6911_v19, %v6906_v36  ;;  %v6963_v9 = vld [vmem:[%s12341_s3 + $0x410] sm:$0xff]  ;;  %v1161_v10 = vmul.f32 %v6933_v43, %v512_v61  ;;  %v533_v36 = vld [vmem:[%s12342_s4 + $0xa8] sm:$0xff] }
  0x9a   : > { %v6891_v16 = vpop.permute.xlu0 %775  ;;  %2583 = vadd.xlane.f32.xlu0 %v2279_v8  ;;  %vm1989_vm3 = vcmp.eq.s32.totalorder %v1783_v47, %v6740_v21  ;;  %v6958_v8 = vmul.f32 0.055555556, %v1146_v13  ;;  %v6979_v47 = vmul.f32 0.055555556, %v1155_v25  ;;  %v1792_v25 = vadd.s32 432, %v6410_v27 }
  0x9b   : > { %v787_v17 = vmul.f32 %v6891_v16, %v6768_v34  ;;  %v788_v18 = vmul.f32 %v6891_v16, %v6776_v37  ;;  %v790_v33 = vmul.f32 %v6891_v16, %v6813_v58  ;;  %v824_v34 = vsel %vm796_vm0, %v794_v11, 0.0 }
  0x9c   : > { %v1790_v37 = vadd.s32 416, %v6410_v27  ;;  %v2266_v59 = vsel %vm1989_vm3, %v6747_v24, 0.0  ;;  %12682 = vst [vmem:[#allocation8_spill] sm:$0xff] %v6958_v8  ;;  %v1162_v11 = vmul.f32 %v6935_v46, %v513_v63  ;;  %12683 = vst [vmem:[#allocation9_spill] sm:$0xff] %v6979_v47  ;;  %v2283_v35 = vsel %vm2006_vm7, %v6864_v60, 0.0 }
  0x9d   : > { %v795_v58 = vadd.f32 %v787_v17, %v783_v15  ;;  %v823_v48 = vadd.f32 %v790_v33, %v786_v62  ;;  %v805_v22 = vadd.f32 %v788_v18, %v784_v40  ;;  %2568 = vadd.xlane.f32.xlu1 %v2266_v59  ;;  %v2274_v15 = vsel %vm1997_vm5, %v6747_v24, 0.0  ;;  %v514_v40 = vld [vmem:[%s12342_s4 + $0x10] sm:$0xff]  ;;  %v519_v62 = vld [vmem:[%s12342_s4 + $0x38] sm:$0xff]  ;;  %v6989_v24 = vld [vmem:[%s12341_s3 + $0x448] sm:$0xff] }
  0x9e   : > { %2593 = vadd.xlane.f32.xlu0 %v2287_v42  ;;  %vm2018_vm4 = vcmp.eq.s32.totalorder %v1790_v37, %v6857_v50  ;;  %v1167_v17 = vmul.f32 %v6958_v8, %v518_v7  ;;  %v1422_v18 = vadd.f32 %v1166_v38, %v1165_v1  ;;  %v525_v37 = vld [vmem:[%s12342_s4 + $0x68] sm:$0xff]  ;;  %v1163_v28 = vmul.f32 %v6958_v8, %v514_v40  ;;  %v526_v59 = vld [vmem:[%s12342_s4 + $0x70] sm:$0xff] }
  0x9f   : > { %v807_v29 = vadd.f32 %v806_v20, %v805_v22  ;;  %v798_v30 = vadd.f32 %v797_v57, %v795_v58  ;;  %v825_v31 = vadd.f32 %v824_v34, %v823_v48  ;;  %v2295_v6 = vsel %vm2018_vm4, %v6864_v60, 0.0  ;;  %v524_v20 = vld [vmem:[%s12342_s4 + $0x60] sm:$0xff]  ;;  %v7005_v48 = vld [vmem:[%s12341_s3 + $0x468] sm:$0xff]  ;;  %v7010_v22 = vld [vmem:[%s12341_s3 + $0x458] sm:$0xff] }
  0xa0   : > { %v2299_v34 = vsel %vm2022_vm6, %v6864_v60, 0.0  ;;  %v5317_v58 = vpack.c.bf16 %v6971_v56, %v6963_v9  ;;  %v1168_v39 = vmul.f32 %v6979_v47, %v519_v62  ;;  %v1173_v61 = vmul.f32 %v6933_v43, %v524_v20  ;;  %v398_v7 = vld [vmem:[%s12341_s3 + $0x470] sm:$0xff]  ;;  %v7056_v9 = vld [vmem:[%s12341_s3 + $0x488] sm:$0xff]  ;;  %v403_v56 = vld [vmem:[%s12341_s3 + $0x498] sm:$0xff] }
  0xa1   : > { %v808_v51 = vrot.slane %v807_v29, 4  ;;  %v799_v54 = vrot.slane %v798_v30, 4  ;;  %v826_v55 = vrot.slane %v825_v31, 4  ;;  %2578 = vadd.xlane.f32.xlu1 %v2274_v15  ;;  %v1174_v63 = vmul.f32 %v6935_v46, %v525_v37  ;;  %v522_v40 = vld [vmem:[%s12342_s4 + $0x50] sm:$0xff] }
  0xa2   : > { %2598 = vadd.xlane.f32.xlu0 %v2291_v32  ;;  %v515_v32 = vld [vmem:[%s12342_s4 + $0x18] sm:$0xff]  ;;  %v5191_v38 = vpack.c.bf16 %v7005_v48, %v6989_v24  ;;  %vm2026_vm8 = vcmp.eq.s32.totalorder %v1792_v25, %v6857_v50  ;;  %v404_v48 = vld [vmem:[%s12341_s3 + $0x4a0] sm:$0xff]  ;;  %v409_v25 = vld [vmem:[%s12341_s3 + $0x4c8] sm:$0xff] }
  0xa3   : > { %v809_v2 = vadd.f32 %v808_v51, %v807_v29  ;;  %v800_v3 = vadd.f32 %v799_v54, %v798_v30  ;;  %v827_v52 = vadd.f32 %v826_v55, %v825_v31  ;;  %v1417_v29 = vadd.f32 %v1162_v11, %v1161_v10  ;;  %v521_v55 = vld [vmem:[%s12342_s4 + $0x48] sm:$0xff]  ;;  %v527_v24 = vld [vmem:[%s12342_s4 + $0x78] sm:$0xff] }
  0xa4   : > { %v1423_v54 = vadd.f32 %v1422_v18, %v1167_v17  ;;  %v7061_v10 = vld [vmem:[%s12341_s3 + $0x4a8] sm:$0xff]  ;;  %v1164_v11 = vmul.f32 %v6979_v47, %v515_v32  ;;  %v1170_v62 = vmul.f32 %v6935_v46, %v521_v55  ;;  %v1175_v17 = vmul.f32 %v6958_v8, %v526_v59  ;;  %v415_v32 = vld [vmem:[%s12341_s3 + $0x4f8] sm:$0xff]  ;;  %v528_v55 = vld [vmem:[%s12342_s4 + $0x80] sm:$0xff] }
  0xa5   : > { %v810_v12 = vrot.slane %v809_v2, 2  ;;  %v801_v42 = vrot.slane %v800_v3, 2  ;;  %v828_v13 = vrot.slane %v827_v52, 2  ;;  %2588 = vadd.xlane.f32.xlu1 %v2283_v35  ;;  %v1418_v15 = vadd.f32 %v1417_v29, %v1163_v28  ;;  %v529_v59 = vld [vmem:[%s12342_s4 + $0x88] sm:$0xff] }
  0xa6   : > { %2603 = vadd.xlane.f32.xlu0 %v2295_v6  ;;  %v394_v6 = vld [vmem:[%s12341_s3 + $0x450] sm:$0xff]  ;;  %v1793_v28 = vadd.s32 440, %v6410_v27  ;;  %v1171_v29 = vmul.f32 %v6958_v8, %v522_v40 }
  0xa7   : > { %v811_v33 = vadd.f32 %v810_v12, %v809_v2  ;;  %v802_v57 = vadd.f32 %v801_v42, %v800_v3  ;;  %v829_v21 = vadd.f32 %v828_v13, %v827_v52  ;;  %v5319_v2 = vpack.c.bf16 %v7015_v23, %v7010_v22  ;;  %v392_v3 = vld [vmem:[%s12341_s3 + $0x440] sm:$0xff]  ;;  %v407_v13 = vld [vmem:[%s12341_s3 + $0x4b8] sm:$0xff] }
  0xa8   : > { %v396_v52 = vld [vmem:[%s12341_s3 + $0x460] sm:$0xff]  ;;  %v1169_v12 = vmul.f32 %v6933_v43, %v520_v49  ;;  %v1794_v42 = vadd.s32 448, %v6410_v27  ;;  %v5321_v37 = vpack.c.bf16 %v398_v7, %v394_v6  ;;  %v2303_v22 = vsel %vm2026_vm8, %v6864_v60, 0.0 }
  0xa9   : > { %v812_v30 = vrot.slane %v811_v33, 1  ;;  %v803_v31 = vrot.slane %v802_v57, 1  ;;  %v830_v51 = vrot.slane %v829_v21, 1  ;;  %v5193_v20 = vpack.c.bf16 %v396_v52, %v392_v3  ;;  %v532_v23 = vld [vmem:[%s12342_s4 + $0xa0] sm:$0xff]  ;;  %v534_v52 = vld [vmem:[%s12342_s4 + $0xb0] sm:$0xff] }
  0xaa   : > { %2608 = vadd.xlane.f32.xlu0 %v2299_v34  ;;  %v1432_v34 = vadd.f32 %v1174_v63, %v1173_v61  ;;  %v5323_v19 = vpack.c.bf16 %v407_v13, %v403_v56  ;;  %vm2034_vm9 = vcmp.eq.s32.totalorder %v1794_v42, %v6857_v50  ;;  %v1419_v35 = vadd.f32 %v1418_v15, %v1164_v11  ;;  %v417_v11 = vld [vmem:[%s12341_s3 + $0x508] sm:$0xff]  ;;  %v419_v56 = vld [vmem:[%s12341_s3 + $0x518] sm:$0xff] }
  0xab   : > { %v813_v0 = vadd.f32 %v812_v30, %v811_v33  ;;  %v804_v1 = vadd.f32 %v803_v31, %v802_v57  ;;  %v831_v18 = vadd.f32 %v830_v51, %v829_v21  ;;  %v7081_v33 = vld [vmem:[%s12341_s3 + $0x480] sm:$0xff]  ;;  %v1424_v57 = vadd.f32 %v1423_v54, %v1168_v39  ;;  %v413_v30 = vld [vmem:[%s12341_s3 + $0x4e8] sm:$0xff]  ;;  %v411_v31 = vld [vmem:[%s12341_s3 + $0x4d8] sm:$0xff] }
  0xac   : > { %v5195_v21 = vpack.c.bf16 %v7061_v10, %v7056_v9  ;;  %v1427_v39 = vadd.f32 %v1170_v62, %v1169_v12  ;;  %v1176_v49 = vmul.f32 %v6979_v47, %v527_v24  ;;  %v523_v51 = vld [vmem:[%s12342_s4 + $0x58] sm:$0xff]  ;;  %v1433_v54 = vadd.f32 %v1432_v34, %v1175_v17  ;;  %v410_v9 = vld [vmem:[%s12341_s3 + $0x4d0] sm:$0xff]  ;;  %v421_v42 = vld [vmem:[%s12341_s3 + $0x528] sm:$0xff] }
  0xad   : > { %896 = vmatprep.mubr.f32.mxu0 %v813_v0  ;;  %1038 = vmatprep.mubr.f32.mxu1 %v813_v0  ;;  %v1181_v61 = vmul.f32 %v6933_v43, %v532_v23  ;;  %v1182_v63 = vmul.f32 %v6935_v46, %v533_v36  ;;  %v5197_v0 = vpack.c.bf16 %v404_v48, %v7081_v33  ;;  %v2311_v3 = vsel %vm2034_vm9, %v6864_v60, 0.0  ;;  %v414_v10 = vld [vmem:[%s12341_s3 + $0x4f0] sm:$0xff]  ;;  %v423_v13 = vld [vmem:[%s12341_s3 + $0x538] sm:$0xff] }
  0xae   : > { %897 = vmatmul.mubr.f32.vlgmr.msra.gmra.mrb[0].mxu0 %v804_v1  ;;  %1039 = vmatmul.mubr.f32.vlgmr.msra.gmra.mrb[0].mxu1 %v804_v1  ;;  %v5199_v6 = vpack.c.bf16 %v413_v30, %v409_v25  ;;  %v5327_v7 = vpack.c.bf16 %v415_v32, %v411_v31  ;;  %vm2030_vm10 = vcmp.eq.s32.totalorder %v1793_v28, %v6857_v50  ;;  %v1796_v12 = vadd.s32 464, %v6410_v27  ;;  %v530_v33 = vld [vmem:[%s12342_s4 + $0x90] sm:$0xff]  ;;  %v429_v28 = vld [vmem:[%s12341_s3 + $0x568] sm:$0xff]  ;;  %v431_v30 = vld [vmem:[%s12341_s3 + $0x578] sm:$0xff] }
  0xaf   : > { %5190 = vmatpush1.bf16.msra.mxu0 %v5189_v26  ;;  %5318 = vmatpush1.bf16.msra.mxu1 %v5317_v58  ;;  %v402_v26 = vld [vmem:[%s12341_s3 + $0x490] sm:$0xff]  ;;  %v1172_v15 = vmul.f32 %v6979_v47, %v523_v51  ;;  %v1428_v40 = vadd.f32 %v1427_v39, %v1171_v29  ;;  %v1177_v62 = vmul.f32 %v6933_v43, %v528_v55  ;;  %v2307_v48 = vsel %vm2030_vm10, %v6864_v60, 0.0  ;;  %v427_v29 = vld [vmem:[%s12341_s3 + $0x558] sm:$0xff] }
  0xb0   : > { %967 = vmatprep.mubr.f32.mxu0 %v831_v18  ;;  %1109 = vmatprep.mubr.f32.mxu1 %v831_v18  ;;  %v406_v58 = vld [vmem:[%s12341_s3 + $0x4b0] sm:$0xff]  ;;  %v1178_v17 = vmul.f32 %v6935_v46, %v529_v59  ;;  %v1434_v18 = vadd.f32 %v1433_v54, %v1176_v49  ;;  %v1442_v24 = vadd.f32 %v1182_v63, %v1181_v61  ;;  %v1795_v25 = vadd.s32 456, %v6410_v27  ;;  %v531_v49 = vld [vmem:[%s12342_s4 + $0x98] sm:$0xff]  ;;  %v428_v61 = vld [vmem:[%s12341_s3 + $0x560] sm:$0xff] }
  0xb1   : > { %5192 = vmatprep.subr.bf16.mxu0 %v5191_v38  ;;  %5320 = vmatprep.subr.bf16.mxu1 %v5319_v2  ;;  %v5325_v1 = vpack.c.bf16 %v406_v58, %v402_v26  ;;  %v408_v38 = vld [vmem:[%s12341_s3 + $0x4c0] sm:$0xff]  ;;  %v5203_v23 = vpack.c.bf16 %v421_v42, %v417_v11  ;;  %v5331_v36 = vpack.c.bf16 %v423_v13, %v419_v56  ;;  %v422_v26 = vld [vmem:[%s12341_s3 + $0x530] sm:$0xff]  ;;  %v425_v58 = vld [vmem:[%s12341_s3 + $0x548] sm:$0xff] }
  0xb2   : > { %2613 = vadd.xlane.f32.xlu0 %v2303_v22  ;;  %1425 = vadd.xlane.f32.xlu1 %v1424_v57  ;;  %v412_v2 = vld [vmem:[%s12341_s3 + $0x4e0] sm:$0xff]  ;;  %v1183_v57 = vmul.f32 %v6958_v8, %v534_v52  ;;  %v535_v22 = vld [vmem:[%s12342_s4 + $0xb8] sm:$0xff]  ;;  %vm2042_vm11 = vcmp.eq.s32.totalorder %v1796_v12, %v6857_v50  ;;  %v1179_v31 = vmul.f32 %v6958_v8, %v530_v33  ;;  %v430_v52 = vld [vmem:[%s12341_s3 + $0x570] sm:$0xff] }
  0xb3   : > { %5194 = vmatpush1.bf16.msra.mxu0 %v5193_v20  ;;  %5322 = vmatpush1.bf16.msra.mxu1 %v5321_v37  ;;  %v5201_v34 = vpack.c.bf16 %v412_v2, %v408_v38  ;;  %v5329_v20 = vpack.c.bf16 %v414_v10, %v410_v9  ;;  %v416_v37 = vld [vmem:[%s12341_s3 + $0x500] sm:$0xff]  ;;  %v1437_v32 = vadd.f32 %v1178_v17, %v1177_v62  ;;  %v2319_v63 = vsel %vm2042_vm11, %v6864_v60, 0.0  ;;  %v437_v9 = vld [vmem:[%s12341_s3 + $0x5a8] sm:$0xff]  ;;  %v435_v10 = vld [vmem:[%s12341_s3 + $0x598] sm:$0xff] }
  0xb4   : > { %5196 = vmatprep.subr.bf16.mxu0 %v5195_v21  ;;  %5324 = vmatprep.subr.bf16.mxu1 %v5323_v19  ;;  %v420_v21 = vld [vmem:[%s12341_s3 + $0x520] sm:$0xff]  ;;  %v418_v19 = vld [vmem:[%s12341_s3 + $0x510] sm:$0xff]  ;;  %v1429_v39 = vadd.f32 %v1428_v40, %v1172_v15  ;;  %v1184_v51 = vmul.f32 %v6979_v47, %v535_v22  ;;  %v1443_v54 = vadd.f32 %v1442_v24, %v1183_v57  ;;  %v439_v11 = vld [vmem:[%s12341_s3 + $0x5b8] sm:$0xff] }
  0xb5   : > { %v5205_v55 = vpack.c.bf16 %v420_v21, %v416_v37  ;;  %v5333_v59 = vpack.c.bf16 %v422_v26, %v418_v19  ;;  %v5207_v38 = vpack.c.bf16 %v429_v28, %v425_v58  ;;  %v5335_v2 = vpack.c.bf16 %v431_v30, %v427_v29  ;;  %v432_v17 = vld [vmem:[%s12341_s3 + $0x580] sm:$0xff]  ;;  %v538_v57 = vld [vmem:[%s12342_s4 + $0xd0] sm:$0xff]  ;;  %v441_v21 = vld [vmem:[%s12341_s3 + $0x5c8] sm:$0xff] }
  0xb6   : > { %1420 = vadd.xlane.f32.xlu0 %v1419_v35  ;;  %2623 = vadd.xlane.f32.xlu1 %v2311_v3  ;;  %v424_v35 = vld [vmem:[%s12341_s3 + $0x540] sm:$0xff]  ;;  %v426_v3 = vld [vmem:[%s12341_s3 + $0x550] sm:$0xff]  ;;  %vm2038_vm12 = vcmp.eq.s32.totalorder %v1795_v25, %v6857_v50  ;;  %v1180_v12 = vmul.f32 %v6979_v47, %v531_v49  ;;  %v1438_v42 = vadd.f32 %v1437_v32, %v1179_v31  ;;  %v445_v22 = vld [vmem:[%s12341_s3 + $0x5e8] sm:$0xff] }
  0xb7   : > { %5198 = vmatpush1.bf16.msra.mxu0 %v5197_v0  ;;  %5326 = vmatpush1.bf16.msra.mxu1 %v5325_v1  ;;  %v536_v0 = vld [vmem:[%s12342_s4 + $0xc0] sm:$0xff]  ;;  %v537_v1 = vld [vmem:[%s12342_s4 + $0xc8] sm:$0xff]  ;;  %v1444_v56 = vadd.f32 %v1443_v54, %v1184_v51  ;;  %v5209_v40 = vpack.c.bf16 %v428_v61, %v424_v35  ;;  %v5337_v62 = vpack.c.bf16 %v430_v52, %v426_v3  ;;  %v2315_v33 = vsel %vm2038_vm12, %v6864_v60, 0.0  ;;  %v438_v37 = vld [vmem:[%s12341_s3 + $0x5b0] sm:$0xff] }
  0xb8   : > { %5200 = vmatprep.subr.bf16.mxu0 %v5199_v6  ;;  %5328 = vmatprep.subr.bf16.mxu1 %v5327_v7  ;;  %v433_v6 = vld [vmem:[%s12341_s3 + $0x588] sm:$0xff]  ;;  %v1798_v7 = vadd.s32 480, %v6410_v27  ;;  %v1185_v13 = vmul.f32 %v6933_v43, %v536_v0  ;;  %v1186_v15 = vmul.f32 %v6935_v46, %v537_v1  ;;  %v1439_v19 = vadd.f32 %v1438_v42, %v1180_v12  ;;  %v440_v29 = vld [vmem:[%s12341_s3 + $0x5c0] sm:$0xff]  ;;  %v539_v31 = vld [vmem:[%s12342_s4 + $0xd8] sm:$0xff] }
  0xb9   : > { %v5211_v24 = vpack.c.bf16 %v437_v9, %v433_v6  ;;  %v1187_v26 = vmul.f32 %v6958_v8, %v538_v57  ;;  %v444_v30 = vld [vmem:[%s12341_s3 + $0x5e0] sm:$0xff]  ;;  %v5215_v35 = vpack.c.bf16 %v445_v22, %v441_v21  ;;  %v442_v49 = vld [vmem:[%s12341_s3 + $0x5d0] sm:$0xff]  ;;  %v449_v54 = vld [vmem:[%s12341_s3 + $0x608] sm:$0xff]  ;;  %v1799_v42 = vadd.s32 488, %v6410_v27 }
  0xba   : > { %2618 = vadd.xlane.f32.xlu0 %v2307_v48  ;;  %1435 = vadd.xlane.f32.xlu1 %v1434_v18  ;;  %v436_v18 = vld [vmem:[%s12341_s3 + $0x5a0] sm:$0xff]  ;;  %v1797_v48 = vadd.s32 472, %v6410_v27  ;;  %vm2050_vm13 = vcmp.eq.s32.totalorder %v1798_v7, %v6857_v50  ;;  %v1447_v58 = vadd.f32 %v1186_v15, %v1185_v13  ;;  %v446_v51 = vld [vmem:[%s12341_s3 + $0x5f0] sm:$0xff]  ;;  %v455_v61 = vld [vmem:[%s12341_s3 + $0x638] sm:$0xff]  ;;  %v5217_v1 = vpack.c.bf16 %v444_v30, %v440_v29 }
  0xbb   : > { %5202 = vmatpush1.bf16.msra.mxu0 %v5201_v34  ;;  %5330 = vmatpush1.bf16.msra.mxu1 %v5329_v20  ;;  %v5339_v34 = vpack.c.bf16 %v439_v11, %v435_v10  ;;  %v434_v20 = vld [vmem:[%s12341_s3 + $0x590] sm:$0xff]  ;;  %v5213_v25 = vpack.c.bf16 %v436_v18, %v432_v17  ;;  %v2327_v32 = vsel %vm2050_vm13, %v6864_v60, 0.0  ;;  %v452_v3 = vld [vmem:[%s12341_s3 + $0x620] sm:$0xff]  ;;  %v457_v11 = vld [vmem:[%s12341_s3 + $0x648] sm:$0xff]  ;;  %v789_v57 = vmul.f32 %v6891_v16, %v6788_v45 }
  0xbc   : > { %5204 = vmatprep.subr.bf16.mxu0 %v5203_v23  ;;  %5332 = vmatprep.subr.bf16.mxu1 %v5331_v36  ;;  %v443_v23 = vld [vmem:[%s12341_s3 + $0x5d8] sm:$0xff]  ;;  %v5341_v28 = vpack.c.bf16 %v438_v37, %v434_v20  ;;  %vm2046_vm14 = vcmp.eq.s32.totalorder %v1797_v48, %v6857_v50  ;;  %v1448_v0 = vadd.f32 %v1447_v58, %v1187_v26  ;;  %v450_v52 = vld [vmem:[%s12341_s3 + $0x610] sm:$0xff]  ;;  %v461_v12 = vld [vmem:[%s12341_s3 + $0x668] sm:$0xff] }
  0xbd   : > { %v447_v36 = vld [vmem:[%s12341_s3 + $0x5f8] sm:$0xff]  ;;  %v2323_v6 = vsel %vm2046_vm14, %v6864_v60, 0.0  ;;  %v454_v10 = vld [vmem:[%s12341_s3 + $0x630] sm:$0xff]  ;;  %v5223_v17 = vpack.c.bf16 %v461_v12, %v457_v11  ;;  %v456_v18 = vld [vmem:[%s12341_s3 + $0x640] sm:$0xff]  ;;  %vm2054_vm15 = vcmp.eq.s32.totalorder %v1799_v42, %v6857_v50  ;;  %v793_v45 = vmul.f32 %v6872_v5, %v6802_v53 }
  0xbe   : > { %1430 = vadd.xlane.f32.xlu0 %v1429_v39  ;;  %2633 = vadd.xlane.f32.xlu1 %v2319_v63  ;;  %v5343_v39 = vpack.c.bf16 %v447_v36, %v443_v23  ;;  %v1188_v63 = vmul.f32 %v6979_v47, %v539_v31  ;;  %v463_v13 = vld [vmem:[%s12341_s3 + $0x678] sm:$0xff]  ;;  %v462_v20 = vld [vmem:[%s12341_s3 + $0x670] sm:$0xff]  ;;  %v465_v37 = vld [vmem:[%s12341_s3 + $0x688] sm:$0xff]  ;;  %v785_v22 = vmul.f32 %v6870_v4, %v6785_v44 }
  0xbf   : > { %5206 = vmatpush1.bf16.msra.mxu0 %v5205_v55  ;;  %5334 = vmatpush1.bf16.msra.mxu1 %v5333_v59  ;;  %v453_v55 = vld [vmem:[%s12341_s3 + $0x628] sm:$0xff]  ;;  %v451_v59 = vld [vmem:[%s12341_s3 + $0x618] sm:$0xff]  ;;  %v464_v5 = vld [vmem:[%s12341_s3 + $0x680] sm:$0xff]  ;;  %v815_v29 = vsel %vm796_vm0, %v793_v45, 0.0  ;;  %vm2660_vm0 = vcmask 1040384  }
  0xc0   : > { %5208 = vmatprep.subr.bf16.mxu0 %v5207_v38  ;;  %5336 = vmatprep.subr.bf16.mxu1 %v5335_v2  ;;  %v5345_v38 = vpack.c.bf16 %v446_v51, %v442_v49  ;;  %v448_v2 = vld [vmem:[%s12341_s3 + $0x600] sm:$0xff]  ;;  %v5219_v7 = vpack.c.bf16 %v453_v55, %v449_v54  ;;  %v5347_v9 = vpack.c.bf16 %v455_v61, %v451_v59  ;;  %v469_v16 = vld [vmem:[%s12341_s3 + $0x6a8] sm:$0xff]  ;;  %v467_v21 = vld [vmem:[%s12341_s3 + $0x698] sm:$0xff] }
  0xc1   : > { %v1449_v15 = vadd.f32 %v1448_v0, %v1188_v63  ;;  %v471_v48 = vld [vmem:[%s12341_s3 + $0x6b8] sm:$0xff]  ;;  %v468_v36 = vld [vmem:[%s12341_s3 + $0x6a0] sm:$0xff]  ;;  %v814_v26 = vadd.f32 %v789_v57, %v785_v22  ;;  %v5227_v58 = vpack.c.bf16 %v469_v16, %v465_v37  ;;  %v466_v4 = vld [vmem:[%s12341_s3 + $0x690] sm:$0xff] }
  0xc2   : > { %2628 = vadd.xlane.f32.xlu0 %v2315_v33  ;;  %1445 = vadd.xlane.f32.xlu1 %v1444_v56  ;;  %v459_v56 = vld [vmem:[%s12341_s3 + $0x658] sm:$0xff]  ;;  %v460_v33 = vld [vmem:[%s12341_s3 + $0x660] sm:$0xff]  ;;  %v5355_v44 = vpack.c.bf16 %v471_v48, %v467_v21  ;;  %v477_v30 = vld [vmem:[%s12341_s3 + $0x6e8] sm:$0xff] }
  0xc3   : > { %5210 = vmatpush1.bf16.msra.mxu0 %v5209_v40  ;;  %5338 = vmatpush1.bf16.msra.mxu1 %v5337_v62  ;;  %v5221_v40 = vpack.c.bf16 %v452_v3, %v448_v2  ;;  %v5349_v62 = vpack.c.bf16 %v454_v10, %v450_v52  ;;  %v5225_v23 = vpack.c.bf16 %v460_v33, %v456_v18  ;;  %v475_v31 = vld [vmem:[%s12341_s3 + $0x6d8] sm:$0xff]  ;;  %v472_v49 = vld [vmem:[%s12341_s3 + $0x6c0] sm:$0xff]  ;;  %v474_v61 = vld [vmem:[%s12341_s3 + $0x6d0] sm:$0xff] }
  0xc4   : > { %5212 = vmatprep.subr.bf16.mxu0 %v5211_v24  ;;  %5340 = vmatprep.subr.bf16.mxu1 %v5339_v34  ;;  %v5351_v24 = vpack.c.bf16 %v463_v13, %v459_v56  ;;  %v458_v34 = vld [vmem:[%s12341_s3 + $0x650] sm:$0xff]  ;;  %v476_v51 = vld [vmem:[%s12341_s3 + $0x6e0] sm:$0xff]  ;;  %v816_v54 = vadd.f32 %v815_v29, %v814_v26  ;;  %v481_v0 = vld [vmem:[%s12341_s3 + $0x708] sm:$0xff] }
  0xc5   : > { %v5353_v53 = vpack.c.bf16 %v462_v20, %v458_v34  ;;  %v478_v63 = vld [vmem:[%s12341_s3 + $0x6f0] sm:$0xff]  ;;  %v487_v2 = vld [vmem:[%s12341_s3 + $0x738] sm:$0xff]  ;;  %v5233_v3 = vpack.c.bf16 %v476_v51, %v472_v49  ;;  %v489_v42 = vld [vmem:[%s12341_s3 + $0x748] sm:$0xff] }
  0xc6   : > { %1440 = vadd.xlane.f32.xlu0 %v1439_v19  ;;  %2643 = vadd.xlane.f32.xlu1 %v2327_v32  ;;  %v2331_v19 = vsel %vm2054_vm15, %v6864_v60, 0.0  ;;  %v479_v32 = vld [vmem:[%s12341_s3 + $0x6f8] sm:$0xff]  ;;  %v5361_v52 = vpack.c.bf16 %v478_v63, %v474_v61  ;;  %v482_v11 = vld [vmem:[%s12341_s3 + $0x710] sm:$0xff]  ;;  %v817_v56 = vrot.slane %v816_v54, 4  ;;  %v493_v13 = vld [vmem:[%s12341_s3 + $0x768] sm:$0xff] }
  0xc7   : > { %5214 = vmatpush1.bf16.msra.mxu0 %v5213_v25  ;;  %5342 = vmatpush1.bf16.msra.mxu1 %v5341_v28  ;;  %v470_v25 = vld [vmem:[%s12341_s3 + $0x6b0] sm:$0xff]  ;;  %v473_v28 = vld [vmem:[%s12341_s3 + $0x6c8] sm:$0xff]  ;;  %v5359_v59 = vpack.c.bf16 %v479_v32, %v475_v31  ;;  %v488_v18 = vld [vmem:[%s12341_s3 + $0x740] sm:$0xff]  ;;  %v5239_v57 = vpack.c.bf16 %v493_v13, %v489_v42  ;;  %v7523_v42 = vpop.xlane.xlu0 %2343 }
  0xc8   : > { %5216 = vmatprep.subr.bf16.mxu0 %v5215_v35  ;;  %5344 = vmatprep.subr.bf16.mxu1 %v5343_v39  ;;  %v5229_v35 = vpack.c.bf16 %v468_v36, %v464_v5  ;;  %v5357_v39 = vpack.c.bf16 %v470_v25, %v466_v4  ;;  %v5231_v55 = vpack.c.bf16 %v477_v30, %v473_v28  ;;  %v486_v12 = vld [vmem:[%s12341_s3 + $0x730] sm:$0xff]  ;;  %v492_v33 = vld [vmem:[%s12341_s3 + $0x760] sm:$0xff]  ;;  %v497_v37 = vld [vmem:[%s12341_s3 + $0x788] sm:$0xff]  ;;  %vm2679_vm3 = vcmp.ge.f32.partialorder %v7523_v42, 0.0 }
  0xc9   : > { %v490_v34 = vld [vmem:[%s12341_s3 + $0x750] sm:$0xff]  ;;  %v818_v45 = vadd.f32 %v817_v56, %v816_v54  ;;  %v501_v16 = vld [vmem:[%s12341_s3 + $0x7a8] sm:$0xff]  ;;  %v499_v21 = vld [vmem:[%s12341_s3 + $0x798] sm:$0xff]  ;;  %v5241_v22 = vpack.c.bf16 %v492_v33, %v488_v18 }
  0xca   : > { %2638 = vadd.xlane.f32.xlu0 %v2323_v6  ;;  %v480_v6 = vld [vmem:[%s12341_s3 + $0x700] sm:$0xff]  ;;  %v494_v20 = vld [vmem:[%s12341_s3 + $0x770] sm:$0xff]  ;;  %v503_v48 = vld [vmem:[%s12341_s3 + $0x7b8] sm:$0xff]  ;;  %v5243_v36 = vpack.c.bf16 %v501_v16, %v497_v37 }
  0xcb   : > { %5218 = vmatpush1.bf16.msra.mxu0 %v5217_v1  ;;  %5346 = vmatpush1.bf16.msra.mxu1 %v5345_v38  ;;  %v485_v1 = vld [vmem:[%s12341_s3 + $0x728] sm:$0xff]  ;;  %v483_v38 = vld [vmem:[%s12341_s3 + $0x718] sm:$0xff]  ;;  %v500_v5 = vld [vmem:[%s12341_s3 + $0x7a0] sm:$0xff]  ;;  %v819_v4 = vrot.slane %v818_v45, 2  ;;  %v7525_v56 = vpop.xlane.xlu0 %2353 }
  0xcc   : > { %5220 = vmatprep.subr.bf16.mxu0 %v5219_v7  ;;  %5348 = vmatprep.subr.bf16.mxu1 %v5347_v9  ;;  %v484_v7 = vld [vmem:[%s12341_s3 + $0x720] sm:$0xff]  ;;  %v5235_v9 = vpack.c.bf16 %v485_v1, %v481_v0  ;;  %v5363_v10 = vpack.c.bf16 %v487_v2, %v483_v38  ;;  %v498_v26 = vld [vmem:[%s12341_s3 + $0x790] sm:$0xff]  ;;  %v509_v25 = vld [vmem:[%s12341_s3 + $0x7e8] sm:$0xff]  ;;  %12684 = vst [vmem:[#allocation10_spill] sm:$0xff] %v7525_v56 }
  0xcd   : > { %v507_v28 = vld [vmem:[%s12341_s3 + $0x7d8] sm:$0xff]  ;;  %v504_v32 = vld [vmem:[%s12341_s3 + $0x7c0] sm:$0xff]  ;;  %v506_v51 = vld [vmem:[%s12341_s3 + $0x7d0] sm:$0xff] }
  0xce   : > { %1450 = vadd.xlane.f32.xlu0 %v1449_v15  ;;  %v491_v15 = vld [vmem:[%s12341_s3 + $0x758] sm:$0xff]  ;;  %v508_v49 = vld [vmem:[%s12341_s3 + $0x7e0] sm:$0xff]  ;;  %v510_v54 = vld [vmem:[%s12341_s3 + $0x7f0] sm:$0xff] }
  0xcf   : > { %5222 = vmatpush1.bf16.msra.mxu0 %v5221_v40  ;;  %5350 = vmatpush1.bf16.msra.mxu1 %v5349_v62  ;;  %v495_v40 = vld [vmem:[%s12341_s3 + $0x778] sm:$0xff]  ;;  %v5237_v62 = vpack.c.bf16 %v484_v7, %v480_v6  ;;  %v5377_v61 = vpack.c.bf16 %v510_v54, %v506_v51  ;;  %v540_v1 = vld [vmem:[%s12342_s4 + $0xe0] sm:$0xff]  ;;  %v541_v38 = vld [vmem:[%s12342_s4 + $0xe8] sm:$0xff]  ;;  %v7527_v13 = vpop.xlane.xlu0 %2363  ;;  %v7537_v18 = vpop.xlane.xlu1 %2348 }
  0xd0   : > { %5224 = vmatprep.subr.bf16.mxu0 %v5223_v17  ;;  %5352 = vmatprep.subr.bf16.mxu1 %v5351_v24  ;;  %v5365_v17 = vpack.c.bf16 %v486_v12, %v482_v11  ;;  %v5367_v24 = vpack.c.bf16 %v495_v40, %v491_v15  ;;  %v511_v29 = vld [vmem:[%s12341_s3 + $0x7f8] sm:$0xff]  ;;  %v1189_v2 = vmul.f32 %v6933_v43, %v540_v1  ;;  %v602_v56 = vld [vmem:[%s12342_s4 + $0x2d0] sm:$0xff] }
  0xd1   : > { %12685 = vst [vmem:[#allocation11_spill] sm:$0xff] %v7527_v13  ;;  %12689 = vst [vmem:[#allocation15_spill] sm:$0xff] %v7537_v18  ;;  %v547_v1 = vld [vmem:[%s12342_s4 + $0x118] sm:$0xff]  ;;  %v594_v13 = vld [vmem:[%s12342_s4 + $0x290] sm:$0xff] }
  0xd2   : > { %2648 = vadd.xlane.f32.xlu0 %v2331_v19  ;;  %v5371_v19 = vpack.c.bf16 %v503_v48, %v499_v21 }
  0xd3   : > { %5226 = vmatpush1.bf16.msra.mxu0 %v5225_v23  ;;  %5354 = vmatpush1.bf16.msra.mxu1 %v5353_v53  ;;  %v5369_v23 = vpack.c.bf16 %v494_v20, %v490_v34  ;;  %v496_v53 = vld [vmem:[%s12341_s3 + $0x780] sm:$0xff]  ;;  %v7529_v15 = vpop.xlane.xlu0 %2373 }
  0xd4   : > { %5228 = vmatprep.subr.bf16.mxu0 %v5227_v58  ;;  %5356 = vmatprep.subr.bf16.mxu1 %v5355_v44  ;;  %v502_v58 = vld [vmem:[%s12341_s3 + $0x7b0] sm:$0xff]  ;;  %v505_v44 = vld [vmem:[%s12341_s3 + $0x7c8] sm:$0xff]  ;;  %v5245_v30 = vpack.c.bf16 %v500_v5, %v496_v53  ;;  %12686 = vst [vmem:[#allocation12_spill] sm:$0xff] %v7529_v15  ;;  %v588_v15 = vld [vmem:[%s12342_s4 + $0x260] sm:$0xff] }
  0xd5   : > { %v5373_v31 = vpack.c.bf16 %v502_v58, %v498_v26 }
  0xd7   : > { %5230 = vmatpush1.bf16.msra.mxu0 %v5229_v35  ;;  %5358 = vmatpush1.bf16.msra.mxu1 %v5357_v39  ;;  %v5247_v35 = vpack.c.bf16 %v509_v25, %v505_v44  ;;  %v5375_v39 = vpack.c.bf16 %v511_v29, %v507_v28  ;;  %v7531_v40 = vpop.xlane.xlu0 %2383 }
  0xd8   : > { %5232 = vmatprep.subr.bf16.mxu0 %v5231_v55  ;;  %5360 = vmatprep.subr.bf16.mxu1 %v5359_v59  ;;  %v820_v55 = vadd.f32 %v819_v4, %v818_v45  ;;  %v5249_v59 = vpack.c.bf16 %v508_v49, %v504_v32  ;;  %v544_v32 = vld [vmem:[%s12342_s4 + $0x100] sm:$0xff]  ;;  %vm2687_vm8 = vcmp.ge.f32.partialorder %v7531_v40, 0.0 }
  0xd9   : > { %v1193_v49 = vmul.f32 %v6933_v43, %v544_v32 }
  0xda   : > { %v821_v63 = vrot.slane %v820_v55, 1 }
  0xdb   : > { %5234 = vmatpush1.bf16.msra.mxu0 %v5233_v3  ;;  %5362 = vmatpush1.bf16.msra.mxu1 %v5361_v52  ;;  %v1190_v3 = vmul.f32 %v6935_v46, %v541_v38  ;;  %v542_v52 = vld [vmem:[%s12342_s4 + $0xf0] sm:$0xff] }
  0xdc   : > { %5236 = vmatprep.subr.bf16.mxu0 %v5235_v9  ;;  %5364 = vmatprep.subr.bf16.mxu1 %v5363_v10  ;;  %v822_v0 = vadd.f32 %v821_v63, %v820_v55  ;;  %v1191_v6 = vmul.f32 %v6958_v8, %v542_v52  ;;  %v543_v9 = vld [vmem:[%s12342_s4 + $0xf8] sm:$0xff]  ;;  %v553_v52 = vld [vmem:[%s12342_s4 + $0x148] sm:$0xff] }
  0xdd   : > { %v1452_v7 = vadd.f32 %v1190_v3, %v1189_v2  ;;  %v1192_v10 = vmul.f32 %v6979_v47, %v543_v9  ;;  %v552_v3 = vld [vmem:[%s12342_s4 + $0x140] sm:$0xff] }
  0xdf   : > { %5238 = vmatpush1.bf16.msra.mxu0 %v5237_v62  ;;  %5366 = vmatpush1.bf16.msra.mxu1 %v5365_v17  ;;  %v1453_v11 = vadd.f32 %v1452_v7, %v1191_v6  ;;  %v7533_v62 = vpop.xlane.xlu0 %2393 }
  0xe0   : > { %5240 = vmatprep.subr.bf16.mxu0 %v5239_v57  ;;  %5368 = vmatprep.subr.bf16.mxu1 %v5367_v24  ;;  %12687 = vst [vmem:[#allocation13_spill] sm:$0xff] %v7533_v62  ;;  %v7541_v57 = vpop.xlane.xlu1 %2358 }
  0xe1   : > { %v1454_v12 = vadd.f32 %v1453_v11, %v1192_v10  ;;  %12691 = vst [vmem:[#allocation17_spill] sm:$0xff] %v7541_v57 }
  0xe3   : > { %5242 = vmatpush1.bf16.msra.mxu0 %v5241_v22  ;;  %5370 = vmatpush1.bf16.msra.mxu1 %v5369_v23  ;;  %v7535_v17 = vpop.xlane.xlu0 %2403 }
  0xe4   : > { %5244 = vmatprep.subr.bf16.mxu0 %v5243_v36  ;;  %5372 = vmatprep.subr.bf16.mxu1 %v5371_v19  ;;  %12688 = vst [vmem:[#allocation14_spill] sm:$0xff] %v7535_v17  ;;  %v7545_v34 = vpop.xlane.xlu1 %2368 }
  0xe5   : > { %1455 = vadd.xlane.f32.xlu1 %v1454_v12  ;;  %12693 = vst [vmem:[#allocation19_spill] sm:$0xff] %v7545_v34  ;;  %v1800_v12 = vadd.s32 496, %v6410_v27  ;;  %v587_v34 = vld [vmem:[%s12342_s4 + $0x258] sm:$0xff] }
  0xe7   : > { %5246 = vmatpush1.bf16.msra.mxu0 %v5245_v30  ;;  %5374 = vmatpush1.bf16.msra.mxu1 %v5373_v31  ;;  %v7539_v33 = vpop.xlane.xlu0 %2413  ;;  %vm2058_vm1 = vcmp.eq.s32.totalorder %v1800_v12, %v6857_v50 }
  0xe8   : > { %5248 = vmatprep.subr.bf16.mxu0 %v5247_v35  ;;  %5376 = vmatprep.subr.bf16.mxu1 %v5375_v39  ;;  %12690 = vst [vmem:[#allocation16_spill] sm:$0xff] %v7539_v33  ;;  %v7549_v37 = vpop.xlane.xlu1 %2378  ;;  %v545_v35 = vld [vmem:[%s12342_s4 + $0x108] sm:$0xff]  ;;  %v546_v39 = vld [vmem:[%s12342_s4 + $0x110] sm:$0xff] }
  0xe9   : > { %12694 = vst [vmem:[#allocation20_spill] sm:$0xff] %v7549_v37  ;;  %v1194_v51 = vmul.f32 %v6935_v46, %v545_v35  ;;  %v1195_v38 = vmul.f32 %v6958_v8, %v546_v39  ;;  %v586_v37 = vld [vmem:[%s12342_s4 + $0x250] sm:$0xff] }
  0xeb   : > { %5250 = vmatpush1.bf16.msra.mxu0 %v5249_v59  ;;  %5378 = vmatpush1.bf16.msra.mxu1 %v5377_v61  ;;  %v7543_v24 = vpop.xlane.xlu0 %2423  ;;  %v1457_v2 = vadd.f32 %v1194_v51, %v1193_v49 }
  0xec   : > { %12692 = vst [vmem:[#allocation18_spill] sm:$0xff] %v7543_v24  ;;  %v7553_v16 = vpop.xlane.xlu1 %2388 }
  0xed   : > { %12695 = vst [vmem:[#allocation21_spill] sm:$0xff] %v7553_v16  ;;  %v1458_v14 = vadd.f32 %v1457_v2, %v1195_v38  ;;  %v1801_v38 = vadd.s32 504, %v6410_v27  ;;  %v584_v16 = vld [vmem:[%s12342_s4 + $0x240] sm:$0xff] }
  0xee   : > { %968 = vmatmul.mubr.f32.vlgmr.msra.gmra.mrb[0].mxu0 %v822_v0  ;;  %1110 = vmatmul.mubr.f32.vlgmr.msra.gmra.mrb[0].mxu1 %v822_v0 }
  0xef   : > { %v7547_v20 = vpop.xlane.xlu0 %2433  ;;  %vm2062_vm2 = vcmp.eq.s32.totalorder %v1801_v38, %v6857_v50  ;;  %v562_v50 = vld [vmem:[%s12342_s4 + $0x190] sm:$0xff]  ;;  %v563_v38 = vld [vmem:[%s12342_s4 + $0x198] sm:$0xff] }
  0xf0   : > { %v7557_v48 = vpop.xlane.xlu1 %2398  ;;  %v2339_v12 = vsel %vm2062_vm2, %v6864_v60, 0.0 }
  0xf1   : > { %12696 = vst [vmem:[#allocation22_spill] sm:$0xff] %v7557_v48 }
  0xf3   : > { %v7551_v45 = vpop.xlane.xlu0 %2443 }
  0xf4   : > { %v7561_v19 = vpop.xlane.xlu1 %2408 }
  0xf5   : > { %12697 = vst [vmem:[#allocation23_spill] sm:$0xff] %v7561_v19 }
  0xf7   : > { %v7555_v21 = vpop.xlane.xlu0 %2453 }
  0xf8   : > { %v7565_v58 = vpop.xlane.xlu1 %2418 }
  0xf9   : > { %12698 = vst [vmem:[#allocation24_spill] sm:$0xff] %v7565_v58 }
  0xfb   : > { %v7559_v22 = vpop.xlane.xlu0 %2463 }
  0xfc   : > { %v7569_v4 = vpop.xlane.xlu1 %2428 }
  0xfd   : > { %12700 = vst [vmem:[#allocation26_spill] sm:$0xff] %v7569_v4  ;;  %v554_v4 = vld [vmem:[%s12342_s4 + $0x150] sm:$0xff] }
  0xfe   : > { %v1203_v2 = vmul.f32 %v6958_v8, %v554_v4  ;;  %v560_v4 = vld [vmem:[%s12342_s4 + $0x180] sm:$0xff] }
  0xff   : > { %v7563_v26 = vpop.xlane.xlu0 %2473 }
 0x100   : > { %v7573_v28 = vpop.xlane.xlu1 %2438 }
 0x103   : > { %v7567_v44 = vpop.xlane.xlu0 %2483 }
 0x104   : > { %12699 = vst [vmem:[#allocation25_spill] sm:$0xff] %v7567_v44  ;;  %v7577_v30 = vpop.xlane.xlu1 %2448 }
 0x107   : > { %v7571_v25 = vpop.xlane.xlu0 %2493 }
 0x108   : > { %v7598_v61 = vpop.xlane.xlu1 %2458 }
 0x10b   : > { %v7575_v29 = vpop.xlane.xlu0 %2503 }
 0x10c   : > { %v7630_v32 = vpop.xlane.xlu1 %2468 }
 0x10f   : > { %v7579_v31 = vpop.xlane.xlu0 %2513 }
 0x113   : > { %v7600_v63 = vpop.xlane.xlu0 %2523 }
 0x117   : > { %v7632_v35 = vpop.xlane.xlu0 %2533 }
 0x1c1   : > { %v969_v23 = vpop.f32.mrb[0].mxu0  ;;  %v1111_v53 = vpop.f32.mrb[0].mxu1 }
 0x1c2   : > { %v971_v5 = vpop.f32.mrb[1].mxu0  ;;  %v1113_v36 = vpop.f32.mrb[1].mxu1  ;;  %v7592_v54 = vmul.f32 0.044194173, %v969_v23  ;;  %v7594_v55 = vmul.f32 0.044194173, %v1111_v53  ;;  %v1196_v53 = vmul.f32 %v6979_v47, %v547_v1 }
 0x1c3   : > { %v7596_v59 = vmul.f32 0.044194173, %v971_v5  ;;  %v7602_v0 = vmul.f32 0.044194173, %v1113_v36  ;;  %v1201_v5 = vmul.f32 %v6933_v43, %v552_v3  ;;  %v1202_v36 = vmul.f32 %v6935_v46, %v553_v52  ;;  %v556_v1 = vld [vmem:[%s12342_s4 + $0x160] sm:$0xff]  ;;  %v557_v3 = vld [vmem:[%s12342_s4 + $0x168] sm:$0xff] }
 0x1c4   : > { %v2670_v7 = vsel %vm2660_vm0, %v7592_v54, inf  ;;  %v2672_v9 = vsel %vm2660_vm0, %v7594_v55, inf  ;;  %v2661_v51 = vsel %vm2660_vm0, %v7592_v54, -inf  ;;  %v2663_v52 = vsel %vm2660_vm0, %v7594_v55, -inf }
 0x1c5   : > { %12701 = vst [vmem:[#allocation27_spill] sm:$0xff] %v7602_v0  ;;  %v2671_v6 = vsel %vm2660_vm0, %v7596_v59, inf  ;;  %v2662_v10 = vsel %vm2660_vm0, %v7596_v59, -inf  ;;  %v2673_v11 = vsel %vm2660_vm0, %v7602_v0, inf  ;;  %v2664_v23 = vsel %vm2660_vm0, %v7602_v0, -inf }
 0x1c6   : > { %v2674_v39 = vmin.f32 %v2670_v7, %v2671_v6  ;;  %v2675_v49 = vmin.f32 %v2672_v9, %v2673_v11  ;;  %v2665_v6 = vmax.f32 %v2661_v51, %v2662_v10  ;;  %v2666_v9 = vmax.f32 %v2663_v52, %v2664_v23  ;;  %v555_v10 = vld [vmem:[%s12342_s4 + $0x158] sm:$0xff]  ;;  %v558_v23 = vld [vmem:[%s12342_s4 + $0x170] sm:$0xff] }
 0x1c7   : > { %v1467_v11 = vadd.f32 %v1202_v36, %v1201_v5  ;;  %v1205_v24 = vmul.f32 %v6933_v43, %v556_v1  ;;  %v1206_v58 = vmul.f32 %v6935_v46, %v557_v3  ;;  %v1459_v48 = vadd.f32 %v1458_v14, %v1196_v53  ;;  %v561_v5 = vld [vmem:[%s12342_s4 + $0x188] sm:$0xff]  ;;  %v7664_v36 = vpop.xlane.xlu1 %2478  ;;  %v559_v3 = vld [vmem:[%s12342_s4 + $0x178] sm:$0xff] }
 0x1c8   : > { %v2676_v7 = vmin.f32 %v2674_v39, %v2675_v49  ;;  %v2667_v19 = vmax.f32 %v2665_v6, %v2666_v9  ;;  %v7666_v39 = vpop.xlane.xlu0 %2543  ;;  %v2335_v14 = vsel %vm2058_vm1, %v6864_v60, 0.0  ;;  %v1204_v53 = vmul.f32 %v6979_v47, %v555_v10  ;;  %v564_v6 = vld [vmem:[%s12342_s4 + $0x1a0] sm:$0xff] }
 0x1c9   : > { %12702 = vst [vmem:[#allocation28_spill] sm:$0xff] %v7666_v39  ;;  %v1468_v49 = vadd.f32 %v1467_v11, %v1203_v2  ;;  %v1207_v51 = vmul.f32 %v6958_v8, %v558_v23  ;;  %v1472_v1 = vadd.f32 %v1206_v58, %v1205_v24  ;;  %v1209_v52 = vmul.f32 %v6933_v43, %v560_v4  ;;  %v565_v24 = vld [vmem:[%s12342_s4 + $0x1a8] sm:$0xff]  ;;  %v568_v4 = vld [vmem:[%s12342_s4 + $0x1c0] sm:$0xff] }
 0x1ca   : > { %2677 = vmin.xlane.f32.xlu0 %v2676_v7  ;;  %2668 = vmax.xlane.f32.xlu1 %v2667_v19  ;;  %v1210_v19 = vmul.f32 %v6935_v46, %v561_v5  ;;  %v1208_v58 = vmul.f32 %v6979_v47, %v559_v3  ;;  %v1211_v2 = vmul.f32 %v6958_v8, %v562_v50  ;;  %v569_v5 = vld [vmem:[%s12342_s4 + $0x1c8] sm:$0xff]  ;;  %v572_v50 = vld [vmem:[%s12342_s4 + $0x1e0] sm:$0xff] }
 0x1cb   : > { %v1473_v7 = vadd.f32 %v1472_v1, %v1207_v51  ;;  %v7690_v9 = vpop.xlane.xlu1 %2488  ;;  %v1213_v10 = vmul.f32 %v6933_v43, %v564_v6  ;;  %v1214_v23 = vmul.f32 %v6935_v46, %v565_v24  ;;  %v1218_v51 = vmul.f32 %v6935_v46, %v569_v5  ;;  %v573_v6 = vld [vmem:[%s12342_s4 + $0x1e8] sm:$0xff]  ;;  %v567_v24 = vld [vmem:[%s12342_s4 + $0x1b8] sm:$0xff] }
 0x1cc   : > { %v7692_v60 = vpop.xlane.xlu0 %2553  ;;  %v1477_v11 = vadd.f32 %v1210_v19, %v1209_v52  ;;  %v571_v5 = vld [vmem:[%s12342_s4 + $0x1d8] sm:$0xff]  ;;  %v1251_v0 = vmul.f32 %v6958_v8, %v602_v56  ;;  %v608_v56 = vld [vmem:[%s12342_s4 + $0x300] sm:$0xff] }
 0x1cd   : > { %12703 = vst [vmem:[#allocation29_spill] sm:$0xff] %v7692_v60  ;;  %v1474_v1 = vadd.f32 %v1473_v7, %v1208_v58  ;;  %v1482_v19 = vadd.f32 %v1214_v23, %v1213_v10  ;;  %v1216_v23 = vmul.f32 %v6979_v47, %v567_v24 }
 0x1ce   : > { %1460 = vadd.xlane.f32.xlu0 %v1459_v48  ;;  %2653 = vadd.xlane.f32.xlu1 %v2335_v14  ;;  %v1469_v48 = vadd.f32 %v1468_v49, %v1204_v53  ;;  %v566_v14 = vld [vmem:[%s12342_s4 + $0x1b0] sm:$0xff]  ;;  %v1212_v53 = vmul.f32 %v6979_v47, %v563_v38  ;;  %v1217_v49 = vmul.f32 %v6933_v43, %v568_v4 }
 0x1cf   : > { %v1478_v3 = vadd.f32 %v1477_v11, %v1211_v2  ;;  %v1215_v52 = vmul.f32 %v6958_v8, %v566_v14  ;;  %v1221_v2 = vmul.f32 %v6933_v43, %v572_v50  ;;  %v1222_v11 = vmul.f32 %v6935_v46, %v573_v6  ;;  %v574_v14 = vld [vmem:[%s12342_s4 + $0x1f0] sm:$0xff]  ;;  %v575_v6 = vld [vmem:[%s12342_s4 + $0x1f8] sm:$0xff] }
 0x1d0   : > { %v7727_v58 = vpop.xlane.xlu0 %2563  ;;  %v1487_v38 = vadd.f32 %v1218_v51, %v1217_v49  ;;  %v576_v49 = vld [vmem:[%s12342_s4 + $0x200] sm:$0xff]  ;;  %v577_v51 = vld [vmem:[%s12342_s4 + $0x208] sm:$0xff] }
 0x1d1   : > { %12704 = vst [vmem:[#allocation30_spill] sm:$0xff] %v7727_v58  ;;  %v1479_v10 = vadd.f32 %v1478_v3, %v1212_v53  ;;  %v1483_v4 = vadd.f32 %v1482_v19, %v1215_v52  ;;  %v1220_v53 = vmul.f32 %v6979_v47, %v571_v5  ;;  %v1223_v3 = vmul.f32 %v6958_v8, %v574_v14 }
 0x1d2   : > { %2658 = vadd.xlane.f32.xlu0 %v2339_v12  ;;  %v570_v12 = vld [vmem:[%s12342_s4 + $0x1d0] sm:$0xff]  ;;  %v1492_v52 = vadd.f32 %v1222_v11, %v1221_v2  ;;  %v1225_v24 = vmul.f32 %v6933_v43, %v576_v49  ;;  %v1226_v27 = vmul.f32 %v6935_v46, %v577_v51  ;;  %v581_v2 = vld [vmem:[%s12342_s4 + $0x228] sm:$0xff] }
 0x1d3   : > { %v1219_v7 = vmul.f32 %v6958_v8, %v570_v12  ;;  %v1484_v50 = vadd.f32 %v1483_v4, %v1216_v23  ;;  %v579_v4 = vld [vmem:[%s12342_s4 + $0x218] sm:$0xff]  ;;  %v1230_v51 = vmul.f32 %v6935_v46, %v581_v2 }
 0x1d4   : > { %v7749_v12 = vpop.xlane.xlu0 %2573  ;;  %v1493_v23 = vadd.f32 %v1492_v52, %v1223_v3  ;;  %v1497_v14 = vadd.f32 %v1226_v27, %v1225_v24  ;;  %v1228_v27 = vmul.f32 %v6979_v47, %v579_v4  ;;  %v1237_v4 = vmul.f32 %v6933_v43, %v588_v15  ;;  %v592_v15 = vld [vmem:[%s12342_s4 + $0x280] sm:$0xff] }
 0x1d5   : > { %12705 = vst [vmem:[#allocation31_spill] sm:$0xff] %v7749_v12 }
 0x1d6   : > { %1470 = vadd.xlane.f32.xlu0 %v1469_v48  ;;  %v7725_v48 = vpop.xlane.xlu1 %2498 }
 0x1d8   : > { %v7783_v52 = vpop.xlane.xlu0 %2583 }
 0x1d9   : > { %12706 = vst [vmem:[#allocation32_spill] sm:$0xff] %v7783_v52 }
 0x1da   : > { %1475 = vadd.xlane.f32.xlu0 %v1474_v1  ;;  %v1488_v1 = vadd.f32 %v1487_v38, %v1219_v7  ;;  %v7747_v19 = vpop.xlane.xlu1 %2508  ;;  %v578_v7 = vld [vmem:[%s12342_s4 + $0x210] sm:$0xff]  ;;  %v580_v38 = vld [vmem:[%s12342_s4 + $0x220] sm:$0xff] }
 0x1db   : > { %v1227_v5 = vmul.f32 %v6958_v8, %v578_v7  ;;  %v1229_v49 = vmul.f32 %v6933_v43, %v580_v38 }
 0x1dc   : > { %v1489_v11 = vadd.f32 %v1488_v1, %v1220_v53  ;;  %v585_v53 = vld [vmem:[%s12342_s4 + $0x248] sm:$0xff]  ;;  %v582_v1 = vld [vmem:[%s12342_s4 + $0x230] sm:$0xff] }
 0x1dd   : > { %v1498_v7 = vadd.f32 %v1497_v14, %v1227_v5  ;;  %v1231_v38 = vmul.f32 %v6958_v8, %v582_v1  ;;  %v1502_v2 = vadd.f32 %v1230_v51, %v1229_v49  ;;  %v7806_v49 = vpop.xlane.xlu0 %2593 }
 0x1de   : > { %1480 = vadd.xlane.f32.xlu0 %v1479_v10  ;;  %v1224_v10 = vmul.f32 %v6979_v47, %v575_v6  ;;  %v7781_v3 = vpop.xlane.xlu1 %2518  ;;  %v1234_v6 = vmul.f32 %v6935_v46, %v585_v53  ;;  %12707 = vst [vmem:[#allocation33_spill] sm:$0xff] %v7806_v49 }
 0x1df   : > { %v1499_v51 = vadd.f32 %v1498_v7, %v1228_v27  ;;  %v1503_v1 = vadd.f32 %v1502_v2, %v1231_v38  ;;  %v1236_v27 = vmul.f32 %v6979_v47, %v587_v34  ;;  %v591_v2 = vld [vmem:[%s12342_s4 + $0x278] sm:$0xff]  ;;  %v596_v34 = vld [vmem:[%s12342_s4 + $0x2a0] sm:$0xff] }
 0x1e0   : > { %v1494_v24 = vadd.f32 %v1493_v23, %v1224_v10  ;;  %v1235_v10 = vmul.f32 %v6958_v8, %v586_v37  ;;  %v590_v37 = vld [vmem:[%s12342_s4 + $0x270] sm:$0xff] }
 0x1e2   : > { %1485 = vadd.xlane.f32.xlu0 %v1484_v50  ;;  %v1233_v50 = vmul.f32 %v6933_v43, %v584_v16  ;;  %v589_v16 = vld [vmem:[%s12342_s4 + $0x268] sm:$0xff]  ;;  %v7804_v14 = vpop.xlane.xlu1 %2528 }
 0x1e3   : > { %v1238_v5 = vmul.f32 %v6935_v46, %v589_v16  ;;  %v1241_v16 = vmul.f32 %v6933_v43, %v592_v15  ;;  %v595_v15 = vld [vmem:[%s12342_s4 + $0x298] sm:$0xff] }
 0x1e4   : > { %v1507_v23 = vadd.f32 %v1234_v6, %v1233_v50  ;;  %v593_v50 = vld [vmem:[%s12342_s4 + $0x288] sm:$0xff] }
 0x1e5   : > { %v1512_v7 = vadd.f32 %v1238_v5, %v1237_v4  ;;  %v7839_v4 = vpop.xlane.xlu0 %2598 }
 0x1e6   : > { %1490 = vadd.xlane.f32.xlu0 %v1489_v11  ;;  %v583_v11 = vld [vmem:[%s12342_s4 + $0x238] sm:$0xff]  ;;  %v1508_v6 = vadd.f32 %v1507_v23, %v1235_v10  ;;  %v597_v10 = vld [vmem:[%s12342_s4 + $0x2a8] sm:$0xff]  ;;  %v7837_v23 = vpop.xlane.xlu1 %2538  ;;  %12708 = vst [vmem:[#allocation34_spill] sm:$0xff] %v7839_v4 }
 0x1e7   : > { %v1232_v53 = vmul.f32 %v6979_v47, %v583_v11  ;;  %v1242_v11 = vmul.f32 %v6935_v46, %v593_v50  ;;  %v1243_v50 = vmul.f32 %v6958_v8, %v594_v13 }
 0x1e8   : > { %v1509_v5 = vadd.f32 %v1508_v6, %v1236_v27  ;;  %v1245_v27 = vmul.f32 %v6933_v43, %v596_v34  ;;  %v1246_v6 = vmul.f32 %v6935_v46, %v597_v10 }
 0x1e9   : > { %v1504_v38 = vadd.f32 %v1503_v1, %v1232_v53  ;;  %v600_v1 = vld [vmem:[%s12342_s4 + $0x2c0] sm:$0xff]  ;;  %v1517_v57 = vadd.f32 %v1242_v11, %v1241_v16  ;;  %v7865_v16 = vpop.xlane.xlu0 %2603 }
 0x1ea   : > { %1495 = vadd.xlane.f32.xlu0 %v1494_v24  ;;  %v1239_v24 = vmul.f32 %v6958_v8, %v590_v37  ;;  %v601_v37 = vld [vmem:[%s12342_s4 + $0x2c8] sm:$0xff]  ;;  %v7863_v13 = vpop.xlane.xlu1 %2548  ;;  %12710 = vst [vmem:[#allocation36_spill] sm:$0xff] %v7865_v16  ;;  %v1522_v18 = vadd.f32 %v1246_v6, %v1245_v27 }
 0x1eb   : > { %12709 = vst [vmem:[#allocation35_spill] sm:$0xff] %v7863_v13  ;;  %v1518_v34 = vadd.f32 %v1517_v57, %v1243_v50  ;;  %v603_v57 = vld [vmem:[%s12342_s4 + $0x2d8] sm:$0xff] }
 0x1ec   : > { %v1513_v53 = vadd.f32 %v1512_v7, %v1239_v24  ;;  %v598_v24 = vld [vmem:[%s12342_s4 + $0x2b0] sm:$0xff]  ;;  %v1249_v7 = vmul.f32 %v6933_v43, %v600_v1  ;;  %v604_v1 = vld [vmem:[%s12342_s4 + $0x2e0] sm:$0xff] }
 0x1ed   : > { %v1247_v10 = vmul.f32 %v6958_v8, %v598_v24  ;;  %v606_v24 = vld [vmem:[%s12342_s4 + $0x2f0] sm:$0xff] }
 0x1ee   : > { %1500 = vadd.xlane.f32.xlu0 %v1499_v51  ;;  %v1240_v51 = vmul.f32 %v6979_v47, %v591_v2  ;;  %v1250_v2 = vmul.f32 %v6935_v46, %v601_v37  ;;  %v605_v37 = vld [vmem:[%s12342_s4 + $0x2e8] sm:$0xff] }
 0x1ef   : > { %v1523_v6 = vadd.f32 %v1522_v18, %v1247_v10  ;;  %v607_v18 = vld [vmem:[%s12342_s4 + $0x2f8] sm:$0xff] }
 0x1f0   : > { %v1514_v11 = vadd.f32 %v1513_v53, %v1240_v51  ;;  %v1253_v51 = vmul.f32 %v6933_v43, %v604_v1  ;;  %v1254_v53 = vmul.f32 %v6935_v46, %v605_v37  ;;  %v7895_v1 = vpop.xlane.xlu0 %2608  ;;  %v1257_v37 = vmul.f32 %v6933_v43, %v608_v56  ;;  %v550_v56 = vld [vmem:[%s12342_s4 + $0x130] sm:$0xff] }
 0x1f1   : > { %12712 = vst [vmem:[#allocation38_spill] sm:$0xff] %v7895_v1  ;;  %v610_v1 = vld [vmem:[%s12342_s4 + $0x310] sm:$0xff] }
 0x1f2   : > { %1505 = vadd.xlane.f32.xlu0 %v1504_v38  ;;  %v1244_v38 = vmul.f32 %v6979_v47, %v595_v15  ;;  %v599_v15 = vld [vmem:[%s12342_s4 + $0x2b8] sm:$0xff]  ;;  %v1532_v10 = vadd.f32 %v1254_v53, %v1253_v51  ;;  %v1256_v51 = vmul.f32 %v6979_v47, %v607_v18  ;;  %v548_v53 = vld [vmem:[%s12342_s4 + $0x120] sm:$0xff] }
 0x1f3   : > { %v1248_v27 = vmul.f32 %v6979_v47, %v599_v15 }
 0x1f4   : > { %v1519_v50 = vadd.f32 %v1518_v34, %v1244_v38  ;;  %v1252_v38 = vmul.f32 %v6979_v47, %v603_v57  ;;  %v1255_v34 = vmul.f32 %v6958_v8, %v606_v24  ;;  %v7930_v18 = vpop.xlane.xlu0 %2613 }
 0x1f5   : > { %v1524_v16 = vadd.f32 %v1523_v6, %v1248_v27  ;;  %v1259_v6 = vmul.f32 %v6958_v8, %v610_v1  ;;  %12714 = vst [vmem:[#allocation40_spill] sm:$0xff] %v7930_v18  ;;  %v611_v1 = vld [vmem:[%s12342_s4 + $0x318] sm:$0xff]  ;;  %v614_v18 = vld [vmem:[%s12342_s4 + $0x330] sm:$0xff] }
 0x1f6   : > { %1510 = vadd.xlane.f32.xlu0 %v1509_v5  ;;  %v1527_v5 = vadd.f32 %v1250_v2, %v1249_v7  ;;  %v609_v7 = vld [vmem:[%s12342_s4 + $0x308] sm:$0xff]  ;;  %v7893_v2 = vpop.xlane.xlu1 %2558  ;;  %v1533_v27 = vadd.f32 %v1532_v10, %v1255_v34  ;;  %v1260_v49 = vmul.f32 %v6979_v47, %v611_v1 }
 0x1f7   : > { %12711 = vst [vmem:[#allocation37_spill] sm:$0xff] %v7893_v2  ;;  %v1258_v15 = vmul.f32 %v6935_v46, %v609_v7  ;;  %v551_v7 = vld [vmem:[%s12342_s4 + $0x138] sm:$0xff] }
 0x1f9   : > { %v1537_v24 = vadd.f32 %v1258_v15, %v1257_v37  ;;  %v616_v37 = vld [vmem:[%s12342_s4 + $0x340] sm:$0xff]  ;;  %v617_v15 = vld [vmem:[%s12342_s4 + $0x348] sm:$0xff] }
 0x1fa   : > { %1515 = vadd.xlane.f32.xlu0 %v1514_v11  ;;  %v1528_v11 = vadd.f32 %v1527_v5, %v1251_v0  ;;  %v612_v0 = vld [vmem:[%s12342_s4 + $0x320] sm:$0xff]  ;;  %v613_v5 = vld [vmem:[%s12342_s4 + $0x328] sm:$0xff]  ;;  %v1265_v52 = vmul.f32 %v6933_v43, %v616_v37  ;;  %v1266_v12 = vmul.f32 %v6935_v46, %v617_v15 }
 0x1fb   : > { %v1261_v34 = vmul.f32 %v6933_v43, %v612_v0  ;;  %v1262_v10 = vmul.f32 %v6935_v46, %v613_v5  ;;  %v1200_v0 = vmul.f32 %v6979_v47, %v551_v7  ;;  %v1534_v5 = vadd.f32 %v1533_v27, %v1256_v51  ;;  %v620_v7 = vld [vmem:[%s12342_s4 + $0x360] sm:$0xff]  ;;  %v621_v51 = vld [vmem:[%s12342_s4 + $0x368] sm:$0xff] }
 0x1fc   : > { %v1529_v57 = vadd.f32 %v1528_v11, %v1252_v38  ;;  %v1197_v38 = vmul.f32 %v6933_v43, %v548_v53  ;;  %v7928_v11 = vpop.xlane.xlu1 %2568  ;;  %v1547_v1 = vadd.f32 %v1266_v12, %v1265_v52  ;;  %v624_v12 = vld [vmem:[%s12342_s4 + $0x380] sm:$0xff]  ;;  %v625_v52 = vld [vmem:[%s12342_s4 + $0x388] sm:$0xff] }
 0x1fd   : > { %12713 = vst [vmem:[#allocation39_spill] sm:$0xff] %v7928_v11  ;;  %v1538_v11 = vadd.f32 %v1537_v24, %v1259_v6  ;;  %v1542_v58 = vadd.f32 %v1262_v10, %v1261_v34  ;;  %v7967_v24 = vpop.xlane.xlu0 %1420  ;;  %v1269_v34 = vmul.f32 %v6933_v43, %v620_v7  ;;  %v1270_v10 = vmul.f32 %v6935_v46, %v621_v51  ;;  %v623_v7 = vld [vmem:[%s12342_s4 + $0x378] sm:$0xff] }
 0x1fe   : > { %1520 = vadd.xlane.f32.xlu0 %v1519_v50  ;;  %v549_v50 = vld [vmem:[%s12342_s4 + $0x128] sm:$0xff]  ;;  %12716 = vst [vmem:[#allocation42_spill] sm:$0xff] %v7967_v24  ;;  %v1273_v51 = vmul.f32 %v6933_v43, %v624_v12  ;;  %v8034_v24 = vrot.slane %v7592_v54, %v6441_v41 }
 0x1ff   : > { %v1198_v53 = vmul.f32 %v6935_v46, %v549_v50  ;;  %v1263_v50 = vmul.f32 %v6958_v8, %v614_v18  ;;  %v1539_v37 = vadd.f32 %v1538_v11, %v1260_v49 }
 0x200   : > { %v7965_v6 = vpop.xlane.xlu1 %2578  ;;  %12721 = vst [vmem:[#allocation47_spill] sm:$0xff] %v8034_v24 }
 0x201   : > { %v1462_v4 = vadd.f32 %v1198_v53, %v1197_v38  ;;  %12715 = vst [vmem:[#allocation41_spill] sm:$0xff] %v7965_v6  ;;  %v1543_v15 = vadd.f32 %v1542_v58, %v1263_v50  ;;  %v619_v53 = vld [vmem:[%s12342_s4 + $0x358] sm:$0xff]  ;;  %v7989_v50 = vpop.xlane.xlu0 %2618 }
 0x202   : > { %1525 = vadd.xlane.f32.xlu0 %v1524_v16  ;;  %v1199_v16 = vmul.f32 %v6958_v8, %v550_v56  ;;  %v618_v56 = vld [vmem:[%s12342_s4 + $0x350] sm:$0xff]  ;;  %v1268_v49 = vmul.f32 %v6979_v47, %v619_v53  ;;  %12718 = vst [vmem:[#allocation44_spill] sm:$0xff] %v7989_v50 }
 0x203   : > { %v1267_v18 = vmul.f32 %v6958_v8, %v618_v56  ;;  %v630_v53 = vld [vmem:[%s12342_s4 + $0x3b0] sm:$0xff] }
 0x204   : > { %v1463_v27 = vadd.f32 %v1462_v4, %v1199_v16  ;;  %v622_v16 = vld [vmem:[%s12342_s4 + $0x370] sm:$0xff] }
 0x205   : > { %v1548_v58 = vadd.f32 %v1547_v1, %v1267_v18  ;;  %v1271_v11 = vmul.f32 %v6958_v8, %v622_v16  ;;  %v629_v18 = vld [vmem:[%s12342_s4 + $0x3a8] sm:$0xff] }
 0x206   : > { %1530 = vadd.xlane.f32.xlu0 %v1529_v57  ;;  %v615_v57 = vld [vmem:[%s12342_s4 + $0x338] sm:$0xff]  ;;  %v1464_v38 = vadd.f32 %v1463_v27, %v1200_v0  ;;  %v1552_v0 = vadd.f32 %v1270_v10, %v1269_v34  ;;  %v1274_v27 = vmul.f32 %v6935_v46, %v625_v52  ;;  %v1272_v34 = vmul.f32 %v6979_v47, %v623_v7  ;;  %v632_v52 = vld [vmem:[%s12342_s4 + $0x3c0] sm:$0xff] }
 0x207   : > { %v1264_v4 = vmul.f32 %v6979_v47, %v615_v57  ;;  %v626_v57 = vld [vmem:[%s12342_s4 + $0x390] sm:$0xff]  ;;  %v1549_v1 = vadd.f32 %v1548_v58, %v1268_v49  ;;  %v1278_v12 = vmul.f32 %v6935_v46, %v629_v18  ;;  %v633_v49 = vld [vmem:[%s12342_s4 + $0x3c8] sm:$0xff]  ;;  %v1279_v7 = vmul.f32 %v6958_v8, %v630_v53 }
 0x208   : > { %1465 = vadd.xlane.f32.xlu1 %v1464_v38  ;;  %v628_v38 = vld [vmem:[%s12342_s4 + $0x3a0] sm:$0xff]  ;;  %v1553_v10 = vadd.f32 %v1552_v0, %v1271_v11  ;;  %v8023_v11 = vpop.xlane.xlu0 %1430  ;;  %v1282_v18 = vmul.f32 %v6935_v46, %v633_v49  ;;  %v8063_v49 = vrot.slane %v7596_v59, %v6441_v41  ;;  %v8082_v59 = vmul.f32 %v8034_v24, %v7573_v28 }
 0x209   : > { %v1544_v56 = vadd.f32 %v1543_v15, %v1264_v4  ;;  %v1275_v4 = vmul.f32 %v6958_v8, %v626_v57  ;;  %v1557_v15 = vadd.f32 %v1274_v27, %v1273_v51  ;;  %v1277_v16 = vmul.f32 %v6933_v43, %v628_v38  ;;  %12720 = vst [vmem:[#allocation46_spill] sm:$0xff] %v8023_v11  ;;  %v631_v27 = vld [vmem:[%s12342_s4 + $0x3b8] sm:$0xff] }
 0x20a   : > { %1535 = vadd.xlane.f32.xlu0 %v1534_v5  ;;  %v7987_v5 = vpop.xlane.xlu1 %2588  ;;  %v1554_v0 = vadd.f32 %v1553_v10, %v1272_v34  ;;  %v1281_v38 = vmul.f32 %v6933_v43, %v632_v52  ;;  %v634_v34 = vld [vmem:[%s12342_s4 + $0x3d0] sm:$0xff]  ;;  %v1280_v10 = vmul.f32 %v6979_v47, %v631_v27  ;;  %v8059_v52 = vmul.f32 %v8034_v24, %v7533_v62 }
 0x20b   : > { %12717 = vst [vmem:[#allocation43_spill] sm:$0xff] %v7987_v5  ;;  %v1558_v51 = vadd.f32 %v1557_v15, %v1275_v4  ;;  %v1562_v57 = vadd.f32 %v1278_v12, %v1277_v16  ;;  %v1283_v54 = vmul.f32 %v6958_v8, %v634_v34  ;;  %v8051_v12 = vmul.f32 %v8034_v24, %v7523_v42 }
 0x20c   : > { %v8046_v4 = vpop.xlane.xlu0 %2628  ;;  %v1567_v16 = vadd.f32 %v1282_v18, %v1281_v38  ;;  %12727 = vst [vmem:[#allocation53_spill] sm:$0xff] %v8059_v52  ;;  %12728 = vst [vmem:[#allocation54_spill] sm:$0xff] %v8063_v49  ;;  %v8086_v27 = vmul.f32 %v8034_v24, %v7551_v45  ;;  %v8094_v38 = vmul.f32 %v8034_v24, %v7555_v21 }
 0x20d   : > { %12724 = vst [vmem:[#allocation50_spill] sm:$0xff] %v8046_v4  ;;  %v1563_v53 = vadd.f32 %v1562_v57, %v1279_v7  ;;  %12725 = vst [vmem:[#allocation51_spill] sm:$0xff] %v8051_v12  ;;  %v8074_v7 = vmul.f32 %v8034_v24, %v7539_v33  ;;  %v8090_v57 = vmul.f32 %v8034_v24, %v7577_v30 }
 0x20e   : > { %1540 = vadd.xlane.f32.xlu0 %v1539_v37  ;;  %v627_v37 = vld [vmem:[%s12342_s4 + $0x398] sm:$0xff]  ;;  %v8021_v58 = vpop.xlane.xlu1 %1425  ;;  %12732 = vst [vmem:[#allocation58_spill] sm:$0xff] %v8082_v59  ;;  %12733 = vst [vmem:[#allocation59_spill] sm:$0xff] %v8086_v27  ;;  %v8098_v18 = vmul.f32 %v8034_v24, %v7598_v61  ;;  %v8102_v34 = vmul.f32 %v8034_v24, %v7559_v22  ;;  %v1568_v27 = vadd.f32 %v1567_v16, %v1283_v54 }
 0x20f   : > { %12719 = vst [vmem:[#allocation45_spill] sm:$0xff] %v8021_v58  ;;  %12730 = vst [vmem:[#allocation56_spill] sm:$0xff] %v8074_v7  ;;  %v1564_v11 = vadd.f32 %v1563_v53, %v1280_v10  ;;  %v8127_v53 = vmul.f32 %v8034_v24, %v7690_v9  ;;  %v8131_v54 = vmul.f32 %v8034_v24, %v7571_v25 }
 0x210   : > { %12734 = vst [vmem:[#allocation60_spill] sm:$0xff] %v8090_v57  ;;  %12735 = vst [vmem:[#allocation61_spill] sm:$0xff] %v8094_v38  ;;  %v8107_v57 = vmul.f32 %v8034_v24, %v7630_v32  ;;  %v8111_v38 = vmul.f32 %v8034_v24, %v7563_v26  ;;  %v8135_v16 = vmul.f32 %v8034_v24, %v7725_v48 }
 0x211   : > { %12736 = vst [vmem:[#allocation62_spill] sm:$0xff] %v8098_v18  ;;  %12737 = vst [vmem:[#allocation63_spill] sm:$0xff] %v8102_v34  ;;  %v8115_v18 = vmul.f32 %v8034_v24, %v7664_v36  ;;  %v8119_v34 = vmul.f32 %v8034_v24, %v7567_v44 }
 0x212   : > { %1545 = vadd.xlane.f32.xlu0 %v1544_v56  ;;  %v1276_v56 = vmul.f32 %v6979_v47, %v627_v37  ;;  %v8044_v37 = vpop.xlane.xlu1 %2623  ;;  %12738 = vst [vmem:[#allocation64_spill] sm:$0xff] %v8107_v57  ;;  %12739 = vst [vmem:[#allocation65_spill] sm:$0xff] %v8111_v38 }
 0x213   : > { %12723 = vst [vmem:[#allocation49_spill] sm:$0xff] %v8044_v37  ;;  %12740 = vst [vmem:[#allocation66_spill] sm:$0xff] %v8115_v18 }
 0x214   : > { %v1559_v15 = vadd.f32 %v1558_v51, %v1276_v56  ;;  %v8070_v56 = vmul.f32 %v8034_v24, %v7535_v17  ;;  %v8078_v51 = vmul.f32 %v8034_v24, %v7547_v20  ;;  %12741 = vst [vmem:[#allocation67_spill] sm:$0xff] %v8119_v34  ;;  %12744 = vst [vmem:[#allocation70_spill] sm:$0xff] %v8127_v53  ;;  %v12759_v34 = vld [vmem:[#allocation30_spill] sm:$0xff] }
 0x215   : > { %12745 = vst [vmem:[#allocation71_spill] sm:$0xff] %v8131_v54  ;;  %12746 = vst [vmem:[#allocation72_spill] sm:$0xff] %v8135_v16  ;;  %v8151_v53 = vmul.f32 %v8034_v24, %v7781_v3  ;;  %v8155_v54 = vmul.f32 %v8034_v24, %v7600_v63  ;;  %v8159_v16 = vmul.f32 %v8034_v24, %v7804_v14 }
 0x216   : > { %1550 = vadd.xlane.f32.xlu0 %v1549_v1  ;;  %v8041_v1 = vrot.slane %v7594_v55, %v6441_v41  ;;  %v8055_v55 = vmul.f32 %v8034_v24, %v7531_v40  ;;  %12729 = vst [vmem:[#allocation55_spill] sm:$0xff] %v8070_v56  ;;  %12731 = vst [vmem:[#allocation57_spill] sm:$0xff] %v8078_v51  ;;  %v8121_v10 = vpop.xlane.xlu1 %1435 }
 0x217   : > { %12742 = vst [vmem:[#allocation68_spill] sm:$0xff] %v8121_v10  ;;  %v8143_v10 = vmul.f32 %v8034_v24, %v7747_v19  ;;  %12750 = vst [vmem:[#allocation76_spill] sm:$0xff] %v8151_v53  ;;  %v8171_v53 = vmul.f32 %v8034_v24, %v7666_v39 }
 0x218   : > { %12722 = vst [vmem:[#allocation48_spill] sm:$0xff] %v8041_v1  ;;  %12726 = vst [vmem:[#allocation52_spill] sm:$0xff] %v8055_v55  ;;  %v8279_v52 = vmul.f32 %v8041_v1, %v7573_v28  ;;  %v8467_v55 = vmul.f32 %v8063_v49, %v7573_v28 }
 0x219   : > { %12748 = vst [vmem:[#allocation74_spill] sm:$0xff] %v8143_v10  ;;  %12751 = vst [vmem:[#allocation77_spill] sm:$0xff] %v8155_v54  ;;  %v8167_v10 = vmul.f32 %v8034_v24, %v7837_v23  ;;  %v8175_v54 = vmul.f32 %v8034_v24, %v7863_v13 }
 0x21a   : > { %1555 = vadd.xlane.f32.xlu0 %v1554_v0  ;;  %v635_v0 = vld [vmem:[%s12342_s4 + $0x3d8] sm:$0xff]  ;;  %12752 = vst [vmem:[#allocation78_spill] sm:$0xff] %v8159_v16  ;;  %12755 = vst [vmem:[#allocation81_spill] sm:$0xff] %v8171_v53  ;;  %v8179_v16 = vmul.f32 %v8034_v24, %v7692_v60 }
 0x21b   : > { %v1284_v58 = vmul.f32 %v6979_v47, %v635_v0  ;;  %v8139_v0 = vmul.f32 %v8034_v24, %v7575_v29  ;;  %12754 = vst [vmem:[#allocation80_spill] sm:$0xff] %v8167_v10  ;;  %12756 = vst [vmem:[#allocation82_spill] sm:$0xff] %v8175_v54  ;;  %v12763_v53 = vld [vmem:[#allocation31_spill] sm:$0xff]  ;;  %v8199_v54 = vmul.f32 %v8034_v24, %v7965_v6 }
 0x21c   : > { %12757 = vst [vmem:[#allocation83_spill] sm:$0xff] %v8179_v16  ;;  %v8195_v10 = vmul.f32 %v8034_v24, %v12763_v53  ;;  %v12766_v16 = vld [vmem:[#allocation32_spill] sm:$0xff]  ;;  %12792 = vst [vmem:[#allocation109_spill] sm:$0xff] %v8279_v52  ;;  %v8303_v52 = vmul.f32 %v8041_v1, %v7630_v32 }
 0x21d   : > { %12747 = vst [vmem:[#allocation73_spill] sm:$0xff] %v8139_v0  ;;  %v8163_v0 = vmul.f32 %v8034_v24, %v7632_v35  ;;  %12765 = vst [vmem:[#allocation88_spill] sm:$0xff] %v8199_v54  ;;  %v8203_v18 = vmul.f32 %v8034_v24, %v12766_v16  ;;  %v12775_v54 = vld [vmem:[#allocation36_spill] sm:$0xff] }
 0x21e   : > { %1560 = vadd.xlane.f32.xlu0 %v1559_v15  ;;  %v8123_v15 = vpop.xlane.xlu0 %1440  ;;  %12764 = vst [vmem:[#allocation87_spill] sm:$0xff] %v8195_v10  ;;  %v8217_v10 = vpop.xlane.xlu1 %2633  ;;  %v8223_v51 = vmul.f32 %v8034_v24, %v12775_v54  ;;  %12798 = vst [vmem:[#allocation115_spill] sm:$0xff] %v8303_v52  ;;  %v8327_v52 = vmul.f32 %v8041_v1, %v7725_v48 }
 0x21f   : > { %12743 = vst [vmem:[#allocation69_spill] sm:$0xff] %v8123_v15  ;;  %v8147_v15 = vmul.f32 %v8034_v24, %v7579_v31  ;;  %12753 = vst [vmem:[#allocation79_spill] sm:$0xff] %v8163_v0  ;;  %v8183_v0 = vmul.f32 %v8034_v24, %v7893_v2  ;;  %v8635_v12 = vmul.f32 %v8063_v49, %v8217_v10 }
 0x220   : > { %12767 = vst [vmem:[#allocation89_spill] sm:$0xff] %v8203_v18  ;;  %12773 = vst [vmem:[#allocation93_spill] sm:$0xff] %v8217_v10  ;;  %v12777_v18 = vld [vmem:[#allocation38_spill] sm:$0xff] }
 0x221   : > { %12749 = vst [vmem:[#allocation75_spill] sm:$0xff] %v8147_v15  ;;  %v1569_v15 = vadd.f32 %v1568_v27, %v1284_v58  ;;  %12758 = vst [vmem:[#allocation84_spill] sm:$0xff] %v8183_v0  ;;  %v12761_v58 = vld [vmem:[#allocation39_spill] sm:$0xff]  ;;  %v8207_v0 = vmul.f32 %v8034_v24, %v7987_v5  ;;  %v8227_v7 = vmul.f32 %v8034_v24, %v12777_v18 }
 0x222   : > { %1565 = vadd.xlane.f32.xlu0 %v1564_v11  ;;  %v8187_v11 = vmul.f32 %v8034_v24, %v12759_v34  ;;  %v8191_v27 = vmul.f32 %v8034_v24, %v12761_v58  ;;  %v8219_v59 = vpop.xlane.xlu0 %2638  ;;  %12776 = vst [vmem:[#allocation95_spill] sm:$0xff] %v8223_v51  ;;  %v8243_v51 = vmul.f32 %v8034_v24, %v8046_v4  ;;  %12804 = vst [vmem:[#allocation121_spill] sm:$0xff] %v8327_v52 }
 0x223   : > { %12768 = vst [vmem:[#allocation90_spill] sm:$0xff] %v8207_v0  ;;  %12774 = vst [vmem:[#allocation94_spill] sm:$0xff] %v8219_v59  ;;  %v12779_v0 = vld [vmem:[#allocation40_spill] sm:$0xff]  ;;  %v8351_v52 = vmul.f32 %v8041_v1, %v7804_v14 }
 0x224   : > { %12760 = vst [vmem:[#allocation85_spill] sm:$0xff] %v8187_v11  ;;  %12762 = vst [vmem:[#allocation86_spill] sm:$0xff] %v8191_v27  ;;  %v12769_v11 = vld [vmem:[#allocation33_spill] sm:$0xff]  ;;  %v12771_v27 = vld [vmem:[#allocation34_spill] sm:$0xff]  ;;  %v8231_v56 = vmul.f32 %v8034_v24, %v12779_v0 }
 0x225   : > { %v8211_v38 = vmul.f32 %v8034_v24, %v12769_v11  ;;  %v8215_v57 = vmul.f32 %v8034_v24, %v12771_v27  ;;  %12778 = vst [vmem:[#allocation96_spill] sm:$0xff] %v8227_v7  ;;  %12783 = vst [vmem:[#allocation100_spill] sm:$0xff] %v8243_v51  ;;  %v8247_v7 = vmul.f32 %v8034_v24, %v8217_v10 }
 0x226   : > { %12780 = vst [vmem:[#allocation97_spill] sm:$0xff] %v8231_v56  ;;  %1570 = vadd.xlane.f32.xlu0 %v1569_v15  ;;  %v8251_v56 = vmul.f32 %v8034_v24, %v8219_v59  ;;  %v8259_v15 = vmul.f32 %v8041_v1, %v7531_v40  ;;  %v8267_v51 = vmul.f32 %v8041_v1, %v7535_v17  ;;  %12810 = vst [vmem:[#allocation127_spill] sm:$0xff] %v8351_v52 }
 0x227   : > { %12770 = vst [vmem:[#allocation91_spill] sm:$0xff] %v8211_v38  ;;  %12772 = vst [vmem:[#allocation92_spill] sm:$0xff] %v8215_v57  ;;  %v8235_v38 = vmul.f32 %v8034_v24, %v7989_v50  ;;  %v8239_v57 = vmul.f32 %v8034_v24, %v8044_v37  ;;  %v8375_v52 = vmul.f32 %v8041_v1, %v7893_v2 }
 0x228   : > { %12784 = vst [vmem:[#allocation101_spill] sm:$0xff] %v8247_v7  ;;  %12785 = vst [vmem:[#allocation102_spill] sm:$0xff] %v8251_v56  ;;  %v8271_v7 = vmul.f32 %v8041_v1, %v7539_v33  ;;  %v8275_v56 = vmul.f32 %v8041_v1, %v7547_v20 }
 0x229   : > { %12781 = vst [vmem:[#allocation98_spill] sm:$0xff] %v8235_v38  ;;  %12782 = vst [vmem:[#allocation99_spill] sm:$0xff] %v8239_v57  ;;  %v8255_v38 = vmul.f32 %v8041_v1, %v7523_v42  ;;  %v8263_v57 = vmul.f32 %v8041_v1, %v7533_v62 }
 0x22a   : > { %12787 = vst [vmem:[#allocation104_spill] sm:$0xff] %v8259_v15  ;;  %12789 = vst [vmem:[#allocation106_spill] sm:$0xff] %v8267_v51  ;;  %v8283_v15 = vmul.f32 %v8041_v1, %v7551_v45  ;;  %v8291_v51 = vmul.f32 %v8041_v1, %v7555_v21 }
 0x22b   : > { %12786 = vst [vmem:[#allocation103_spill] sm:$0xff] %v8255_v38  ;;  %12788 = vst [vmem:[#allocation105_spill] sm:$0xff] %v8263_v57  ;;  %v8287_v57 = vmul.f32 %v8041_v1, %v7577_v30  ;;  %v8495_v38 = vpop.xlane.xlu0 %1450 }
 0x22c   : > { %12790 = vst [vmem:[#allocation107_spill] sm:$0xff] %v8271_v7  ;;  %12791 = vst [vmem:[#allocation108_spill] sm:$0xff] %v8275_v56  ;;  %v8295_v7 = vmul.f32 %v8041_v1, %v7598_v61  ;;  %v8299_v56 = vmul.f32 %v8041_v1, %v7559_v22 }
 0x22d   : > { %12793 = vst [vmem:[#allocation110_spill] sm:$0xff] %v8283_v15  ;;  %12794 = vst [vmem:[#allocation111_spill] sm:$0xff] %v8287_v57  ;;  %v8307_v15 = vmul.f32 %v8041_v1, %v7563_v26  ;;  %v8311_v57 = vmul.f32 %v8041_v1, %v7664_v36 }
 0x22e   : > { %12795 = vst [vmem:[#allocation112_spill] sm:$0xff] %v8291_v51  ;;  %12796 = vst [vmem:[#allocation113_spill] sm:$0xff] %v8295_v7  ;;  %v8315_v51 = vmul.f32 %v8041_v1, %v7567_v44  ;;  %v8319_v7 = vmul.f32 %v8041_v1, %v7690_v9 }
 0x22f   : > { %12797 = vst [vmem:[#allocation114_spill] sm:$0xff] %v8299_v56  ;;  %12799 = vst [vmem:[#allocation116_spill] sm:$0xff] %v8307_v15  ;;  %v8323_v56 = vmul.f32 %v8041_v1, %v7571_v25  ;;  %v8331_v15 = vmul.f32 %v8041_v1, %v7575_v29 }
 0x230   : > { %12800 = vst [vmem:[#allocation117_spill] sm:$0xff] %v8311_v57  ;;  %12801 = vst [vmem:[#allocation118_spill] sm:$0xff] %v8315_v51  ;;  %v8335_v57 = vmul.f32 %v8041_v1, %v7747_v19  ;;  %v8339_v51 = vmul.f32 %v8041_v1, %v7579_v31 }
 0x231   : > { %12802 = vst [vmem:[#allocation119_spill] sm:$0xff] %v8319_v7  ;;  %12803 = vst [vmem:[#allocation120_spill] sm:$0xff] %v8323_v56  ;;  %v8343_v7 = vmul.f32 %v8041_v1, %v7781_v3  ;;  %v8347_v56 = vmul.f32 %v8041_v1, %v7600_v63 }
 0x232   : > { %12805 = vst [vmem:[#allocation122_spill] sm:$0xff] %v8331_v15  ;;  %12806 = vst [vmem:[#allocation123_spill] sm:$0xff] %v8335_v57  ;;  %v8355_v15 = vmul.f32 %v8041_v1, %v7632_v35  ;;  %v8359_v57 = vmul.f32 %v8041_v1, %v7837_v23 }
 0x233   : > { %12807 = vst [vmem:[#allocation124_spill] sm:$0xff] %v8339_v51  ;;  %12808 = vst [vmem:[#allocation125_spill] sm:$0xff] %v8343_v7  ;;  %v8363_v51 = vmul.f32 %v8041_v1, %v7666_v39  ;;  %v8367_v7 = vmul.f32 %v8041_v1, %v7863_v13 }
 0x234   : > { %12809 = vst [vmem:[#allocation126_spill] sm:$0xff] %v8347_v56  ;;  %12811 = vst [vmem:[#allocation128_spill] sm:$0xff] %v8355_v15  ;;  %v8371_v56 = vmul.f32 %v8041_v1, %v7692_v60  ;;  %v8379_v15 = vmul.f32 %v8041_v1, %v12759_v34 }
 0x235   : > { %12812 = vst [vmem:[#allocation129_spill] sm:$0xff] %v8359_v57  ;;  %12813 = vst [vmem:[#allocation130_spill] sm:$0xff] %v8363_v51  ;;  %v8383_v57 = vmul.f32 %v8041_v1, %v12761_v58  ;;  %v8387_v51 = vmul.f32 %v8041_v1, %v12763_v53 }
 0x236   : > { %12814 = vst [vmem:[#allocation131_spill] sm:$0xff] %v8367_v7  ;;  %12815 = vst [vmem:[#allocation132_spill] sm:$0xff] %v8371_v56  ;;  %v8391_v7 = vmul.f32 %v8041_v1, %v7965_v6  ;;  %v8395_v56 = vmul.f32 %v8041_v1, %v12766_v16 }
 0x237   : > { %12816 = vst [vmem:[#allocation133_spill] sm:$0xff] %v8375_v52  ;;  %12817 = vst [vmem:[#allocation134_spill] sm:$0xff] %v8379_v15  ;;  %v8399_v52 = vmul.f32 %v8041_v1, %v7987_v5  ;;  %v8403_v15 = vmul.f32 %v8041_v1, %v12769_v11 }
 0x238   : > { %12818 = vst [vmem:[#allocation135_spill] sm:$0xff] %v8383_v57  ;;  %12819 = vst [vmem:[#allocation136_spill] sm:$0xff] %v8387_v51  ;;  %v8407_v57 = vmul.f32 %v8041_v1, %v12771_v27  ;;  %v8411_v51 = vmul.f32 %v8041_v1, %v12775_v54 }
 0x239   : > { %12820 = vst [vmem:[#allocation137_spill] sm:$0xff] %v8391_v7  ;;  %12821 = vst [vmem:[#allocation138_spill] sm:$0xff] %v8395_v56  ;;  %v8415_v7 = vmul.f32 %v8041_v1, %v12777_v18  ;;  %v8419_v56 = vmul.f32 %v8041_v1, %v12779_v0 }
 0x23a   : > { %12822 = vst [vmem:[#allocation139_spill] sm:$0xff] %v8399_v52  ;;  %12823 = vst [vmem:[#allocation140_spill] sm:$0xff] %v8403_v15  ;;  %v8423_v52 = vmul.f32 %v8041_v1, %v7989_v50  ;;  %v8427_v15 = vmul.f32 %v8041_v1, %v8044_v37 }
 0x23b   : > { %12824 = vst [vmem:[#allocation141_spill] sm:$0xff] %v8407_v57  ;;  %12825 = vst [vmem:[#allocation142_spill] sm:$0xff] %v8411_v51  ;;  %v8431_v57 = vmul.f32 %v8041_v1, %v8046_v4  ;;  %v8435_v51 = vmul.f32 %v8041_v1, %v8217_v10 }
 0x23c   : > { %12826 = vst [vmem:[#allocation143_spill] sm:$0xff] %v8415_v7  ;;  %12827 = vst [vmem:[#allocation144_spill] sm:$0xff] %v8419_v56  ;;  %v8439_v7 = vmul.f32 %v8041_v1, %v8219_v59  ;;  %v8443_v56 = vmul.f32 %v8063_v49, %v7523_v42 }
 0x23d   : > { %12828 = vst [vmem:[#allocation145_spill] sm:$0xff] %v8423_v52  ;;  %12829 = vst [vmem:[#allocation146_spill] sm:$0xff] %v8427_v15  ;;  %v8447_v52 = vmul.f32 %v8063_v49, %v7531_v40  ;;  %v8451_v15 = vmul.f32 %v8063_v49, %v7533_v62 }
 0x23e   : > { %12830 = vst [vmem:[#allocation147_spill] sm:$0xff] %v8431_v57  ;;  %12831 = vst [vmem:[#allocation148_spill] sm:$0xff] %v8435_v51  ;;  %v8455_v57 = vmul.f32 %v8063_v49, %v7535_v17  ;;  %v8459_v51 = vmul.f32 %v8063_v49, %v7539_v33 }
 0x23f   : > { %12832 = vst [vmem:[#allocation149_spill] sm:$0xff] %v8439_v7  ;;  %12833 = vst [vmem:[#allocation150_spill] sm:$0xff] %v8443_v56  ;;  %v8463_v7 = vmul.f32 %v8063_v49, %v7547_v20 }
 0x240   : > { %12834 = vst [vmem:[#allocation151_spill] sm:$0xff] %v8447_v52  ;;  %12835 = vst [vmem:[#allocation152_spill] sm:$0xff] %v8451_v15  ;;  %v8471_v52 = vmul.f32 %v8063_v49, %v7551_v45  ;;  %v8475_v15 = vmul.f32 %v8063_v49, %v7577_v30 }
 0x241   : > { %12836 = vst [vmem:[#allocation153_spill] sm:$0xff] %v8455_v57  ;;  %12837 = vst [vmem:[#allocation154_spill] sm:$0xff] %v8459_v51  ;;  %v8477_v57 = vpop.xlane.xlu1 %1445  ;;  %v8481_v51 = vmul.f32 %v8063_v49, %v7555_v21 }
 0x242   : > { %12838 = vst [vmem:[#allocation155_spill] sm:$0xff] %v8463_v7  ;;  %12839 = vst [vmem:[#allocation156_spill] sm:$0xff] %v8467_v55  ;;  %v8485_v7 = vmul.f32 %v8063_v49, %v7598_v61  ;;  %v8489_v55 = vmul.f32 %v8063_v49, %v7559_v22 }
 0x243   : > { %12840 = vst [vmem:[#allocation157_spill] sm:$0xff] %v8471_v52  ;;  %12841 = vst [vmem:[#allocation158_spill] sm:$0xff] %v8475_v15  ;;  %v8493_v52 = vmul.f32 %v8063_v49, %v7630_v32  ;;  %v8611_v15 = vpop.xlane.xlu0 %2648 }
 0x244   : > { %12842 = vst [vmem:[#allocation159_spill] sm:$0xff] %v8477_v57  ;;  %12843 = vst [vmem:[#allocation160_spill] sm:$0xff] %v8481_v51  ;;  %v8499_v57 = vmul.f32 %v8063_v49, %v7563_v26  ;;  %v8503_v51 = vmul.f32 %v8063_v49, %v7664_v36 }
 0x245   : > { %12844 = vst [vmem:[#allocation161_spill] sm:$0xff] %v8485_v7  ;;  %12845 = vst [vmem:[#allocation162_spill] sm:$0xff] %v8489_v55  ;;  %v8507_v7 = vmul.f32 %v8063_v49, %v7567_v44  ;;  %v8511_v55 = vmul.f32 %v8063_v49, %v7690_v9 }
 0x246   : > { %12846 = vst [vmem:[#allocation163_spill] sm:$0xff] %v8493_v52  ;;  %12847 = vst [vmem:[#allocation164_spill] sm:$0xff] %v8495_v38  ;;  %v8515_v52 = vmul.f32 %v8063_v49, %v7571_v25  ;;  %v8519_v38 = vmul.f32 %v8063_v49, %v7725_v48 }
 0x247   : > { %12848 = vst [vmem:[#allocation165_spill] sm:$0xff] %v8499_v57  ;;  %12849 = vst [vmem:[#allocation166_spill] sm:$0xff] %v8503_v51  ;;  %v8523_v57 = vmul.f32 %v8063_v49, %v7575_v29  ;;  %v8527_v51 = vmul.f32 %v8063_v49, %v7747_v19 }
 0x248   : > { %12850 = vst [vmem:[#allocation167_spill] sm:$0xff] %v8507_v7  ;;  %12851 = vst [vmem:[#allocation168_spill] sm:$0xff] %v8511_v55  ;;  %v8531_v7 = vmul.f32 %v8063_v49, %v7579_v31  ;;  %v8535_v55 = vmul.f32 %v8063_v49, %v7781_v3 }
 0x249   : > { %12852 = vst [vmem:[#allocation169_spill] sm:$0xff] %v8515_v52  ;;  %12853 = vst [vmem:[#allocation170_spill] sm:$0xff] %v8519_v38  ;;  %v8539_v52 = vmul.f32 %v8063_v49, %v7600_v63  ;;  %v8543_v38 = vmul.f32 %v8063_v49, %v7804_v14 }
 0x24a   : > { %12854 = vst [vmem:[#allocation171_spill] sm:$0xff] %v8523_v57  ;;  %12855 = vst [vmem:[#allocation172_spill] sm:$0xff] %v8527_v51  ;;  %v8547_v57 = vmul.f32 %v8063_v49, %v7632_v35  ;;  %v8551_v51 = vmul.f32 %v8063_v49, %v7837_v23 }
 0x24b   : > { %12856 = vst [vmem:[#allocation173_spill] sm:$0xff] %v8531_v7  ;;  %12857 = vst [vmem:[#allocation174_spill] sm:$0xff] %v8535_v55  ;;  %v8555_v7 = vmul.f32 %v8063_v49, %v7666_v39  ;;  %v8559_v55 = vmul.f32 %v8063_v49, %v7863_v13 }
 0x24c   : > { %12858 = vst [vmem:[#allocation175_spill] sm:$0xff] %v8539_v52  ;;  %12859 = vst [vmem:[#allocation176_spill] sm:$0xff] %v8543_v38  ;;  %v8563_v52 = vmul.f32 %v8063_v49, %v7692_v60  ;;  %v8567_v38 = vmul.f32 %v8063_v49, %v7893_v2 }
 0x24d   : > { %12860 = vst [vmem:[#allocation177_spill] sm:$0xff] %v8547_v57  ;;  %12861 = vst [vmem:[#allocation178_spill] sm:$0xff] %v8551_v51  ;;  %v8571_v57 = vmul.f32 %v8063_v49, %v12759_v34  ;;  %v8575_v51 = vmul.f32 %v8063_v49, %v12761_v58 }
 0x24e   : > { %12862 = vst [vmem:[#allocation179_spill] sm:$0xff] %v8555_v7  ;;  %12863 = vst [vmem:[#allocation180_spill] sm:$0xff] %v8559_v55  ;;  %v8579_v7 = vmul.f32 %v8063_v49, %v12763_v53  ;;  %v8583_v55 = vmul.f32 %v8063_v49, %v7965_v6 }
 0x24f   : > { %12864 = vst [vmem:[#allocation181_spill] sm:$0xff] %v8563_v52  ;;  %12865 = vst [vmem:[#allocation182_spill] sm:$0xff] %v8567_v38  ;;  %v8587_v52 = vmul.f32 %v8063_v49, %v12766_v16  ;;  %v8591_v38 = vmul.f32 %v8063_v49, %v7987_v5 }
 0x250   : > { %12866 = vst [vmem:[#allocation183_spill] sm:$0xff] %v8571_v57  ;;  %12867 = vst [vmem:[#allocation184_spill] sm:$0xff] %v8575_v51  ;;  %v8593_v57 = vpop.xlane.xlu1 %2643  ;;  %v8597_v51 = vmul.f32 %v8063_v49, %v12769_v11  ;;  %v641_v11 = vld [vmem:[%s12342_s4 + $0x408] sm:$0xff] }
 0x251   : > { %12868 = vst [vmem:[#allocation185_spill] sm:$0xff] %v8579_v7  ;;  %12869 = vst [vmem:[#allocation186_spill] sm:$0xff] %v8583_v55  ;;  %v8601_v7 = vmul.f32 %v8063_v49, %v12771_v27  ;;  %v8605_v55 = vmul.f32 %v8063_v49, %v12775_v54 }
 0x252   : > { %12870 = vst [vmem:[#allocation187_spill] sm:$0xff] %v8587_v52  ;;  %12871 = vst [vmem:[#allocation188_spill] sm:$0xff] %v8591_v38  ;;  %v8609_v52 = vmul.f32 %v8063_v49, %v12777_v18  ;;  %v8615_v38 = vmul.f32 %v8063_v49, %v12779_v0 }
 0x253   : > { %12872 = vst [vmem:[#allocation189_spill] sm:$0xff] %v8593_v57  ;;  %12873 = vst [vmem:[#allocation190_spill] sm:$0xff] %v8597_v51  ;;  %v8619_v51 = vmul.f32 %v8063_v49, %v7989_v50 }
 0x254   : > { %12874 = vst [vmem:[#allocation191_spill] sm:$0xff] %v8601_v7  ;;  %12875 = vst [vmem:[#allocation192_spill] sm:$0xff] %v8605_v55  ;;  %v8623_v7 = vmul.f32 %v8063_v49, %v8044_v37  ;;  %v12881_v55 = vld [vmem:[#allocation27_spill] sm:$0xff] }
 0x255   : > { %12876 = vst [vmem:[#allocation193_spill] sm:$0xff] %v8609_v52  ;;  %12877 = vst [vmem:[#allocation194_spill] sm:$0xff] %v8611_v15  ;;  %v8627_v56 = vrot.slane %v12881_v55, %v6441_v41  ;;  %v8631_v52 = vmul.f32 %v8063_v49, %v8046_v4  ;;  %v8647_v55 = vmul.f32 %v8063_v49, %v8593_v57 }
 0x256   : > { %12878 = vst [vmem:[#allocation195_spill] sm:$0xff] %v8615_v38  ;;  %12879 = vst [vmem:[#allocation196_spill] sm:$0xff] %v8619_v51  ;;  %v8639_v38 = vmul.f32 %v8063_v49, %v8219_v59  ;;  %v8643_v51 = vmul.f32 %v8034_v24, %v8593_v57 }
 0x257   : > { %12880 = vst [vmem:[#allocation197_spill] sm:$0xff] %v8623_v7  ;;  %12882 = vst [vmem:[#allocation27_spill] sm:$0xff] %v8627_v56  ;;  %v8651_v7 = vmul.f32 %v8041_v1, %v8593_v57 }
 0x258   : > { %12883 = vst [vmem:[#allocation198_spill] sm:$0xff] %v8631_v52  ;;  %12884 = vst [vmem:[#allocation199_spill] sm:$0xff] %v8635_v12  ;;  %v8655_v52 = vmul.f32 %v8034_v24, %v8611_v15  ;;  %v8659_v12 = vmul.f32 %v8063_v49, %v8611_v15 }
 0x259   : > { %12885 = vst [vmem:[#allocation200_spill] sm:$0xff] %v8639_v38  ;;  %12886 = vst [vmem:[#allocation201_spill] sm:$0xff] %v8643_v51  ;;  %v8663_v38 = vmul.f32 %v8041_v1, %v8611_v15  ;;  %v12892_v51 = vld [vmem:[#allocation15_spill] sm:$0xff] }
 0x25a   : > { %12887 = vst [vmem:[#allocation202_spill] sm:$0xff] %v8647_v55  ;;  %12888 = vst [vmem:[#allocation203_spill] sm:$0xff] %v8651_v7  ;;  %v8667_v59 = vmul.f32 %v8034_v24, %v12892_v51  ;;  %v8671_v55 = vmul.f32 %v8063_v49, %v12892_v51  ;;  %v8675_v7 = vmul.f32 %v8041_v1, %v12892_v51  ;;  %vm2680_vm4 = vcmp.ge.f32.partialorder %v12892_v51, 0.0 }
 0x25b   : > { %12889 = vst [vmem:[#allocation204_spill] sm:$0xff] %v8655_v52  ;;  %12890 = vst [vmem:[#allocation205_spill] sm:$0xff] %v8659_v12  ;;  %v8679_v52 = vmul.f32 %v8627_v56, %v12892_v51  ;;  %v8683_v12 = vmul.f32 %v8627_v56, %v7523_v42 }
 0x25c   : > { %12891 = vst [vmem:[#allocation206_spill] sm:$0xff] %v8663_v38  ;;  %12893 = vst [vmem:[#allocation15_spill] sm:$0xff] %v8667_v59  ;;  %v12898_v38 = vld [vmem:[#allocation10_spill] sm:$0xff] }
 0x25d   : > { %12894 = vst [vmem:[#allocation207_spill] sm:$0xff] %v8671_v55  ;;  %12895 = vst [vmem:[#allocation208_spill] sm:$0xff] %v8675_v7  ;;  %v8687_v15 = vmul.f32 %v8034_v24, %v12898_v38  ;;  %v8691_v59 = vmul.f32 %v8063_v49, %v12898_v38  ;;  %v8695_v55 = vmul.f32 %v8041_v1, %v12898_v38  ;;  %vm2681_vm5 = vcmp.ge.f32.partialorder %v12898_v38, 0.0 }
 0x25e   : > { %12896 = vst [vmem:[#allocation209_spill] sm:$0xff] %v8679_v52  ;;  %12897 = vst [vmem:[#allocation210_spill] sm:$0xff] %v8683_v12  ;;  %v8699_v7 = vmul.f32 %v8627_v56, %v12898_v38  ;;  %v12903_v52 = vld [vmem:[#allocation17_spill] sm:$0xff] }
 0x25f   : > { %12899 = vst [vmem:[#allocation10_spill] sm:$0xff] %v8687_v15  ;;  %12900 = vst [vmem:[#allocation211_spill] sm:$0xff] %v8691_v59  ;;  %v8703_v57 = vmul.f32 %v8034_v24, %v12903_v52  ;;  %v8707_v12 = vmul.f32 %v8063_v49, %v12903_v52  ;;  %v8711_v15 = vmul.f32 %v8041_v1, %v12903_v52  ;;  %vm2682_vm6 = vcmp.ge.f32.partialorder %v12903_v52, 0.0 }
 0x260   : > { %12901 = vst [vmem:[#allocation212_spill] sm:$0xff] %v8695_v55  ;;  %12902 = vst [vmem:[#allocation213_spill] sm:$0xff] %v8699_v7  ;;  %v8715_v59 = vmul.f32 %v8627_v56, %v12903_v52  ;;  %v12908_v55 = vld [vmem:[#allocation11_spill] sm:$0xff] }
 0x261   : > { %12904 = vst [vmem:[#allocation17_spill] sm:$0xff] %v8703_v57  ;;  %12905 = vst [vmem:[#allocation214_spill] sm:$0xff] %v8707_v12  ;;  %v8719_v10 = vmul.f32 %v8034_v24, %v12908_v55  ;;  %v8723_v7 = vmul.f32 %v8063_v49, %v12908_v55  ;;  %v8727_v57 = vmul.f32 %v8041_v1, %v12908_v55  ;;  %vm2683_vm7 = vcmp.ge.f32.partialorder %v12908_v55, 0.0 }
 0x262   : > { %12906 = vst [vmem:[#allocation215_spill] sm:$0xff] %v8711_v15  ;;  %12907 = vst [vmem:[#allocation216_spill] sm:$0xff] %v8715_v59  ;;  %v8731_v12 = vmul.f32 %v8627_v56, %v12908_v55  ;;  %v12913_v15 = vld [vmem:[#allocation19_spill] sm:$0xff] }
 0x263   : > { %12909 = vst [vmem:[#allocation11_spill] sm:$0xff] %v8719_v10  ;;  %12910 = vst [vmem:[#allocation217_spill] sm:$0xff] %v8723_v7  ;;  %v8735_v4 = vmul.f32 %v8034_v24, %v12913_v15  ;;  %v8739_v59 = vmul.f32 %v8063_v49, %v12913_v15  ;;  %v8743_v10 = vmul.f32 %v8041_v1, %v12913_v15  ;;  %vm2684_vm9 = vcmp.ge.f32.partialorder %v12913_v15, 0.0 }
 0x264   : > { %12911 = vst [vmem:[#allocation218_spill] sm:$0xff] %v8727_v57  ;;  %12912 = vst [vmem:[#allocation219_spill] sm:$0xff] %v8731_v12  ;;  %v8747_v7 = vmul.f32 %v8627_v56, %v12913_v15  ;;  %v8751_v57 = vmul.f32 %v8627_v56, %v7531_v40  ;;  %v12919_v12 = vld [vmem:[#allocation12_spill] sm:$0xff] }
 0x265   : > { %12914 = vst [vmem:[#allocation19_spill] sm:$0xff] %v8735_v4  ;;  %12915 = vst [vmem:[#allocation220_spill] sm:$0xff] %v8739_v59  ;;  %v8755_v37 = vmul.f32 %v8034_v24, %v12919_v12  ;;  %v8759_v4 = vmul.f32 %v8063_v49, %v12919_v12  ;;  %v8763_v59 = vmul.f32 %v8041_v1, %v12919_v12  ;;  %vm2685_vm10 = vcmp.ge.f32.partialorder %v12919_v12, 0.0 }
 0x266   : > { %12916 = vst [vmem:[#allocation221_spill] sm:$0xff] %v8743_v10  ;;  %12917 = vst [vmem:[#allocation222_spill] sm:$0xff] %v8747_v7  ;;  %v8767_v10 = vmul.f32 %v8627_v56, %v12919_v12  ;;  %v8771_v7 = vmul.f32 %v8627_v56, %v7533_v62 }
 0x267   : > { %12918 = vst [vmem:[#allocation223_spill] sm:$0xff] %v8751_v57  ;;  %12920 = vst [vmem:[#allocation12_spill] sm:$0xff] %v8755_v37  ;;  %v12925_v57 = vld [vmem:[#allocation20_spill] sm:$0xff] }
 0x268   : > { %12921 = vst [vmem:[#allocation224_spill] sm:$0xff] %v8759_v4  ;;  %12922 = vst [vmem:[#allocation225_spill] sm:$0xff] %v8763_v59  ;;  %v8775_v50 = vmul.f32 %v8034_v24, %v12925_v57  ;;  %v8779_v37 = vmul.f32 %v8063_v49, %v12925_v57  ;;  %v8783_v4 = vmul.f32 %v8041_v1, %v12925_v57  ;;  %vm2686_vm12 = vcmp.ge.f32.partialorder %v12925_v57, 0.0 }
 0x269   : > { %12923 = vst [vmem:[#allocation226_spill] sm:$0xff] %v8767_v10  ;;  %12924 = vst [vmem:[#allocation227_spill] sm:$0xff] %v8771_v7  ;;  %v8787_v59 = vmul.f32 %v8627_v56, %v12925_v57  ;;  %v8791_v10 = vmul.f32 %v8627_v56, %v7535_v17  ;;  %v12931_v7 = vld [vmem:[#allocation21_spill] sm:$0xff] }
 0x26a   : > { %12926 = vst [vmem:[#allocation20_spill] sm:$0xff] %v8775_v50  ;;  %12927 = vst [vmem:[#allocation228_spill] sm:$0xff] %v8779_v37  ;;  %v8795_v0 = vmul.f32 %v8034_v24, %v12931_v7  ;;  %v8799_v50 = vmul.f32 %v8063_v49, %v12931_v7  ;;  %v8803_v37 = vmul.f32 %v8041_v1, %v12931_v7 }
 0x26b   : > { %12928 = vst [vmem:[#allocation229_spill] sm:$0xff] %v8783_v4  ;;  %12929 = vst [vmem:[#allocation230_spill] sm:$0xff] %v8787_v59  ;;  %v8807_v4 = vmul.f32 %v8627_v56, %v12931_v7  ;;  %v8811_v59 = vmul.f32 %v8627_v56, %v7539_v33 }
 0x26c   : > { %12930 = vst [vmem:[#allocation231_spill] sm:$0xff] %v8791_v10  ;;  %12932 = vst [vmem:[#allocation232_spill] sm:$0xff] %v8795_v0  ;;  %v12937_v10 = vld [vmem:[#allocation22_spill] sm:$0xff] }
 0x26d   : > { %12933 = vst [vmem:[#allocation233_spill] sm:$0xff] %v8799_v50  ;;  %12934 = vst [vmem:[#allocation234_spill] sm:$0xff] %v8803_v37  ;;  %v8815_v18 = vmul.f32 %v8034_v24, %v12937_v10  ;;  %v8819_v0 = vmul.f32 %v8063_v49, %v12937_v10  ;;  %v636_v37 = vld [vmem:[%s12342_s4 + $0x3e0] sm:$0xff]  ;;  %v8832_v50 = vmul.f32 %v8041_v1, %v12937_v10 }
 0x26e   : > { %12935 = vst [vmem:[#allocation235_spill] sm:$0xff] %v8807_v4  ;;  %12936 = vst [vmem:[#allocation236_spill] sm:$0xff] %v8811_v59  ;;  %v637_v4 = vld [vmem:[%s12342_s4 + $0x3e8] sm:$0xff]  ;;  %v640_v59 = vld [vmem:[%s12342_s4 + $0x400] sm:$0xff] }
 0x26f   : > { %12938 = vst [vmem:[#allocation237_spill] sm:$0xff] %v8815_v18  ;;  %12939 = vst [vmem:[#allocation238_spill] sm:$0xff] %v8819_v0  ;;  %v8836_v18 = vmul.f32 %v8627_v56, %v12937_v10  ;;  %v12942_v0 = vld [vmem:[#allocation23_spill] sm:$0xff] }
 0x270   : > { %12940 = vst [vmem:[#allocation239_spill] sm:$0xff] %v8832_v50  ;;  %v8840_v54 = vmul.f32 %v8034_v24, %v12942_v0  ;;  %v8844_v27 = vmul.f32 %v8063_v49, %v12942_v0  ;;  %v644_v50 = vld [vmem:[%s12342_s4 + $0x420] sm:$0xff]  ;;  %v8857_v5 = vmul.f32 %v8041_v1, %v12942_v0 }
 0x271   : > { %12941 = vst [vmem:[#allocation240_spill] sm:$0xff] %v8836_v18  ;;  %v645_v18 = vld [vmem:[%s12342_s4 + $0x428] sm:$0xff] }
 0x272   : > { %12943 = vst [vmem:[#allocation241_spill] sm:$0xff] %v8840_v54  ;;  %12944 = vst [vmem:[#allocation242_spill] sm:$0xff] %v8844_v27  ;;  %v8861_v54 = vmul.f32 %v8627_v56, %v12942_v0  ;;  %v12947_v27 = vld [vmem:[#allocation24_spill] sm:$0xff] }
 0x273   : > { %12945 = vst [vmem:[#allocation243_spill] sm:$0xff] %v8857_v5  ;;  %v8865_v33 = vmul.f32 %v8034_v24, %v12947_v27  ;;  %v8869_v17 = vmul.f32 %v8063_v49, %v12947_v27  ;;  %v8873_v10 = vmul.f32 %v8041_v1, %v12947_v27  ;;  %v8877_v62 = vmul.f32 %v8627_v56, %v12947_v27  ;;  %v12952_v5 = vld [vmem:[#allocation18_spill] sm:$0xff] }
 0x274   : > { %12946 = vst [vmem:[#allocation244_spill] sm:$0xff] %v8861_v54  ;;  %v8881_v0 = vmul.f32 %v8034_v24, %v12952_v5  ;;  %v8885_v54 = vmul.f32 %v8063_v49, %v12952_v5  ;;  %v8891_v7 = vmul.f32 %v8041_v1, %v12952_v5 }
 0x275   : > { %12948 = vst [vmem:[#allocation245_spill] sm:$0xff] %v8865_v33  ;;  %12949 = vst [vmem:[#allocation246_spill] sm:$0xff] %v8869_v17  ;;  %v1285_v33 = vmul.f32 %v6933_v43, %v636_v37  ;;  %v1286_v17 = vmul.f32 %v6935_v46, %v637_v4  ;;  %v1293_v37 = vmul.f32 %v6933_v43, %v644_v50 }
 0x276   : > { %12950 = vst [vmem:[#allocation247_spill] sm:$0xff] %v8873_v10  ;;  %12951 = vst [vmem:[#allocation248_spill] sm:$0xff] %v8877_v62  ;;  %v8895_v10 = vmul.f32 %v8627_v56, %v12952_v5  ;;  %v1289_v62 = vmul.f32 %v6933_v43, %v640_v59  ;;  %v1294_v4 = vmul.f32 %v6935_v46, %v645_v18  ;;  %v12957_v5 = vld [vmem:[#allocation26_spill] sm:$0xff] }
 0x277   : > { %12953 = vst [vmem:[#allocation249_spill] sm:$0xff] %v8881_v0  ;;  %12954 = vst [vmem:[#allocation250_spill] sm:$0xff] %v8885_v54  ;;  %v638_v0 = vld [vmem:[%s12342_s4 + $0x3f0] sm:$0xff]  ;;  %v1290_v54 = vmul.f32 %v6935_v46, %v641_v11  ;;  %v8912_v27 = vmul.f32 %v8034_v24, %v12957_v5  ;;  %v8916_v59 = vmul.f32 %v8063_v49, %v12957_v5 }
 0x278   : > { %12955 = vst [vmem:[#allocation251_spill] sm:$0xff] %v8891_v7  ;;  %12956 = vst [vmem:[#allocation252_spill] sm:$0xff] %v8895_v10  ;;  %v642_v7 = vld [vmem:[%s12342_s4 + $0x410] sm:$0xff]  ;;  %v8920_v50 = vmul.f32 %v8041_v1, %v12957_v5  ;;  %v8924_v18 = vmul.f32 %v8627_v56, %v12957_v5  ;;  %v8928_v11 = vmul.f32 %v8627_v56, %v7547_v20 }
 0x279   : > { %v646_v10 = vld [vmem:[%s12342_s4 + $0x430] sm:$0xff]  ;;  %12958 = vst [vmem:[#allocation26_spill] sm:$0xff] %v8912_v27  ;;  %12959 = vst [vmem:[#allocation253_spill] sm:$0xff] %v8916_v59  ;;  %v8932_v46 = vmul.f32 %v8627_v56, %v7573_v28  ;;  %v8936_v49 = vmul.f32 %v8627_v56, %v7551_v45  ;;  %v8940_v1 = vmul.f32 %v8627_v56, %v7577_v30 }
 0x27a   : > { %12960 = vst [vmem:[#allocation254_spill] sm:$0xff] %v8920_v50  ;;  %12961 = vst [vmem:[#allocation255_spill] sm:$0xff] %v8924_v18  ;;  %v1287_v43 = vmul.f32 %v6958_v8, %v638_v0  ;;  %v1572_v50 = vadd.f32 %v1286_v17, %v1285_v33  ;;  %v8945_v18 = vmul.f32 %v8627_v56, %v7555_v21  ;;  %v643_v17 = vld [vmem:[%s12342_s4 + $0x418] sm:$0xff] }
 0x27b   : > { %12962 = vst [vmem:[#allocation256_spill] sm:$0xff] %v8928_v11  ;;  %12963 = vst [vmem:[#allocation257_spill] sm:$0xff] %v8932_v46  ;;  %v8949_v11 = vmul.f32 %v8627_v56, %v7598_v61  ;;  %v639_v46 = vld [vmem:[%s12342_s4 + $0x3f8] sm:$0xff]  ;;  %v1577_v59 = vadd.f32 %v1290_v54, %v1289_v62  ;;  %v1582_v27 = vadd.f32 %v1294_v4, %v1293_v37 }
 0x27c   : > { %12964 = vst [vmem:[#allocation258_spill] sm:$0xff] %v8936_v49  ;;  %12965 = vst [vmem:[#allocation259_spill] sm:$0xff] %v8940_v1  ;;  %v1291_v49 = vmul.f32 %v6958_v8, %v642_v7  ;;  %v1295_v1 = vmul.f32 %v6958_v8, %v646_v10  ;;  %v647_v33 = vld [vmem:[%s12342_s4 + $0x438] sm:$0xff]  ;;  %v8964_v0 = vmul.f32 %v8627_v56, %v7559_v22 }
 0x27d   : > { %12966 = vst [vmem:[#allocation260_spill] sm:$0xff] %v8945_v18  ;;  %12967 = vst [vmem:[#allocation261_spill] sm:$0xff] %v8949_v11  ;;  %v8968_v11 = vmul.f32 %v8627_v56, %v7630_v32  ;;  %v8972_v62 = vmul.f32 %v8627_v56, %v7563_v26  ;;  %v8976_v7 = vmul.f32 %v8627_v56, %v7664_v36 }
 0x27e   : > { %12968 = vst [vmem:[#allocation262_spill] sm:$0xff] %v8964_v0  ;;  %v8980_v10 = vmul.f32 %v8627_v56, %v7567_v44  ;;  %v8984_v54 = vmul.f32 %v8627_v56, %v7690_v9  ;;  %v8988_v37 = vmul.f32 %v8627_v56, %v7571_v25  ;;  %v8992_v4 = vmul.f32 %v8627_v56, %v7725_v48 }
 0x27f   : > { %12969 = vst [vmem:[#allocation263_spill] sm:$0xff] %v8968_v11  ;;  %12970 = vst [vmem:[#allocation264_spill] sm:$0xff] %v8972_v62  ;;  %v1288_v8 = vmul.f32 %v6979_v47, %v639_v46  ;;  %v1573_v62 = vadd.f32 %v1572_v50, %v1287_v43  ;;  %v1292_v11 = vmul.f32 %v6979_v47, %v643_v17 }
 0x280   : > { %12971 = vst [vmem:[#allocation265_spill] sm:$0xff] %v8976_v7  ;;  %12972 = vst [vmem:[#allocation266_spill] sm:$0xff] %v8980_v10  ;;  %v8997_v7 = vmul.f32 %v8627_v56, %v7575_v29  ;;  %v9001_v10 = vmul.f32 %v8627_v56, %v7747_v19  ;;  %v1578_v0 = vadd.f32 %v1577_v59, %v1291_v49 }
 0x281   : > { %12973 = vst [vmem:[#allocation267_spill] sm:$0xff] %v8984_v54  ;;  %12974 = vst [vmem:[#allocation268_spill] sm:$0xff] %v8988_v37  ;;  %v2678_v54 = vpop.xlane.xlu0 %2677  ;;  %v1296_v37 = vmul.f32 %v6979_v47, %v647_v33  ;;  %v1583_v18 = vadd.f32 %v1582_v27, %v1295_v1  ;;  %v9010_v43 = vmul.f32 %v8627_v56, %v7579_v31  ;;  %v13009_v47 = vld [vmem:[#allocation13_spill] sm:$0xff] }
 0x282   : > { %12975 = vst [vmem:[#allocation269_spill] sm:$0xff] %v8992_v4  ;;  %12976 = vst [vmem:[#allocation270_spill] sm:$0xff] %v8997_v7  ;;  %v9006_v4 = vrot.slane %v2678_v54, %v6441_v41  ;;  %v9014_v46 = vmul.f32 %v8627_v56, %v7781_v3  ;;  %v9018_v50 = vmul.f32 %v8627_v56, %v7600_v63  ;;  %vm2689_vm11 = vcmp.ge.f32.partialorder %v13009_v47, 0.0 }
 0x283   : > { %12977 = vst [vmem:[#allocation271_spill] sm:$0xff] %v9001_v10  ;;  %12979 = vst [vmem:[#allocation273_spill] sm:$0xff] %v9010_v43  ;;  %v9022_v49 = vmul.f32 %v8627_v56, %v7804_v14  ;;  %v9026_v1 = vmul.f32 %v8627_v56, %v7632_v35  ;;  %v9030_v27 = vmul.f32 %v8627_v56, %v7837_v23  ;;  %v13013_v10 = vld [vmem:[#allocation14_spill] sm:$0xff] }
 0x284   : > { %12978 = vst [vmem:[#allocation272_spill] sm:$0xff] %v9006_v4  ;;  %12980 = vst [vmem:[#allocation274_spill] sm:$0xff] %v9014_v46  ;;  %v9034_v59 = vmul.f32 %v8627_v56, %v7666_v39  ;;  %v9036_v17 = vadd.f32 %v1573_v62, %v1288_v8  ;;  %v9040_v33 = vmul.f32 %v8627_v56, %v7863_v13  ;;  %v13011_v46 = vld [vmem:[#allocation22_spill] sm:$0xff]  ;;  %vm2691_vm13 = vcmp.ge.f32.partialorder %v13013_v10, 0.0 }
 0x285   : > { %12981 = vst [vmem:[#allocation275_spill] sm:$0xff] %v9018_v50  ;;  %12982 = vst [vmem:[#allocation276_spill] sm:$0xff] %v9022_v49  ;;  %v9044_v54 = vmul.f32 %v8627_v56, %v7692_v60  ;;  %v9050_v49 = vadd.f32 %v1578_v0, %v1292_v11  ;;  %v9056_v8 = vmul.f32 %v8627_v56, %v12759_v34  ;;  %v9078_v0 = vpop.xlane.xlu1 %1455 }
 0x286   : > { %12983 = vst [vmem:[#allocation277_spill] sm:$0xff] %v9026_v1  ;;  %12984 = vst [vmem:[#allocation278_spill] sm:$0xff] %v9030_v27  ;;  %v9048_v1 = vmul.f32 %v8627_v56, %v7893_v2  ;;  %v9052_v27 = vadd.f32 %v1583_v18, %v1296_v37  ;;  %v9060_v62 = vmul.f32 %v8627_v56, %v12761_v58 }
 0x287   : > { %12985 = vst [vmem:[#allocation279_spill] sm:$0xff] %v9034_v59  ;;  %12986 = vst [vmem:[#allocation280_spill] sm:$0xff] %v9036_v17  ;;  %v9072_v18 = vmul.f32 %v8627_v56, %v7965_v6  ;;  %v9076_v11 = vmul.f32 %v8627_v56, %v12766_v16  ;;  %v9082_v37 = vmul.f32 %v9006_v4, %v12892_v51  ;;  %v13017_v17 = vld [vmem:[#allocation16_spill] sm:$0xff] }
 0x288   : > { %12987 = vst [vmem:[#allocation281_spill] sm:$0xff] %v9040_v33  ;;  %12988 = vst [vmem:[#allocation282_spill] sm:$0xff] %v9044_v54  ;;  %v9064_v33 = vmul.f32 %v9006_v4, %v7523_v42  ;;  %v9068_v54 = vmul.f32 %v8627_v56, %v12763_v53  ;;  %v9098_v56 = vmul.f32 %v9006_v4, %v12913_v15  ;;  %vm2693_vm15 = vcmp.ge.f32.partialorder %v13017_v17, 0.0 }
 0x289   : > { %12989 = vst [vmem:[#allocation283_spill] sm:$0xff] %v9048_v1  ;;  %12990 = vst [vmem:[#allocation284_spill] sm:$0xff] %v9050_v49  ;;  %v13007_v1 = vld [vmem:[#allocation21_spill] sm:$0xff]  ;;  %v9118_v50 = vmul.f32 %v9006_v4, %v13009_v47  ;;  %v9122_v43 = vmul.f32 %v9006_v4, %v13011_v46  ;;  %v9126_v7 = vmul.f32 %v9006_v4, %v13013_v10 }
 0x28a   : > { %12991 = vst [vmem:[#allocation285_spill] sm:$0xff] %v9052_v27  ;;  %12992 = vst [vmem:[#allocation286_spill] sm:$0xff] %v9056_v8  ;;  %v9110_v8 = vmul.f32 %v9006_v4, %v7531_v40  ;;  %v9114_v59 = vmul.f32 %v9006_v4, %v13007_v1  ;;  %v13015_v27 = vld [vmem:[#allocation23_spill] sm:$0xff] }
 0x28b   : > { %12993 = vst [vmem:[#allocation287_spill] sm:$0xff] %v9060_v62  ;;  %12994 = vst [vmem:[#allocation288_spill] sm:$0xff] %v9064_v33  ;;  %v9086_v62 = vmul.f32 %v9006_v4, %v12898_v38  ;;  %v9130_v49 = vmul.f32 %v9006_v4, %v13015_v27  ;;  %v13063_v33 = vld [vmem:[#allocation36_spill] sm:$0xff] }
 0x28c   : > { %12995 = vst [vmem:[#allocation289_spill] sm:$0xff] %v9068_v54  ;;  %12996 = vst [vmem:[#allocation290_spill] sm:$0xff] %v9072_v18  ;;  %v9090_v54 = vmul.f32 %v9006_v4, %v12903_v52  ;;  %v9094_v18 = vmul.f32 %v9006_v4, %v12908_v55 }
 0x28d   : > { %12997 = vst [vmem:[#allocation291_spill] sm:$0xff] %v9076_v11  ;;  %12998 = vst [vmem:[#allocation292_spill] sm:$0xff] %v9078_v0  ;;  %v9102_v0 = vmul.f32 %v9006_v4, %v12919_v12  ;;  %v9106_v11 = vmul.f32 %v9006_v4, %v12925_v57 }
 0x28e   : > { %12999 = vst [vmem:[#allocation293_spill] sm:$0xff] %v9082_v37  ;;  %13000 = vst [vmem:[#allocation294_spill] sm:$0xff] %v9086_v62  ;;  %v13065_v37 = vld [vmem:[#allocation38_spill] sm:$0xff] }
 0x28f   : > { %13001 = vst [vmem:[#allocation295_spill] sm:$0xff] %v9090_v54  ;;  %13002 = vst [vmem:[#allocation296_spill] sm:$0xff] %v9094_v18 }
 0x290   : > { %13003 = vst [vmem:[#allocation297_spill] sm:$0xff] %v9098_v56  ;;  %13004 = vst [vmem:[#allocation298_spill] sm:$0xff] %v9102_v0  ;;  %v9214_v56 = vmul.f32 %v9006_v4, %v7579_v31 }
 0x291   : > { %13005 = vst [vmem:[#allocation299_spill] sm:$0xff] %v9106_v11  ;;  %13006 = vst [vmem:[#allocation300_spill] sm:$0xff] %v9110_v8  ;;  %v9134_v11 = vmul.f32 %v9006_v4, %v13017_v17 }
 0x292   : > { %13008 = vst [vmem:[#allocation301_spill] sm:$0xff] %v9114_v59  ;;  %13010 = vst [vmem:[#allocation13_spill] sm:$0xff] %v9118_v50  ;;  %v13019_v59 = vld [vmem:[#allocation24_spill] sm:$0xff]  ;;  %v13021_v50 = vld [vmem:[#allocation18_spill] sm:$0xff] }
 0x293   : > { %13012 = vst [vmem:[#allocation302_spill] sm:$0xff] %v9122_v43  ;;  %13014 = vst [vmem:[#allocation14_spill] sm:$0xff] %v9126_v7  ;;  %v9138_v0 = vmul.f32 %v9006_v4, %v13019_v59  ;;  %v9142_v8 = vmul.f32 %v9006_v4, %v13021_v50  ;;  %v9146_v43 = vmul.f32 %v9006_v4, %v12957_v5 }
 0x294   : > { %13016 = vst [vmem:[#allocation303_spill] sm:$0xff] %v9130_v49  ;;  %13018 = vst [vmem:[#allocation16_spill] sm:$0xff] %v9134_v11  ;;  %v9150_v7 = vmul.f32 %v9006_v4, %v7547_v20  ;;  %v9154_v49 = vmul.f32 %v9006_v4, %v7573_v28  ;;  %v9158_v11 = vmul.f32 %v9006_v4, %v7551_v45 }
 0x295   : > { %13020 = vst [vmem:[#allocation304_spill] sm:$0xff] %v9138_v0  ;;  %13022 = vst [vmem:[#allocation18_spill] sm:$0xff] %v9142_v8  ;;  %v9162_v0 = vmul.f32 %v9006_v4, %v7577_v30  ;;  %v9166_v8 = vmul.f32 %v9006_v4, %v7555_v21 }
 0x296   : > { %13023 = vst [vmem:[#allocation305_spill] sm:$0xff] %v9146_v43  ;;  %13024 = vst [vmem:[#allocation306_spill] sm:$0xff] %v9150_v7  ;;  %v9170_v43 = vmul.f32 %v9006_v4, %v7598_v61  ;;  %v9174_v7 = vmul.f32 %v9006_v4, %v7559_v22 }
 0x297   : > { %13025 = vst [vmem:[#allocation307_spill] sm:$0xff] %v9154_v49  ;;  %13026 = vst [vmem:[#allocation308_spill] sm:$0xff] %v9158_v11  ;;  %v9178_v49 = vmul.f32 %v9006_v4, %v7630_v32  ;;  %v9182_v11 = vmul.f32 %v9006_v4, %v7563_v26 }
 0x298   : > { %13027 = vst [vmem:[#allocation309_spill] sm:$0xff] %v9162_v0  ;;  %13028 = vst [vmem:[#allocation310_spill] sm:$0xff] %v9166_v8  ;;  %v9186_v0 = vmul.f32 %v9006_v4, %v7664_v36  ;;  %v9190_v8 = vmul.f32 %v9006_v4, %v7567_v44 }
 0x299   : > { %13029 = vst [vmem:[#allocation311_spill] sm:$0xff] %v9170_v43  ;;  %13030 = vst [vmem:[#allocation312_spill] sm:$0xff] %v9174_v7  ;;  %v2669_v43 = vpop.xlane.xlu1 %2668  ;;  %v9194_v7 = vmul.f32 %v9006_v4, %v7690_v9 }
 0x29a   : > { %13031 = vst [vmem:[#allocation313_spill] sm:$0xff] %v9178_v49  ;;  %13032 = vst [vmem:[#allocation314_spill] sm:$0xff] %v9182_v11  ;;  %v9198_v49 = vmul.f32 %v9006_v4, %v7571_v25  ;;  %v9202_v11 = vmul.f32 %v9006_v4, %v7725_v48 }
 0x29b   : > { %13033 = vst [vmem:[#allocation315_spill] sm:$0xff] %v9186_v0  ;;  %13034 = vst [vmem:[#allocation316_spill] sm:$0xff] %v9190_v8  ;;  %v9206_v0 = vmul.f32 %v9006_v4, %v7575_v29  ;;  %v9210_v8 = vmul.f32 %v9006_v4, %v7747_v19 }
 0x29c   : > { %13035 = vst [vmem:[#allocation317_spill] sm:$0xff] %v9194_v7  ;;  %13036 = vst [vmem:[#allocation318_spill] sm:$0xff] %v9198_v49  ;;  %v9218_v7 = vmul.f32 %v9006_v4, %v7781_v3  ;;  %v9222_v49 = vmul.f32 %v9006_v4, %v7600_v63 }
 0x29d   : > { %13037 = vst [vmem:[#allocation319_spill] sm:$0xff] %v9202_v11  ;;  %13038 = vst [vmem:[#allocation320_spill] sm:$0xff] %v9206_v0  ;;  %v9226_v11 = vmul.f32 %v9006_v4, %v7804_v14  ;;  %v9230_v0 = vmul.f32 %v9006_v4, %v7632_v35 }
 0x29e   : > { %13039 = vst [vmem:[#allocation321_spill] sm:$0xff] %v9210_v8  ;;  %13040 = vst [vmem:[#allocation322_spill] sm:$0xff] %v9214_v56  ;;  %v9234_v8 = vmul.f32 %v9006_v4, %v7837_v23  ;;  %v9238_v56 = vmul.f32 %v9006_v4, %v7666_v39 }
 0x29f   : > { %13041 = vst [vmem:[#allocation323_spill] sm:$0xff] %v9218_v7  ;;  %13042 = vst [vmem:[#allocation324_spill] sm:$0xff] %v9222_v49  ;;  %v9242_v7 = vmul.f32 %v9006_v4, %v7863_v13  ;;  %v9246_v49 = vmul.f32 %v9006_v4, %v7692_v60 }
 0x2a0   : > { %13043 = vst [vmem:[#allocation325_spill] sm:$0xff] %v9226_v11  ;;  %13044 = vst [vmem:[#allocation326_spill] sm:$0xff] %v9230_v0  ;;  %v9250_v11 = vmul.f32 %v9006_v4, %v7893_v2  ;;  %v9254_v0 = vmul.f32 %v9006_v4, %v12759_v34 }
 0x2a1   : > { %13045 = vst [vmem:[#allocation327_spill] sm:$0xff] %v9234_v8  ;;  %13046 = vst [vmem:[#allocation328_spill] sm:$0xff] %v9238_v56  ;;  %v9258_v8 = vmul.f32 %v9006_v4, %v12761_v58  ;;  %v9262_v56 = vmul.f32 %v9006_v4, %v12763_v53 }
 0x2a2   : > { %13047 = vst [vmem:[#allocation329_spill] sm:$0xff] %v9242_v7  ;;  %13048 = vst [vmem:[#allocation330_spill] sm:$0xff] %v9246_v49  ;;  %v9266_v7 = vmul.f32 %v9006_v4, %v7965_v6  ;;  %v9270_v49 = vmul.f32 %v9006_v4, %v12766_v16 }
 0x2a3   : > { %13049 = vst [vmem:[#allocation331_spill] sm:$0xff] %v9250_v11  ;;  %13050 = vst [vmem:[#allocation332_spill] sm:$0xff] %v9254_v0  ;;  %v13055_v11 = vld [vmem:[#allocation43_spill] sm:$0xff]  ;;  %v13057_v0 = vld [vmem:[#allocation33_spill] sm:$0xff] }
 0x2a4   : > { %13051 = vst [vmem:[#allocation333_spill] sm:$0xff] %v9258_v8  ;;  %13052 = vst [vmem:[#allocation334_spill] sm:$0xff] %v9262_v56  ;;  %v9274_v18 = vmul.f32 %v9006_v4, %v13055_v11  ;;  %v9278_v54 = vmul.f32 %v9006_v4, %v13057_v0  ;;  %v13059_v8 = vld [vmem:[#allocation34_spill] sm:$0xff]  ;;  %v9285_v56 = vrot.slane %v2669_v43, %v6441_v41  ;;  %v13067_v11 = vld [vmem:[#allocation40_spill] sm:$0xff] }
 0x2a5   : > { %13053 = vst [vmem:[#allocation335_spill] sm:$0xff] %v9266_v7  ;;  %13054 = vst [vmem:[#allocation336_spill] sm:$0xff] %v9270_v49  ;;  %v9282_v62 = vmul.f32 %v9006_v4, %v13059_v8  ;;  %v9287_v7 = vpop.xlane.xlu1 %2653  ;;  %v9291_v49 = vmul.f32 %v9006_v4, %v13063_v33  ;;  %v13069_v0 = vld [vmem:[#allocation44_spill] sm:$0xff]  ;;  %v13071_v41 = vld [vmem:[#allocation49_spill] sm:$0xff] }
 0x2a6   : > { %13056 = vst [vmem:[#allocation337_spill] sm:$0xff] %v9274_v18  ;;  %13058 = vst [vmem:[#allocation338_spill] sm:$0xff] %v9278_v54  ;;  %v9295_v18 = vmul.f32 %v9006_v4, %v13065_v37  ;;  %v9299_v54 = vmul.f32 %v9006_v4, %v13067_v11  ;;  %v9307_v43 = vmul.f32 %v9006_v4, %v13071_v41  ;;  %v13073_v8 = vld [vmem:[#allocation50_spill] sm:$0xff] }
 0x2a7   : > { %13060 = vst [vmem:[#allocation339_spill] sm:$0xff] %v9282_v62  ;;  %13061 = vst [vmem:[#allocation340_spill] sm:$0xff] %v9285_v56  ;;  %v9303_v62 = vmul.f32 %v9006_v4, %v13069_v0  ;;  %v9311_v33 = vmul.f32 %v9006_v4, %v13073_v8 }
 0x2a8   : > { %13062 = vst [vmem:[#allocation341_spill] sm:$0xff] %v9287_v7  ;;  %13064 = vst [vmem:[#allocation342_spill] sm:$0xff] %v9291_v49  ;;  %v13075_v49 = vld [vmem:[#allocation93_spill] sm:$0xff] }
 0x2a9   : > { %13066 = vst [vmem:[#allocation343_spill] sm:$0xff] %v9295_v18  ;;  %13068 = vst [vmem:[#allocation344_spill] sm:$0xff] %v9299_v54  ;;  %v9315_v37 = vmul.f32 %v9006_v4, %v13075_v49  ;;  %v13077_v18 = vld [vmem:[#allocation94_spill] sm:$0xff]  ;;  %v13079_v54 = vld [vmem:[#allocation189_spill] sm:$0xff] }
 0x2aa   : > { %13070 = vst [vmem:[#allocation345_spill] sm:$0xff] %v9303_v62  ;;  %13072 = vst [vmem:[#allocation346_spill] sm:$0xff] %v9307_v43  ;;  %v9319_v11 = vmul.f32 %v9006_v4, %v13077_v18  ;;  %v9323_v0 = vmul.f32 %v9006_v4, %v13079_v54  ;;  %v13081_v62 = vld [vmem:[#allocation194_spill] sm:$0xff]  ;;  %v9331_v43 = vmul.f32 %v9006_v4, %v9287_v7 }
 0x2ab   : > { %13074 = vst [vmem:[#allocation347_spill] sm:$0xff] %v9311_v33  ;;  %13076 = vst [vmem:[#allocation348_spill] sm:$0xff] %v9315_v37  ;;  %v9327_v41 = vmul.f32 %v9006_v4, %v13081_v62  ;;  %v9335_v33 = vmul.f32 %v8034_v24, %v9287_v7  ;;  %v9339_v37 = vmul.f32 %v9285_v56, %v7523_v42 }
 0x2ac   : > { %13078 = vst [vmem:[#allocation349_spill] sm:$0xff] %v9319_v11  ;;  %13080 = vst [vmem:[#allocation350_spill] sm:$0xff] %v9323_v0  ;;  %v9343_v11 = vmul.f32 %v9285_v56, %v12892_v51  ;;  %v9347_v0 = vmul.f32 %v9285_v56, %v12898_v38  ;;  %v9363_v24 = vmul.f32 %v9285_v56, %v12919_v12  ;;  %v13152_v51 = vld [vmem:[#allocation51_spill] sm:$0xff] }
 0x2ad   : > { %13082 = vst [vmem:[#allocation351_spill] sm:$0xff] %v9327_v41  ;;  %13083 = vst [vmem:[#allocation352_spill] sm:$0xff] %v9331_v43  ;;  %v9351_v41 = vmul.f32 %v9285_v56, %v12903_v52  ;;  %v9355_v43 = vmul.f32 %v9285_v56, %v12908_v55  ;;  %v9367_v4 = vmul.f32 %v9285_v56, %v12925_v57 }
 0x2ae   : > { %13084 = vst [vmem:[#allocation353_spill] sm:$0xff] %v9335_v33  ;;  %v9359_v33 = vmul.f32 %v9285_v56, %v12913_v15  ;;  %13087 = vst [vmem:[#allocation356_spill] sm:$0xff] %v9363_v24  ;;  %v9371_v7 = vmul.f32 %v9285_v56, %v7531_v40  ;;  %v9375_v62 = vmul.f32 %v9285_v56, %v13007_v1  ;;  %v13177_v15 = vld [vmem:[#allocation222_spill] sm:$0xff] }
 0x2af   : > { %13085 = vst [vmem:[#allocation354_spill] sm:$0xff] %v9355_v43  ;;  %13088 = vst [vmem:[#allocation357_spill] sm:$0xff] %v9367_v4  ;;  %v9379_v43 = vmul.f32 %v9285_v56, %v13009_v47  ;;  %v9387_v24 = vmul.f32 %v9285_v56, %v13013_v10  ;;  %v9391_v4 = vmul.f32 %v9285_v56, %v13015_v27 }
 0x2b0   : > { %13086 = vst [vmem:[#allocation355_spill] sm:$0xff] %v9359_v33  ;;  %13089 = vst [vmem:[#allocation358_spill] sm:$0xff] %v9375_v62  ;;  %v9383_v33 = vmul.f32 %v9285_v56, %v13011_v46  ;;  %v9395_v1 = vmul.f32 %v9285_v56, %v13017_v17  ;;  %v9399_v62 = vmul.f32 %v9285_v56, %v13019_v59 }
 0x2b1   : > { %13091 = vst [vmem:[#allocation360_spill] sm:$0xff] %v9391_v4  ;;  %v9403_v46 = vmul.f32 %v9285_v56, %v13021_v50  ;;  %v9411_v27 = vmul.f32 %v9285_v56, %v7547_v20  ;;  %v9415_v4 = vmul.f32 %v9285_v56, %v7573_v28  ;;  %v9419_v59 = vmul.f32 %v9285_v56, %v7551_v45 }
 0x2b2   : > { %13090 = vst [vmem:[#allocation359_spill] sm:$0xff] %v9383_v33  ;;  %13092 = vst [vmem:[#allocation361_spill] sm:$0xff] %v9399_v62  ;;  %v9407_v33 = vmul.f32 %v9285_v56, %v12957_v5  ;;  %v9423_v62 = vmul.f32 %v9285_v56, %v7577_v30 }
 0x2b3   : > { %13093 = vst [vmem:[#allocation362_spill] sm:$0xff] %v9403_v46  ;;  %13095 = vst [vmem:[#allocation364_spill] sm:$0xff] %v9415_v4  ;;  %v9427_v46 = vmul.f32 %v9285_v56, %v7555_v21  ;;  %v9436_v4 = vmul.f32 %v9285_v56, %v7559_v22 }
 0x2b4   : > { %13094 = vst [vmem:[#allocation363_spill] sm:$0xff] %v9407_v33  ;;  %13096 = vst [vmem:[#allocation365_spill] sm:$0xff] %v9419_v59  ;;  %v9431_v33 = vmul.f32 %v9285_v56, %v7598_v61  ;;  %v9440_v59 = vmul.f32 %v9285_v56, %v7630_v32 }
 0x2b5   : > { %13097 = vst [vmem:[#allocation366_spill] sm:$0xff] %v9423_v62  ;;  %13098 = vst [vmem:[#allocation367_spill] sm:$0xff] %v9427_v46  ;;  %v9444_v62 = vmul.f32 %v9285_v56, %v7563_v26  ;;  %v9448_v46 = vmul.f32 %v9285_v56, %v7664_v36 }
 0x2b6   : > { %13099 = vst [vmem:[#allocation368_spill] sm:$0xff] %v9431_v33  ;;  %13100 = vst [vmem:[#allocation369_spill] sm:$0xff] %v9436_v4  ;;  %v9454_v33 = vmul.f32 %v9285_v56, %v7567_v44  ;;  %v9458_v4 = vmul.f32 %v9285_v56, %v7690_v9  ;;  %v9474_v44 = vmul.f32 %v9285_v56, %v7747_v19 }
 0x2b7   : > { %13101 = vst [vmem:[#allocation370_spill] sm:$0xff] %v9440_v59  ;;  %13102 = vst [vmem:[#allocation371_spill] sm:$0xff] %v9444_v62  ;;  %v9462_v59 = vmul.f32 %v9285_v56, %v7571_v25  ;;  %v9466_v62 = vmul.f32 %v9285_v56, %v7725_v48 }
 0x2b8   : > { %13103 = vst [vmem:[#allocation372_spill] sm:$0xff] %v9448_v46  ;;  %13104 = vst [vmem:[#allocation373_spill] sm:$0xff] %v9454_v33  ;;  %v9470_v46 = vmul.f32 %v9285_v56, %v7575_v29  ;;  %v9478_v33 = vmul.f32 %v9285_v56, %v7579_v31 }
 0x2b9   : > { %13105 = vst [vmem:[#allocation374_spill] sm:$0xff] %v9458_v4  ;;  %13106 = vst [vmem:[#allocation375_spill] sm:$0xff] %v9462_v59  ;;  %v9482_v4 = vmul.f32 %v9285_v56, %v7781_v3  ;;  %v9486_v59 = vmul.f32 %v9285_v56, %v7600_v63 }
 0x2ba   : > { %13107 = vst [vmem:[#allocation376_spill] sm:$0xff] %v9466_v62  ;;  %13108 = vst [vmem:[#allocation377_spill] sm:$0xff] %v9470_v46  ;;  %v9490_v62 = vmul.f32 %v9285_v56, %v7804_v14  ;;  %v9494_v46 = vmul.f32 %v9285_v56, %v7632_v35 }
 0x2bb   : > { %13109 = vst [vmem:[#allocation378_spill] sm:$0xff] %v9474_v44  ;;  %13110 = vst [vmem:[#allocation379_spill] sm:$0xff] %v9478_v33  ;;  %v9498_v44 = vmul.f32 %v9285_v56, %v7837_v23  ;;  %v9502_v33 = vmul.f32 %v9285_v56, %v7666_v39 }
 0x2bc   : > { %13111 = vst [vmem:[#allocation380_spill] sm:$0xff] %v9482_v4  ;;  %13112 = vst [vmem:[#allocation381_spill] sm:$0xff] %v9486_v59  ;;  %v9506_v4 = vmul.f32 %v9285_v56, %v7863_v13  ;;  %v9510_v59 = vmul.f32 %v9285_v56, %v7692_v60  ;;  %v13157_v13 = vld [vmem:[#allocation211_spill] sm:$0xff] }
 0x2bd   : > { %13113 = vst [vmem:[#allocation382_spill] sm:$0xff] %v9490_v62  ;;  %13114 = vst [vmem:[#allocation383_spill] sm:$0xff] %v9494_v46  ;;  %v9514_v62 = vmul.f32 %v9285_v56, %v7893_v2  ;;  %v9518_v46 = vmul.f32 %v9285_v56, %v12759_v34  ;;  %v9534_v2 = vmul.f32 %v9285_v56, %v12766_v16 }
 0x2be   : > { %13115 = vst [vmem:[#allocation384_spill] sm:$0xff] %v9498_v44  ;;  %13116 = vst [vmem:[#allocation385_spill] sm:$0xff] %v9502_v33  ;;  %v9522_v44 = vmul.f32 %v9285_v56, %v12761_v58  ;;  %v9526_v33 = vmul.f32 %v9285_v56, %v12763_v53 }
 0x2bf   : > { %13117 = vst [vmem:[#allocation386_spill] sm:$0xff] %v9506_v4  ;;  %13118 = vst [vmem:[#allocation387_spill] sm:$0xff] %v9510_v59  ;;  %v9530_v4 = vmul.f32 %v9285_v56, %v7965_v6 }
 0x2c0   : > { %13119 = vst [vmem:[#allocation388_spill] sm:$0xff] %v9514_v62  ;;  %13120 = vst [vmem:[#allocation389_spill] sm:$0xff] %v9518_v46  ;;  %v13125_v62 = vld [vmem:[#allocation43_spill] sm:$0xff]  ;;  %v13127_v46 = vld [vmem:[#allocation33_spill] sm:$0xff] }
 0x2c1   : > { %13121 = vst [vmem:[#allocation390_spill] sm:$0xff] %v9522_v44  ;;  %13122 = vst [vmem:[#allocation391_spill] sm:$0xff] %v9526_v33  ;;  %v9538_v34 = vmul.f32 %v9285_v56, %v13125_v62  ;;  %v9542_v58 = vmul.f32 %v9285_v56, %v13127_v46  ;;  %v13129_v44 = vld [vmem:[#allocation34_spill] sm:$0xff]  ;;  %v13131_v33 = vld [vmem:[#allocation36_spill] sm:$0xff] }
 0x2c2   : > { %13123 = vst [vmem:[#allocation392_spill] sm:$0xff] %v9530_v4  ;;  %13124 = vst [vmem:[#allocation393_spill] sm:$0xff] %v9534_v2  ;;  %v9546_v53 = vmul.f32 %v9285_v56, %v13129_v44  ;;  %v9550_v6 = vmul.f32 %v9285_v56, %v13131_v33  ;;  %v13133_v4 = vld [vmem:[#allocation38_spill] sm:$0xff]  ;;  %v13135_v2 = vld [vmem:[#allocation40_spill] sm:$0xff] }
 0x2c3   : > { %13126 = vst [vmem:[#allocation394_spill] sm:$0xff] %v9538_v34  ;;  %13128 = vst [vmem:[#allocation395_spill] sm:$0xff] %v9542_v58  ;;  %v9554_v16 = vmul.f32 %v9285_v56, %v13133_v4  ;;  %v9558_v62 = vmul.f32 %v9285_v56, %v13135_v2  ;;  %v13137_v34 = vld [vmem:[#allocation44_spill] sm:$0xff]  ;;  %v13151_v2 = vld [vmem:[#allocation209_spill] sm:$0xff] }
 0x2c4   : > { %13130 = vst [vmem:[#allocation396_spill] sm:$0xff] %v9546_v53  ;;  %13132 = vst [vmem:[#allocation397_spill] sm:$0xff] %v9550_v6  ;;  %v9562_v46 = vmul.f32 %v9285_v56, %v13137_v34  ;;  %v13139_v53 = vld [vmem:[#allocation49_spill] sm:$0xff]  ;;  %v9572_v6 = vmul.f32 %v9285_v56, %v13073_v8  ;;  %v9580_v34 = vmul.f32 %v9285_v56, %v13077_v18  ;;  %v13149_v8 = vld [vmem:[#allocation207_spill] sm:$0xff] }
 0x2c5   : > { %13134 = vst [vmem:[#allocation398_spill] sm:$0xff] %v9554_v16  ;;  %13136 = vst [vmem:[#allocation399_spill] sm:$0xff] %v9558_v62  ;;  %v9568_v33 = vmul.f32 %v9285_v56, %v13139_v53  ;;  %v9576_v16 = vmul.f32 %v9285_v56, %v13075_v49  ;;  %v13145_v62 = vld [vmem:[#allocation293_spill] sm:$0xff]  ;;  %v13146_v53 = vld [vmem:[#allocation288_spill] sm:$0xff] }
 0x2c6   : > { %13138 = vst [vmem:[#allocation400_spill] sm:$0xff] %v9562_v46  ;;  %13141 = vst [vmem:[#allocation402_spill] sm:$0xff] %v9572_v6  ;;  %v9584_v46 = vmul.f32 %v9285_v56, %v13079_v54  ;;  %v2879_v6 = vsel %vm2679_vm3, %v9339_v37, %v13146_v53  ;;  %v13147_v49 = vld [vmem:[#allocation294_spill] sm:$0xff]  ;;  %v13154_v44 = vld [vmem:[#allocation103_spill] sm:$0xff]  ;;  %vm2695_vm3 = vcmp.ge.f32.partialorder %v13021_v50, 0.0 }
 0x2c7   : > { %13140 = vst [vmem:[#allocation401_spill] sm:$0xff] %v9568_v33  ;;  %13142 = vst [vmem:[#allocation403_spill] sm:$0xff] %v9576_v16  ;;  %v2880_v33 = vsel %vm2680_vm4, %v9343_v11, %v13145_v62  ;;  %v2881_v16 = vsel %vm2681_vm5, %v9347_v0, %v13147_v49  ;;  %v3215_v62 = vsub.f32 %v13152_v51, %v2879_v6  ;;  %v13153_v11 = vld [vmem:[#allocation150_spill] sm:$0xff]  ;;  %vm2696_vm4 = vcmp.ge.f32.partialorder %v12957_v5, 0.0  ;;  %v13289_v5 = vld [vmem:[#allocation253_spill] sm:$0xff] }
 0x2c8   : > { %13143 = vst [vmem:[#allocation404_spill] sm:$0xff] %v9580_v34  ;;  %13144 = vst [vmem:[#allocation405_spill] sm:$0xff] %v9584_v46  ;;  %v13148_v34 = vld [vmem:[#allocation15_spill] sm:$0xff]  ;;  %v3220_v56 = vsub.f32 %v13149_v8, %v2880_v33  ;;  %v13150_v46 = vld [vmem:[#allocation208_spill] sm:$0xff]  ;;  %v3222_v4 = vsub.f32 %v13151_v2, %v2880_v33  ;;  %v3216_v58 = vsub.f32 %v13153_v11, %v2879_v6  ;;  %vm2697_vm5 = vcmp.ge.f32.partialorder %v7547_v20, 0.0 }
 0x2c9   : > { %v3219_v18 = vsub.f32 %v13148_v34, %v2880_v33  ;;  %v3221_v54 = vsub.f32 %v13150_v46, %v2880_v33  ;;  %v3217_v42 = vsub.f32 %v13154_v44, %v2879_v6  ;;  %v13155_v53 = vld [vmem:[#allocation210_spill] sm:$0xff]  ;;  %v3471_v8 = vmul.f32 1.442695, %v3215_v62  ;;  %v13158_v44 = vld [vmem:[#allocation212_spill] sm:$0xff]  ;;  %v13297_v20 = vld [vmem:[#allocation155_spill] sm:$0xff] }
 0x2ca   : > { %v3218_v37 = vsub.f32 %v13155_v53, %v2879_v6  ;;  %v3481_v60 = vmul.f32 1.442695, %v3220_v56  ;;  %v13156_v49 = vld [vmem:[#allocation10_spill] sm:$0xff]  ;;  %v3485_v34 = vmul.f32 1.442695, %v3222_v4  ;;  %v3224_v2 = vsub.f32 %v13157_v13, %v2881_v16  ;;  %v13159_v6 = vld [vmem:[#allocation213_spill] sm:$0xff] }
 0x2cb   : > { %v3479_v59 = vmul.f32 1.442695, %v3219_v18  ;;  %v3483_v38 = vmul.f32 1.442695, %v3221_v54  ;;  %v3223_v0 = vsub.f32 %v13156_v49, %v2881_v16  ;;  %v3473_v46 = vmul.f32 1.442695, %v3216_v58 }
 0x2cc   : > { %v3475_v33 = vmul.f32 1.442695, %v3217_v42  ;;  %v3477_v51 = vmul.f32 1.442695, %v3218_v37  ;;  %v3225_v11 = vsub.f32 %v13158_v44, %v2881_v16  ;;  %v3226_v56 = vsub.f32 %v13159_v6, %v2881_v16  ;;  %v13160_v49 = vld [vmem:[#allocation295_spill] sm:$0xff]  ;;  %v13161_v13 = vld [vmem:[#allocation296_spill] sm:$0xff] }
 0x2cd   : > { %5427 = vpow2.f32 %v3479_v59  ;;  %v3487_v54 = vmul.f32 1.442695, %v3223_v0  ;;  %v3489_v18 = vmul.f32 1.442695, %v3224_v2  ;;  %v2882_v58 = vsel %vm2682_vm6, %v9351_v41, %v13160_v49  ;;  %v13162_v4 = vld [vmem:[#allocation354_spill] sm:$0xff]  ;;  %v13163_v42 = vld [vmem:[#allocation17_spill] sm:$0xff] }
 0x2ce   : > { %5429 = vpow2.f32 %v3481_v60  ;;  %v3491_v53 = vmul.f32 1.442695, %v3225_v11  ;;  %v2883_v59 = vsel %vm2683_vm7, %v13162_v4, %v13161_v13  ;;  %v3493_v62 = vmul.f32 1.442695, %v3226_v56  ;;  %v13164_v37 = vld [vmem:[#allocation214_spill] sm:$0xff]  ;;  %v13165_v0 = vld [vmem:[#allocation215_spill] sm:$0xff] }
 0x2cf   : > { %5431 = vpow2.f32 %v3483_v38  ;;  %v3227_v60 = vsub.f32 %v13163_v42, %v2882_v58  ;;  %v3228_v16 = vsub.f32 %v13164_v37, %v2882_v58  ;;  %v3229_v38 = vsub.f32 %v13165_v0, %v2882_v58  ;;  %v13166_v2 = vld [vmem:[#allocation216_spill] sm:$0xff]  ;;  %v13167_v11 = vld [vmem:[#allocation11_spill] sm:$0xff]  ;;  %v13168_v49 = vld [vmem:[#allocation217_spill] sm:$0xff] }
 0x2d0   : > { %5433 = vpow2.f32 %v3485_v34  ;;  %v3230_v44 = vsub.f32 %v13166_v2, %v2882_v58  ;;  %v3231_v6 = vsub.f32 %v13167_v11, %v2883_v59  ;;  %v3232_v39 = vsub.f32 %v13168_v49, %v2883_v59  ;;  %v13169_v56 = vld [vmem:[#allocation218_spill] sm:$0xff]  ;;  %v13171_v0 = vld [vmem:[#allocation297_spill] sm:$0xff]  ;;  %v13175_v2 = vld [vmem:[#allocation220_spill] sm:$0xff] }
 0x2d1   : > { %5435 = vpow2.f32 %v3471_v8  ;;  %v3495_v52 = vmul.f32 1.442695, %v3227_v60  ;;  %v3497_v41 = vmul.f32 1.442695, %v3228_v16  ;;  %v3499_v55 = vmul.f32 1.442695, %v3229_v38 }
 0x2d2   : > { %5437 = vpow2.f32 %v3473_v46  ;;  %v3501_v34 = vmul.f32 1.442695, %v3230_v44  ;;  %v3233_v13 = vsub.f32 %v13169_v56, %v2883_v59  ;;  %v13170_v8 = vld [vmem:[#allocation219_spill] sm:$0xff]  ;;  %v3503_v42 = vmul.f32 1.442695, %v3231_v6  ;;  %v13173_v16 = vld [vmem:[#allocation300_spill] sm:$0xff] }
 0x2d3   : > { %5439 = vpow2.f32 %v3475_v33  ;;  %v3234_v4 = vsub.f32 %v13170_v8, %v2883_v59  ;;  %v3505_v37 = vmul.f32 1.442695, %v3232_v39  ;;  %v13172_v46 = vld [vmem:[#allocation355_spill] sm:$0xff]  ;;  %v2887_v33 = vsel %vm2687_vm8, %v9371_v7, %v13173_v16  ;;  %v13176_v44 = vld [vmem:[#allocation221_spill] sm:$0xff]  ;;  %v13178_v49 = vld [vmem:[#allocation52_spill] sm:$0xff] }
 0x2d4   : > { %5441 = vpow2.f32 %v3477_v51  ;;  %v3507_v58 = vmul.f32 1.442695, %v3233_v13  ;;  %v2884_v60 = vsel %vm2684_vm9, %v13172_v46, %v13171_v0  ;;  %v13174_v38 = vld [vmem:[#allocation19_spill] sm:$0xff]  ;;  %v3247_v56 = vsub.f32 %v13178_v49, %v2887_v33  ;;  %v13183_v49 = vld [vmem:[#allocation298_spill] sm:$0xff] }
 0x2d5   : > { %5443 = vpow2.f32 %v3487_v54  ;;  %v3509_v51 = vmul.f32 1.442695, %v3234_v4  ;;  %v3235_v59 = vsub.f32 %v13174_v38, %v2884_v60  ;;  %v3236_v39 = vsub.f32 %v13175_v2, %v2884_v60  ;;  %v13181_v2 = vld [vmem:[#allocation223_spill] sm:$0xff]  ;;  %v13280_v50 = vld [vmem:[#allocation250_spill] sm:$0xff] }
 0x2d6   : > { %5445 = vpow2.f32 %v3489_v18  ;;  %v3237_v11 = vsub.f32 %v13176_v44, %v2884_v60  ;;  %v3238_v6 = vsub.f32 %v13177_v15, %v2884_v60  ;;  %v13179_v18 = vld [vmem:[#allocation151_spill] sm:$0xff]  ;;  %v13180_v60 = vld [vmem:[#allocation104_spill] sm:$0xff]  ;;  %v3250_v44 = vsub.f32 %v13181_v2, %v2887_v33 }
 0x2d7   : > { %v9640_v54 = vpop.eup %5427  ;;  %5447 = vpow2.f32 %v3491_v53  ;;  %v3511_v40 = vmul.f32 1.442695, %v3235_v59  ;;  %v3513_v7 = vmul.f32 1.442695, %v3236_v39  ;;  %v3248_v8 = vsub.f32 %v13179_v18, %v2887_v33 }
 0x2d8   : > { %v9645_v13 = vpop.eup %5429  ;;  %5449 = vpow2.f32 %v3493_v62  ;;  %v3515_v53 = vmul.f32 1.442695, %v3237_v11  ;;  %v3517_v46 = vmul.f32 1.442695, %v3238_v6  ;;  %v3249_v38 = vsub.f32 %v13180_v60, %v2887_v33  ;;  %v13186_v33 = vld [vmem:[#allocation12_spill] sm:$0xff] }
 0x2d9   : > { %v9648_v4 = vpop.eup %5431  ;;  %v3988_v0 = vadd.f32 %v9645_v13, %v9640_v54  ;;  %5451 = vpow2.f32 %v3495_v52  ;;  %v3535_v62 = vmul.f32 1.442695, %v3247_v56  ;;  %v3537_v15 = vmul.f32 1.442695, %v3248_v8  ;;  %v13184_v52 = vld [vmem:[#allocation356_spill] sm:$0xff] }
 0x2da   : > { %v9652_v16 = vpop.eup %5433  ;;  %5453 = vpow2.f32 %v3497_v41  ;;  %v2885_v11 = vsel %vm2685_vm10, %v13184_v52, %v13183_v49  ;;  %v3539_v41 = vmul.f32 1.442695, %v3249_v38  ;;  %v9666_v18 = vmul.f32 1.442695, %v3250_v44  ;;  %v13188_v8 = vld [vmem:[#allocation224_spill] sm:$0xff]  ;;  %v13191_v44 = vld [vmem:[#allocation226_spill] sm:$0xff] }
 0x2db   : > { %v9657_v59 = vpop.eup %5435  ;;  %v3989_v39 = vadd.f32 %v9648_v4, %v3988_v0  ;;  %5455 = vpow2.f32 %v3499_v55  ;;  %v3239_v56 = vsub.f32 %v13186_v33, %v2885_v11  ;;  %v3240_v0 = vsub.f32 %v13188_v8, %v2885_v11 }
 0x2dc   : > { %13182 = vst [vmem:[#allocation293_spill] sm:$0xff] %v9657_v59  ;;  %v9664_v6 = vpop.eup %5437  ;;  %5457 = vpow2.f32 %v3501_v34  ;;  %v13190_v34 = vld [vmem:[#allocation225_spill] sm:$0xff]  ;;  %v3242_v49 = vsub.f32 %v13191_v44, %v2885_v11  ;;  %vm2698_vm6 = vcmp.ge.f32.partialorder %v7573_v28, 0.0  ;;  %vm2699_vm7 = vcmp.ge.f32.partialorder %v7551_v45, 0.0  ;;  %v13307_v28 = vld [vmem:[#allocation156_spill] sm:$0xff] }
 0x2dd   : > { %13185 = vst [vmem:[#allocation288_spill] sm:$0xff] %v9664_v6  ;;  %v9669_v60 = vpop.eup %5439  ;;  %v3990_v2 = vadd.f32 %v9652_v16, %v3989_v39  ;;  %v3983_v55 = vadd.f32 %v9664_v6, %v9657_v59  ;;  %5459 = vpow2.f32 %v3503_v42  ;;  %v3241_v38 = vsub.f32 %v13190_v34, %v2885_v11  ;;  %v13193_v42 = vld [vmem:[#allocation13_spill] sm:$0xff] }
 0x2de   : > { %13187 = vst [vmem:[#allocation294_spill] sm:$0xff] %v9669_v60  ;;  %v9675_v12 = vpop.eup %5441  ;;  %5461 = vpow2.f32 %v3505_v37  ;;  %v3519_v52 = vmul.f32 1.442695, %v3239_v56  ;;  %v3521_v6 = vmul.f32 1.442695, %v3240_v0  ;;  %v2889_v8 = vsel %vm2689_vm11, %v9379_v43, %v13193_v42  ;;  %v13195_v11 = vld [vmem:[#allocation53_spill] sm:$0xff] }
 0x2df   : > { %13189 = vst [vmem:[#allocation15_spill] sm:$0xff] %v9675_v12  ;;  %v9680_v33 = vpop.eup %5443  ;;  %3991 = vadd.xlane.f32.xlu1 %v3990_v2  ;;  %v3984_v39 = vadd.f32 %v9669_v60, %v3983_v55  ;;  %5463 = vpow2.f32 %v3507_v58  ;;  %v9689_v37 = vmul.f32 1.442695, %v3241_v38  ;;  %v9691_v34 = vmul.f32 1.442695, %v3242_v49  ;;  %v13196_v55 = vld [vmem:[#allocation152_spill] sm:$0xff] }
 0x2e0   : > { %13192 = vst [vmem:[#allocation207_spill] sm:$0xff] %v9680_v33  ;;  %v9687_v59 = vpop.eup %5445  ;;  %5465 = vpow2.f32 %v3509_v51  ;;  %v3255_v56 = vsub.f32 %v13195_v11, %v2889_v8  ;;  %v3256_v47 = vsub.f32 %v13196_v55, %v2889_v8  ;;  %v13197_v51 = vld [vmem:[#allocation105_spill] sm:$0xff]  ;;  %v13198_v38 = vld [vmem:[#allocation227_spill] sm:$0xff]  ;;  %vm2700_vm8 = vcmp.ge.f32.partialorder %v7577_v30, 0.0  ;;  %v13325_v30 = vld [vmem:[#allocation158_spill] sm:$0xff] }
 0x2e1   : > { %13194 = vst [vmem:[#allocation208_spill] sm:$0xff] %v9687_v59  ;;  %v9694_v44 = vpop.eup %5447  ;;  %v3985_v2 = vadd.f32 %v9675_v12, %v3984_v39  ;;  %v3993_v58 = vadd.f32 %v9687_v59, %v9680_v33  ;;  %5467 = vpow2.f32 %v3511_v40  ;;  %v3257_v0 = vsub.f32 %v13197_v51, %v2889_v8  ;;  %v13199_v11 = vld [vmem:[#allocation21_spill] sm:$0xff]  ;;  %v13201_v59 = vld [vmem:[#allocation299_spill] sm:$0xff]  ;;  %v13204_v51 = vld [vmem:[#allocation20_spill] sm:$0xff] }
 0x2e2   : > { %v9700_v43 = vpop.eup %5449  ;;  %5469 = vpow2.f32 %v3513_v7  ;;  %v3258_v49 = vsub.f32 %v13198_v38, %v2889_v8  ;;  %v9704_v42 = vmul.f32 1.442695, %v3255_v56  ;;  %vm2688_vm14 = vcmp.ge.f32.partialorder %v13199_v11, 0.0  ;;  %v13202_v55 = vld [vmem:[#allocation357_spill] sm:$0xff] }
 0x2e3   : > { %v9707_v60 = vpop.eup %5451  ;;  %3986 = vadd.xlane.f32.xlu0 %v3985_v2  ;;  %v3994_v39 = vadd.f32 %v9694_v44, %v3993_v58  ;;  %5471 = vpow2.f32 %v3515_v53  ;;  %v3553_v40 = vmul.f32 1.442695, %v3256_v47  ;;  %v2886_v7 = vsel %vm2686_vm12, %v13202_v55, %v13201_v59  ;;  %v13206_v58 = vld [vmem:[#allocation228_spill] sm:$0xff]  ;;  %v13315_v45 = vld [vmem:[#allocation157_spill] sm:$0xff] }
 0x2e4   : > { %13200 = vst [vmem:[#allocation209_spill] sm:$0xff] %v9707_v60  ;;  %v9714_v33 = vpop.eup %5453  ;;  %5473 = vpow2.f32 %v3517_v46  ;;  %v9716_v8 = vmul.f32 1.442695, %v3257_v0  ;;  %v9718_v56 = vmul.f32 1.442695, %v3258_v49  ;;  %v3243_v38 = vsub.f32 %v13204_v51, %v2886_v7  ;;  %v13208_v46 = vld [vmem:[#allocation229_spill] sm:$0xff] }
 0x2e5   : > { %13203 = vst [vmem:[#allocation51_spill] sm:$0xff] %v9714_v33  ;;  %v9721_v12 = vpop.eup %5455  ;;  %v3995_v2 = vadd.f32 %v9700_v43, %v3994_v39  ;;  %v3998_v53 = vadd.f32 %v9714_v33, %v9707_v60  ;;  %5475 = vpow2.f32 %v3535_v62  ;;  %v3244_v57 = vsub.f32 %v13206_v58, %v2886_v7  ;;  %v13209_v0 = vld [vmem:[#allocation230_spill] sm:$0xff]  ;;  %v13211_v39 = vld [vmem:[#allocation280_spill] sm:$0xff] }
 0x2e6   : > { %13205 = vst [vmem:[#allocation150_spill] sm:$0xff] %v9721_v12  ;;  %v9727_v59 = vpop.eup %5457  ;;  %5477 = vpow2.f32 %v3537_v15  ;;  %v3245_v47 = vsub.f32 %v13208_v46, %v2886_v7  ;;  %v3246_v49 = vsub.f32 %v13209_v0, %v2886_v7  ;;  %v9732_v55 = vmul.f32 1.442695, %v3243_v38  ;;  %v13212_v33 = vld [vmem:[#allocation14_spill] sm:$0xff] }
 0x2e7   : > { %13207 = vst [vmem:[#allocation103_spill] sm:$0xff] %v9727_v59  ;;  %v9734_v51 = vpop.eup %5459  ;;  %3996 = vadd.xlane.f32.xlu1 %v3995_v2  ;;  %1575 = vadd.xlane.f32.xlu0 %v13211_v39  ;;  %v3999_v62 = vadd.f32 %v9721_v12, %v3998_v53  ;;  %5479 = vpow2.f32 %v3539_v41  ;;  %v3529_v58 = vmul.f32 1.442695, %v3244_v57  ;;  %v2891_v15 = vsel %vm2691_vm13, %v9387_v24, %v13212_v33  ;;  %v13214_v2 = vld [vmem:[#allocation55_spill] sm:$0xff]  ;;  %v9752_v53 = vpop.xlane.xlu0 %1460  ;;  %v13217_v24 = vld [vmem:[#allocation153_spill] sm:$0xff]  ;;  %v13220_v12 = vld [vmem:[#allocation22_spill] sm:$0xff] }
 0x2e8   : > { %13210 = vst [vmem:[#allocation210_spill] sm:$0xff] %v9734_v51  ;;  %v9742_v60 = vpop.eup %5461  ;;  %5481 = vpow2.f32 %v9666_v18  ;;  %v9745_v7 = vmul.f32 1.442695, %v3245_v47  ;;  %v9747_v38 = vmul.f32 1.442695, %v3246_v49  ;;  %v3263_v46 = vsub.f32 %v13214_v2, %v2891_v15  ;;  %13216 = vst [vmem:[#allocation212_spill] sm:$0xff] %v9752_v53 }
 0x2e9   : > { %13213 = vst [vmem:[#allocation10_spill] sm:$0xff] %v9742_v60  ;;  %v9750_v0 = vpop.eup %5463  ;;  %v4000_v41 = vadd.f32 %v9727_v59, %v3999_v62  ;;  %v4003_v10 = vadd.f32 %v9742_v60, %v9734_v51  ;;  %5483 = vpow2.f32 %v3519_v52  ;;  %v3264_v33 = vsub.f32 %v13217_v24, %v2891_v15  ;;  %v13218_v18 = vld [vmem:[#allocation106_spill] sm:$0xff]  ;;  %v13219_v49 = vld [vmem:[#allocation231_spill] sm:$0xff]  ;;  %v13222_v62 = vld [vmem:[#allocation284_spill] sm:$0xff] }
 0x2ea   : > { %13215 = vst [vmem:[#allocation211_spill] sm:$0xff] %v9750_v0  ;;  %v9758_v57 = vpop.eup %5465  ;;  %5485 = vpow2.f32 %v3521_v6  ;;  %v3265_v47 = vsub.f32 %v13218_v18, %v2891_v15  ;;  %v3266_v39 = vsub.f32 %v13219_v49, %v2891_v15  ;;  %v9762_v2 = vmul.f32 1.442695, %v3263_v46  ;;  %v13223_v60 = vld [vmem:[#allocation301_spill] sm:$0xff]  ;;  %v13224_v6 = vld [vmem:[#allocation358_spill] sm:$0xff] }
 0x2eb   : > { %vm2690_vm0 = vcmp.ge.f32.partialorder %v13220_v12, 0.0  ;;  %v9765_v53 = vpop.eup %5467  ;;  %4001 = vadd.xlane.f32.xlu1 %v4000_v41  ;;  %1580 = vadd.xlane.f32.xlu0 %v13222_v62  ;;  %v4004_v52 = vadd.f32 %v9750_v0, %v4003_v10  ;;  %5487 = vpow2.f32 %v9689_v37  ;;  %v3569_v24 = vmul.f32 1.442695, %v3264_v33  ;;  %v13226_v41 = vld [vmem:[#allocation232_spill] sm:$0xff]  ;;  %v13250_v12 = vld [vmem:[#allocation238_spill] sm:$0xff] }
 0x2ec   : > { %13221 = vst [vmem:[#allocation213_spill] sm:$0xff] %v9765_v53  ;;  %v2888_v18 = vsel %vm2688_vm14, %v13224_v6, %v13223_v60  ;;  %v9774_v15 = vpop.eup %5469  ;;  %5489 = vpow2.f32 %v9691_v34  ;;  %v9777_v46 = vmul.f32 1.442695, %v3265_v47  ;;  %v9779_v49 = vmul.f32 1.442695, %v3266_v39  ;;  %v13228_v60 = vld [vmem:[#allocation233_spill] sm:$0xff] }
 0x2ed   : > { %13225 = vst [vmem:[#allocation295_spill] sm:$0xff] %v9774_v15  ;;  %v3251_v62 = vsub.f32 %v13226_v41, %v2888_v18  ;;  %v9782_v51 = vpop.eup %5471  ;;  %v4005_v37 = vadd.f32 %v9758_v57, %v4004_v52  ;;  %v4008_v10 = vadd.f32 %v9774_v15, %v9765_v53  ;;  %5491 = vpow2.f32 %v9704_v42  ;;  %v13230_v34 = vld [vmem:[#allocation234_spill] sm:$0xff]  ;;  %v13231_v39 = vld [vmem:[#allocation235_spill] sm:$0xff]  ;;  %v9798_v52 = vpop.xlane.xlu0 %2658  ;;  %v13234_v15 = vld [vmem:[#allocation285_spill] sm:$0xff] }
 0x2ee   : > { %13227 = vst [vmem:[#allocation296_spill] sm:$0xff] %v9782_v51  ;;  %v3252_v11 = vsub.f32 %v13228_v60, %v2888_v18  ;;  %v9789_v33 = vpop.eup %5473  ;;  %5493 = vpow2.f32 %v3553_v40  ;;  %v3253_v47 = vsub.f32 %v13230_v34, %v2888_v18  ;;  %v3254_v6 = vsub.f32 %v13231_v39, %v2888_v18  ;;  %v13232_v41 = vld [vmem:[#allocation23_spill] sm:$0xff]  ;;  %13233 = vst [vmem:[#allocation17_spill] sm:$0xff] %v9798_v52  ;;  %v13235_v60 = vld [vmem:[#allocation16_spill] sm:$0xff] }
 0x2ef   : > { %13229 = vst [vmem:[#allocation354_spill] sm:$0xff] %v9789_v33  ;;  %v9793_v0 = vmul.f32 1.442695, %v3251_v62  ;;  %vm2692_vm1 = vcmp.ge.f32.partialorder %v13232_v41, 0.0  ;;  %v9796_v59 = vpop.eup %5475  ;;  %4006 = vadd.xlane.f32.xlu1 %v4005_v37  ;;  %1585 = vadd.xlane.f32.xlu0 %v13234_v15  ;;  %v4009_v42 = vadd.f32 %v9782_v51, %v4008_v10  ;;  %5495 = vpow2.f32 %v9716_v8  ;;  %v13237_v37 = vld [vmem:[#allocation56_spill] sm:$0xff]  ;;  %v13259_v41 = vld [vmem:[#allocation242_spill] sm:$0xff] }
 0x2f0   : > { %v3545_v40 = vmul.f32 1.442695, %v3252_v11  ;;  %v2893_v18 = vsel %vm2693_vm15, %v9395_v1, %v13235_v60  ;;  %v9807_v62 = vpop.eup %5477  ;;  %5497 = vpow2.f32 %v9718_v56  ;;  %v9810_v34 = vmul.f32 1.442695, %v3253_v47  ;;  %v13239_v1 = vld [vmem:[#allocation154_spill] sm:$0xff]  ;;  %v13240_v56 = vld [vmem:[#allocation107_spill] sm:$0xff] }
 0x2f1   : > { %13236 = vst [vmem:[#allocation214_spill] sm:$0xff] %v9807_v62  ;;  %v9812_v39 = vmul.f32 1.442695, %v3254_v6  ;;  %v3271_v15 = vsub.f32 %v13237_v37, %v2893_v18  ;;  %v9815_v52 = vpop.eup %5479  ;;  %v4010_v8 = vadd.f32 %v9789_v33, %v4009_v42  ;;  %v4023_v10 = vadd.f32 %v9807_v62, %v9796_v59  ;;  %v13241_v6 = vld [vmem:[#allocation236_spill] sm:$0xff]  ;;  %v13244_v33 = vld [vmem:[#allocation302_spill] sm:$0xff]  ;;  %v9835_v62 = vpop.xlane.xlu0 %1470 }
 0x2f2   : > { %13238 = vst [vmem:[#allocation215_spill] sm:$0xff] %v9815_v52  ;;  %5499 = vpow2.f32 %v9732_v55  ;;  %v3272_v17 = vsub.f32 %v13239_v1, %v2893_v18  ;;  %v9822_v11 = vpop.eup %5481  ;;  %v3273_v47 = vsub.f32 %v13240_v56, %v2893_v18  ;;  %v3274_v60 = vsub.f32 %v13241_v6, %v2893_v18  ;;  %v13242_v37 = vld [vmem:[#allocation24_spill] sm:$0xff]  ;;  %v13245_v1 = vld [vmem:[#allocation359_spill] sm:$0xff]  ;;  %13246 = vst [vmem:[#allocation11_spill] sm:$0xff] %v9835_v62 }
 0x2f3   : > { %5501 = vpow2.f32 %v3529_v58  ;;  %v3583_v51 = vmul.f32 1.442695, %v3271_v15  ;;  %vm2694_vm2 = vcmp.ge.f32.partialorder %v13242_v37, 0.0  ;;  %v9827_v53 = vpop.eup %5483  ;;  %4011 = vadd.xlane.f32.xlu1 %v4010_v8  ;;  %v4024_v42 = vadd.f32 %v9815_v52, %v4023_v10  ;;  %v13248_v8 = vld [vmem:[#allocation237_spill] sm:$0xff]  ;;  %v13270_v37 = vld [vmem:[#allocation246_spill] sm:$0xff] }
 0x2f4   : > { %13243 = vst [vmem:[#allocation216_spill] sm:$0xff] %v9827_v53  ;;  %5503 = vpow2.f32 %v9745_v7  ;;  %v3585_v55 = vmul.f32 1.442695, %v3272_v17  ;;  %v2890_v58 = vsel %vm2690_vm0, %v13245_v1, %v13244_v33  ;;  %v9837_v56 = vpop.eup %5485  ;;  %v3587_v18 = vmul.f32 1.442695, %v3273_v47 }
 0x2f5   : > { %13247 = vst [vmem:[#allocation217_spill] sm:$0xff] %v9837_v56  ;;  %5505 = vpow2.f32 %v9747_v38  ;;  %v9840_v15 = vmul.f32 1.442695, %v3274_v60  ;;  %v3259_v6 = vsub.f32 %v13248_v8, %v2890_v58  ;;  %v9843_v10 = vpop.eup %5487  ;;  %v4025_v7 = vadd.f32 %v9822_v11, %v4024_v42  ;;  %v13252_v38 = vld [vmem:[#allocation239_spill] sm:$0xff]  ;;  %v13253_v60 = vld [vmem:[#allocation240_spill] sm:$0xff] }
 0x2f6   : > { %13249 = vst [vmem:[#allocation218_spill] sm:$0xff] %v9843_v10  ;;  %v4013_v17 = vadd.f32 %v9837_v56, %v9827_v53  ;;  %5507 = vpow2.f32 %v9762_v2  ;;  %v3260_v33 = vsub.f32 %v13250_v12, %v2890_v58  ;;  %v9850_v1 = vpop.eup %5489  ;;  %v3261_v47 = vsub.f32 %v13252_v38, %v2890_v58  ;;  %v13254_v56 = vld [vmem:[#allocation303_spill] sm:$0xff]  ;;  %v13255_v12 = vld [vmem:[#allocation360_spill] sm:$0xff]  ;;  %v13257_v38 = vld [vmem:[#allocation241_spill] sm:$0xff] }
 0x2f7   : > { %13251 = vst [vmem:[#allocation219_spill] sm:$0xff] %v9850_v1  ;;  %5509 = vpow2.f32 %v3569_v24  ;;  %v3262_v62 = vsub.f32 %v13253_v60, %v2890_v58  ;;  %v3559_v52 = vmul.f32 1.442695, %v3259_v6  ;;  %v9855_v8 = vpop.eup %5491  ;;  %4026 = vadd.xlane.f32.xlu0 %v4025_v7  ;;  %v2892_v24 = vsel %vm2692_vm1, %v13255_v12, %v13254_v56  ;;  %v13263_v12 = vld [vmem:[#allocation244_spill] sm:$0xff] }
 0x2f8   : > { %v4014_v42 = vadd.f32 %v9843_v10, %v4013_v17  ;;  %5511 = vpow2.f32 %v9777_v46  ;;  %v3561_v2 = vmul.f32 1.442695, %v3260_v33  ;;  %v9863_v53 = vpop.eup %5493  ;;  %v9866_v58 = vmul.f32 1.442695, %v3261_v47  ;;  %v9878_v33 = vpop.xlane.xlu0 %1475 }
 0x2f9   : > { %13256 = vst [vmem:[#allocation297_spill] sm:$0xff] %v9863_v53  ;;  %5513 = vpow2.f32 %v9779_v49  ;;  %v9868_v6 = vmul.f32 1.442695, %v3262_v62  ;;  %v3267_v7 = vsub.f32 %v13257_v38, %v2892_v24  ;;  %v9871_v60 = vpop.eup %5495  ;;  %v4033_v17 = vadd.f32 %v9863_v53, %v9855_v8  ;;  %13260 = vst [vmem:[#allocation300_spill] sm:$0xff] %v9878_v33  ;;  %v13262_v62 = vld [vmem:[#allocation243_spill] sm:$0xff]  ;;  %v13266_v33 = vld [vmem:[#allocation361_spill] sm:$0xff] }
 0x2fa   : > { %13258 = vst [vmem:[#allocation355_spill] sm:$0xff] %v9871_v60  ;;  %v4015_v46 = vadd.f32 %v9850_v1, %v4014_v42  ;;  %5515 = vpow2.f32 %v9793_v0  ;;  %v3268_v56 = vsub.f32 %v13259_v41, %v2892_v24  ;;  %v9880_v49 = vpop.eup %5497  ;;  %v3269_v47 = vsub.f32 %v13262_v62, %v2892_v24  ;;  %v13265_v41 = vld [vmem:[#allocation304_spill] sm:$0xff]  ;;  %v13268_v62 = vld [vmem:[#allocation245_spill] sm:$0xff] }
 0x2fb   : > { %13261 = vst [vmem:[#allocation19_spill] sm:$0xff] %v9880_v49  ;;  %5517 = vpow2.f32 %v3545_v40  ;;  %v3270_v38 = vsub.f32 %v13263_v12, %v2892_v24  ;;  %v3575_v10 = vmul.f32 1.442695, %v3267_v7  ;;  %v4034_v1 = vadd.f32 %v9871_v60, %v4033_v17 }
 0x2fc   : > { %v9885_v42 = vpop.eup %5499  ;;  %4016 = vadd.xlane.f32.xlu1 %v4015_v46  ;;  %5519 = vpow2.f32 %v9810_v34  ;;  %v3577_v0 = vmul.f32 1.442695, %v3268_v56  ;;  %v2894_v40 = vsel %vm2694_vm2, %v13266_v33, %v13265_v41  ;;  %v9896_v24 = vmul.f32 1.442695, %v3269_v47 }
 0x2fd   : > { %13264 = vst [vmem:[#allocation220_spill] sm:$0xff] %v9885_v42  ;;  %v9893_v53 = vpop.eup %5501  ;;  %5521 = vpow2.f32 %v9812_v39  ;;  %v9898_v7 = vmul.f32 1.442695, %v3270_v38  ;;  %v3275_v46 = vsub.f32 %v13268_v62, %v2894_v40  ;;  %v4035_v34 = vadd.f32 %v9880_v49, %v4034_v1  ;;  %v13272_v39 = vld [vmem:[#allocation247_spill] sm:$0xff]  ;;  %v13273_v38 = vld [vmem:[#allocation248_spill] sm:$0xff]  ;;  %v9919_v49 = vpop.xlane.xlu0 %1480 }
 0x2fe   : > { %13267 = vst [vmem:[#allocation221_spill] sm:$0xff] %v9893_v53  ;;  %v9901_v12 = vpop.eup %5503  ;;  %v4018_v17 = vadd.f32 %v9893_v53, %v9885_v42  ;;  %5523 = vpow2.f32 %v3583_v51  ;;  %v3276_v56 = vsub.f32 %v13270_v37, %v2894_v40  ;;  %v3277_v47 = vsub.f32 %v13272_v39, %v2894_v40  ;;  %v13275_v51 = vld [vmem:[#allocation18_spill] sm:$0xff]  ;;  %v13278_v39 = vld [vmem:[#allocation249_spill] sm:$0xff] }
 0x2ff   : > { %13269 = vst [vmem:[#allocation222_spill] sm:$0xff] %v9901_v12  ;;  %v9907_v33 = vpop.eup %5505  ;;  %5525 = vpow2.f32 %v3585_v55  ;;  %v3278_v41 = vsub.f32 %v13273_v38, %v2894_v40  ;;  %v3591_v62 = vmul.f32 1.442695, %v3275_v46  ;;  %4036 = vadd.xlane.f32.xlu0 %v4035_v34  ;;  %v13276_v42 = vld [vmem:[#allocation362_spill] sm:$0xff]  ;;  %vm2701_vm9 = vcmp.ge.f32.partialorder %v7555_v21, 0.0  ;;  %v13336_v21 = vld [vmem:[#allocation160_spill] sm:$0xff] }
 0x300   : > { %13271 = vst [vmem:[#allocation52_spill] sm:$0xff] %v9907_v33  ;;  %v9912_v60 = vpop.eup %5507  ;;  %v4019_v1 = vadd.f32 %v9901_v12, %v4018_v17  ;;  %5527 = vpow2.f32 %v3587_v18  ;;  %v3593_v53 = vmul.f32 1.442695, %v3276_v56  ;;  %v2895_v37 = vsel %vm2695_vm3, %v13276_v42, %v13275_v51 }
 0x301   : > { %13274 = vst [vmem:[#allocation151_spill] sm:$0xff] %v9912_v60  ;;  %v9921_v55 = vpop.eup %5509  ;;  %5529 = vpow2.f32 %v9840_v15  ;;  %v3595_v40 = vmul.f32 1.442695, %v3277_v47  ;;  %v9924_v46 = vmul.f32 1.442695, %v3278_v41  ;;  %v3279_v34 = vsub.f32 %v13278_v39, %v2895_v37  ;;  %v13281_v15 = vld [vmem:[#allocation251_spill] sm:$0xff] }
 0x302   : > { %13277 = vst [vmem:[#allocation104_spill] sm:$0xff] %v9921_v55  ;;  %v9927_v38 = vpop.eup %5511  ;;  %v4020_v18 = vadd.f32 %v9907_v33, %v4019_v1  ;;  %v4043_v17 = vadd.f32 %v9921_v55, %v9912_v60  ;;  %5531 = vpow2.f32 %v3559_v52  ;;  %v3280_v42 = vsub.f32 %v13280_v50, %v2895_v37  ;;  %v13282_v41 = vld [vmem:[#allocation252_spill] sm:$0xff]  ;;  %v13284_v33 = vld [vmem:[#allocation305_spill] sm:$0xff]  ;;  %v13285_v50 = vld [vmem:[#allocation363_spill] sm:$0xff] }
 0x303   : > { %13279 = vst [vmem:[#allocation223_spill] sm:$0xff] %v9927_v38  ;;  %v9933_v56 = vpop.eup %5513  ;;  %5533 = vpow2.f32 %v3561_v2  ;;  %v3281_v47 = vsub.f32 %v13281_v15, %v2895_v37  ;;  %v3282_v51 = vsub.f32 %v13282_v41, %v2895_v37  ;;  %v3599_v39 = vmul.f32 1.442695, %v3279_v34  ;;  %v13287_v34 = vld [vmem:[#allocation26_spill] sm:$0xff] }
 0x304   : > { %v9938_v12 = vpop.eup %5515  ;;  %4021 = vadd.xlane.f32.xlu1 %v4020_v18  ;;  %v4044_v1 = vadd.f32 %v9927_v38, %v4043_v17  ;;  %5535 = vpow2.f32 %v9866_v58  ;;  %v3601_v52 = vmul.f32 1.442695, %v3280_v42  ;;  %v2896_v55 = vsel %vm2696_vm4, %v13285_v50, %v13284_v33  ;;  %v9960_v42 = vpop.xlane.xlu0 %1485 }
 0x305   : > { %13283 = vst [vmem:[#allocation298_spill] sm:$0xff] %v9938_v12  ;;  %v9946_v60 = vpop.eup %5517  ;;  %5537 = vpow2.f32 %v9868_v6  ;;  %v9949_v2 = vmul.f32 1.442695, %v3281_v47  ;;  %v9951_v37 = vmul.f32 1.442695, %v3282_v51  ;;  %v3283_v18 = vsub.f32 %v13287_v34, %v2896_v55  ;;  %13290 = vst [vmem:[#allocation224_spill] sm:$0xff] %v9960_v42 }
 0x306   : > { %13286 = vst [vmem:[#allocation356_spill] sm:$0xff] %v9946_v60  ;;  %v9954_v15 = vpop.eup %5519  ;;  %v4045_v58 = vadd.f32 %v9933_v56, %v4044_v1  ;;  %v4028_v17 = vadd.f32 %v9946_v60, %v9938_v12  ;;  %5539 = vpow2.f32 %v3575_v10  ;;  %v3284_v33 = vsub.f32 %v13289_v5, %v2896_v55  ;;  %v13292_v6 = vld [vmem:[#allocation254_spill] sm:$0xff]  ;;  %v13293_v51 = vld [vmem:[#allocation255_spill] sm:$0xff] }
 0x307   : > { %13288 = vst [vmem:[#allocation12_spill] sm:$0xff] %v9954_v15  ;;  %v9962_v41 = vpop.eup %5521  ;;  %5541 = vpow2.f32 %v3577_v0  ;;  %v3285_v47 = vsub.f32 %v13292_v6, %v2896_v55  ;;  %v3286_v50 = vsub.f32 %v13293_v51, %v2896_v55  ;;  %v3607_v34 = vmul.f32 1.442695, %v3283_v18  ;;  %v13294_v5 = vld [vmem:[#allocation306_spill] sm:$0xff]  ;;  %v13295_v18 = vld [vmem:[#allocation57_spill] sm:$0xff]  ;;  %v13300_v51 = vld [vmem:[#allocation256_spill] sm:$0xff] }
 0x308   : > { %13291 = vst [vmem:[#allocation225_spill] sm:$0xff] %v9962_v41  ;;  %v9967_v38 = vpop.eup %5523  ;;  %4046 = vadd.xlane.f32.xlu0 %v4045_v58  ;;  %v4029_v1 = vadd.f32 %v9954_v15, %v4028_v17  ;;  %5543 = vpow2.f32 %v9896_v24  ;;  %v3609_v10 = vmul.f32 1.442695, %v3284_v33  ;;  %v2897_v42 = vsel %vm2697_vm5, %v9411_v27, %v13294_v5  ;;  %v13303_v15 = vld [vmem:[#allocation364_spill] sm:$0xff]  ;;  %v10001_v12 = vpop.xlane.xlu0 %1490 }
 0x309   : > { %v9975_v60 = vpop.eup %5525  ;;  %5545 = vpow2.f32 %v9898_v7  ;;  %v9978_v0 = vmul.f32 1.442695, %v3285_v47  ;;  %v9980_v55 = vmul.f32 1.442695, %v3286_v50  ;;  %v3287_v58 = vsub.f32 %v13295_v18, %v2897_v42  ;;  %v13299_v7 = vld [vmem:[#allocation108_spill] sm:$0xff] }
 0x30a   : > { %v9983_v6 = vpop.eup %5527  ;;  %v4030_v24 = vadd.f32 %v9962_v41, %v4029_v1  ;;  %v4053_v17 = vadd.f32 %v9975_v60, %v9967_v38  ;;  %5547 = vpow2.f32 %v3591_v62  ;;  %v3288_v27 = vsub.f32 %v13297_v20, %v2897_v42  ;;  %v13302_v62 = vld [vmem:[#allocation307_spill] sm:$0xff] }
 0x30b   : > { %13296 = vst [vmem:[#allocation226_spill] sm:$0xff] %v9983_v6  ;;  %v9989_v33 = vpop.eup %5529  ;;  %5549 = vpow2.f32 %v3593_v53  ;;  %v3289_v47 = vsub.f32 %v13299_v7, %v2897_v42  ;;  %v3290_v50 = vsub.f32 %v13300_v51, %v2897_v42  ;;  %v3615_v5 = vmul.f32 1.442695, %v3287_v58  ;;  %v13305_v7 = vld [vmem:[#allocation58_spill] sm:$0xff] }
 0x30c   : > { %13298 = vst [vmem:[#allocation13_spill] sm:$0xff] %v9989_v33  ;;  %v9994_v18 = vpop.eup %5531  ;;  %4031 = vadd.xlane.f32.xlu1 %v4030_v24  ;;  %v4054_v1 = vadd.f32 %v9983_v6, %v4053_v17  ;;  %5551 = vpow2.f32 %v3595_v40  ;;  %v3617_v41 = vmul.f32 1.442695, %v3288_v27  ;;  %v2898_v20 = vsel %vm2698_vm6, %v13303_v15, %v13302_v62 }
 0x30d   : > { %13301 = vst [vmem:[#allocation53_spill] sm:$0xff] %v9994_v18  ;;  %v10003_v53 = vpop.eup %5533  ;;  %5553 = vpow2.f32 %v9924_v46  ;;  %v3619_v42 = vmul.f32 1.442695, %v3289_v47  ;;  %v10006_v58 = vmul.f32 1.442695, %v3290_v50  ;;  %v3291_v24 = vsub.f32 %v13305_v7, %v2898_v20  ;;  %v13308_v46 = vld [vmem:[#allocation109_spill] sm:$0xff] }
 0x30e   : > { %13304 = vst [vmem:[#allocation152_spill] sm:$0xff] %v10003_v53  ;;  %v10009_v51 = vpop.eup %5535  ;;  %v4055_v40 = vadd.f32 %v9989_v33, %v4054_v1  ;;  %v4038_v17 = vadd.f32 %v10003_v53, %v9994_v18  ;;  %5555 = vpow2.f32 %v3599_v39  ;;  %v3292_v15 = vsub.f32 %v13307_v28, %v2898_v20  ;;  %v13309_v50 = vld [vmem:[#allocation257_spill] sm:$0xff]  ;;  %v13311_v53 = vld [vmem:[#allocation308_spill] sm:$0xff] }
 0x30f   : > { %13306 = vst [vmem:[#allocation105_spill] sm:$0xff] %v10009_v51  ;;  %v10015_v27 = vpop.eup %5537  ;;  %5557 = vpow2.f32 %v3601_v52  ;;  %v3293_v47 = vsub.f32 %v13308_v46, %v2898_v20  ;;  %v3294_v62 = vsub.f32 %v13309_v50, %v2898_v20  ;;  %v3623_v7 = vmul.f32 1.442695, %v3291_v24  ;;  %v13312_v28 = vld [vmem:[#allocation365_spill] sm:$0xff]  ;;  %v13314_v24 = vld [vmem:[#allocation59_spill] sm:$0xff] }
 0x310   : > { %v10020_v6 = vpop.eup %5539  ;;  %4056 = vadd.xlane.f32.xlu0 %v4055_v40  ;;  %v4039_v1 = vadd.f32 %v10009_v51, %v4038_v17  ;;  %5559 = vpow2.f32 %v9949_v2  ;;  %v3625_v39 = vmul.f32 1.442695, %v3292_v15  ;;  %v2899_v18 = vsel %vm2699_vm7, %v13312_v28, %v13311_v53  ;;  %v10042_v15 = vpop.xlane.xlu0 %1495 }
 0x311   : > { %13310 = vst [vmem:[#allocation227_spill] sm:$0xff] %v10020_v6  ;;  %v10028_v33 = vpop.eup %5541  ;;  %5561 = vpow2.f32 %v9951_v37  ;;  %v10031_v52 = vmul.f32 1.442695, %v3293_v47  ;;  %v10033_v20 = vmul.f32 1.442695, %v3294_v62  ;;  %v3295_v40 = vsub.f32 %v13314_v24, %v2899_v18  ;;  %13316 = vst [vmem:[#allocation299_spill] sm:$0xff] %v10042_v15 }
 0x312   : > { %13313 = vst [vmem:[#allocation21_spill] sm:$0xff] %v10028_v33  ;;  %v10036_v46 = vpop.eup %5543  ;;  %v4040_v2 = vadd.f32 %v10015_v27, %v4039_v1  ;;  %v4048_v17 = vadd.f32 %v10028_v33, %v10020_v6  ;;  %5563 = vpow2.f32 %v3607_v34  ;;  %v3296_v53 = vsub.f32 %v13315_v45, %v2899_v18  ;;  %v13318_v37 = vld [vmem:[#allocation110_spill] sm:$0xff]  ;;  %v13321_v45 = vld [vmem:[#allocation309_spill] sm:$0xff] }
 0x313   : > { %v10044_v50 = vpop.eup %5545  ;;  %vm2702_vm10 = vcmp.ge.f32.partialorder %v7598_v61, 0.0  ;;  %5565 = vpow2.f32 %v3609_v10  ;;  %v3297_v47 = vsub.f32 %v13318_v37, %v2899_v18  ;;  %v13319_v62 = vld [vmem:[#allocation258_spill] sm:$0xff]  ;;  %v3631_v24 = vmul.f32 1.442695, %v3295_v40  ;;  %v13324_v40 = vld [vmem:[#allocation60_spill] sm:$0xff]  ;;  %v13344_v61 = vld [vmem:[#allocation161_spill] sm:$0xff] }
 0x314   : > { %13317 = vst [vmem:[#allocation357_spill] sm:$0xff] %v10044_v50  ;;  %v3298_v28 = vsub.f32 %v13319_v62, %v2899_v18  ;;  %v10049_v51 = vpop.eup %5547  ;;  %4041 = vadd.xlane.f32.xlu1 %v4040_v2  ;;  %v4049_v1 = vadd.f32 %v10036_v46, %v4048_v17  ;;  %5567 = vpow2.f32 %v9978_v0  ;;  %v3633_v34 = vmul.f32 1.442695, %v3296_v53  ;;  %v13322_v15 = vld [vmem:[#allocation366_spill] sm:$0xff]  ;;  %v13328_v62 = vld [vmem:[#allocation259_spill] sm:$0xff] }
 0x315   : > { %13320 = vst [vmem:[#allocation20_spill] sm:$0xff] %v10049_v51  ;;  %v2900_v33 = vsel %vm2700_vm8, %v13322_v15, %v13321_v45  ;;  %v10057_v6 = vpop.eup %5549  ;;  %5569 = vpow2.f32 %v9980_v55  ;;  %v10060_v10 = vmul.f32 1.442695, %v3297_v47  ;;  %vm2703_vm11 = vcmp.ge.f32.partialorder %v7559_v22, 0.0  ;;  %v13327_v55 = vld [vmem:[#allocation111_spill] sm:$0xff]  ;;  %v13355_v22 = vld [vmem:[#allocation162_spill] sm:$0xff] }
 0x316   : > { %13323 = vst [vmem:[#allocation228_spill] sm:$0xff] %v10057_v6  ;;  %v10062_v18 = vmul.f32 1.442695, %v3298_v28  ;;  %v3299_v2 = vsub.f32 %v13324_v40, %v2900_v33  ;;  %v10065_v37 = vpop.eup %5551  ;;  %v4050_v0 = vadd.f32 %v10044_v50, %v4049_v1  ;;  %v4058_v17 = vadd.f32 %v10057_v6, %v10049_v51  ;;  %v13331_v51 = vld [vmem:[#allocation367_spill] sm:$0xff]  ;;  %v10083_v50 = vpop.xlane.xlu0 %1500 }
 0x317   : > { %5571 = vpow2.f32 %v3615_v5  ;;  %v3300_v53 = vsub.f32 %v13325_v30, %v2900_v33  ;;  %v10071_v15 = vpop.eup %5553  ;;  %v3301_v47 = vsub.f32 %v13327_v55, %v2900_v33  ;;  %v3302_v28 = vsub.f32 %v13328_v62, %v2900_v33  ;;  %v13330_v5 = vld [vmem:[#allocation310_spill] sm:$0xff]  ;;  %13332 = vst [vmem:[#allocation280_spill] sm:$0xff] %v10083_v50  ;;  %v13334_v55 = vld [vmem:[#allocation61_spill] sm:$0xff] }
 0x318   : > { %13326 = vst [vmem:[#allocation229_spill] sm:$0xff] %v10071_v15  ;;  %5573 = vpow2.f32 %v3617_v41  ;;  %v3639_v45 = vmul.f32 1.442695, %v3299_v2  ;;  %v10076_v40 = vpop.eup %5555  ;;  %4051 = vadd.xlane.f32.xlu1 %v4050_v0  ;;  %v4059_v1 = vadd.f32 %v10065_v37, %v4058_v17  ;;  %v2901_v30 = vsel %vm2701_vm9, %v13331_v51, %v13330_v5 }
 0x319   : > { %13329 = vst [vmem:[#allocation230_spill] sm:$0xff] %v10076_v40  ;;  %5575 = vpow2.f32 %v3619_v42  ;;  %v3641_v6 = vmul.f32 1.442695, %v3300_v53  ;;  %v10085_v41 = vpop.eup %5557  ;;  %v3643_v33 = vmul.f32 1.442695, %v3301_v47  ;;  %v3303_v0 = vsub.f32 %v13334_v55, %v2901_v30 }
 0x31a   : > { %13333 = vst [vmem:[#allocation14_spill] sm:$0xff] %v10085_v41  ;;  %5577 = vpow2.f32 %v10006_v58  ;;  %v10088_v2 = vmul.f32 1.442695, %v3302_v28  ;;  %v10091_v62 = vpop.eup %5559  ;;  %v4060_v42 = vadd.f32 %v10071_v15, %v4059_v1  ;;  %v4063_v17 = vadd.f32 %v10085_v41, %v10076_v40  ;;  %v13337_v58 = vld [vmem:[#allocation112_spill] sm:$0xff]  ;;  %v13340_v41 = vld [vmem:[#allocation311_spill] sm:$0xff] }
 0x31b   : > { %13335 = vst [vmem:[#allocation55_spill] sm:$0xff] %v10091_v62  ;;  %5579 = vpow2.f32 %v3623_v7  ;;  %v3304_v51 = vsub.f32 %v13336_v21, %v2901_v30  ;;  %v10097_v53 = vpop.eup %5561  ;;  %vm2704_vm12 = vcmp.ge.f32.partialorder %v7630_v32, 0.0  ;;  %v3305_v47 = vsub.f32 %v13337_v58, %v2901_v30  ;;  %v13338_v28 = vld [vmem:[#allocation260_spill] sm:$0xff]  ;;  %v13366_v32 = vld [vmem:[#allocation163_spill] sm:$0xff] }
 0x31c   : > { %5581 = vpow2.f32 %v3625_v39  ;;  %v3306_v5 = vsub.f32 %v13338_v28, %v2901_v30  ;;  %v3647_v55 = vmul.f32 1.442695, %v3303_v0  ;;  %v10102_v50 = vpop.eup %5563  ;;  %4061 = vadd.xlane.f32.xlu1 %v4060_v42  ;;  %v4064_v1 = vadd.f32 %v10091_v62, %v4063_v17  ;;  %v13341_v21 = vld [vmem:[#allocation368_spill] sm:$0xff]  ;;  %v13343_v0 = vld [vmem:[#allocation62_spill] sm:$0xff] }
 0x31d   : > { %13339 = vst [vmem:[#allocation153_spill] sm:$0xff] %v10102_v50  ;;  %5583 = vpow2.f32 %v10031_v52  ;;  %v3649_v7 = vmul.f32 1.442695, %v3304_v51  ;;  %v2902_v40 = vsel %vm2702_vm10, %v13341_v21, %v13340_v41  ;;  %v10110_v15 = vpop.eup %5565  ;;  %v10113_v39 = vmul.f32 1.442695, %v3305_v47  ;;  %v10124_v51 = vpop.xlane.xlu0 %1505 }
 0x31e   : > { %13342 = vst [vmem:[#allocation106_spill] sm:$0xff] %v10110_v15  ;;  %5585 = vpow2.f32 %v10033_v20  ;;  %v10115_v30 = vmul.f32 1.442695, %v3306_v5  ;;  %v3307_v42 = vsub.f32 %v13343_v0, %v2902_v40  ;;  %v10118_v58 = vpop.eup %5567  ;;  %v4065_v52 = vadd.f32 %v10097_v53, %v4064_v1  ;;  %13345 = vst [vmem:[#allocation231_spill] sm:$0xff] %v10124_v51  ;;  %v13347_v20 = vld [vmem:[#allocation113_spill] sm:$0xff] }
 0x31f   : > { %v4068_v17 = vadd.f32 %v10110_v15, %v10102_v50  ;;  %5587 = vpow2.f32 %v3631_v24  ;;  %v3308_v41 = vsub.f32 %v13344_v61, %v2902_v40  ;;  %v10126_v28 = vpop.eup %5569  ;;  %vm2705_vm13 = vcmp.ge.f32.partialorder %v7563_v26, 0.0  ;;  %v13348_v5 = vld [vmem:[#allocation261_spill] sm:$0xff]  ;;  %v13350_v61 = vld [vmem:[#allocation312_spill] sm:$0xff] }
 0x320   : > { %13346 = vst [vmem:[#allocation22_spill] sm:$0xff] %v10126_v28  ;;  %5589 = vpow2.f32 %v3633_v34  ;;  %v3309_v47 = vsub.f32 %v13347_v20, %v2902_v40  ;;  %v3310_v21 = vsub.f32 %v13348_v5, %v2902_v40  ;;  %v3655_v0 = vmul.f32 1.442695, %v3307_v42  ;;  %4066 = vadd.xlane.f32.xlu1 %v4065_v52  ;;  %v13351_v15 = vld [vmem:[#allocation369_spill] sm:$0xff]  ;;  %v13353_v42 = vld [vmem:[#allocation63_spill] sm:$0xff]  ;;  %v13358_v5 = vld [vmem:[#allocation262_spill] sm:$0xff] }
 0x321   : > { %v10131_v62 = vpop.eup %5571  ;;  %v4069_v1 = vadd.f32 %v10118_v58, %v4068_v17  ;;  %5591 = vpow2.f32 %v10060_v10  ;;  %v3657_v24 = vmul.f32 1.442695, %v3308_v41  ;;  %v2903_v50 = vsel %vm2703_vm11, %v13351_v15, %v13350_v61  ;;  %v13376_v26 = vld [vmem:[#allocation165_spill] sm:$0xff] }
 0x322   : > { %13349 = vst [vmem:[#allocation284_spill] sm:$0xff] %v10131_v62  ;;  %v10139_v51 = vpop.eup %5573  ;;  %5593 = vpow2.f32 %v10062_v18  ;;  %v10142_v34 = vmul.f32 1.442695, %v3309_v47  ;;  %v10144_v40 = vmul.f32 1.442695, %v3310_v21  ;;  %v3311_v52 = vsub.f32 %v13353_v42, %v2903_v50  ;;  %v13357_v18 = vld [vmem:[#allocation114_spill] sm:$0xff] }
 0x323   : > { %13352 = vst [vmem:[#allocation301_spill] sm:$0xff] %v10139_v51  ;;  %v10147_v20 = vpop.eup %5575  ;;  %v4070_v10 = vadd.f32 %v10126_v28, %v4069_v1  ;;  %v4073_v17 = vadd.f32 %v10139_v51, %v10131_v62  ;;  %5595 = vpow2.f32 %v3639_v45  ;;  %v3312_v15 = vsub.f32 %v13355_v22, %v2903_v50  ;;  %v13360_v45 = vld [vmem:[#allocation313_spill] sm:$0xff]  ;;  %v13361_v62 = vld [vmem:[#allocation370_spill] sm:$0xff]  ;;  %v10165_v28 = vpop.xlane.xlu0 %1510 }
 0x324   : > { %13354 = vst [vmem:[#allocation358_spill] sm:$0xff] %v10147_v20  ;;  %v10153_v41 = vpop.eup %5577  ;;  %vm2706_vm14 = vcmp.ge.f32.partialorder %v7664_v36, 0.0  ;;  %5597 = vpow2.f32 %v3641_v6  ;;  %v3313_v47 = vsub.f32 %v13357_v18, %v2903_v50  ;;  %v3314_v21 = vsub.f32 %v13358_v5, %v2903_v50  ;;  %13362 = vst [vmem:[#allocation234_spill] sm:$0xff] %v10165_v28  ;;  %v13364_v18 = vld [vmem:[#allocation64_spill] sm:$0xff]  ;;  %v13386_v36 = vld [vmem:[#allocation166_spill] sm:$0xff] }
 0x325   : > { %13356 = vst [vmem:[#allocation232_spill] sm:$0xff] %v10153_v41  ;;  %v3663_v61 = vmul.f32 1.442695, %v3311_v52  ;;  %v10158_v42 = vpop.eup %5579  ;;  %4071 = vadd.xlane.f32.xlu1 %v4070_v10  ;;  %v4074_v1 = vadd.f32 %v10147_v20, %v4073_v17  ;;  %5599 = vpow2.f32 %v3643_v33  ;;  %v3665_v51 = vmul.f32 1.442695, %v3312_v15 }
 0x326   : > { %13359 = vst [vmem:[#allocation233_spill] sm:$0xff] %v10158_v42  ;;  %v2904_v22 = vsel %vm2704_vm12, %v13361_v62, %v13360_v45  ;;  %v10167_v6 = vpop.eup %5581  ;;  %5601 = vpow2.f32 %v10088_v2  ;;  %v3667_v50 = vmul.f32 1.442695, %v3313_v47  ;;  %v10170_v52 = vmul.f32 1.442695, %v3314_v21  ;;  %v13368_v45 = vld [vmem:[#allocation25_spill] sm:$0xff] }
 0x327   : > { %13363 = vst [vmem:[#allocation235_spill] sm:$0xff] %v10167_v6  ;;  %v3315_v10 = vsub.f32 %v13364_v18, %v2904_v22  ;;  %v10173_v5 = vpop.eup %5583  ;;  %v4075_v33 = vadd.f32 %v10153_v41, %v4074_v1  ;;  %v4078_v17 = vadd.f32 %v10167_v6, %v10158_v42  ;;  %5603 = vpow2.f32 %v3647_v55  ;;  %v13369_v2 = vld [vmem:[#allocation115_spill] sm:$0xff]  ;;  %v13372_v6 = vld [vmem:[#allocation314_spill] sm:$0xff] }
 0x328   : > { %13365 = vst [vmem:[#allocation23_spill] sm:$0xff] %v10173_v5  ;;  %v3316_v62 = vsub.f32 %v13366_v32, %v2904_v22  ;;  %v10179_v15 = vpop.eup %5585  ;;  %vm2707_vm15 = vcmp.ge.f32.partialorder %v13368_v45, 0.0  ;;  %5605 = vpow2.f32 %v3649_v7  ;;  %v3317_v47 = vsub.f32 %v13369_v2, %v2904_v22  ;;  %v13370_v21 = vld [vmem:[#allocation263_spill] sm:$0xff] }
 0x329   : > { %13367 = vst [vmem:[#allocation285_spill] sm:$0xff] %v10179_v15  ;;  %v3318_v20 = vsub.f32 %v13370_v21, %v2904_v22  ;;  %v3671_v18 = vmul.f32 1.442695, %v3315_v10  ;;  %v10184_v28 = vpop.eup %5587  ;;  %4076 = vadd.xlane.f32.xlu1 %v4075_v33  ;;  %v4079_v1 = vadd.f32 %v10173_v5, %v4078_v17  ;;  %5607 = vpow2.f32 %v10113_v39  ;;  %v13373_v32 = vld [vmem:[#allocation371_spill] sm:$0xff]  ;;  %v13375_v10 = vld [vmem:[#allocation65_spill] sm:$0xff] }
 0x32a   : > { %13371 = vst [vmem:[#allocation16_spill] sm:$0xff] %v10184_v28  ;;  %v3673_v55 = vmul.f32 1.442695, %v3316_v62  ;;  %v2905_v42 = vsel %vm2705_vm13, %v13373_v32, %v13372_v6  ;;  %v10192_v41 = vpop.eup %5589  ;;  %5609 = vpow2.f32 %v10115_v30  ;;  %v10195_v7 = vmul.f32 1.442695, %v3317_v47  ;;  %v10206_v62 = vpop.xlane.xlu0 %1515  ;;  %v13378_v30 = vld [vmem:[#allocation116_spill] sm:$0xff] }
 0x32b   : > { %13374 = vst [vmem:[#allocation56_spill] sm:$0xff] %v10192_v41  ;;  %v10197_v22 = vmul.f32 1.442695, %v3318_v20  ;;  %v3319_v33 = vsub.f32 %v13375_v10, %v2905_v42  ;;  %v10200_v2 = vpop.eup %5591  ;;  %v4080_v39 = vadd.f32 %v10179_v15, %v4079_v1  ;;  %v4083_v17 = vadd.f32 %v10192_v41, %v10184_v28  ;;  %v13379_v47 = vld [vmem:[#allocation264_spill] sm:$0xff] }
 0x32c   : > { %5611 = vpow2.f32 %v3655_v0  ;;  %v3320_v6 = vsub.f32 %v13376_v26, %v2905_v42  ;;  %v10208_v21 = vpop.eup %5593  ;;  %vm2708_vm0 = vcmp.ge.f32.partialorder %v7690_v9, 0.0  ;;  %v3321_v20 = vsub.f32 %v13378_v30, %v2905_v42  ;;  %v13381_v26 = vld [vmem:[#allocation315_spill] sm:$0xff]  ;;  %v13382_v41 = vld [vmem:[#allocation372_spill] sm:$0xff] }
 0x32d   : > { %13377 = vst [vmem:[#allocation154_spill] sm:$0xff] %v10208_v21  ;;  %5613 = vpow2.f32 %v3657_v24  ;;  %v3322_v32 = vsub.f32 %v13379_v47, %v2905_v42  ;;  %v3679_v10 = vmul.f32 1.442695, %v3319_v33  ;;  %v10213_v5 = vpop.eup %5595  ;;  %4081 = vadd.xlane.f32.xlu1 %v4080_v39  ;;  %v4084_v1 = vadd.f32 %v10200_v2, %v4083_v17  ;;  %v13384_v33 = vld [vmem:[#allocation66_spill] sm:$0xff]  ;;  %v13389_v47 = vld [vmem:[#allocation265_spill] sm:$0xff]  ;;  %v13406_v9 = vld [vmem:[#allocation168_spill] sm:$0xff] }
 0x32e   : > { %13380 = vst [vmem:[#allocation107_spill] sm:$0xff] %v10213_v5  ;;  %5615 = vpow2.f32 %v10142_v34  ;;  %v3681_v0 = vmul.f32 1.442695, %v3320_v6  ;;  %v2906_v28 = vsel %vm2706_vm14, %v13382_v41, %v13381_v26  ;;  %v10221_v15 = vpop.eup %5597  ;;  %v10224_v24 = vmul.f32 1.442695, %v3321_v20 }
 0x32f   : > { %13383 = vst [vmem:[#allocation236_spill] sm:$0xff] %v10221_v15  ;;  %5617 = vpow2.f32 %v10144_v40  ;;  %v10226_v42 = vmul.f32 1.442695, %v3322_v32  ;;  %v3323_v39 = vsub.f32 %v13384_v33, %v2906_v28  ;;  %v10229_v30 = vpop.eup %5599  ;;  %v4085_v34 = vadd.f32 %v10208_v21, %v4084_v1  ;;  %v13388_v40 = vld [vmem:[#allocation117_spill] sm:$0xff]  ;;  %v10247_v21 = vpop.xlane.xlu0 %1520 }
 0x330   : > { %13385 = vst [vmem:[#allocation24_spill] sm:$0xff] %v10229_v30  ;;  %v4088_v17 = vadd.f32 %v10221_v15, %v10213_v5  ;;  %5619 = vpow2.f32 %v3663_v61  ;;  %v3324_v41 = vsub.f32 %v13386_v36, %v2906_v28  ;;  %v10235_v6 = vpop.eup %5601  ;;  %vm2709_vm1 = vcmp.ge.f32.partialorder %v7571_v25, 0.0  ;;  %v13391_v61 = vld [vmem:[#allocation316_spill] sm:$0xff]  ;;  %v13392_v5 = vld [vmem:[#allocation373_spill] sm:$0xff] }
 0x331   : > { %13387 = vst [vmem:[#allocation302_spill] sm:$0xff] %v10235_v6  ;;  %5621 = vpow2.f32 %v3665_v51  ;;  %v3325_v20 = vsub.f32 %v13388_v40, %v2906_v28  ;;  %v3326_v32 = vsub.f32 %v13389_v47, %v2906_v28  ;;  %v3687_v26 = vmul.f32 1.442695, %v3323_v39  ;;  %v10240_v33 = vpop.eup %5603  ;;  %4086 = vadd.xlane.f32.xlu1 %v4085_v34  ;;  %v13394_v40 = vld [vmem:[#allocation67_spill] sm:$0xff]  ;;  %v13416_v25 = vld [vmem:[#allocation169_spill] sm:$0xff] }
 0x332   : > { %13390 = vst [vmem:[#allocation359_spill] sm:$0xff] %v10240_v33  ;;  %v4089_v1 = vadd.f32 %v10229_v30, %v4088_v17  ;;  %5623 = vpow2.f32 %v3667_v50  ;;  %v3689_v15 = vmul.f32 1.442695, %v3324_v41  ;;  %v2907_v36 = vsel %vm2707_vm15, %v13392_v5, %v13391_v61  ;;  %v10249_v51 = vpop.eup %5605  ;;  %v13396_v5 = vld [vmem:[#allocation167_spill] sm:$0xff] }
 0x333   : > { %13393 = vst [vmem:[#allocation237_spill] sm:$0xff] %v10249_v51  ;;  %5625 = vpow2.f32 %v10170_v52  ;;  %v3691_v28 = vmul.f32 1.442695, %v3325_v20  ;;  %v10252_v39 = vmul.f32 1.442695, %v3326_v32  ;;  %v3327_v34 = vsub.f32 %v13394_v40, %v2907_v36  ;;  %v10255_v47 = vpop.eup %5607  ;;  %v13398_v52 = vld [vmem:[#allocation118_spill] sm:$0xff] }
 0x334   : > { %13395 = vst [vmem:[#allocation238_spill] sm:$0xff] %v10255_v47  ;;  %v4090_v50 = vadd.f32 %v10235_v6, %v4089_v1  ;;  %v4093_v17 = vadd.f32 %v10249_v51, %v10240_v33  ;;  %5627 = vpow2.f32 %v3671_v18  ;;  %v3328_v45 = vsub.f32 %v13396_v5, %v2907_v36  ;;  %v10261_v41 = vpop.eup %5609  ;;  %v13399_v32 = vld [vmem:[#allocation266_spill] sm:$0xff]  ;;  %v13401_v51 = vld [vmem:[#allocation317_spill] sm:$0xff] }
 0x335   : > { %13397 = vst [vmem:[#allocation239_spill] sm:$0xff] %v10261_v41  ;;  %vm2710_vm2 = vcmp.ge.f32.partialorder %v7725_v48, 0.0  ;;  %5629 = vpow2.f32 %v3673_v55  ;;  %v3329_v20 = vsub.f32 %v13398_v52, %v2907_v36  ;;  %v3330_v61 = vsub.f32 %v13399_v32, %v2907_v36  ;;  %v13402_v5 = vld [vmem:[#allocation374_spill] sm:$0xff] }
 0x336   : > { %v3695_v40 = vmul.f32 1.442695, %v3327_v34  ;;  %v10266_v30 = vpop.eup %5611  ;;  %4091 = vadd.xlane.f32.xlu1 %v4090_v50  ;;  %v4094_v1 = vadd.f32 %v10255_v47, %v4093_v17  ;;  %5631 = vpow2.f32 %v10195_v7  ;;  %v3697_v18 = vmul.f32 1.442695, %v3328_v45  ;;  %v13404_v34 = vld [vmem:[#allocation70_spill] sm:$0xff]  ;;  %v10288_v45 = vpop.xlane.xlu0 %1525 }
 0x337   : > { %13400 = vst [vmem:[#allocation240_spill] sm:$0xff] %v10266_v30  ;;  %v2908_v33 = vsel %vm2708_vm0, %v13402_v5, %v13401_v51  ;;  %v10274_v6 = vpop.eup %5613  ;;  %5633 = vpow2.f32 %v10197_v22  ;;  %v10277_v55 = vmul.f32 1.442695, %v3329_v20  ;;  %v10279_v36 = vmul.f32 1.442695, %v3330_v61  ;;  %v13408_v22 = vld [vmem:[#allocation119_spill] sm:$0xff] }
 0x338   : > { %13403 = vst [vmem:[#allocation303_spill] sm:$0xff] %v10274_v6  ;;  %v3331_v50 = vsub.f32 %v13404_v34, %v2908_v33  ;;  %v10282_v52 = vpop.eup %5615  ;;  %v4095_v7 = vadd.f32 %v10261_v41, %v4094_v1  ;;  %v4098_v17 = vadd.f32 %v10274_v6, %v10266_v30  ;;  %5635 = vpow2.f32 %v3679_v10  ;;  %v13409_v61 = vld [vmem:[#allocation267_spill] sm:$0xff]  ;;  %v13426_v48 = vld [vmem:[#allocation170_spill] sm:$0xff] }
 0x339   : > { %13405 = vst [vmem:[#allocation360_spill] sm:$0xff] %v10282_v52  ;;  %v3332_v51 = vsub.f32 %v13406_v9, %v2908_v33  ;;  %v10290_v32 = vpop.eup %5617  ;;  %vm2711_vm3 = vcmp.ge.f32.partialorder %v7575_v29, 0.0  ;;  %5637 = vpow2.f32 %v3681_v0  ;;  %v3333_v20 = vsub.f32 %v13408_v22, %v2908_v33  ;;  %v13411_v9 = vld [vmem:[#allocation318_spill] sm:$0xff]  ;;  %v13412_v6 = vld [vmem:[#allocation375_spill] sm:$0xff] }
 0x33a   : > { %13407 = vst [vmem:[#allocation241_spill] sm:$0xff] %v10290_v32  ;;  %v3334_v5 = vsub.f32 %v13409_v61, %v2908_v33  ;;  %v3703_v34 = vmul.f32 1.442695, %v3331_v50  ;;  %v10295_v47 = vpop.eup %5619  ;;  %4096 = vadd.xlane.f32.xlu1 %v4095_v7  ;;  %v4099_v1 = vadd.f32 %v10282_v52, %v4098_v17  ;;  %5639 = vpow2.f32 %v10224_v24  ;;  %v13414_v50 = vld [vmem:[#allocation71_spill] sm:$0xff]  ;;  %v13419_v61 = vld [vmem:[#allocation268_spill] sm:$0xff]  ;;  %v13492_v52 = vld [vmem:[#allocation382_spill] sm:$0xff] }
 0x33b   : > { %13410 = vst [vmem:[#allocation242_spill] sm:$0xff] %v10295_v47  ;;  %v3705_v10 = vmul.f32 1.442695, %v3332_v51  ;;  %v2909_v30 = vsel %vm2709_vm1, %v13412_v6, %v13411_v9  ;;  %v10303_v41 = vpop.eup %5621  ;;  %5641 = vpow2.f32 %v10226_v42  ;;  %v10306_v0 = vmul.f32 1.442695, %v3333_v20  ;;  %v13418_v42 = vld [vmem:[#allocation120_spill] sm:$0xff] }
 0x33c   : > { %13413 = vst [vmem:[#allocation243_spill] sm:$0xff] %v10303_v41  ;;  %v10308_v33 = vmul.f32 1.442695, %v3334_v5  ;;  %v3335_v7 = vsub.f32 %v13414_v50, %v2909_v30  ;;  %v10311_v22 = vpop.eup %5623  ;;  %v4100_v24 = vadd.f32 %v10290_v32, %v4099_v1  ;;  %v4103_v17 = vadd.f32 %v10303_v41, %v10295_v47  ;;  %v13422_v47 = vld [vmem:[#allocation376_spill] sm:$0xff]  ;;  %v10329_v32 = vpop.xlane.xlu0 %1530 }
 0x33d   : > { %13415 = vst [vmem:[#allocation244_spill] sm:$0xff] %v10311_v22  ;;  %5643 = vpow2.f32 %v3687_v26  ;;  %v3336_v6 = vsub.f32 %v13416_v25, %v2909_v30  ;;  %v10317_v51 = vpop.eup %5625  ;;  %vm2712_vm4 = vcmp.ge.f32.partialorder %v7747_v19, 0.0  ;;  %v3337_v20 = vsub.f32 %v13418_v42, %v2909_v30  ;;  %v13421_v26 = vld [vmem:[#allocation319_spill] sm:$0xff]  ;;  %v13424_v42 = vld [vmem:[#allocation72_spill] sm:$0xff] }
 0x33e   : > { %13417 = vst [vmem:[#allocation304_spill] sm:$0xff] %v10317_v51  ;;  %5645 = vpow2.f32 %v3689_v15  ;;  %v3338_v5 = vsub.f32 %v13419_v61, %v2909_v30  ;;  %v3711_v9 = vmul.f32 1.442695, %v3335_v7  ;;  %v10322_v50 = vpop.eup %5627  ;;  %4101 = vadd.xlane.f32.xlu1 %v4100_v24  ;;  %v4104_v1 = vadd.f32 %v10311_v22, %v4103_v17 }
 0x33f   : > { %13420 = vst [vmem:[#allocation361_spill] sm:$0xff] %v10322_v50  ;;  %5647 = vpow2.f32 %v3691_v28  ;;  %v3713_v41 = vmul.f32 1.442695, %v3336_v6  ;;  %v2910_v25 = vsel %vm2710_vm2, %v13422_v47, %v13421_v26  ;;  %v10331_v15 = vpop.eup %5629  ;;  %v3715_v30 = vmul.f32 1.442695, %v3337_v20 }
 0x340   : > { %13423 = vst [vmem:[#allocation245_spill] sm:$0xff] %v10331_v15  ;;  %5649 = vpow2.f32 %v10252_v39  ;;  %v10334_v7 = vmul.f32 1.442695, %v3338_v5  ;;  %v3339_v24 = vsub.f32 %v13424_v42, %v2910_v25  ;;  %v10337_v61 = vpop.eup %5631  ;;  %v4105_v28 = vadd.f32 %v10317_v51, %v4104_v1  ;;  %v13428_v39 = vld [vmem:[#allocation121_spill] sm:$0xff] }
 0x341   : > { %13425 = vst [vmem:[#allocation246_spill] sm:$0xff] %v10337_v61  ;;  %v4108_v17 = vadd.f32 %v10331_v15, %v10322_v50  ;;  %5651 = vpow2.f32 %v3695_v40  ;;  %v3340_v47 = vsub.f32 %v13426_v48, %v2910_v25  ;;  %v10343_v6 = vpop.eup %5633  ;;  %vm2713_vm5 = vcmp.ge.f32.partialorder %v7579_v31, 0.0  ;;  %v13429_v5 = vld [vmem:[#allocation269_spill] sm:$0xff]  ;;  %v13431_v15 = vld [vmem:[#allocation320_spill] sm:$0xff] }
 0x342   : > { %13427 = vst [vmem:[#allocation247_spill] sm:$0xff] %v10343_v6  ;;  %5653 = vpow2.f32 %v3697_v18  ;;  %v3341_v20 = vsub.f32 %v13428_v39, %v2910_v25  ;;  %v3342_v26 = vsub.f32 %v13429_v5, %v2910_v25  ;;  %v3719_v42 = vmul.f32 1.442695, %v3339_v24  ;;  %v10348_v22 = vpop.eup %5635  ;;  %4106 = vadd.xlane.f32.xlu1 %v4105_v28  ;;  %v13432_v48 = vld [vmem:[#allocation377_spill] sm:$0xff] }
 0x343   : > { %13430 = vst [vmem:[#allocation248_spill] sm:$0xff] %v10348_v22  ;;  %v4109_v1 = vadd.f32 %v10337_v61, %v4108_v17  ;;  %5655 = vpow2.f32 %v10277_v55  ;;  %v3721_v40 = vmul.f32 1.442695, %v3340_v47  ;;  %v2911_v50 = vsel %vm2711_vm3, %v13432_v48, %v13431_v15  ;;  %v10356_v51 = vpop.eup %5637  ;;  %v13434_v24 = vld [vmem:[#allocation73_spill] sm:$0xff]  ;;  %v13436_v47 = vld [vmem:[#allocation171_spill] sm:$0xff]  ;;  %v10368_v15 = vpop.xlane.xlu0 %1535 }
 0x344   : > { %13433 = vst [vmem:[#allocation18_spill] sm:$0xff] %v10356_v51  ;;  %5657 = vpow2.f32 %v10279_v36  ;;  %v3723_v18 = vmul.f32 1.442695, %v3341_v20  ;;  %v10359_v25 = vmul.f32 1.442695, %v3342_v26  ;;  %v3343_v39 = vsub.f32 %v13434_v24, %v2911_v50  ;;  %v10362_v28 = vpop.eup %5639  ;;  %v13438_v36 = vld [vmem:[#allocation122_spill] sm:$0xff] }
 0x345   : > { %13435 = vst [vmem:[#allocation362_spill] sm:$0xff] %v10362_v28  ;;  %v4110_v17 = vadd.f32 %v10343_v6, %v4109_v1  ;;  %v4113_v55 = vadd.f32 %v10356_v51, %v10348_v22  ;;  %5659 = vpow2.f32 %v3703_v34  ;;  %v3344_v29 = vsub.f32 %v13436_v47, %v2911_v50  ;;  %v10370_v5 = vpop.eup %5641  ;;  %v13439_v26 = vld [vmem:[#allocation270_spill] sm:$0xff]  ;;  %v13441_v47 = vld [vmem:[#allocation321_spill] sm:$0xff] }
 0x346   : > { %13437 = vst [vmem:[#allocation249_spill] sm:$0xff] %v10370_v5  ;;  %vm2714_vm6 = vcmp.ge.f32.partialorder %v7781_v3, 0.0  ;;  %5661 = vpow2.f32 %v3705_v10  ;;  %v3345_v20 = vsub.f32 %v13438_v36, %v2911_v50  ;;  %v3346_v48 = vsub.f32 %v13439_v26, %v2911_v50  ;;  %v13442_v51 = vld [vmem:[#allocation378_spill] sm:$0xff]  ;;  %v13449_v26 = vld [vmem:[#allocation271_spill] sm:$0xff]  ;;  %v13457_v31 = vld [vmem:[#allocation173_spill] sm:$0xff] }
 0x347   : > { %v3727_v24 = vmul.f32 1.442695, %v3343_v39  ;;  %v10375_v61 = vpop.eup %5643  ;;  %4111 = vadd.xlane.f32.xlu1 %v4110_v17  ;;  %v4114_v1 = vadd.f32 %v10362_v28, %v4113_v55  ;;  %5663 = vpow2.f32 %v10306_v0  ;;  %v3729_v34 = vmul.f32 1.442695, %v3344_v29  ;;  %v13444_v39 = vld [vmem:[#allocation74_spill] sm:$0xff]  ;;  %v13446_v29 = vld [vmem:[#allocation172_spill] sm:$0xff] }
 0x348   : > { %13440 = vst [vmem:[#allocation250_spill] sm:$0xff] %v10375_v61  ;;  %v2912_v22 = vsel %vm2712_vm4, %v13442_v51, %v13441_v47  ;;  %v10383_v6 = vpop.eup %5645  ;;  %5665 = vpow2.f32 %v10308_v33  ;;  %v3731_v10 = vmul.f32 1.442695, %v3345_v20  ;;  %v10386_v50 = vmul.f32 1.442695, %v3346_v48  ;;  %v13448_v33 = vld [vmem:[#allocation123_spill] sm:$0xff] }
 0x349   : > { %13443 = vst [vmem:[#allocation251_spill] sm:$0xff] %v10383_v6  ;;  %v3347_v36 = vsub.f32 %v13444_v39, %v2912_v22  ;;  %v10389_v17 = vpop.eup %5647  ;;  %v4115_v55 = vadd.f32 %v10370_v5, %v4114_v1  ;;  %v4118_v0 = vadd.f32 %v10383_v6, %v10375_v61  ;;  %5667 = vpow2.f32 %v3711_v9  ;;  %v10403_v9 = vpop.xlane.xlu0 %1540  ;;  %v13453_v61 = vld [vmem:[#allocation379_spill] sm:$0xff] }
 0x34a   : > { %13445 = vst [vmem:[#allocation252_spill] sm:$0xff] %v10389_v17  ;;  %v3348_v19 = vsub.f32 %v13446_v29, %v2912_v22  ;;  %v10395_v51 = vpop.eup %5649  ;;  %vm2715_vm7 = vcmp.ge.f32.partialorder %v7600_v63, 0.0  ;;  %5669 = vpow2.f32 %v3713_v41  ;;  %v3349_v20 = vsub.f32 %v13448_v33, %v2912_v22  ;;  %13451 = vst [vmem:[#allocation26_spill] sm:$0xff] %v10403_v9  ;;  %v13452_v29 = vld [vmem:[#allocation322_spill] sm:$0xff] }
 0x34b   : > { %13447 = vst [vmem:[#allocation305_spill] sm:$0xff] %v10395_v51  ;;  %v3350_v48 = vsub.f32 %v13449_v26, %v2912_v22  ;;  %v3735_v47 = vmul.f32 1.442695, %v3347_v36  ;;  %v10400_v39 = vpop.eup %5651  ;;  %4116 = vadd.xlane.f32.xlu1 %v4115_v55  ;;  %v4119_v1 = vadd.f32 %v10389_v17, %v4118_v0  ;;  %5671 = vpow2.f32 %v3715_v30  ;;  %v13455_v55 = vld [vmem:[#allocation75_spill] sm:$0xff] }
 0x34c   : > { %13450 = vst [vmem:[#allocation363_spill] sm:$0xff] %v10400_v39  ;;  %v3737_v6 = vmul.f32 1.442695, %v3348_v19  ;;  %v2913_v5 = vsel %vm2713_vm5, %v13453_v61, %v13452_v29  ;;  %v10409_v41 = vpop.eup %5653  ;;  %5673 = vpow2.f32 %v10334_v7  ;;  %v10412_v22 = vmul.f32 1.442695, %v3349_v20  ;;  %v13459_v7 = vld [vmem:[#allocation124_spill] sm:$0xff] }
 0x34d   : > { %13454 = vst [vmem:[#allocation253_spill] sm:$0xff] %v10409_v41  ;;  %v10414_v36 = vmul.f32 1.442695, %v3350_v48  ;;  %v3351_v33 = vsub.f32 %v13455_v55, %v2913_v5  ;;  %v10417_v0 = vpop.eup %5655  ;;  %v4120_v30 = vadd.f32 %v10395_v51, %v4119_v1  ;;  %v4123_v19 = vadd.f32 %v10409_v41, %v10400_v39  ;;  %v13460_v29 = vld [vmem:[#allocation273_spill] sm:$0xff]  ;;  %v13462_v41 = vld [vmem:[#allocation323_spill] sm:$0xff] }
 0x34e   : > { %13456 = vst [vmem:[#allocation254_spill] sm:$0xff] %v10417_v0  ;;  %5675 = vpow2.f32 %v3719_v42  ;;  %v3352_v61 = vsub.f32 %v13457_v31, %v2913_v5  ;;  %v10423_v26 = vpop.eup %5657  ;;  %v3353_v20 = vsub.f32 %v13459_v7, %v2913_v5  ;;  %v3354_v48 = vsub.f32 %v13460_v29, %v2913_v5  ;;  %v13463_v42 = vld [vmem:[#allocation380_spill] sm:$0xff] }
 0x34f   : > { %13458 = vst [vmem:[#allocation255_spill] sm:$0xff] %v10423_v26  ;;  %5677 = vpow2.f32 %v3721_v40  ;;  %v10427_v17 = vmul.f32 1.442695, %v3351_v33  ;;  %v10429_v55 = vpop.eup %5659  ;;  %4121 = vadd.xlane.f32.xlu1 %v4120_v30  ;;  %v4124_v1 = vadd.f32 %v10417_v0, %v4123_v19  ;;  %v2914_v31 = vsel %vm2714_vm6, %v13463_v42, %v13462_v41  ;;  %v13465_v33 = vld [vmem:[#allocation76_spill] sm:$0xff]  ;;  %v10450_v41 = vpop.xlane.xlu0 %1545  ;;  %v13468_v19 = vld [vmem:[#allocation174_spill] sm:$0xff] }
 0x350   : > { %13461 = vst [vmem:[#allocation306_spill] sm:$0xff] %v10429_v55  ;;  %5679 = vpow2.f32 %v3723_v18  ;;  %v3745_v51 = vmul.f32 1.442695, %v3352_v61  ;;  %v10436_v39 = vpop.eup %5661  ;;  %v10439_v40 = vmul.f32 1.442695, %v3353_v20  ;;  %v3355_v7 = vsub.f32 %v13465_v33, %v2914_v31  ;;  %13467 = vst [vmem:[#allocation108_spill] sm:$0xff] %v10450_v41 }
 0x351   : > { %13464 = vst [vmem:[#allocation57_spill] sm:$0xff] %v10436_v39  ;;  %5681 = vpow2.f32 %v10359_v25  ;;  %v10441_v5 = vmul.f32 1.442695, %v3354_v48  ;;  %v10444_v30 = vpop.eup %5663  ;;  %vm2716_vm8 = vcmp.ge.f32.partialorder %v7804_v14, 0.0  ;;  %v4125_v18 = vadd.f32 %v10423_v26, %v4124_v1  ;;  %v13470_v20 = vld [vmem:[#allocation125_spill] sm:$0xff]  ;;  %v13471_v48 = vld [vmem:[#allocation274_spill] sm:$0xff] }
 0x352   : > { %13466 = vst [vmem:[#allocation155_spill] sm:$0xff] %v10444_v30  ;;  %v4128_v3 = vadd.f32 %v10436_v39, %v10429_v55  ;;  %5683 = vpow2.f32 %v3727_v24  ;;  %v3356_v25 = vsub.f32 %v13468_v19, %v2914_v31  ;;  %v10453_v61 = vpop.eup %5665  ;;  %v3357_v29 = vsub.f32 %v13470_v20, %v2914_v31  ;;  %v13473_v39 = vld [vmem:[#allocation324_spill] sm:$0xff]  ;;  %v13474_v55 = vld [vmem:[#allocation381_spill] sm:$0xff] }
 0x353   : > { %13469 = vst [vmem:[#allocation256_spill] sm:$0xff] %v10453_v61  ;;  %5685 = vpow2.f32 %v3729_v34  ;;  %v3358_v42 = vsub.f32 %v13471_v48, %v2914_v31  ;;  %v10457_v33 = vmul.f32 1.442695, %v3355_v7  ;;  %v10459_v0 = vpop.eup %5667  ;;  %4126 = vadd.xlane.f32.xlu1 %v4125_v18  ;;  %v2915_v19 = vsel %vm2715_vm7, %v13474_v55, %v13473_v39  ;;  %v13476_v20 = vld [vmem:[#allocation77_spill] sm:$0xff]  ;;  %v13478_v39 = vld [vmem:[#allocation175_spill] sm:$0xff]  ;;  %v13480_v48 = vld [vmem:[#allocation126_spill] sm:$0xff] }
 0x354   : > { %13472 = vst [vmem:[#allocation307_spill] sm:$0xff] %v10459_v0  ;;  %v4129_v1 = vadd.f32 %v10444_v30, %v4128_v3  ;;  %5687 = vpow2.f32 %v3731_v10  ;;  %v10462_v24 = vmul.f32 1.442695, %v3356_v25  ;;  %v10468_v34 = vpop.eup %5669  ;;  %v10471_v31 = vmul.f32 1.442695, %v3357_v29  ;;  %v648_v10 = vld [vmem:[%s12342_s4 + $0x440] sm:$0xff] }
 0x355   : > { %13475 = vst [vmem:[#allocation364_spill] sm:$0xff] %v10468_v34  ;;  %5689 = vpow2.f32 %v10386_v50  ;;  %v10473_v7 = vmul.f32 1.442695, %v3358_v42  ;;  %v3359_v18 = vsub.f32 %v13476_v20, %v2915_v19  ;;  %v10479_v3 = vpop.eup %5671  ;;  %v4133_v63 = vadd.f32 %v10468_v34, %v10459_v0  ;;  %v649_v55 = vld [vmem:[%s12342_s4 + $0x448] sm:$0xff]  ;;  %v13481_v20 = vld [vmem:[#allocation275_spill] sm:$0xff]  ;;  %v10501_v34 = vpop.xlane.xlu0 %1550  ;;  %v13498_v14 = vld [vmem:[#allocation276_spill] sm:$0xff] }
 0x356   : > { %13477 = vst [vmem:[#allocation58_spill] sm:$0xff] %v10479_v3  ;;  %v4130_v25 = vadd.f32 %v10453_v61, %v4129_v1  ;;  %5691 = vpow2.f32 %v3735_v47  ;;  %v3360_v50 = vsub.f32 %v13478_v39, %v2915_v19  ;;  %v10488_v29 = vpop.eup %5673  ;;  %v3361_v42 = vsub.f32 %v13480_v48, %v2915_v19  ;;  %v650_v1 = vld [vmem:[%s12342_s4 + $0x450] sm:$0xff]  ;;  %13483 = vst [vmem:[#allocation257_spill] sm:$0xff] %v10501_v34  ;;  %v13491_v41 = vld [vmem:[#allocation325_spill] sm:$0xff] }
 0x357   : > { %13479 = vst [vmem:[#allocation156_spill] sm:$0xff] %v10488_v29  ;;  %5693 = vpow2.f32 %v3737_v6  ;;  %v3362_v30 = vsub.f32 %v13481_v20, %v2915_v19  ;;  %v10492_v26 = vmul.f32 1.442695, %v3359_v18  ;;  %v4134_v39 = vadd.f32 %v10479_v3, %v4133_v63  ;;  %v651_v19 = vld [vmem:[%s12342_s4 + $0x458] sm:$0xff]  ;;  %v13484_v18 = vld [vmem:[#allocation6_spill] sm:$0xff] }
 0x358   : > { %v10497_v47 = vpop.eup %5675  ;;  %4131 = vadd.xlane.f32.xlu1 %v4130_v25  ;;  %5695 = vpow2.f32 %v10412_v22  ;;  %v10503_v6 = vmul.f32 1.442695, %v3360_v50  ;;  %v1297_v48 = vmul.f32 %v13484_v18, %v648_v10  ;;  %vm2717_vm9 = vcmp.ge.f32.partialorder %v7632_v35, 0.0  ;;  %v13486_v22 = vld [vmem:[#allocation7_spill] sm:$0xff]  ;;  %v13488_v10 = vld [vmem:[#allocation8_spill] sm:$0xff] }
 0x359   : > { %13482 = vst [vmem:[#allocation109_spill] sm:$0xff] %v10497_v47  ;;  %v10509_v20 = vpop.eup %5677  ;;  %5697 = vpow2.f32 %v10414_v36  ;;  %v10513_v25 = vmul.f32 1.442695, %v3361_v42  ;;  %v10515_v63 = vmul.f32 1.442695, %v3362_v30  ;;  %v1298_v3 = vmul.f32 %v13486_v22, %v649_v55  ;;  %v13490_v36 = vld [vmem:[#allocation9_spill] sm:$0xff] }
 0x35a   : > { %13485 = vst [vmem:[#allocation308_spill] sm:$0xff] %v10509_v20  ;;  %v10518_v50 = vpop.eup %5679  ;;  %v4135_v0 = vadd.f32 %v10488_v29, %v4134_v39  ;;  %v4138_v61 = vadd.f32 %v10509_v20, %v10497_v47  ;;  %5699 = vpow2.f32 %v10427_v17  ;;  %v1299_v28 = vmul.f32 %v13488_v10, %v650_v1  ;;  %v13494_v17 = vld [vmem:[#allocation78_spill] sm:$0xff]  ;;  %v13495_v20 = vld [vmem:[#allocation176_spill] sm:$0xff] }
 0x35b   : > { %13487 = vst [vmem:[#allocation365_spill] sm:$0xff] %v10518_v50  ;;  %v10525_v34 = vpop.eup %5681  ;;  %5701 = vpow2.f32 %v3745_v51  ;;  %v1300_v42 = vmul.f32 %v13490_v36, %v651_v19  ;;  %v1587_v30 = vadd.f32 %v1298_v3, %v1297_v48  ;;  %v2916_v55 = vsel %vm2716_vm8, %v13492_v52, %v13491_v41  ;;  %v13497_v19 = vld [vmem:[#allocation127_spill] sm:$0xff]  ;;  %v13512_v35 = vld [vmem:[#allocation128_spill] sm:$0xff] }
 0x35c   : > { %13489 = vst [vmem:[#allocation59_spill] sm:$0xff] %v10525_v34  ;;  %v10532_v9 = vpop.eup %5683  ;;  %4136 = vadd.xlane.f32.xlu1 %v4135_v0  ;;  %v4139_v39 = vadd.f32 %v10518_v50, %v4138_v61  ;;  %5703 = vpow2.f32 %v10439_v40  ;;  %v3363_v1 = vsub.f32 %v13494_v17, %v2916_v55  ;;  %v3364_v47 = vsub.f32 %v13495_v20, %v2916_v55  ;;  %v652_v0 = vld [vmem:[%s12342_s4 + $0x460] sm:$0xff]  ;;  %v10552_v20 = vpop.xlane.xlu0 %1555 }
 0x35d   : > { %13493 = vst [vmem:[#allocation157_spill] sm:$0xff] %v10532_v9  ;;  %v10538_v51 = vpop.eup %5685  ;;  %5705 = vpow2.f32 %v10441_v5  ;;  %v1588_v3 = vadd.f32 %v1587_v30, %v1299_v28  ;;  %v3365_v48 = vsub.f32 %v13497_v19, %v2916_v55  ;;  %v3366_v52 = vsub.f32 %v13498_v14, %v2916_v55  ;;  %13500 = vst [vmem:[#allocation309_spill] sm:$0xff] %v10552_v20  ;;  %v653_v5 = vld [vmem:[%s12342_s4 + $0x468] sm:$0xff]  ;;  %v654_v30 = vld [vmem:[%s12342_s4 + $0x470] sm:$0xff] }
 0x35e   : > { %13496 = vst [vmem:[#allocation110_spill] sm:$0xff] %v10538_v51  ;;  %v10546_v41 = vpop.eup %5687  ;;  %v4140_v40 = vadd.f32 %v10525_v34, %v4139_v39  ;;  %v4143_v61 = vadd.f32 %v10538_v51, %v10532_v9  ;;  %5707 = vpow2.f32 %v10457_v33  ;;  %v3767_v28 = vmul.f32 1.442695, %v3363_v1  ;;  %v655_v55 = vld [vmem:[%s12342_s4 + $0x478] sm:$0xff]  ;;  %v13682_v20 = vld [vmem:[#allocation52_spill] sm:$0xff] }
 0x35f   : > { %13499 = vst [vmem:[#allocation258_spill] sm:$0xff] %v10546_v41  ;;  %v10563_v39 = vpop.eup %5689  ;;  %5709 = vpow2.f32 %v10462_v24  ;;  %v1589_v33 = vadd.f32 %v1588_v3, %v1300_v42  ;;  %v3769_v17 = vmul.f32 1.442695, %v3364_v47  ;;  %v3771_v19 = vmul.f32 1.442695, %v3365_v48 }
 0x360   : > { %13501 = vst [vmem:[#allocation366_spill] sm:$0xff] %v10563_v39  ;;  %v10566_v1 = vpop.eup %5691  ;;  %vm2718_vm10 = vcmp.ge.f32.partialorder %v7837_v23, 0.0  ;;  %4141 = vadd.xlane.f32.xlu1 %v4140_v40  ;;  %v4144_v14 = vadd.f32 %v10546_v41, %v4143_v61  ;;  %5711 = vpow2.f32 %v10471_v31  ;;  %v3773_v51 = vmul.f32 1.442695, %v3366_v52  ;;  %v13505_v52 = vld [vmem:[#allocation326_spill] sm:$0xff] }
 0x361   : > { %13502 = vst [vmem:[#allocation60_spill] sm:$0xff] %v10566_v1  ;;  %v1301_v9 = vmul.f32 %v13484_v18, %v652_v0  ;;  %v10572_v34 = vpop.eup %5693  ;;  %5713 = vpow2.f32 %v10473_v7  ;;  %1590 = vadd.xlane.f32.xlu0 %v1589_v33  ;;  %v1302_v24 = vmul.f32 %v13486_v22, %v653_v5  ;;  %v1303_v47 = vmul.f32 %v13488_v10, %v654_v30  ;;  %v13506_v0 = vld [vmem:[#allocation383_spill] sm:$0xff]  ;;  %v13526_v23 = vld [vmem:[#allocation178_spill] sm:$0xff] }
 0x362   : > { %13503 = vst [vmem:[#allocation158_spill] sm:$0xff] %v10572_v34  ;;  %v1304_v42 = vmul.f32 %v13490_v36, %v655_v55  ;;  %v10578_v3 = vpop.eup %5695  ;;  %v4145_v48 = vadd.f32 %v10563_v39, %v4144_v14  ;;  %v4148_v31 = vadd.f32 %v10572_v34, %v10566_v1  ;;  %5715 = vpow2.f32 %v10492_v26  ;;  %v13508_v5 = vld [vmem:[#allocation79_spill] sm:$0xff]  ;;  %v13509_v55 = vld [vmem:[#allocation177_spill] sm:$0xff]  ;;  %v10597_v26 = vpop.xlane.xlu0 %1560 }
 0x363   : > { %13504 = vst [vmem:[#allocation111_spill] sm:$0xff] %v10578_v3  ;;  %v2917_v7 = vsel %vm2717_vm9, %v13506_v0, %v13505_v52  ;;  %v10588_v40 = vpop.eup %5697  ;;  %5717 = vpow2.f32 %v10503_v6  ;;  %v1592_v61 = vadd.f32 %v1302_v24, %v1301_v9  ;;  %13511 = vst [vmem:[#allocation367_spill] sm:$0xff] %v10597_v26  ;;  %v13513_v0 = vld [vmem:[#allocation277_spill] sm:$0xff]  ;;  %v656_v9 = vld [vmem:[%s12342_s4 + $0x480] sm:$0xff] }
 0x364   : > { %13507 = vst [vmem:[#allocation259_spill] sm:$0xff] %v10588_v40  ;;  %v3367_v30 = vsub.f32 %v13508_v5, %v2917_v7  ;;  %v3368_v33 = vsub.f32 %v13509_v55, %v2917_v7  ;;  %v10593_v14 = vpop.eup %5699  ;;  %4146 = vadd.xlane.f32.xlu1 %v4145_v48  ;;  %v4149_v34 = vadd.f32 %v10578_v3, %v4148_v31  ;;  %5719 = vpow2.f32 %v10513_v25  ;;  %v657_v25 = vld [vmem:[%s12342_s4 + $0x488] sm:$0xff]  ;;  %v658_v31 = vld [vmem:[%s12342_s4 + $0x490] sm:$0xff] }
 0x365   : > { %13510 = vst [vmem:[#allocation310_spill] sm:$0xff] %v10593_v14  ;;  %v3369_v52 = vsub.f32 %v13512_v35, %v2917_v7  ;;  %v3370_v1 = vsub.f32 %v13513_v0, %v2917_v7  ;;  %v10604_v6 = vpop.eup %5701  ;;  %5721 = vpow2.f32 %v10515_v63  ;;  %v1593_v24 = vadd.f32 %v1592_v61, %v1303_v47  ;;  %v659_v47 = vld [vmem:[%s12342_s4 + $0x498] sm:$0xff]  ;;  %v660_v61 = vld [vmem:[%s12342_s4 + $0x4a0] sm:$0xff] }
 0x366   : > { %13514 = vst [vmem:[#allocation61_spill] sm:$0xff] %v10604_v6  ;;  %v3775_v48 = vmul.f32 1.442695, %v3367_v30  ;;  %v3777_v5 = vmul.f32 1.442695, %v3368_v33  ;;  %v10613_v7 = vpop.eup %5703  ;;  %v4150_v55 = vadd.f32 %v10588_v40, %v4149_v34  ;;  %v4153_v35 = vadd.f32 %v10604_v6, %v10593_v14  ;;  %v13517_v33 = vld [vmem:[#allocation28_spill] sm:$0xff] }
 0x367   : > { %13515 = vst [vmem:[#allocation160_spill] sm:$0xff] %v10613_v7  ;;  %5723 = vpow2.f32 %v3767_v28  ;;  %v3779_v63 = vmul.f32 1.442695, %v3369_v52  ;;  %v10624_v30 = vpop.eup %5705  ;;  %vm2719_vm11 = vcmp.ge.f32.partialorder %v13517_v33, 0.0  ;;  %v1594_v0 = vadd.f32 %v1593_v24, %v1304_v42  ;;  %v13520_v42 = vld [vmem:[#allocation327_spill] sm:$0xff] }
 0x368   : > { %13516 = vst [vmem:[#allocation112_spill] sm:$0xff] %v10624_v30  ;;  %5725 = vpow2.f32 %v3769_v17  ;;  %v3781_v34 = vmul.f32 1.442695, %v3370_v1  ;;  %v1305_v40 = vmul.f32 %v13484_v18, %v656_v9  ;;  %v10628_v6 = vpop.eup %5707  ;;  %4151 = vadd.xlane.f32.xlu1 %v4150_v55  ;;  %v4154_v28 = vadd.f32 %v10613_v7, %v4153_v35  ;;  %v13521_v1 = vld [vmem:[#allocation384_spill] sm:$0xff]  ;;  %v10653_v7 = vpop.xlane.xlu1 %1465 }
 0x369   : > { %13518 = vst [vmem:[#allocation260_spill] sm:$0xff] %v10628_v6  ;;  %5727 = vpow2.f32 %v3771_v19  ;;  %v1306_v52 = vmul.f32 %v13486_v22, %v657_v25  ;;  %v1307_v14 = vmul.f32 %v13488_v10, %v658_v31  ;;  %v10633_v3 = vpop.eup %5709  ;;  %1595 = vadd.xlane.f32.xlu0 %v1594_v0  ;;  %v1308_v17 = vmul.f32 %v13490_v36, %v659_v47  ;;  %v10646_v31 = vpop.xlane.xlu0 %1565  ;;  %v13525_v47 = vld [vmem:[#allocation80_spill] sm:$0xff] }
 0x36a   : > { %13519 = vst [vmem:[#allocation311_spill] sm:$0xff] %v10633_v3  ;;  %5729 = vpow2.f32 %v3773_v51  ;;  %v2918_v9 = vsel %vm2718_vm10, %v13521_v1, %v13520_v42  ;;  %v1309_v24 = vmul.f32 %v13484_v18, %v660_v61  ;;  %v10641_v55 = vpop.eup %5711  ;;  %v4155_v19 = vadd.f32 %v10624_v30, %v4154_v28  ;;  %13523 = vst [vmem:[#allocation62_spill] sm:$0xff] %v10646_v31  ;;  %v13527_v1 = vld [vmem:[#allocation129_spill] sm:$0xff] }
 0x36b   : > { %13522 = vst [vmem:[#allocation368_spill] sm:$0xff] %v10641_v55  ;;  %v4158_v25 = vadd.f32 %v10633_v3, %v10628_v6  ;;  %5731 = vpow2.f32 %v3775_v48  ;;  %v1597_v51 = vadd.f32 %v1306_v52, %v1305_v40  ;;  %v10648_v35 = vpop.eup %5713  ;;  %v3371_v0 = vsub.f32 %v13525_v47, %v2918_v9  ;;  %v661_v28 = vld [vmem:[%s12342_s4 + $0x4a8] sm:$0xff]  ;;  %v662_v47 = vld [vmem:[%s12342_s4 + $0x4b0] sm:$0xff] }
 0x36c   : > { %13524 = vst [vmem:[#allocation161_spill] sm:$0xff] %v10648_v35  ;;  %5733 = vpow2.f32 %v3777_v5  ;;  %v3372_v42 = vsub.f32 %v13526_v23, %v2918_v9  ;;  %v3373_v61 = vsub.f32 %v13527_v1, %v2918_v9  ;;  %v10658_v3 = vpop.eup %5715  ;;  %4156 = vadd.xlane.f32.xlu1 %v4155_v19  ;;  %v13529_v5 = vld [vmem:[#allocation278_spill] sm:$0xff]  ;;  %v663_v23 = vld [vmem:[%s12342_s4 + $0x4b8] sm:$0xff]  ;;  %v664_v1 = vld [vmem:[%s12342_s4 + $0x4c0] sm:$0xff]  ;;  %v1310_v41 = vmul.f32 %v13486_v22, %v661_v28 }
 0x36d   : > { %13528 = vst [vmem:[#allocation113_spill] sm:$0xff] %v10658_v3  ;;  %v4159_v40 = vadd.f32 %v10641_v55, %v4158_v25  ;;  %5735 = vpow2.f32 %v3779_v63  ;;  %v1598_v48 = vadd.f32 %v1597_v51, %v1307_v14  ;;  %v3374_v52 = vsub.f32 %v13529_v5, %v2918_v9  ;;  %v10671_v6 = vpop.eup %5717  ;;  %v13532_v9 = vld [vmem:[#allocation35_spill] sm:$0xff] }
 0x36e   : > { %13530 = vst [vmem:[#allocation261_spill] sm:$0xff] %v10671_v6  ;;  %5737 = vpow2.f32 %v3781_v34  ;;  %v3783_v19 = vmul.f32 1.442695, %v3371_v0  ;;  %v3785_v63 = vmul.f32 1.442695, %v3372_v42  ;;  %v10673_v25 = vpop.eup %5719  ;;  %vm2720_vm12 = vcmp.ge.f32.partialorder %v13532_v9, 0.0 }
 0x36f   : > { %v3787_v14 = vmul.f32 1.442695, %v3373_v61  ;;  %13531 = vst [vmem:[#allocation312_spill] sm:$0xff] %v10673_v25  ;;  %v4160_v51 = vadd.f32 %v10648_v35, %v4159_v40  ;;  %v4163_v5 = vadd.f32 %v10671_v6, %v10658_v3  ;;  %v1599_v55 = vadd.f32 %v1598_v48, %v1308_v17  ;;  %v10679_v39 = vpop.eup %5721  ;;  %v10687_v40 = vpop.xlane.xlu0 %1570  ;;  %v13536_v17 = vld [vmem:[#allocation328_spill] sm:$0xff]  ;;  %v13537_v48 = vld [vmem:[#allocation385_spill] sm:$0xff] }
 0x370   : > { %v3789_v30 = vmul.f32 1.442695, %v3374_v52  ;;  %13533 = vst [vmem:[#allocation369_spill] sm:$0xff] %v10679_v39  ;;  %5739 = vpow2.f32 %v3783_v19  ;;  %v1311_v34 = vmul.f32 %v13488_v10, %v662_v47  ;;  %v1312_v0 = vmul.f32 %v13490_v36, %v663_v23  ;;  %13535 = vst [vmem:[#allocation162_spill] sm:$0xff] %v10687_v40  ;;  %v13539_v23 = vld [vmem:[#allocation81_spill] sm:$0xff] }
 0x371   : > { %v10684_v42 = vpop.eup %5723  ;;  %4161 = vadd.xlane.f32.xlu1 %v4160_v51  ;;  %v4164_v61 = vadd.f32 %v10673_v25, %v4163_v5  ;;  %1600 = vadd.xlane.f32.xlu0 %v1599_v55  ;;  %5741 = vpow2.f32 %v3785_v63  ;;  %v2919_v52 = vsel %vm2719_vm11, %v13537_v48, %v13536_v17  ;;  %v1313_v28 = vmul.f32 %v13484_v18, %v664_v1  ;;  %v13540_v51 = vld [vmem:[#allocation179_spill] sm:$0xff]  ;;  %v3992_v5 = vpop.xlane.xlu1 %3991  ;;  %v665_v55 = vld [vmem:[%s12342_s4 + $0x4c8] sm:$0xff]  ;;  %v13542_v17 = vld [vmem:[#allocation130_spill] sm:$0xff] }
 0x372   : > { %13534 = vst [vmem:[#allocation63_spill] sm:$0xff] %v10684_v42  ;;  %v10694_v19 = vpop.eup %5725  ;;  %5743 = vpow2.f32 %v3787_v14  ;;  %v1602_v47 = vadd.f32 %v1310_v41, %v1309_v24  ;;  %v3375_v6 = vsub.f32 %v13539_v23, %v2919_v52  ;;  %v3376_v3 = vsub.f32 %v13540_v51, %v2919_v52  ;;  %v666_v41 = vld [vmem:[%s12342_s4 + $0x4d0] sm:$0xff]  ;;  %v13544_v23 = vld [vmem:[#allocation279_spill] sm:$0xff] }
 0x373   : > { %13538 = vst [vmem:[#allocation114_spill] sm:$0xff] %v10694_v19  ;;  %v10701_v63 = vpop.eup %5727  ;;  %v4165_v33 = vadd.f32 %v10679_v39, %v4164_v61  ;;  %v4168_v1 = vadd.f32 %v10694_v19, %v10684_v42  ;;  %5745 = vpow2.f32 %v3789_v30  ;;  %v3377_v14 = vsub.f32 %v13542_v17, %v2919_v52  ;;  %v667_v61 = vld [vmem:[%s12342_s4 + $0x4d8] sm:$0xff]  ;;  %v13546_v30 = vld [vmem:[#allocation29_spill] sm:$0xff] }
 0x374   : > { %13541 = vst [vmem:[#allocation262_spill] sm:$0xff] %v10701_v63  ;;  %v10710_v24 = vpop.eup %5729  ;;  %v1603_v48 = vadd.f32 %v1602_v47, %v1311_v34  ;;  %v3378_v51 = vsub.f32 %v13544_v23, %v2919_v52  ;;  %v3791_v25 = vmul.f32 1.442695, %v3375_v6  ;;  %v3793_v35 = vmul.f32 1.442695, %v3376_v3  ;;  %v668_v6 = vld [vmem:[%s12342_s4 + $0x4e0] sm:$0xff] }
 0x375   : > { %13543 = vst [vmem:[#allocation313_spill] sm:$0xff] %v10710_v24  ;;  %v10716_v39 = vpop.eup %5731  ;;  %vm2721_vm13 = vcmp.ge.f32.partialorder %v13546_v30, 0.0  ;;  %4166 = vadd.xlane.f32.xlu1 %v4165_v33  ;;  %v4169_v17 = vadd.f32 %v10701_v63, %v4168_v1  ;;  %v3795_v19 = vmul.f32 1.442695, %v3377_v14  ;;  %5747 = vrcp.f32 %v3992_v5  ;;  %v3997_v9 = vpop.xlane.xlu1 %3996  ;;  %v13567_v30 = vld [vmem:[#allocation132_spill] sm:$0xff] }
 0x376   : > { %13545 = vst [vmem:[#allocation370_spill] sm:$0xff] %v10716_v39  ;;  %v1314_v42 = vmul.f32 %v13486_v22, %v665_v55  ;;  %v10724_v3 = vpop.eup %5733  ;;  %v1604_v34 = vadd.f32 %v1603_v48, %v1312_v0  ;;  %5749 = vpow2.f32 %v3791_v25  ;;  %v3797_v52 = vmul.f32 1.442695, %v3378_v51  ;;  %v3987_v55 = vpop.xlane.xlu0 %3986  ;;  %v13550_v25 = vld [vmem:[#allocation329_spill] sm:$0xff]  ;;  %v13551_v48 = vld [vmem:[#allocation386_spill] sm:$0xff] }
 0x377   : > { %13547 = vst [vmem:[#allocation64_spill] sm:$0xff] %v10724_v3  ;;  %v1315_v47 = vmul.f32 %v13488_v10, %v666_v41  ;;  %v10727_v23 = vpop.eup %5735  ;;  %v4170_v33 = vadd.f32 %v10710_v24, %v4169_v17  ;;  %v4173_v5 = vadd.f32 %v10724_v3, %v10716_v39  ;;  %5751 = vpow2.f32 %v3793_v35  ;;  %v13552_v35 = vld [vmem:[#allocation82_spill] sm:$0xff]  ;;  %v13553_v39 = vld [vmem:[#allocation180_spill] sm:$0xff] }
 0x378   : > { %13548 = vst [vmem:[#allocation163_spill] sm:$0xff] %v10727_v23  ;;  %v1316_v1 = vmul.f32 %v13490_v36, %v667_v61  ;;  %v10733_v14 = vpop.eup %5737  ;;  %1605 = vadd.xlane.f32.xlu0 %v1604_v34  ;;  %5753 = vpow2.f32 %v3795_v19  ;;  %v1607_v0 = vadd.f32 %v1314_v42, %v1313_v28  ;;  %v2920_v41 = vsel %vm2720_vm12, %v13551_v48, %v13550_v25  ;;  %v13555_v42 = vld [vmem:[#allocation131_spill] sm:$0xff]  ;;  %v13556_v34 = vld [vmem:[#allocation281_spill] sm:$0xff] }
 0x379   : > { %13549 = vst [vmem:[#allocation25_spill] sm:$0xff] %v10733_v14  ;;  %v1317_v51 = vmul.f32 %v13484_v18, %v668_v6  ;;  %4171 = vadd.xlane.f32.xlu1 %v4170_v33  ;;  %v4174_v17 = vadd.f32 %v10727_v23, %v4173_v5  ;;  %5755 = vpow2.f32 %v3797_v52  ;;  %v3379_v3 = vsub.f32 %v13552_v35, %v2920_v41  ;;  %v669_v6 = vld [vmem:[%s12342_s4 + $0x4e8] sm:$0xff]  ;;  %v670_v52 = vld [vmem:[%s12342_s4 + $0x4f0] sm:$0xff]  ;;  %v13561_v23 = vld [vmem:[#allocation387_spill] sm:$0xff] }
 0x37a   : > { %v3380_v61 = vsub.f32 %v13553_v39, %v2920_v41  ;;  %v10743_v24 = vpop.eup %5739  ;;  %5757 = vrcp.f32 %v3987_v55  ;;  %v1608_v19 = vadd.f32 %v1607_v0, %v1315_v47  ;;  %v3381_v28 = vsub.f32 %v13555_v42, %v2920_v41  ;;  %v671_v39 = vld [vmem:[%s12342_s4 + $0x4f8] sm:$0xff]  ;;  %v672_v0 = vld [vmem:[%s12342_s4 + $0x500] sm:$0xff] }
 0x37b   : > { %13554 = vst [vmem:[#allocation115_spill] sm:$0xff] %v10743_v24  ;;  %v3382_v63 = vsub.f32 %v13556_v34, %v2920_v41  ;;  %v10756_v33 = vpop.eup %5741  ;;  %v4175_v47 = vadd.f32 %v10733_v14, %v4174_v17  ;;  %v3799_v5 = vmul.f32 1.442695, %v3379_v3  ;;  %5759 = vrcp.f32 %v3997_v9  ;;  %v13560_v14 = vld [vmem:[#allocation330_spill] sm:$0xff] }
 0x37c   : > { %13557 = vst [vmem:[#allocation263_spill] sm:$0xff] %v10756_v33  ;;  %v3801_v55 = vmul.f32 1.442695, %v3380_v61  ;;  %v10762_v25 = vpop.eup %5743  ;;  %v4178_v48 = vadd.f32 %v10756_v33, %v10743_v24  ;;  %v1609_v41 = vadd.f32 %v1608_v19, %v1316_v1  ;;  %v3803_v35 = vmul.f32 1.442695, %v3381_v28  ;;  %v10777_v28 = vpop.xlane.xlu0 %1575 }
 0x37d   : > { %13558 = vst [vmem:[#allocation314_spill] sm:$0xff] %v10762_v25  ;;  %v3805_v42 = vmul.f32 1.442695, %v3382_v63  ;;  %v10766_v34 = vpop.eup %5745  ;;  %4176 = vadd.xlane.f32.xlu1 %v4175_v47  ;;  %5761 = vpow2.f32 %v3799_v5  ;;  %v1318_v3 = vmul.f32 %v13486_v22, %v669_v6  ;;  %v1319_v17 = vmul.f32 %v13488_v10, %v670_v52  ;;  %13562 = vst [vmem:[#allocation65_spill] sm:$0xff] %v10777_v28  ;;  %v13563_v47 = vld [vmem:[#allocation83_spill] sm:$0xff]  ;;  %v13564_v5 = vld [vmem:[#allocation181_spill] sm:$0xff] }
 0x37e   : > { %13559 = vst [vmem:[#allocation371_spill] sm:$0xff] %v10766_v34  ;;  %v1320_v61 = vmul.f32 %v13490_v36, %v671_v39  ;;  %v4179_v9 = vadd.f32 %v10762_v25, %v4178_v48  ;;  %1610 = vadd.xlane.f32.xlu0 %v1609_v41  ;;  %5763 = vpow2.f32 %v3801_v55  ;;  %v2921_v1 = vsel %vm2721_vm13, %v13561_v23, %v13560_v14  ;;  %v13566_v48 = vld [vmem:[#allocation45_spill] sm:$0xff]  ;;  %v13570_v25 = vld [vmem:[#allocation282_spill] sm:$0xff] }
 0x37f   : > { %v1321_v63 = vmul.f32 %v13484_v18, %v672_v0  ;;  %v5748_v19 = vpop.eup %5747  ;;  %5765 = vpow2.f32 %v3803_v35  ;;  %v1612_v6 = vadd.f32 %v1318_v3, %v1317_v51  ;;  %v3383_v52 = vsub.f32 %v13563_v47, %v2921_v1  ;;  %v13569_v0 = vld [vmem:[#allocation37_spill] sm:$0xff] }
 0x380   : > { %v3384_v39 = vsub.f32 %v13564_v5, %v2921_v1  ;;  %v10781_v33 = vpop.eup %5749  ;;  %v4180_v55 = vadd.f32 %v10766_v34, %v4179_v9  ;;  %v4368_v41 = vmul.f32 %v5748_v19, %v13566_v48  ;;  %5767 = vpow2.f32 %v3805_v42  ;;  %v673_v5 = vld [vmem:[%s12342_s4 + $0x508] sm:$0xff]  ;;  %v4002_v48 = vpop.xlane.xlu1 %4001 }
 0x381   : > { %13565 = vst [vmem:[#allocation165_spill] sm:$0xff] %v10781_v33  ;;  %v3385_v23 = vsub.f32 %v13567_v30, %v2921_v1  ;;  %v10786_v14 = vpop.eup %5751  ;;  %vm2722_vm14 = vcmp.ge.f32.partialorder %v13569_v0, 0.0  ;;  %v1613_v35 = vadd.f32 %v1612_v6, %v1319_v17  ;;  %v3386_v51 = vsub.f32 %v13570_v25, %v2921_v1  ;;  %v674_v25 = vld [vmem:[%s12342_s4 + $0x510] sm:$0xff]  ;;  %v675_v1 = vld [vmem:[%s12342_s4 + $0x518] sm:$0xff]  ;;  %v10812_v50 = vpop.xlane.xlu0 %1580  ;;  %v677_v0 = vld [vmem:[%s12342_s4 + $0x528] sm:$0xff] }
 0x382   : > { %13568 = vst [vmem:[#allocation116_spill] sm:$0xff] %v10786_v14  ;;  %v3807_v3 = vmul.f32 1.442695, %v3383_v52  ;;  %v3809_v47 = vmul.f32 1.442695, %v3384_v39  ;;  %v10793_v24 = vpop.eup %5753  ;;  %4181 = vadd.xlane.f32.xlu1 %v4180_v55  ;;  %v4183_v42 = vadd.f32 %v10786_v14, %v10781_v33  ;;  %v4435_v9 = vmul.f32 %v9640_v54, %v4368_v41  ;;  %v13573_v33 = vld [vmem:[#allocation42_spill] sm:$0xff] }
 0x383   : > { %13571 = vst [vmem:[#allocation264_spill] sm:$0xff] %v10793_v24  ;;  %v4436_v19 = vmul.f32 %v9645_v13, %v4368_v41  ;;  %v4437_v17 = vmul.f32 %v9648_v4, %v4368_v41  ;;  %v10806_v6 = vpop.eup %5755  ;;  %v4438_v52 = vmul.f32 %v9652_v16, %v4368_v41  ;;  %v1614_v39 = vadd.f32 %v1613_v35, %v1320_v61 }
 0x384   : > { %13572 = vst [vmem:[#allocation315_spill] sm:$0xff] %v10806_v6  ;;  %5769 = vpow2.f32 %v3807_v3  ;;  %v3811_v55 = vmul.f32 1.442695, %v3385_v23  ;;  %v5758_v54 = vpop.eup %5757  ;;  %v4184_v13 = vadd.f32 %v10793_v24, %v4183_v42  ;;  %v3813_v4 = vmul.f32 1.442695, %v3386_v51  ;;  %13574 = vst [vmem:[#allocation372_spill] sm:$0xff] %v10812_v50 }
 0x385   : > { %5771 = vpow2.f32 %v3809_v47  ;;  %v1322_v30 = vmul.f32 %v13486_v22, %v673_v5  ;;  %v5760_v14 = vpop.eup %5759  ;;  %v4367_v34 = vmul.f32 %v5758_v54, %v13573_v33  ;;  %1615 = vadd.xlane.f32.xlu0 %v1614_v39  ;;  %v1323_v16 = vmul.f32 %v13488_v10, %v674_v25  ;;  %v13575_v23 = vld [vmem:[#allocation46_spill] sm:$0xff]  ;;  %v13578_v5 = vld [vmem:[#allocation293_spill] sm:$0xff]  ;;  %v13579_v42 = vld [vmem:[#allocation288_spill] sm:$0xff] }
 0x386   : > { %5773 = vpow2.f32 %v3811_v55  ;;  %v1324_v61 = vmul.f32 %v13490_v36, %v675_v1  ;;  %v4185_v41 = vadd.f32 %v10806_v6, %v4184_v13  ;;  %v4369_v35 = vmul.f32 %v5760_v14, %v13575_v23  ;;  %v13577_v47 = vld [vmem:[#allocation30_spill] sm:$0xff]  ;;  %v13581_v24 = vld [vmem:[#allocation15_spill] sm:$0xff]  ;;  %v13584_v14 = vld [vmem:[#allocation208_spill] sm:$0xff] }
 0x387   : > { %5775 = vpow2.f32 %v3813_v4  ;;  %v1617_v51 = vadd.f32 %v1322_v30, %v1321_v63  ;;  %v10818_v3 = vpop.eup %5761  ;;  %vm2723_vm15 = vcmp.ge.f32.partialorder %v13577_v47, 0.0  ;;  %v4431_v33 = vmul.f32 %v13578_v5, %v4367_v34  ;;  %v13580_v55 = vld [vmem:[#allocation294_spill] sm:$0xff]  ;;  %v13583_v1 = vld [vmem:[#allocation207_spill] sm:$0xff]  ;;  %v681_v47 = vld [vmem:[%s12342_s4 + $0x548] sm:$0xff] }
 0x388   : > { %13576 = vst [vmem:[#allocation66_spill] sm:$0xff] %v10818_v3  ;;  %v4432_v39 = vmul.f32 %v13579_v42, %v4367_v34  ;;  %v4433_v54 = vmul.f32 %v13580_v55, %v4367_v34  ;;  %v4434_v25 = vmul.f32 %v13581_v24, %v4367_v34  ;;  %v10825_v50 = vpop.eup %5763  ;;  %4186 = vadd.xlane.f32.xlu1 %v4185_v41  ;;  %5777 = vrcp.f32 %v4002_v48  ;;  %v13587_v41 = vld [vmem:[#allocation331_spill] sm:$0xff]  ;;  %v10852_v48 = vpop.xlane.xlu0 %1585 }
 0x389   : > { %13582 = vst [vmem:[#allocation166_spill] sm:$0xff] %v10825_v50  ;;  %v4439_v13 = vmul.f32 %v13583_v1, %v4369_v35  ;;  %v4440_v4 = vmul.f32 %v13584_v14, %v4369_v35  ;;  %v4441_v63 = vmul.f32 %v9694_v44, %v4369_v35  ;;  %v4442_v30 = vmul.f32 %v9700_v43, %v4369_v35  ;;  %v10831_v23 = vpop.eup %5765  ;;  %v13588_v1 = vld [vmem:[#allocation388_spill] sm:$0xff]  ;;  %v4007_v14 = vpop.xlane.xlu1 %4006 }
 0x38a   : > { %13585 = vst [vmem:[#allocation117_spill] sm:$0xff] %v10831_v23  ;;  %v4687_v5 = vadd.f32 %v4435_v9, %v4431_v33  ;;  %v4756_v6 = vadd.f32 %v4436_v19, %v4432_v39  ;;  %v4825_v42 = vadd.f32 %v4437_v17, %v4433_v54  ;;  %v4894_v28 = vadd.f32 %v4438_v52, %v4434_v25  ;;  %v10833_v55 = vpop.eup %5767  ;;  %v676_v43 = vld [vmem:[%s12342_s4 + $0x520] sm:$0xff]  ;;  %v13591_v39 = vld [vmem:[#allocation182_spill] sm:$0xff] }
 0x38b   : > { %13586 = vst [vmem:[#allocation265_spill] sm:$0xff] %v10833_v55  ;;  %v4188_v24 = vadd.f32 %v10825_v50, %v10818_v3  ;;  %v1618_v34 = vadd.f32 %v1617_v51, %v1323_v16  ;;  %v2922_v44 = vsel %vm2722_vm14, %v13588_v1, %v13587_v41  ;;  %13589 = vst [vmem:[#allocation316_spill] sm:$0xff] %v10852_v48  ;;  %v13590_v51 = vld [vmem:[#allocation84_spill] sm:$0xff]  ;;  %5779 = vrcp.f32 %v4007_v14 }
 0x38c   : > { %v10844_v9 = vadd.f32 %v4687_v5, %v4439_v13  ;;  %v10846_v19 = vadd.f32 %v4756_v6, %v4440_v4  ;;  %v10848_v17 = vadd.f32 %v4825_v42, %v4441_v63  ;;  %v10850_v52 = vadd.f32 %v4894_v28, %v4442_v30  ;;  %v678_v6 = vld [vmem:[%s12342_s4 + $0x530] sm:$0xff]  ;;  %v13593_v28 = vld [vmem:[#allocation39_spill] sm:$0xff]  ;;  %v13594_v13 = vld [vmem:[#allocation133_spill] sm:$0xff] }
 0x38d   : > { %v4189_v16 = vadd.f32 %v10831_v23, %v4188_v24  ;;  %v1619_v35 = vadd.f32 %v1618_v34, %v1324_v61  ;;  %v3387_v33 = vsub.f32 %v13590_v51, %v2922_v44  ;;  %v3388_v54 = vsub.f32 %v13591_v39, %v2922_v44  ;;  %v13595_v63 = vld [vmem:[#allocation283_spill] sm:$0xff]  ;;  %v13604_v23 = vld [vmem:[#allocation286_spill] sm:$0xff] }
 0x38e   : > { %v10863_v25 = vpop.eup %5769  ;;  %vm2724_vm0 = vcmp.ge.f32.partialorder %v13593_v28, 0.0  ;;  %v3389_v4 = vsub.f32 %v13594_v13, %v2922_v44  ;;  %v3390_v30 = vsub.f32 %v13595_v63, %v2922_v44  ;;  %v679_v61 = vld [vmem:[%s12342_s4 + $0x538] sm:$0xff]  ;;  %v1325_v5 = vmul.f32 %v13484_v18, %v676_v43 }
 0x38f   : > { %13592 = vst [vmem:[#allocation373_spill] sm:$0xff] %v10863_v25  ;;  %v10872_v42 = vpop.eup %5771  ;;  %v4190_v24 = vadd.f32 %v10833_v55, %v4189_v16  ;;  %1620 = vadd.xlane.f32.xlu0 %v1619_v35  ;;  %v3815_v34 = vmul.f32 1.442695, %v3387_v33  ;;  %v3817_v41 = vmul.f32 1.442695, %v3388_v54  ;;  %v1326_v1 = vmul.f32 %v13486_v22, %v677_v0  ;;  %v13599_v35 = vld [vmem:[#allocation332_spill] sm:$0xff] }
 0x390   : > { %13596 = vst [vmem:[#allocation67_spill] sm:$0xff] %v10872_v42  ;;  %v10876_v51 = vpop.eup %5773  ;;  %v4193_v44 = vadd.f32 %v10872_v42, %v10863_v25  ;;  %v3819_v14 = vmul.f32 1.442695, %v3389_v4  ;;  %v3821_v39 = vmul.f32 1.442695, %v3390_v30  ;;  %v1327_v13 = vmul.f32 %v13488_v10, %v678_v6  ;;  %v13600_v33 = vld [vmem:[#allocation389_spill] sm:$0xff]  ;;  %v4027_v6 = vpop.xlane.xlu0 %4026 }
 0x391   : > { %13597 = vst [vmem:[#allocation167_spill] sm:$0xff] %v10876_v51  ;;  %v10881_v63 = vpop.eup %5775  ;;  %4191 = vadd.xlane.f32.xlu1 %v4190_v24  ;;  %5781 = vpow2.f32 %v3815_v34  ;;  %v1328_v43 = vmul.f32 %v13490_v36, %v679_v61  ;;  %v1622_v16 = vadd.f32 %v1326_v1, %v1325_v5  ;;  %v2923_v0 = vsel %vm2723_vm15, %v13600_v33, %v13599_v35  ;;  %v13601_v42 = vld [vmem:[#allocation85_spill] sm:$0xff]  ;;  %v13602_v30 = vld [vmem:[#allocation183_spill] sm:$0xff]  ;;  %v13603_v24 = vld [vmem:[#allocation134_spill] sm:$0xff] }
 0x392   : > { %13598 = vst [vmem:[#allocation118_spill] sm:$0xff] %v10881_v63  ;;  %v4194_v54 = vadd.f32 %v10876_v51, %v4193_v44  ;;  %5783 = vpow2.f32 %v3817_v41  ;;  %v3391_v4 = vsub.f32 %v13601_v42, %v2923_v0  ;;  %v3392_v25 = vsub.f32 %v13602_v30, %v2923_v0  ;;  %v680_v5 = vld [vmem:[%s12342_s4 + $0x540] sm:$0xff]  ;;  %v682_v44 = vld [vmem:[%s12342_s4 + $0x550] sm:$0xff]  ;;  %v13606_v30 = vld [vmem:[#allocation333_spill] sm:$0xff] }
 0x393   : > { %5785 = vpow2.f32 %v3819_v14  ;;  %v1623_v55 = vadd.f32 %v1622_v16, %v1327_v13  ;;  %v3393_v34 = vsub.f32 %v13603_v24, %v2923_v0  ;;  %v3394_v61 = vsub.f32 %v13604_v23, %v2923_v0  ;;  %v683_v23 = vld [vmem:[%s12342_s4 + $0x558] sm:$0xff]  ;;  %v5778_v14 = vpop.eup %5777  ;;  %v13605_v33 = vld [vmem:[#allocation68_spill] sm:$0xff]  ;;  %v13607_v24 = vld [vmem:[#allocation390_spill] sm:$0xff] }
 0x394   : > { %v4195_v41 = vadd.f32 %v10881_v63, %v4194_v54  ;;  %5787 = vpow2.f32 %v3821_v39  ;;  %v3823_v42 = vmul.f32 1.442695, %v3391_v4  ;;  %v3825_v1 = vmul.f32 1.442695, %v3392_v25 }
 0x395   : > { %v1624_v13 = vadd.f32 %v1623_v55, %v1328_v43  ;;  %v3827_v16 = vmul.f32 1.442695, %v3393_v34  ;;  %v3829_v35 = vmul.f32 1.442695, %v3394_v61  ;;  %5789 = vrcp.f32 %v4027_v6  ;;  %v5780_v43 = vpop.eup %5779  ;;  %v13608_v6 = vld [vmem:[#allocation209_spill] sm:$0xff]  ;;  %v13609_v61 = vld [vmem:[#allocation51_spill] sm:$0xff] }
 0x396   : > { %4196 = vadd.xlane.f32.xlu1 %v4195_v41  ;;  %v4370_v0 = vmul.f32 %v5778_v14, %v13605_v33  ;;  %5791 = vpow2.f32 %v3823_v42  ;;  %v1329_v39 = vmul.f32 %v13484_v18, %v680_v5  ;;  %v1330_v25 = vmul.f32 %v13486_v22, %v681_v47  ;;  %v13610_v42 = vld [vmem:[#allocation150_spill] sm:$0xff]  ;;  %v13611_v14 = vld [vmem:[#allocation103_spill] sm:$0xff] }
 0x397   : > { %1625 = vadd.xlane.f32.xlu0 %v1624_v13  ;;  %5793 = vpow2.f32 %v3825_v1  ;;  %v1331_v54 = vmul.f32 %v13488_v10, %v682_v44  ;;  %v1332_v4 = vmul.f32 %v13490_v36, %v683_v23  ;;  %v2924_v55 = vsel %vm2724_vm0, %v13607_v24, %v13606_v30  ;;  %v13612_v13 = vld [vmem:[#allocation69_spill] sm:$0xff]  ;;  %v4012_v44 = vpop.xlane.xlu1 %4011  ;;  %v13613_v23 = vld [vmem:[#allocation86_spill] sm:$0xff] }
 0x398   : > { %v4443_v34 = vmul.f32 %v13608_v6, %v4370_v0  ;;  %v4444_v41 = vmul.f32 %v13609_v61, %v4370_v0  ;;  %v4445_v5 = vmul.f32 %v13610_v42, %v4370_v0  ;;  %v4446_v47 = vmul.f32 %v13611_v14, %v4370_v0  ;;  %v13615_v61 = vld [vmem:[#allocation31_spill] sm:$0xff]  ;;  %v13616_v0 = vld [vmem:[#allocation210_spill] sm:$0xff] }
 0x399   : > { %v4371_v1 = vmul.f32 %v5780_v43, %v13612_v13  ;;  %5795 = vpow2.f32 %v3827_v16  ;;  %v1627_v33 = vadd.f32 %v1330_v25, %v1329_v39  ;;  %v3395_v63 = vsub.f32 %v13613_v23, %v2924_v55  ;;  %v13617_v43 = vld [vmem:[#allocation10_spill] sm:$0xff]  ;;  %v13618_v14 = vld [vmem:[#allocation211_spill] sm:$0xff] }
 0x39a   : > { %v4689_v51 = vadd.f32 %v10844_v9, %v4443_v34  ;;  %v4758_v28 = vadd.f32 %v10846_v19, %v4444_v41  ;;  %v4827_v30 = vadd.f32 %v10848_v17, %v4445_v5  ;;  %v4896_v24 = vadd.f32 %v10850_v52, %v4446_v47  ;;  %v13620_v19 = vld [vmem:[#allocation184_spill] sm:$0xff]  ;;  %v13621_v34 = vld [vmem:[#allocation135_spill] sm:$0xff] }
 0x39b   : > { %v10925_v6 = vpop.eup %5781  ;;  %vm2725_vm1 = vcmp.ge.f32.partialorder %v13615_v61, 0.0  ;;  %v4447_v42 = vmul.f32 %v13616_v0, %v4371_v1  ;;  %v4448_v16 = vmul.f32 %v13617_v43, %v4371_v1  ;;  %v4449_v39 = vmul.f32 %v13618_v14, %v4371_v1  ;;  %v13624_v43 = vld [vmem:[#allocation287_spill] sm:$0xff] }
 0x39c   : > { %13614 = vst [vmem:[#allocation266_spill] sm:$0xff] %v10925_v6  ;;  %v4450_v25 = vmul.f32 %v9758_v57, %v4371_v1  ;;  %v10932_v13 = vpop.eup %5783  ;;  %5797 = vpow2.f32 %v3829_v35  ;;  %v1628_v9 = vadd.f32 %v1627_v33, %v1331_v54  ;;  %v3396_v17 = vsub.f32 %v13620_v19, %v2924_v55  ;;  %v4037_v57 = vpop.xlane.xlu0 %4036  ;;  %v684_v35 = vld [vmem:[%s12342_s4 + $0x560] sm:$0xff] }
 0x39d   : > { %13619 = vst [vmem:[#allocation317_spill] sm:$0xff] %v10932_v13  ;;  %v3397_v52 = vsub.f32 %v13621_v34, %v2924_v55  ;;  %v10936_v41 = vpop.eup %5785  ;;  %v4198_v5 = vadd.f32 %v10932_v13, %v10925_v6  ;;  %v10940_v47 = vadd.f32 %v4689_v51, %v4447_v42  ;;  %v10942_v23 = vadd.f32 %v4758_v28, %v4448_v16  ;;  %v685_v51 = vld [vmem:[%s12342_s4 + $0x568] sm:$0xff]  ;;  %v686_v28 = vld [vmem:[%s12342_s4 + $0x570] sm:$0xff]  ;;  %v692_v13 = vld [vmem:[%s12342_s4 + $0x5a0] sm:$0xff] }
 0x39e   : > { %13622 = vst [vmem:[#allocation374_spill] sm:$0xff] %v10936_v41  ;;  %v10944_v0 = vadd.f32 %v4827_v30, %v4449_v39  ;;  %v10949_v54 = vpop.eup %5787  ;;  %v10951_v1 = vadd.f32 %v4896_v24, %v4450_v25  ;;  %5799 = vrcp.f32 %v4012_v44  ;;  %v1629_v33 = vadd.f32 %v1628_v9, %v1332_v4  ;;  %v4017_v24 = vpop.xlane.xlu1 %4016  ;;  %v13626_v4 = vld [vmem:[#allocation212_spill] sm:$0xff]  ;;  %v687_v9 = vld [vmem:[%s12342_s4 + $0x578] sm:$0xff] }
 0x39f   : > { %13623 = vst [vmem:[#allocation70_spill] sm:$0xff] %v10949_v54  ;;  %v3398_v14 = vsub.f32 %v13624_v43, %v2924_v55  ;;  %v5790_v30 = vpop.eup %5789  ;;  %v4199_v42 = vadd.f32 %v10936_v41, %v4198_v5  ;;  %v3831_v16 = vmul.f32 1.442695, %v3395_v63  ;;  %v3833_v39 = vmul.f32 1.442695, %v3396_v17  ;;  %v13628_v5 = vld [vmem:[#allocation41_spill] sm:$0xff] }
 0x3a0   : > { %v3835_v19 = vmul.f32 1.442695, %v3397_v52  ;;  %v10961_v25 = vpop.eup %5791  ;;  %v4375_v44 = vmul.f32 %v5790_v30, %v13626_v4  ;;  %1630 = vadd.xlane.f32.xlu0 %v1629_v33  ;;  %5801 = vrcp.f32 %v4037_v57  ;;  %v1333_v34 = vmul.f32 %v13484_v18, %v684_v35  ;;  %v688_v57 = vld [vmem:[%s12342_s4 + $0x580] sm:$0xff]  ;;  %v13630_v4 = vld [vmem:[#allocation215_spill] sm:$0xff] }
 0x3a1   : > { %13625 = vst [vmem:[#allocation168_spill] sm:$0xff] %v10961_v25  ;;  %v3837_v55 = vmul.f32 1.442695, %v3398_v14  ;;  %v10968_v43 = vpop.eup %5793  ;;  %vm2726_vm2 = vcmp.ge.f32.partialorder %v13628_v5, 0.0  ;;  %v4200_v63 = vadd.f32 %v10949_v54, %v4199_v42  ;;  %5803 = vpow2.f32 %v3831_v16  ;;  %v13629_v14 = vld [vmem:[#allocation214_spill] sm:$0xff] }
 0x3a2   : > { %13627 = vst [vmem:[#allocation119_spill] sm:$0xff] %v10968_v43  ;;  %v1334_v17 = vmul.f32 %v13486_v22, %v685_v51  ;;  %v1335_v52 = vmul.f32 %v13488_v10, %v686_v28  ;;  %v4203_v33 = vadd.f32 %v10968_v43, %v10961_v25  ;;  %v10980_v35 = vmul.f32 %v9796_v59, %v4375_v44  ;;  %v689_v59 = vld [vmem:[%s12342_s4 + $0x588] sm:$0xff]  ;;  %v13632_v43 = vld [vmem:[#allocation334_spill] sm:$0xff]  ;;  %v4022_v41 = vpop.xlane.xlu1 %4021 }
 0x3a3   : > { %v10983_v30 = vmul.f32 %v13629_v14, %v4375_v44  ;;  %v10986_v42 = vmul.f32 %v13630_v4, %v4375_v44  ;;  %v10988_v16 = vpop.eup %5795  ;;  %4201 = vadd.xlane.f32.xlu1 %v4200_v63  ;;  %v10991_v51 = vmul.f32 %v9822_v11, %v4375_v44  ;;  %5805 = vpow2.f32 %v3833_v39  ;;  %v13633_v4 = vld [vmem:[#allocation391_spill] sm:$0xff] }
 0x3a4   : > { %13631 = vst [vmem:[#allocation267_spill] sm:$0xff] %v10988_v16  ;;  %v1336_v28 = vmul.f32 %v13490_v36, %v687_v9  ;;  %v1632_v54 = vadd.f32 %v1334_v17, %v1333_v34  ;;  %v4204_v14 = vadd.f32 %v10988_v16, %v4203_v33  ;;  %5807 = vpow2.f32 %v3835_v19  ;;  %v13634_v39 = vld [vmem:[#allocation87_spill] sm:$0xff]  ;;  %v13635_v9 = vld [vmem:[#allocation185_spill] sm:$0xff]  ;;  %v4047_v17 = vpop.xlane.xlu0 %4046  ;;  %v690_v33 = vld [vmem:[%s12342_s4 + $0x590] sm:$0xff] }
 0x3a5   : > { %v2925_v25 = vsel %vm2725_vm1, %v13633_v4, %v13632_v43  ;;  %v1337_v63 = vmul.f32 %v13484_v18, %v688_v57  ;;  %5809 = vpow2.f32 %v3837_v55  ;;  %v13637_v16 = vld [vmem:[#allocation136_spill] sm:$0xff]  ;;  %v13638_v43 = vld [vmem:[#allocation289_spill] sm:$0xff]  ;;  %v1338_v55 = vmul.f32 %v13486_v22, %v689_v59  ;;  %v13639_v59 = vld [vmem:[#allocation159_spill] sm:$0xff] }
 0x3a6   : > { %v1633_v11 = vadd.f32 %v1632_v54, %v1335_v52  ;;  %v3399_v44 = vsub.f32 %v13634_v39, %v2925_v25  ;;  %v3400_v34 = vsub.f32 %v13635_v9, %v2925_v25  ;;  %v11008_v19 = vpop.eup %5797  ;;  %5811 = vrcp.f32 %v4017_v24  ;;  %v691_v54 = vld [vmem:[%s12342_s4 + $0x598] sm:$0xff]  ;;  %v693_v24 = vld [vmem:[%s12342_s4 + $0x5a8] sm:$0xff] }
 0x3a7   : > { %13636 = vst [vmem:[#allocation318_spill] sm:$0xff] %v11008_v19  ;;  %v3401_v61 = vsub.f32 %v13637_v16, %v2925_v25  ;;  %v3402_v4 = vsub.f32 %v13638_v43, %v2925_v25  ;;  %v4205_v52 = vadd.f32 %v11008_v19, %v4204_v14  ;;  %5813 = vrcp.f32 %v4047_v17  ;;  %v13641_v19 = vld [vmem:[#allocation392_spill] sm:$0xff] }
 0x3a8   : > { %v1634_v57 = vadd.f32 %v1633_v11, %v1336_v28  ;;  %v3839_v39 = vmul.f32 1.442695, %v3399_v44  ;;  %v3841_v9 = vmul.f32 1.442695, %v3400_v34  ;;  %v5800_v25 = vpop.eup %5799  ;;  %v1339_v6 = vmul.f32 %v13488_v10, %v690_v33  ;;  %v13640_v34 = vld [vmem:[#allocation335_spill] sm:$0xff] }
 0x3a9   : > { %v3843_v16 = vmul.f32 1.442695, %v3401_v61  ;;  %v3845_v43 = vmul.f32 1.442695, %v3402_v4  ;;  %4206 = vadd.xlane.f32.xlu1 %v4205_v52  ;;  %v4372_v14 = vmul.f32 %v5800_v25, %v13639_v59  ;;  %v1340_v28 = vmul.f32 %v13490_v36, %v691_v54  ;;  %v13643_v4 = vld [vmem:[#allocation213_spill] sm:$0xff]  ;;  %v4032_v25 = vpop.xlane.xlu1 %4031  ;;  %v13647_v59 = vld [vmem:[#allocation11_spill] sm:$0xff] }
 0x3aa   : > { %1635 = vadd.xlane.f32.xlu0 %v1634_v57  ;;  %5815 = vpow2.f32 %v3839_v39  ;;  %v1637_v11 = vadd.f32 %v1338_v55, %v1337_v63  ;;  %v5802_v44 = vpop.eup %5801  ;;  %v2926_v50 = vsel %vm2726_vm2, %v13641_v19, %v13640_v34  ;;  %v11031_v61 = vmul.f32 %v13484_v18, %v692_v13  ;;  %v13644_v57 = vld [vmem:[#allocation295_spill] sm:$0xff]  ;;  %v13645_v63 = vld [vmem:[#allocation296_spill] sm:$0xff]  ;;  %v13646_v39 = vld [vmem:[#allocation354_spill] sm:$0xff] }
 0x3ab   : > { %5817 = vpow2.f32 %v3841_v9  ;;  %v11034_v17 = vmul.f32 %v13486_v22, %v693_v24  ;;  %v11036_v33 = vpop.eup %5803  ;;  %v4451_v52 = vmul.f32 %v13643_v4, %v4372_v14  ;;  %v4452_v54 = vmul.f32 %v13644_v57, %v4372_v14  ;;  %v13648_v13 = vld [vmem:[#allocation88_spill] sm:$0xff] }
 0x3ac   : > { %13642 = vst [vmem:[#allocation375_spill] sm:$0xff] %v11036_v33  ;;  %v4453_v55 = vmul.f32 %v13645_v63, %v4372_v14  ;;  %v4454_v9 = vmul.f32 %v13646_v39, %v4372_v14  ;;  %v4377_v5 = vmul.f32 %v5802_v44, %v13647_v59  ;;  %5819 = vpow2.f32 %v3843_v16  ;;  %v13651_v14 = vld [vmem:[#allocation32_spill] sm:$0xff]  ;;  %v13656_v39 = vld [vmem:[#allocation186_spill] sm:$0xff] }
 0x3ad   : > { %v1638_v19 = vadd.f32 %v1637_v11, %v1339_v6  ;;  %v3403_v34 = vsub.f32 %v13648_v13, %v2926_v50  ;;  %v11044_v3 = vpop.eup %5805  ;;  %v4691_v24 = vadd.f32 %v10940_v47, %v4451_v52  ;;  %v4760_v48 = vadd.f32 %v10942_v23, %v4452_v54  ;;  %v13652_v11 = vld [vmem:[#allocation297_spill] sm:$0xff]  ;;  %v13653_v47 = vld [vmem:[#allocation355_spill] sm:$0xff]  ;;  %v4057_v23 = vpop.xlane.xlu0 %4056 }
 0x3ae   : > { %13649 = vst [vmem:[#allocation71_spill] sm:$0xff] %v11044_v3  ;;  %v4829_v4 = vadd.f32 %v10944_v0, %v4453_v55  ;;  %v4898_v57 = vadd.f32 %v10951_v1, %v4454_v9  ;;  %v11050_v63 = vpop.eup %5807  ;;  %vm2727_vm3 = vcmp.ge.f32.partialorder %v13651_v14, 0.0  ;;  %v4208_v16 = vadd.f32 %v11044_v3, %v11036_v33  ;;  %v13655_v1 = vld [vmem:[#allocation19_spill] sm:$0xff]  ;;  %v13657_v13 = vld [vmem:[#allocation137_spill] sm:$0xff]  ;;  %v13658_v3 = vld [vmem:[#allocation290_spill] sm:$0xff] }
 0x3af   : > { %13650 = vst [vmem:[#allocation169_spill] sm:$0xff] %v11050_v63  ;;  %v11056_v6 = vmul.f32 %v9855_v8, %v4377_v5  ;;  %v11059_v44 = vmul.f32 %v13652_v11, %v4377_v5  ;;  %v11062_v52 = vmul.f32 %v13653_v47, %v4377_v5  ;;  %v11064_v0 = vpop.eup %5809  ;;  %v11067_v54 = vmul.f32 %v13655_v1, %v4377_v5  ;;  %v13659_v47 = vld [vmem:[#allocation164_spill] sm:$0xff]  ;;  %v4042_v5 = vpop.xlane.xlu1 %4041 }
 0x3b0   : > { %13654 = vst [vmem:[#allocation120_spill] sm:$0xff] %v11064_v0  ;;  %5821 = vpow2.f32 %v3845_v43  ;;  %v1639_v55 = vadd.f32 %v1638_v19, %v1340_v28  ;;  %v3404_v9 = vsub.f32 %v13656_v39, %v2926_v50  ;;  %v5812_v59 = vpop.eup %5811  ;;  %v4209_v8 = vadd.f32 %v11050_v63, %v4208_v16  ;;  %v694_v43 = vld [vmem:[%s12342_s4 + $0x5b0] sm:$0xff]  ;;  %v695_v28 = vld [vmem:[%s12342_s4 + $0x5b8] sm:$0xff]  ;;  %v696_v14 = vld [vmem:[%s12342_s4 + $0x5c0] sm:$0xff] }
 0x3b1   : > { %5823 = vrcp.f32 %v4022_v41  ;;  %v3405_v11 = vsub.f32 %v13657_v13, %v2926_v50  ;;  %v3406_v33 = vsub.f32 %v13658_v3, %v2926_v50  ;;  %v4373_v29 = vmul.f32 %v5812_v59, %v13659_v47  ;;  %v5814_v41 = vpop.eup %5813  ;;  %v13663_v39 = vld [vmem:[#allocation218_spill] sm:$0xff]  ;;  %v13664_v59 = vld [vmem:[#allocation219_spill] sm:$0xff] }
 0x3b2   : > { %1640 = vadd.xlane.f32.xlu0 %v1639_v55  ;;  %v3847_v40 = vmul.f32 1.442695, %v3403_v34  ;;  %v3849_v31 = vmul.f32 1.442695, %v3404_v9  ;;  %5825 = vrcp.f32 %v4057_v23  ;;  %v4210_v19 = vadd.f32 %v11064_v0, %v4209_v8  ;;  %v13661_v34 = vld [vmem:[#allocation216_spill] sm:$0xff]  ;;  %v13662_v23 = vld [vmem:[#allocation217_spill] sm:$0xff] }
 0x3b3   : > { %v3851_v16 = vmul.f32 1.442695, %v3405_v11  ;;  %v3853_v50 = vmul.f32 1.442695, %v3406_v33  ;;  %5827 = vrcp.f32 %v4032_v25  ;;  %v4455_v1 = vmul.f32 %v13661_v34, %v4373_v29 }
 0x3b4   : > { %v11081_v3 = vpop.eup %5815  ;;  %v4456_v55 = vmul.f32 %v13662_v23, %v4373_v29  ;;  %v4457_v9 = vmul.f32 %v13663_v39, %v4373_v29  ;;  %v4458_v13 = vmul.f32 %v13664_v59, %v4373_v29  ;;  %4211 = vadd.xlane.f32.xlu1 %v4210_v19  ;;  %v4379_v63 = vmul.f32 %v5814_v41, %v9919_v49  ;;  %v13667_v29 = vld [vmem:[#allocation151_spill] sm:$0xff]  ;;  %v13668_v19 = vld [vmem:[#allocation104_spill] sm:$0xff] }
 0x3b5   : > { %13660 = vst [vmem:[#allocation268_spill] sm:$0xff] %v11081_v3  ;;  %v11087_v47 = vpop.eup %5817  ;;  %5829 = vpow2.f32 %v3847_v40  ;;  %v1343_v8 = vmul.f32 %v13488_v10, %v694_v43  ;;  %v1344_v33 = vmul.f32 %v13490_v36, %v695_v28  ;;  %v4692_v25 = vadd.f32 %v4691_v24, %v4455_v1  ;;  %v13669_v49 = vld [vmem:[#allocation223_spill] sm:$0xff]  ;;  %v13670_v24 = vld [vmem:[#allocation336_spill] sm:$0xff]  ;;  %v11114_v28 = vpop.xlane.xlu1 %4051  ;;  %v13672_v1 = vld [vmem:[#allocation89_spill] sm:$0xff] }
 0x3b6   : > { %13665 = vst [vmem:[#allocation319_spill] sm:$0xff] %v11087_v47  ;;  %v4761_v11 = vadd.f32 %v4760_v48, %v4456_v55  ;;  %v4830_v0 = vadd.f32 %v4829_v4, %v4457_v9  ;;  %v4899_v34 = vadd.f32 %v4898_v57, %v4458_v13  ;;  %v11092_v26 = vpop.eup %5819  ;;  %v4213_v23 = vadd.f32 %v11087_v47, %v11081_v3  ;;  %v13671_v4 = vld [vmem:[#allocation393_spill] sm:$0xff]  ;;  %v13673_v9 = vld [vmem:[#allocation187_spill] sm:$0xff]  ;;  %v13679_v3 = vld [vmem:[#allocation220_spill] sm:$0xff] }
 0x3b7   : > { %13666 = vst [vmem:[#allocation376_spill] sm:$0xff] %v11092_v26  ;;  %v11097_v39 = vmul.f32 %v13667_v29, %v4379_v63  ;;  %v11100_v59 = vmul.f32 %v13668_v19, %v4379_v63  ;;  %v11103_v40 = vmul.f32 %v13669_v49, %v4379_v63  ;;  %v11106_v43 = vmul.f32 %v9933_v56, %v4379_v63  ;;  %v13675_v63 = vld [vmem:[#allocation138_spill] sm:$0xff]  ;;  %v13677_v19 = vld [vmem:[#allocation43_spill] sm:$0xff] }
 0x3b8   : > { %5831 = vpow2.f32 %v3849_v31  ;;  %v1642_v48 = vadd.f32 %v11034_v17, %v11031_v61  ;;  %v2927_v57 = vsel %vm2727_vm3, %v13671_v4, %v13670_v24  ;;  %v4214_v41 = vadd.f32 %v11092_v26, %v4213_v23  ;;  %v13676_v17 = vld [vmem:[#allocation291_spill] sm:$0xff] }
 0x3b9   : > { %5833 = vpow2.f32 %v3851_v16  ;;  %v3407_v55 = vsub.f32 %v13672_v1, %v2927_v57  ;;  %v3408_v13 = vsub.f32 %v13673_v9, %v2927_v57  ;;  %v3409_v61 = vsub.f32 %v13675_v63, %v2927_v57  ;;  %v697_v16 = vld [vmem:[%s12342_s4 + $0x5c8] sm:$0xff] }
 0x3ba   : > { %v11119_v56 = vpop.eup %5821  ;;  %5835 = vpow2.f32 %v3853_v50  ;;  %v1643_v31 = vadd.f32 %v1642_v48, %v1343_v8  ;;  %v3410_v29 = vsub.f32 %v13676_v17, %v2927_v57  ;;  %vm2728_vm4 = vcmp.ge.f32.partialorder %v13677_v19, 0.0  ;;  %v13678_v48 = vld [vmem:[#allocation292_spill] sm:$0xff] }
 0x3bb   : > { %13674 = vst [vmem:[#allocation72_spill] sm:$0xff] %v11119_v56  ;;  %v5824_v23 = vpop.eup %5823  ;;  %v4215_v49 = vadd.f32 %v11119_v56, %v4214_v41  ;;  %v3855_v24 = vmul.f32 1.442695, %v3407_v55  ;;  %v3857_v50 = vmul.f32 1.442695, %v3408_v13  ;;  %5837 = vrcp.f32 %v4042_v5  ;;  %v13680_v55 = vld [vmem:[#allocation221_spill] sm:$0xff] }
 0x3bc   : > { %v5826_v8 = vpop.eup %5825  ;;  %v4374_v4 = vmul.f32 %v5824_v23, %v13678_v48  ;;  %v1644_v57 = vadd.f32 %v1643_v31, %v1344_v33  ;;  %v3859_v1 = vmul.f32 1.442695, %v3409_v61  ;;  %v3861_v9 = vmul.f32 1.442695, %v3410_v29  ;;  %v13681_v5 = vld [vmem:[#allocation222_spill] sm:$0xff]  ;;  %v11145_v31 = vpop.xlane.xlu1 %4061 }
 0x3bd   : > { %v5828_v63 = vpop.eup %5827  ;;  %4216 = vadd.xlane.f32.xlu1 %v4215_v49  ;;  %v4381_v17 = vmul.f32 %v5826_v8, %v10001_v12  ;;  %5839 = vpow2.f32 %v3855_v24  ;;  %v1345_v26 = vmul.f32 %v13484_v18, %v696_v14  ;;  %v1346_v47 = vmul.f32 %v13486_v22, %v697_v16  ;;  %v698_v33 = vld [vmem:[%s12342_s4 + $0x5d0] sm:$0xff]  ;;  %v699_v12 = vld [vmem:[%s12342_s4 + $0x5d8] sm:$0xff]  ;;  %v13684_v16 = vld [vmem:[#allocation13_spill] sm:$0xff] }
 0x3be   : > { %v4459_v41 = vmul.f32 %v13679_v3, %v4374_v4  ;;  %v4460_v13 = vmul.f32 %v13680_v55, %v4374_v4  ;;  %v4461_v56 = vmul.f32 %v13681_v5, %v4374_v4  ;;  %v4462_v23 = vmul.f32 %v13682_v20, %v4374_v4  ;;  %1645 = vadd.xlane.f32.xlu0 %v1644_v57  ;;  %v13683_v20 = vld [vmem:[#allocation226_spill] sm:$0xff] }
 0x3bf   : > { %v11147_v61 = vpop.eup %5829  ;;  %v11150_v3 = vmul.f32 %v9967_v38, %v4381_v17  ;;  %v11153_v29 = vmul.f32 %v9975_v60, %v4381_v17  ;;  %v11156_v14 = vmul.f32 %v13683_v20, %v4381_v17  ;;  %v11159_v49 = vmul.f32 %v13684_v16, %v4381_v17 }
 0x3c0   : > { %v4693_v24 = vadd.f32 %v4692_v25, %v4459_v41  ;;  %v4762_v8 = vadd.f32 %v4761_v11, %v4460_v13  ;;  %v4831_v48 = vadd.f32 %v4830_v0, %v4461_v56  ;;  %v4900_v4 = vadd.f32 %v4899_v34, %v4462_v23  ;;  %v13685_v0 = vld [vmem:[#allocation298_spill] sm:$0xff]  ;;  %v13686_v56 = vld [vmem:[#allocation356_spill] sm:$0xff] }
 0x3c1   : > { %v4376_v57 = vmul.f32 %v5828_v63, %v10653_v7  ;;  %5841 = vpow2.f32 %v3857_v50  ;;  %v1347_v55 = vmul.f32 %v13488_v10, %v698_v33  ;;  %v1348_v38 = vmul.f32 %v13490_v36, %v699_v12  ;;  %v13687_v63 = vld [vmem:[#allocation12_spill] sm:$0xff]  ;;  %v13690_v33 = vld [vmem:[#allocation394_spill] sm:$0xff]  ;;  %v11184_v12 = vpop.xlane.xlu1 %4066 }
 0x3c2   : > { %v11164_v5 = vpop.eup %5831  ;;  %v4694_v60 = vadd.f32 %v4693_v24, %v10980_v35  ;;  %v4763_v20 = vadd.f32 %v4762_v8, %v10983_v30  ;;  %v4832_v17 = vadd.f32 %v4831_v48, %v10986_v42  ;;  %v4901_v25 = vadd.f32 %v4900_v4, %v10991_v51  ;;  %v13688_v35 = vld [vmem:[#allocation225_spill] sm:$0xff] }
 0x3c3   : > { %v11170_v11 = vpop.eup %5833  ;;  %v4218_v7 = vadd.f32 %v11164_v5, %v11147_v61  ;;  %v4467_v34 = vmul.f32 %v13685_v0, %v4376_v57  ;;  %v4468_v50 = vmul.f32 %v13686_v56, %v4376_v57  ;;  %v4469_v41 = vmul.f32 %v13687_v63, %v4376_v57  ;;  %v13689_v42 = vld [vmem:[#allocation337_spill] sm:$0xff]  ;;  %v13691_v56 = vld [vmem:[#allocation300_spill] sm:$0xff] }
 0x3c4   : > { %v11177_v13 = vpop.eup %5835  ;;  %v4470_v23 = vmul.f32 %v13688_v35, %v4376_v57  ;;  %5843 = vpow2.f32 %v3859_v1  ;;  %v1647_v30 = vadd.f32 %v1346_v47, %v1345_v26  ;;  %v2928_v51 = vsel %vm2728_vm4, %v13690_v33, %v13689_v42  ;;  %v13692_v26 = vld [vmem:[#allocation33_spill] sm:$0xff] }
 0x3c5   : > { %v5838_v16 = vpop.eup %5837  ;;  %v4219_v24 = vadd.f32 %v11170_v11, %v4218_v7  ;;  %v4695_v8 = vadd.f32 %v4694_v60, %v4467_v34  ;;  %v4764_v48 = vadd.f32 %v4763_v20, %v4468_v50  ;;  %v4833_v4 = vadd.f32 %v4832_v17, %v4469_v41  ;;  %v13693_v20 = vld [vmem:[#allocation53_spill] sm:$0xff] }
 0x3c6   : > { %v4902_v0 = vadd.f32 %v4901_v25, %v4470_v23  ;;  %5845 = vpow2.f32 %v3861_v9  ;;  %v4378_v63 = vmul.f32 %v5838_v16, %v13691_v56  ;;  %v1648_v57 = vadd.f32 %v1647_v30, %v1347_v55  ;;  %v13694_v9 = vld [vmem:[#allocation152_spill] sm:$0xff]  ;;  %v13695_v34 = vld [vmem:[#allocation105_spill] sm:$0xff]  ;;  %v13696_v23 = vld [vmem:[#allocation27_spill] sm:$0xff] }
 0x3c7   : > { %v11188_v1 = vpop.eup %5839  ;;  %vm2729_vm5 = vcmp.ge.f32.partialorder %v13692_v26, 0.0  ;;  %v4220_v47 = vadd.f32 %v11177_v13, %v4219_v24  ;;  %v4696_v35 = vadd.f32 %v4695_v8, %v11056_v6  ;;  %v4765_v42 = vadd.f32 %v4764_v48, %v11059_v44  ;;  %v13697_v6 = vld [vmem:[#allocation90_spill] sm:$0xff]  ;;  %v13698_v24 = vld [vmem:[#allocation188_spill] sm:$0xff]  ;;  %v11204_v8 = vpop.xlane.xlu1 %4071 }
 0x3c8   : > { %v4834_v7 = vadd.f32 %v4833_v4, %v11062_v52  ;;  %v4903_v60 = vadd.f32 %v4902_v0, %v11067_v54  ;;  %v4475_v17 = vmul.f32 %v13693_v20, %v4378_v63  ;;  %v4476_v25 = vmul.f32 %v13694_v9, %v4378_v63  ;;  %v13699_v0 = vld [vmem:[#allocation139_spill] sm:$0xff] }
 0x3c9   : > { %v4477_v55 = vmul.f32 %v13695_v34, %v4378_v63  ;;  %4221 = vadd.xlane.f32.xlu1 %v4220_v47  ;;  %v4478_v50 = vmul.f32 %v10015_v27, %v4378_v63  ;;  %v1649_v41 = vadd.f32 %v1648_v57, %v1348_v38  ;;  %v3158_v30 = vmul.f32 %v13696_v23, %v13677_v19  ;;  %v700_v19 = vld [vmem:[%s12342_s4 + $0x5e0] sm:$0xff]  ;;  %v701_v63 = vld [vmem:[%s12342_s4 + $0x5e8] sm:$0xff]  ;;  %v13700_v57 = vld [vmem:[#allocation34_spill] sm:$0xff] }
 0x3ca   : > { %v3411_v33 = vsub.f32 %v13697_v6, %v2928_v51  ;;  %v4697_v44 = vadd.f32 %v4696_v35, %v4475_v17  ;;  %v4766_v16 = vadd.f32 %v4765_v42, %v4476_v25  ;;  %v3412_v54 = vsub.f32 %v13698_v24, %v2928_v51  ;;  %v13704_v6 = vld [vmem:[#allocation395_spill] sm:$0xff] }
 0x3cb   : > { %v4835_v52 = vadd.f32 %v4834_v7, %v4477_v55  ;;  %v11206_v48 = vpop.eup %5841  ;;  %v4904_v4 = vadd.f32 %v4903_v60, %v4478_v50  ;;  %1650 = vadd.xlane.f32.xlu0 %v1649_v41  ;;  %v3413_v56 = vsub.f32 %v13699_v0, %v2928_v51  ;;  %v3414_v27 = vsub.f32 %v3158_v30, %v2928_v51  ;;  %v702_v7 = vld [vmem:[%s12342_s4 + $0x5f0] sm:$0xff]  ;;  %v703_v60 = vld [vmem:[%s12342_s4 + $0x5f8] sm:$0xff] }
 0x3cc   : > { %v3863_v38 = vmul.f32 1.442695, %v3411_v33  ;;  %vm2730_vm6 = vcmp.ge.f32.partialorder %v13700_v57, 0.0  ;;  %v4223_v47 = vadd.f32 %v11206_v48, %v11188_v1  ;;  %v11219_v35 = vadd.f32 %v4697_v44, %v11097_v39  ;;  %v13703_v30 = vld [vmem:[#allocation338_spill] sm:$0xff]  ;;  %v704_v44 = vld [vmem:[%s12342_s4 + $0x600] sm:$0xff] }
 0x3cd   : > { %v11222_v42 = vadd.f32 %v4766_v16, %v11100_v59  ;;  %v11225_v51 = vadd.f32 %v4835_v52, %v11103_v40  ;;  %v11234_v20 = vadd.f32 %v4904_v4, %v11106_v43  ;;  %v3865_v39 = vmul.f32 1.442695, %v3412_v54  ;;  %v705_v16 = vld [vmem:[%s12342_s4 + $0x608] sm:$0xff]  ;;  %v11258_v52 = vpop.xlane.xlu1 %4076  ;;  %v13705_v54 = vld [vmem:[#allocation91_spill] sm:$0xff]  ;;  %v13706_v0 = vld [vmem:[#allocation190_spill] sm:$0xff] }
 0x3ce   : > { %5847 = vpow2.f32 %v3863_v38  ;;  %v3867_v17 = vmul.f32 1.442695, %v3413_v56  ;;  %v11236_v9 = vpop.eup %5843  ;;  %v3869_v59 = vmul.f32 1.442695, %v3414_v27  ;;  %v1349_v40 = vmul.f32 %v13484_v18, %v700_v19  ;;  %v13707_v38 = vld [vmem:[#allocation140_spill] sm:$0xff] }
 0x3cf   : > { %13701 = vst [vmem:[#allocation170_spill] sm:$0xff] %v11236_v9  ;;  %5849 = vrcp.f32 %v11114_v28  ;;  %v1350_v25 = vmul.f32 %v13486_v22, %v701_v63  ;;  %v4224_v34 = vadd.f32 %v11236_v9, %v4223_v47  ;;  %v1351_v55 = vmul.f32 %v13488_v10, %v702_v7  ;;  %v707_v47 = vld [vmem:[%s12342_s4 + $0x618] sm:$0xff] }
 0x3d0   : > { %5851 = vpow2.f32 %v3865_v39  ;;  %v1352_v43 = vmul.f32 %v13490_v36, %v703_v60  ;;  %v11244_v50 = vpop.eup %5845  ;;  %v2929_v28 = vsel %vm2729_vm5, %v13704_v6, %v13703_v30  ;;  %v3162_v33 = vmul.f32 %v13696_v23, %v13692_v26  ;;  %v706_v26 = vld [vmem:[%s12342_s4 + $0x610] sm:$0xff]  ;;  %v13708_v30 = vld [vmem:[#allocation339_spill] sm:$0xff]  ;;  %v13709_v6 = vld [vmem:[#allocation396_spill] sm:$0xff] }
 0x3d1   : > { %13702 = vst [vmem:[#allocation121_spill] sm:$0xff] %v11244_v50  ;;  %5853 = vpow2.f32 %v3867_v17  ;;  %v1652_v41 = vadd.f32 %v1350_v25, %v1349_v40  ;;  %v4225_v24 = vadd.f32 %v11244_v50, %v4224_v34  ;;  %v3415_v4 = vsub.f32 %v13705_v54, %v2929_v28  ;;  %v11286_v54 = vpop.xlane.xlu1 %4081  ;;  %v13942_v50 = vld [vmem:[#allocation369_spill] sm:$0xff] }
 0x3d2   : > { %5855 = vpow2.f32 %v3869_v59  ;;  %v3416_v56 = vsub.f32 %v13706_v0, %v2929_v28  ;;  %v3417_v19 = vsub.f32 %v13707_v38, %v2929_v28  ;;  %v3418_v63 = vsub.f32 %v3162_v33, %v2929_v28  ;;  %v13710_v33 = vld [vmem:[#allocation92_spill] sm:$0xff] }
 0x3d3   : > { %v1653_v27 = vadd.f32 %v1652_v41, %v1351_v55  ;;  %5857 = vrcp.f32 %v11145_v31  ;;  %4226 = vadd.xlane.f32.xlu1 %v4225_v24  ;;  %v3871_v7 = vmul.f32 1.442695, %v3415_v4  ;;  %v1353_v39 = vmul.f32 %v13484_v18, %v704_v44  ;;  %v708_v31 = vld [vmem:[%s12342_s4 + $0x620] sm:$0xff] }
 0x3d4   : > { %v3873_v60 = vmul.f32 1.442695, %v3416_v56  ;;  %v1354_v17 = vmul.f32 %v13486_v22, %v705_v16  ;;  %v3875_v40 = vmul.f32 1.442695, %v3417_v19  ;;  %v3877_v25 = vmul.f32 1.442695, %v3418_v63 }
 0x3d5   : > { %v1654_v59 = vadd.f32 %v1653_v27, %v1352_v43  ;;  %v1355_v34 = vmul.f32 %v13488_v10, %v706_v26  ;;  %5859 = vpow2.f32 %v3871_v7  ;;  %v1356_v55 = vmul.f32 %v13490_v36, %v707_v47  ;;  %v13711_v16 = vld [vmem:[#allocation191_spill] sm:$0xff]  ;;  %v13713_v56 = vld [vmem:[#allocation141_spill] sm:$0xff] }
 0x3d6   : > { %v1657_v41 = vadd.f32 %v1354_v17, %v1353_v39  ;;  %v2930_v28 = vsel %vm2730_vm6, %v13709_v6, %v13708_v30  ;;  %5861 = vpow2.f32 %v3873_v60  ;;  %v3166_v43 = vmul.f32 %v13696_v23, %v13700_v57  ;;  %v709_v27 = vld [vmem:[%s12342_s4 + $0x628] sm:$0xff]  ;;  %v13714_v57 = vld [vmem:[#allocation36_spill] sm:$0xff] }
 0x3d7   : > { %1655 = vadd.xlane.f32.xlu0 %v1654_v59  ;;  %v3419_v44 = vsub.f32 %v13710_v33, %v2930_v28  ;;  %v3420_v24 = vsub.f32 %v13711_v16, %v2930_v28  ;;  %5863 = vpow2.f32 %v3875_v40  ;;  %v3421_v26 = vsub.f32 %v13713_v56, %v2930_v28  ;;  %v13716_v39 = vld [vmem:[#allocation224_spill] sm:$0xff]  ;;  %v13721_v16 = vld [vmem:[#allocation357_spill] sm:$0xff] }
 0x3d8   : > { %v11288_v4 = vpop.eup %5847  ;;  %v1658_v0 = vadd.f32 %v1657_v41, %v1355_v34  ;;  %v1357_v38 = vmul.f32 %v13484_v18, %v708_v31  ;;  %vm2731_vm7 = vcmp.ge.f32.partialorder %v13714_v57, 0.0  ;;  %5865 = vpow2.f32 %v3877_v25  ;;  %v710_v34 = vld [vmem:[%s12342_s4 + $0x630] sm:$0xff]  ;;  %v711_v31 = vld [vmem:[%s12342_s4 + $0x638] sm:$0xff] }
 0x3d9   : > { %13712 = vst [vmem:[#allocation269_spill] sm:$0xff] %v11288_v4  ;;  %v5850_v19 = vpop.eup %5849  ;;  %v3422_v63 = vsub.f32 %v3166_v43, %v2930_v28  ;;  %v3879_v47 = vmul.f32 1.442695, %v3419_v44  ;;  %v3881_v7 = vmul.f32 1.442695, %v3420_v24  ;;  %5867 = vrcp.f32 %v11184_v12  ;;  %v13719_v12 = vld [vmem:[#allocation227_spill] sm:$0xff] }
 0x3da   : > { %v11296_v60 = vpop.eup %5851  ;;  %v4380_v17 = vmul.f32 %v5850_v19, %v13716_v39  ;;  %v1659_v59 = vadd.f32 %v1658_v0, %v1356_v55  ;;  %v3883_v40 = vmul.f32 1.442695, %v3421_v26  ;;  %v1358_v55 = vmul.f32 %v13486_v22, %v709_v27  ;;  %v13720_v43 = vld [vmem:[#allocation21_spill] sm:$0xff]  ;;  %v11320_v27 = vpop.xlane.xlu1 %4086 }
 0x3db   : > { %13715 = vst [vmem:[#allocation320_spill] sm:$0xff] %v11296_v60  ;;  %v11306_v25 = vpop.eup %5853  ;;  %v4228_v41 = vadd.f32 %v11296_v60, %v11288_v4  ;;  %5869 = vpow2.f32 %v3879_v47  ;;  %v3885_v30 = vmul.f32 1.442695, %v3422_v63  ;;  %v1359_v26 = vmul.f32 %v13488_v10, %v710_v34  ;;  %v13941_v4 = vld [vmem:[#allocation312_spill] sm:$0xff] }
 0x3dc   : > { %13717 = vst [vmem:[#allocation377_spill] sm:$0xff] %v11306_v25  ;;  %v11311_v6 = vpop.eup %5855  ;;  %v4483_v28 = vmul.f32 %v13719_v12, %v4380_v17  ;;  %v4484_v33 = vmul.f32 %v13720_v43, %v4380_v17  ;;  %v4485_v44 = vmul.f32 %v10036_v46, %v4380_v17  ;;  %v4486_v24 = vmul.f32 %v13721_v16, %v4380_v17  ;;  %v13726_v43 = vld [vmem:[#allocation228_spill] sm:$0xff]  ;;  %v13731_v16 = vld [vmem:[#allocation397_spill] sm:$0xff] }
 0x3dd   : > { %13718 = vst [vmem:[#allocation73_spill] sm:$0xff] %v11311_v6  ;;  %1660 = vadd.xlane.f32.xlu0 %v1659_v59  ;;  %v5858_v0 = vpop.eup %5857  ;;  %v4229_v56 = vadd.f32 %v11306_v25, %v4228_v41  ;;  %5871 = vpow2.f32 %v3881_v7  ;;  %v1360_v19 = vmul.f32 %v13490_v36, %v711_v31  ;;  %v13722_v59 = vld [vmem:[#allocation299_spill] sm:$0xff]  ;;  %v1662_v7 = vadd.f32 %v1358_v55, %v1357_v38  ;;  %v13727_v38 = vld [vmem:[#allocation229_spill] sm:$0xff] }
 0x3de   : > { %v4699_v63 = vadd.f32 %v11219_v35, %v4483_v28  ;;  %v4768_v47 = vadd.f32 %v11222_v42, %v4484_v33  ;;  %v4837_v39 = vadd.f32 %v11225_v51, %v4485_v44  ;;  %v4906_v46 = vadd.f32 %v11234_v20, %v4486_v24  ;;  %v13725_v51 = vld [vmem:[#allocation20_spill] sm:$0xff] }
 0x3df   : > { %v4230_v17 = vadd.f32 %v11311_v6, %v4229_v56  ;;  %v4382_v12 = vmul.f32 %v5858_v0, %v13722_v59  ;;  %5873 = vpow2.f32 %v3883_v40  ;;  %v11328_v41 = vpop.eup %5859  ;;  %v3170_v59 = vmul.f32 %v13696_v23, %v13714_v57 }
 0x3e0   : > { %13723 = vst [vmem:[#allocation171_spill] sm:$0xff] %v11328_v41  ;;  %v4700_v34 = vadd.f32 %v4699_v63, %v11150_v3  ;;  %v4769_v31 = vadd.f32 %v4768_v47, %v11153_v29  ;;  %v4838_v35 = vadd.f32 %v4837_v39, %v11156_v14  ;;  %v4907_v42 = vadd.f32 %v4906_v46, %v11159_v49  ;;  %v11334_v28 = vpop.eup %5861  ;;  %v13729_v3 = vld [vmem:[#allocation38_spill] sm:$0xff]  ;;  %v712_v39 = vld [vmem:[%s12342_s4 + $0x640] sm:$0xff]  ;;  %v11354_v46 = vpop.xlane.xlu1 %4091 }
 0x3e1   : > { %13724 = vst [vmem:[#allocation122_spill] sm:$0xff] %v11334_v28  ;;  %4231 = vadd.xlane.f32.xlu1 %v4230_v17  ;;  %v4491_v20 = vmul.f32 %v13725_v51, %v4382_v12  ;;  %v4492_v33 = vmul.f32 %v13726_v43, %v4382_v12  ;;  %v4493_v40 = vmul.f32 %v10065_v37, %v4382_v12  ;;  %v11340_v44 = vpop.eup %5863  ;;  %vm2732_vm8 = vcmp.ge.f32.partialorder %v13729_v3, 0.0  ;;  %v13730_v49 = vld [vmem:[#allocation342_spill] sm:$0xff] }
 0x3e2   : > { %v4494_v55 = vmul.f32 %v13727_v38, %v4382_v12  ;;  %13728 = vst [vmem:[#allocation270_spill] sm:$0xff] %v11340_v44  ;;  %v4233_v29 = vadd.f32 %v11334_v28, %v11328_v41  ;;  %5875 = vpow2.f32 %v3885_v30  ;;  %v1663_v14 = vadd.f32 %v1662_v7, %v1359_v26  ;;  %v11349_v0 = vpop.eup %5865  ;;  %v13733_v12 = vld [vmem:[#allocation95_spill] sm:$0xff]  ;;  %v746_v28 = vld [vmem:[%s12342_s4 + $0x750] sm:$0xff] }
 0x3e3   : > { %v2931_v24 = vsel %vm2731_vm7, %v13731_v16, %v13730_v49  ;;  %13732 = vst [vmem:[#allocation321_spill] sm:$0xff] %v11349_v0  ;;  %v4701_v56 = vadd.f32 %v4700_v34, %v4491_v20  ;;  %v4770_v37 = vadd.f32 %v4769_v31, %v4492_v33  ;;  %v4839_v63 = vadd.f32 %v4838_v35, %v4493_v40  ;;  %v5868_v17 = vpop.eup %5867  ;;  %v13735_v34 = vld [vmem:[#allocation280_spill] sm:$0xff]  ;;  %v13737_v20 = vld [vmem:[#allocation142_spill] sm:$0xff]  ;;  %v13741_v16 = vld [vmem:[#allocation55_spill] sm:$0xff] }
 0x3e4   : > { %v4908_v47 = vadd.f32 %v4907_v42, %v4494_v55  ;;  %v4234_v30 = vadd.f32 %v11340_v44, %v4233_v29  ;;  %v1664_v26 = vadd.f32 %v1663_v14, %v1360_v19  ;;  %v3423_v7 = vsub.f32 %v13733_v12, %v2931_v24  ;;  %v13736_v35 = vld [vmem:[#allocation192_spill] sm:$0xff]  ;;  %v13739_v55 = vld [vmem:[#allocation230_spill] sm:$0xff] }
 0x3e5   : > { %v11360_v51 = vpop.eup %5869  ;;  %v4383_v31 = vmul.f32 %v5868_v17, %v13735_v34  ;;  %v3424_v42 = vsub.f32 %v13736_v35, %v2931_v24  ;;  %v3425_v43 = vsub.f32 %v13737_v20, %v2931_v24  ;;  %5877 = vrcp.f32 %v11204_v8  ;;  %v13740_v14 = vld [vmem:[#allocation14_spill] sm:$0xff]  ;;  %v713_v8 = vld [vmem:[%s12342_s4 + $0x648] sm:$0xff] }
 0x3e6   : > { %13734 = vst [vmem:[#allocation378_spill] sm:$0xff] %v11360_v51  ;;  %v4235_v33 = vadd.f32 %v11349_v0, %v4234_v30  ;;  %1665 = vadd.xlane.f32.xlu0 %v1664_v26  ;;  %v3426_v40 = vsub.f32 %v3170_v59, %v2931_v24  ;;  %v3887_v19 = vmul.f32 1.442695, %v3423_v7  ;;  %v1361_v38 = vmul.f32 %v13484_v18, %v712_v39  ;;  %v13742_v30 = vld [vmem:[#allocation40_spill] sm:$0xff]  ;;  %v714_v59 = vld [vmem:[%s12342_s4 + $0x650] sm:$0xff] }
 0x3e7   : > { %v11368_v57 = vpop.eup %5871  ;;  %v4495_v29 = vmul.f32 %v13739_v55, %v4383_v31  ;;  %v4496_v49 = vmul.f32 %v13740_v14, %v4383_v31  ;;  %v4497_v17 = vmul.f32 %v13741_v16, %v4383_v31  ;;  %v4498_v12 = vmul.f32 %v10097_v53, %v4383_v31  ;;  %v715_v53 = vld [vmem:[%s12342_s4 + $0x658] sm:$0xff] }
 0x3e8   : > { %13738 = vst [vmem:[#allocation74_spill] sm:$0xff] %v11368_v57  ;;  %vm2733_vm9 = vcmp.ge.f32.partialorder %v13742_v30, 0.0  ;;  %4236 = vadd.xlane.f32.xlu1 %v4235_v33  ;;  %v4238_v24 = vadd.f32 %v11368_v57, %v11360_v51  ;;  %5879 = vpow2.f32 %v3887_v19  ;;  %v3889_v39 = vmul.f32 1.442695, %v3424_v42  ;;  %v11388_v33 = vpop.xlane.xlu1 %4096  ;;  %v13744_v16 = vld [vmem:[#allocation343_spill] sm:$0xff]  ;;  %v13745_v57 = vld [vmem:[#allocation398_spill] sm:$0xff] }
 0x3e9   : > { %v3891_v26 = vmul.f32 1.442695, %v3425_v43  ;;  %v11386_v7 = vpop.eup %5873  ;;  %v4702_v34 = vadd.f32 %v4701_v56, %v4495_v29  ;;  %v4771_v31 = vadd.f32 %v4770_v37, %v4496_v49  ;;  %v4840_v35 = vadd.f32 %v4839_v63, %v4497_v17  ;;  %v716_v37 = vld [vmem:[%s12342_s4 + $0x660] sm:$0xff]  ;;  %v717_v17 = vld [vmem:[%s12342_s4 + $0x668] sm:$0xff] }
 0x3ea   : > { %13743 = vst [vmem:[#allocation172_spill] sm:$0xff] %v11386_v7  ;;  %v4909_v20 = vadd.f32 %v4908_v47, %v4498_v12  ;;  %v4239_v19 = vadd.f32 %v11386_v7, %v4238_v24  ;;  %5881 = vpow2.f32 %v3889_v39  ;;  %v3893_v42 = vmul.f32 1.442695, %v3426_v40  ;;  %v13747_v29 = vld [vmem:[#allocation96_spill] sm:$0xff]  ;;  %v13749_v39 = vld [vmem:[#allocation143_spill] sm:$0xff]  ;;  %v13756_v7 = vld [vmem:[#allocation106_spill] sm:$0xff] }
 0x3eb   : > { %v1362_v43 = vmul.f32 %v13486_v22, %v713_v8  ;;  %5883 = vpow2.f32 %v3891_v26  ;;  %v1363_v55 = vmul.f32 %v13488_v10, %v714_v59  ;;  %v1364_v14 = vmul.f32 %v13490_v36, %v715_v53  ;;  %v13748_v8 = vld [vmem:[#allocation193_spill] sm:$0xff]  ;;  %v719_v53 = vld [vmem:[%s12342_s4 + $0x678] sm:$0xff] }
 0x3ec   : > { %v2932_v56 = vsel %vm2732_vm8, %v13745_v57, %v13744_v16  ;;  %v11401_v63 = vpop.eup %5875  ;;  %5885 = vpow2.f32 %v3893_v42  ;;  %v3174_v40 = vmul.f32 %v13696_v23, %v13729_v3  ;;  %v718_v57 = vld [vmem:[%s12342_s4 + $0x670] sm:$0xff]  ;;  %v1365_v42 = vmul.f32 %v13484_v18, %v716_v37  ;;  %v13751_v37 = vld [vmem:[#allocation344_spill] sm:$0xff]  ;;  %v13777_v51 = vld [vmem:[#allocation145_spill] sm:$0xff] }
 0x3ed   : > { %13746 = vst [vmem:[#allocation123_spill] sm:$0xff] %v11401_v63  ;;  %v1667_v47 = vadd.f32 %v1362_v43, %v1361_v38  ;;  %v3427_v49 = vsub.f32 %v13747_v29, %v2932_v56  ;;  %v4240_v12 = vadd.f32 %v11401_v63, %v4239_v19  ;;  %v3428_v24 = vsub.f32 %v13748_v8, %v2932_v56  ;;  %v13752_v63 = vld [vmem:[#allocation399_spill] sm:$0xff] }
 0x3ee   : > { %v3429_v26 = vsub.f32 %v13749_v39, %v2932_v56  ;;  %5887 = vrcp.f32 %v11258_v52  ;;  %v3430_v3 = vsub.f32 %v3174_v40, %v2932_v56  ;;  %v1366_v19 = vmul.f32 %v13486_v22, %v717_v17  ;;  %v11422_v39 = vpop.xlane.xlu1 %4101  ;;  %v13750_v52 = vld [vmem:[#allocation231_spill] sm:$0xff]  ;;  %v13754_v17 = vld [vmem:[#allocation44_spill] sm:$0xff] }
 0x3ef   : > { %v1668_v38 = vadd.f32 %v1667_v47, %v1363_v55  ;;  %v3895_v59 = vmul.f32 1.442695, %v3427_v49  ;;  %v5878_v43 = vpop.eup %5877  ;;  %4241 = vadd.xlane.f32.xlu1 %v4240_v12  ;;  %v3897_v16 = vmul.f32 1.442695, %v3428_v24  ;;  %v1367_v8 = vmul.f32 %v13488_v10, %v718_v57  ;;  %v13755_v57 = vld [vmem:[#allocation153_spill] sm:$0xff] }
 0x3f0   : > { %v3899_v29 = vmul.f32 1.442695, %v3429_v26  ;;  %v4384_v55 = vmul.f32 %v5878_v43, %v13750_v52  ;;  %v3901_v47 = vmul.f32 1.442695, %v3430_v3  ;;  %v1368_v40 = vmul.f32 %v13490_v36, %v719_v53 }
 0x3f1   : > { %v1669_v56 = vadd.f32 %v1668_v38, %v1364_v14  ;;  %5889 = vpow2.f32 %v3895_v59  ;;  %v1672_v49 = vadd.f32 %v1366_v19, %v1365_v42  ;;  %v2933_v12 = vsel %vm2733_vm9, %v13752_v63, %v13751_v37  ;;  %v13757_v38 = vld [vmem:[#allocation22_spill] sm:$0xff]  ;;  %v13758_v42 = vld [vmem:[#allocation97_spill] sm:$0xff] }
 0x3f2   : > { %5891 = vpow2.f32 %v3897_v16  ;;  %v11430_v24 = vpop.eup %5879  ;;  %vm2734_vm10 = vcmp.ge.f32.partialorder %v13754_v17, 0.0  ;;  %v4499_v26 = vmul.f32 %v13755_v57, %v4384_v55  ;;  %v4500_v43 = vmul.f32 %v13756_v7, %v4384_v55  ;;  %v721_v7 = vld [vmem:[%s12342_s4 + $0x688] sm:$0xff] }
 0x3f3   : > { %13753 = vst [vmem:[#allocation271_spill] sm:$0xff] %v11430_v24  ;;  %v4501_v14 = vmul.f32 %v10118_v58, %v4384_v55  ;;  %v4502_v3 = vmul.f32 %v13757_v38, %v4384_v55  ;;  %1670 = vadd.xlane.f32.xlu0 %v1669_v56  ;;  %5893 = vpow2.f32 %v3899_v29  ;;  %v1673_v59 = vadd.f32 %v1672_v49, %v1367_v8  ;;  %v720_v58 = vld [vmem:[%s12342_s4 + $0x680] sm:$0xff]  ;;  %v13761_v55 = vld [vmem:[#allocation195_spill] sm:$0xff] }
 0x3f4   : > { %v3178_v53 = vmul.f32 %v13696_v23, %v13742_v30  ;;  %v3431_v63 = vsub.f32 %v13758_v42, %v2933_v12  ;;  %v11440_v16 = vpop.eup %5881  ;;  %v4703_v19 = vadd.f32 %v4702_v34, %v4499_v26  ;;  %v4772_v52 = vadd.f32 %v4771_v31, %v4500_v43  ;;  %v11453_v31 = vpop.xlane.xlu1 %4106  ;;  %v722_v43 = vld [vmem:[%s12342_s4 + $0x690] sm:$0xff] }
 0x3f5   : > { %13759 = vst [vmem:[#allocation322_spill] sm:$0xff] %v11440_v16  ;;  %v4841_v37 = vadd.f32 %v4840_v35, %v4501_v14  ;;  %v4910_v57 = vadd.f32 %v4909_v20, %v4502_v3  ;;  %v11448_v29 = vpop.eup %5883  ;;  %v4243_v30 = vadd.f32 %v11440_v16, %v11430_v24  ;;  %5895 = vpow2.f32 %v3901_v47  ;;  %v13763_v20 = vld [vmem:[#allocation144_spill] sm:$0xff]  ;;  %v723_v47 = vld [vmem:[%s12342_s4 + $0x698] sm:$0xff]  ;;  %v13769_v16 = vld [vmem:[#allocation358_spill] sm:$0xff] }
 0x3f6   : > { %13760 = vst [vmem:[#allocation379_spill] sm:$0xff] %v11448_v29  ;;  %v1674_v8 = vadd.f32 %v1673_v59, %v1368_v40  ;;  %v3432_v34 = vsub.f32 %v13761_v55, %v2933_v12  ;;  %v11455_v35 = vpop.eup %5885  ;;  %v3433_v56 = vsub.f32 %v13763_v20, %v2933_v12  ;;  %v3434_v49 = vsub.f32 %v3178_v53, %v2933_v12  ;;  %v13764_v59 = vld [vmem:[#allocation234_spill] sm:$0xff] }
 0x3f7   : > { %13762 = vst [vmem:[#allocation75_spill] sm:$0xff] %v11455_v35  ;;  %v3903_v26 = vmul.f32 1.442695, %v3431_v63  ;;  %5897 = vrcp.f32 %v11286_v54  ;;  %v4244_v14 = vadd.f32 %v11448_v29, %v4243_v30  ;;  %v1369_v3 = vmul.f32 %v13484_v18, %v720_v58  ;;  %v13765_v63 = vld [vmem:[#allocation49_spill] sm:$0xff] }
 0x3f8   : > { %v5888_v40 = vpop.eup %5887  ;;  %1675 = vadd.xlane.f32.xlu0 %v1674_v8  ;;  %v3905_v38 = vmul.f32 1.442695, %v3432_v34  ;;  %v1370_v12 = vmul.f32 %v13486_v22, %v721_v7  ;;  %v3907_v54 = vmul.f32 1.442695, %v3433_v56  ;;  %v3909_v42 = vmul.f32 1.442695, %v3434_v49 }
 0x3f9   : > { %v4385_v53 = vmul.f32 %v5888_v40, %v13764_v59  ;;  %5899 = vpow2.f32 %v3903_v26  ;;  %vm2735_vm11 = vcmp.ge.f32.partialorder %v13765_v63, 0.0  ;;  %v4245_v55 = vadd.f32 %v11455_v35, %v4244_v14  ;;  %v13767_v34 = vld [vmem:[#allocation284_spill] sm:$0xff]  ;;  %v13768_v29 = vld [vmem:[#allocation301_spill] sm:$0xff] }
 0x3fa   : > { %5901 = vpow2.f32 %v3905_v38  ;;  %v1371_v20 = vmul.f32 %v13488_v10, %v722_v43  ;;  %v1372_v30 = vmul.f32 %v13490_v36, %v723_v47  ;;  %v13770_v26 = vld [vmem:[#allocation232_spill] sm:$0xff]  ;;  %v1677_v14 = vadd.f32 %v1370_v12, %v1369_v3  ;;  %v13772_v38 = vld [vmem:[#allocation345_spill] sm:$0xff] }
 0x3fb   : > { %v11473_v8 = vpop.eup %5889  ;;  %v4503_v58 = vmul.f32 %v13767_v34, %v4385_v53  ;;  %v4504_v7 = vmul.f32 %v13768_v29, %v4385_v53  ;;  %v4505_v40 = vmul.f32 %v13769_v16, %v4385_v53  ;;  %v4506_v56 = vmul.f32 %v13770_v26, %v4385_v53  ;;  %4246 = vadd.xlane.f32.xlu1 %v4245_v55  ;;  %v13773_v59 = vld [vmem:[#allocation400_spill] sm:$0xff]  ;;  %v11487_v34 = vpop.xlane.xlu1 %4111 }
 0x3fc   : > { %13766 = vst [vmem:[#allocation173_spill] sm:$0xff] %v11473_v8  ;;  %v11479_v49 = vpop.eup %5891  ;;  %5903 = vpow2.f32 %v3907_v54  ;;  %v2934_v43 = vsel %vm2734_vm10, %v13773_v59, %v13772_v38  ;;  %v3182_v47 = vmul.f32 %v13696_v23, %v13754_v17  ;;  %v724_v3 = vld [vmem:[%s12342_s4 + $0x6a0] sm:$0xff]  ;;  %v1678_v55 = vadd.f32 %v1677_v14, %v1371_v20  ;;  %v13775_v38 = vld [vmem:[#allocation98_spill] sm:$0xff] }
 0x3fd   : > { %13771 = vst [vmem:[#allocation124_spill] sm:$0xff] %v11479_v49  ;;  %v4248_v16 = vadd.f32 %v11479_v49, %v11473_v8  ;;  %v4704_v29 = vadd.f32 %v4703_v19, %v4503_v58  ;;  %v4773_v53 = vadd.f32 %v4772_v52, %v4504_v7  ;;  %v4842_v26 = vadd.f32 %v4841_v37, %v4505_v40  ;;  %v11494_v12 = vpop.eup %5893  ;;  %v13776_v35 = vld [vmem:[#allocation196_spill] sm:$0xff]  ;;  %v725_v52 = vld [vmem:[%s12342_s4 + $0x6a8] sm:$0xff]  ;;  %v726_v37 = vld [vmem:[%s12342_s4 + $0x6b0] sm:$0xff] }
 0x3fe   : > { %13774 = vst [vmem:[#allocation273_spill] sm:$0xff] %v11494_v12  ;;  %v4911_v54 = vadd.f32 %v4910_v57, %v4506_v56  ;;  %5905 = vpow2.f32 %v3909_v42  ;;  %v3435_v59 = vsub.f32 %v13775_v38, %v2934_v43  ;;  %v3436_v24 = vsub.f32 %v13776_v35, %v2934_v43  ;;  %v727_v35 = vld [vmem:[%s12342_s4 + $0x6b8] sm:$0xff] }
 0x3ff   : > { %v4249_v17 = vadd.f32 %v11494_v12, %v4248_v16  ;;  %v3437_v49 = vsub.f32 %v13777_v51, %v2934_v43  ;;  %v3438_v19 = vsub.f32 %v3182_v47, %v2934_v43  ;;  %v11506_v57 = vpop.eup %5895  ;;  %v1679_v42 = vadd.f32 %v1678_v55, %v1372_v30  ;;  %v11517_v47 = vpop.xlane.xlu1 %4116  ;;  %v13780_v55 = vld [vmem:[#allocation50_spill] sm:$0xff] }
 0x400   : > { %13778 = vst [vmem:[#allocation323_spill] sm:$0xff] %v11506_v57  ;;  %v3911_v20 = vmul.f32 1.442695, %v3435_v59  ;;  %5907 = vrcp.f32 %v11320_v27  ;;  %v1373_v51 = vmul.f32 %v13484_v18, %v724_v3  ;;  %v3913_v40 = vmul.f32 1.442695, %v3436_v24  ;;  %v13782_v3 = vld [vmem:[#allocation401_spill] sm:$0xff] }
 0x401   : > { %v5898_v58 = vpop.eup %5897  ;;  %v4250_v7 = vadd.f32 %v11506_v57, %v4249_v17  ;;  %v3915_v56 = vmul.f32 1.442695, %v3437_v49  ;;  %v3917_v14 = vmul.f32 1.442695, %v3438_v19  ;;  %1680 = vadd.xlane.f32.xlu0 %v1679_v42  ;;  %v1374_v30 = vmul.f32 %v13486_v22, %v725_v52  ;;  %v13781_v49 = vld [vmem:[#allocation346_spill] sm:$0xff]  ;;  %v13784_v17 = vld [vmem:[#allocation233_spill] sm:$0xff] }
 0x402   : > { %v4386_v43 = vmul.f32 %v5898_v58, %v10206_v62  ;;  %5909 = vpow2.f32 %v3911_v20  ;;  %v1375_v27 = vmul.f32 %v13488_v10, %v726_v37  ;;  %vm2736_vm12 = vcmp.ge.f32.partialorder %v13780_v55, 0.0  ;;  %v13785_v52 = vld [vmem:[#allocation235_spill] sm:$0xff]  ;;  %v13787_v58 = vld [vmem:[#allocation285_spill] sm:$0xff] }
 0x403   : > { %v11519_v16 = vpop.eup %5899  ;;  %4251 = vadd.xlane.f32.xlu1 %v4250_v7  ;;  %5911 = vpow2.f32 %v3913_v40  ;;  %v1376_v24 = vmul.f32 %v13490_v36, %v727_v35  ;;  %v2935_v62 = vsel %vm2735_vm11, %v13782_v3, %v13781_v49  ;;  %v3186_v38 = vmul.f32 %v13696_v23, %v13765_v63  ;;  %v13786_v42 = vld [vmem:[#allocation23_spill] sm:$0xff] }
 0x404   : > { %13779 = vst [vmem:[#allocation380_spill] sm:$0xff] %v11519_v16  ;;  %v11529_v59 = vpop.eup %5901  ;;  %v4507_v19 = vmul.f32 %v13784_v17, %v4386_v43  ;;  %v4508_v37 = vmul.f32 %v13785_v52, %v4386_v43  ;;  %v4509_v20 = vmul.f32 %v13786_v42, %v4386_v43  ;;  %v4510_v7 = vmul.f32 %v13787_v58, %v4386_v43  ;;  %v13788_v57 = vld [vmem:[#allocation99_spill] sm:$0xff]  ;;  %v728_v17 = vld [vmem:[%s12342_s4 + $0x6c0] sm:$0xff]  ;;  %v13790_v42 = vld [vmem:[#allocation197_spill] sm:$0xff] }
 0x405   : > { %13783 = vst [vmem:[#allocation76_spill] sm:$0xff] %v11529_v59  ;;  %v4253_v35 = vadd.f32 %v11529_v59, %v11519_v16  ;;  %5913 = vpow2.f32 %v3915_v56  ;;  %v1682_v40 = vadd.f32 %v1374_v30, %v1373_v51  ;;  %v3439_v49 = vsub.f32 %v13788_v57, %v2935_v62  ;;  %v729_v57 = vld [vmem:[%s12342_s4 + $0x6c8] sm:$0xff]  ;;  %v730_v56 = vld [vmem:[%s12342_s4 + $0x6d0] sm:$0xff]  ;;  %v11558_v30 = vpop.xlane.xlu1 %4121 }
 0x406   : > { %v11538_v3 = vpop.eup %5903  ;;  %v4705_v63 = vadd.f32 %v4704_v29, %v4507_v19  ;;  %v4774_v12 = vadd.f32 %v4773_v53, %v4508_v37  ;;  %v4843_v8 = vadd.f32 %v4842_v26, %v4509_v20  ;;  %v4912_v0 = vadd.f32 %v4911_v54, %v4510_v7  ;;  %v13792_v29 = vld [vmem:[#allocation146_spill] sm:$0xff] }
 0x407   : > { %13789 = vst [vmem:[#allocation174_spill] sm:$0xff] %v11538_v3  ;;  %v4254_v52 = vadd.f32 %v11538_v3, %v4253_v35  ;;  %5915 = vpow2.f32 %v3917_v14  ;;  %v1683_v43 = vadd.f32 %v1682_v40, %v1375_v27  ;;  %v3440_v58 = vsub.f32 %v13790_v42, %v2935_v62  ;;  %v731_v14 = vld [vmem:[%s12342_s4 + $0x6d8] sm:$0xff]  ;;  %v13793_v35 = vld [vmem:[#allocation93_spill] sm:$0xff]  ;;  %v13796_v42 = vld [vmem:[#allocation402_spill] sm:$0xff] }
 0x408   : > { %v11548_v51 = vpop.eup %5905  ;;  %v3441_v53 = vsub.f32 %v13792_v29, %v2935_v62  ;;  %v3442_v26 = vsub.f32 %v3186_v38, %v2935_v62  ;;  %v3919_v54 = vmul.f32 1.442695, %v3439_v49  ;;  %5917 = vrcp.f32 %v11354_v46  ;;  %v13849_v3 = vld [vmem:[#allocation202_spill] sm:$0xff] }
 0x409   : > { %13791 = vst [vmem:[#allocation125_spill] sm:$0xff] %v11548_v51  ;;  %v4255_v27 = vadd.f32 %v11548_v51, %v4254_v52  ;;  %v1684_v19 = vadd.f32 %v1683_v43, %v1376_v24  ;;  %v3921_v37 = vmul.f32 1.442695, %v3440_v58  ;;  %v1377_v20 = vmul.f32 %v13484_v18, %v728_v17  ;;  %v13795_v43 = vld [vmem:[#allocation347_spill] sm:$0xff] }
 0x40a   : > { %v5908_v62 = vpop.eup %5907  ;;  %5919 = vpow2.f32 %v3919_v54  ;;  %v3923_v38 = vmul.f32 1.442695, %v3441_v53  ;;  %v3925_v46 = vmul.f32 1.442695, %v3442_v26  ;;  %v1378_v7 = vmul.f32 %v13486_v22, %v729_v57  ;;  %v13799_v26 = vld [vmem:[#allocation56_spill] sm:$0xff] }
 0x40b   : > { %vm2737_vm13 = vcmp.ge.f32.partialorder %v13793_v35, 0.0  ;;  %4256 = vadd.xlane.f32.xlu1 %v4255_v27  ;;  %v4387_v40 = vmul.f32 %v5908_v62, %v10247_v21  ;;  %1685 = vadd.xlane.f32.xlu0 %v1684_v19  ;;  %5921 = vpow2.f32 %v3921_v37  ;;  %v1379_v49 = vmul.f32 %v13488_v10, %v730_v56  ;;  %v13798_v21 = vld [vmem:[#allocation16_spill] sm:$0xff] }
 0x40c   : > { %v1380_v24 = vmul.f32 %v13490_v36, %v731_v14  ;;  %v11567_v52 = vpop.eup %5909  ;;  %5923 = vpow2.f32 %v3923_v38  ;;  %v1687_v17 = vadd.f32 %v1378_v7, %v1377_v20  ;;  %v2936_v58 = vsel %vm2736_vm12, %v13796_v42, %v13795_v43  ;;  %v13800_v14 = vld [vmem:[#allocation154_spill] sm:$0xff]  ;;  %v13801_v20 = vld [vmem:[#allocation100_spill] sm:$0xff]  ;;  %v11587_v38 = vpop.xlane.xlu1 %4126 }
 0x40d   : > { %13794 = vst [vmem:[#allocation274_spill] sm:$0xff] %v11567_v52  ;;  %v3190_v57 = vmul.f32 %v13696_v23, %v13780_v55  ;;  %v11575_v29 = vpop.eup %5911  ;;  %v4511_v53 = vmul.f32 %v13798_v21, %v4387_v40  ;;  %v4512_v54 = vmul.f32 %v13799_v26, %v4387_v40  ;;  %v4513_v56 = vmul.f32 %v10200_v2, %v4387_v40  ;;  %v732_v55 = vld [vmem:[%s12342_s4 + $0x6e0] sm:$0xff] }
 0x40e   : > { %13797 = vst [vmem:[#allocation324_spill] sm:$0xff] %v11575_v29  ;;  %v4514_v27 = vmul.f32 %v13800_v14, %v4387_v40  ;;  %v4258_v19 = vadd.f32 %v11575_v29, %v11567_v52  ;;  %5925 = vpow2.f32 %v3925_v46  ;;  %v1688_v37 = vadd.f32 %v1687_v17, %v1379_v49  ;;  %v733_v40 = vld [vmem:[%s12342_s4 + $0x6e8] sm:$0xff]  ;;  %v13803_v17 = vld [vmem:[#allocation198_spill] sm:$0xff]  ;;  %v13804_v14 = vld [vmem:[#allocation147_spill] sm:$0xff] }
 0x40f   : > { %v3443_v62 = vsub.f32 %v13801_v20, %v2936_v58  ;;  %v11589_v7 = vpop.eup %5913  ;;  %v4706_v43 = vadd.f32 %v4705_v63, %v4511_v53  ;;  %v4775_v42 = vadd.f32 %v4774_v12, %v4512_v54  ;;  %v4844_v2 = vadd.f32 %v4843_v8, %v4513_v56  ;;  %v734_v29 = vld [vmem:[%s12342_s4 + $0x6f0] sm:$0xff] }
 0x410   : > { %13802 = vst [vmem:[#allocation381_spill] sm:$0xff] %v11589_v7  ;;  %v4913_v21 = vadd.f32 %v4912_v0, %v4514_v27  ;;  %v4259_v46 = vadd.f32 %v11589_v7, %v4258_v19  ;;  %v1689_v49 = vadd.f32 %v1688_v37, %v1380_v24  ;;  %v3444_v26 = vsub.f32 %v13803_v17, %v2936_v58  ;;  %v735_v0 = vld [vmem:[%s12342_s4 + $0x6f8] sm:$0xff]  ;;  %v13807_v37 = vld [vmem:[#allocation94_spill] sm:$0xff]  ;;  %v11619_v17 = vpop.xlane.xlu1 %4131 }
 0x411   : > { %v3445_v20 = vsub.f32 %v13804_v14, %v2936_v58  ;;  %v11600_v52 = vpop.eup %5915  ;;  %v3446_v12 = vsub.f32 %v3190_v57, %v2936_v58  ;;  %v3927_v8 = vmul.f32 1.442695, %v3443_v62  ;;  %5927 = vrcp.f32 %v11388_v33  ;;  %v13812_v14 = vld [vmem:[#allocation236_spill] sm:$0xff] }
 0x412   : > { %13805 = vst [vmem:[#allocation77_spill] sm:$0xff] %v11600_v52  ;;  %v1381_v63 = vmul.f32 %v13484_v18, %v732_v55  ;;  %v5918_v24 = vpop.eup %5917  ;;  %v4260_v53 = vadd.f32 %v11600_v52, %v4259_v46  ;;  %1690 = vadd.xlane.f32.xlu0 %v1689_v49  ;;  %v3929_v54 = vmul.f32 1.442695, %v3444_v26  ;;  %v1382_v27 = vmul.f32 %v13486_v22, %v733_v40  ;;  %v13808_v46 = vld [vmem:[#allocation348_spill] sm:$0xff]  ;;  %v13809_v49 = vld [vmem:[#allocation403_spill] sm:$0xff] }
 0x413   : > { %v3931_v56 = vmul.f32 1.442695, %v3445_v20  ;;  %v4388_v19 = vmul.f32 %v5918_v24, %v10288_v45  ;;  %5929 = vpow2.f32 %v3927_v8  ;;  %v3933_v58 = vmul.f32 1.442695, %v3446_v12  ;;  %v13811_v26 = vld [vmem:[#allocation107_spill] sm:$0xff]  ;;  %v13813_v12 = vld [vmem:[#allocation24_spill] sm:$0xff] }
 0x414   : > { %v1383_v33 = vmul.f32 %v13488_v10, %v734_v29  ;;  %v11611_v57 = vpop.eup %5919  ;;  %vm2738_vm14 = vcmp.ge.f32.partialorder %v13807_v37, 0.0  ;;  %4261 = vadd.xlane.f32.xlu1 %v4260_v53  ;;  %5931 = vpow2.f32 %v3929_v54  ;;  %v1384_v62 = vmul.f32 %v13490_v36, %v735_v0  ;;  %v13814_v24 = vld [vmem:[#allocation302_spill] sm:$0xff] }
 0x415   : > { %13806 = vst [vmem:[#allocation175_spill] sm:$0xff] %v11611_v57  ;;  %v1692_v55 = vadd.f32 %v1382_v27, %v1381_v63  ;;  %v2937_v40 = vsel %vm2737_vm13, %v13809_v49, %v13808_v46  ;;  %v11621_v45 = vpop.eup %5921  ;;  %v4515_v29 = vmul.f32 %v13811_v26, %v4388_v19  ;;  %v4516_v20 = vmul.f32 %v13812_v14, %v4388_v19  ;;  %v736_v14 = vld [vmem:[%s12342_s4 + $0x700] sm:$0xff] }
 0x416   : > { %13810 = vst [vmem:[#allocation126_spill] sm:$0xff] %v11621_v45  ;;  %v4517_v8 = vmul.f32 %v13813_v12, %v4388_v19  ;;  %v4518_v53 = vmul.f32 %v13814_v24, %v4388_v19  ;;  %v11627_v54 = vpop.eup %5923  ;;  %v4263_v0 = vadd.f32 %v11621_v45, %v11611_v57  ;;  %5933 = vpow2.f32 %v3931_v56  ;;  %v737_v19 = vld [vmem:[%s12342_s4 + $0x708] sm:$0xff] }
 0x417   : > { %13815 = vst [vmem:[#allocation275_spill] sm:$0xff] %v11627_v54  ;;  %v1693_v63 = vadd.f32 %v1692_v55, %v1383_v33  ;;  %v3194_v27 = vmul.f32 %v13696_v23, %v13793_v35  ;;  %v4707_v46 = vadd.f32 %v4706_v43, %v4515_v29  ;;  %v4776_v49 = vadd.f32 %v4775_v42, %v4516_v20  ;;  %v13817_v55 = vld [vmem:[#allocation101_spill] sm:$0xff]  ;;  %v738_v43 = vld [vmem:[%s12342_s4 + $0x710] sm:$0xff]  ;;  %v13818_v42 = vld [vmem:[#allocation199_spill] sm:$0xff] }
 0x418   : > { %v4845_v52 = vadd.f32 %v4844_v2, %v4517_v8  ;;  %v4914_v26 = vadd.f32 %v4913_v21, %v4518_v53  ;;  %v11639_v12 = vpop.eup %5925  ;;  %v4264_v56 = vadd.f32 %v11627_v54, %v4263_v0  ;;  %5935 = vpow2.f32 %v3933_v58  ;;  %v13819_v21 = vld [vmem:[#allocation148_spill] sm:$0xff]  ;;  %v739_v8 = vld [vmem:[%s12342_s4 + $0x718] sm:$0xff] }
 0x419   : > { %13816 = vst [vmem:[#allocation6_spill] sm:$0xff] %v11639_v12  ;;  %v1694_v33 = vadd.f32 %v1693_v63, %v1384_v62  ;;  %v3447_v35 = vsub.f32 %v13817_v55, %v2937_v40  ;;  %v3448_v2 = vsub.f32 %v13818_v42, %v2937_v40  ;;  %v3449_v29 = vsub.f32 %v13819_v21, %v2937_v40  ;;  %v740_v0 = vld [vmem:[%s12342_s4 + $0x720] sm:$0xff]  ;;  %v11658_v63 = vpop.xlane.xlu1 %4136  ;;  %v13820_v21 = vld [vmem:[#allocation189_spill] sm:$0xff] }
 0x41a   : > { %v3450_v20 = vsub.f32 %v3194_v27, %v2937_v40  ;;  %5937 = vrcp.f32 %v11422_v39  ;;  %v4265_v58 = vadd.f32 %v11639_v12, %v4264_v56  ;;  %v1385_v24 = vmul.f32 %v13484_v18, %v736_v14  ;;  %v13823_v12 = vld [vmem:[#allocation404_spill] sm:$0xff] }
 0x41b   : > { %1695 = vadd.xlane.f32.xlu0 %v1694_v33  ;;  %v3935_v62 = vmul.f32 1.442695, %v3447_v35  ;;  %v1386_v53 = vmul.f32 %v13486_v22, %v737_v19  ;;  %v5928_v40 = vpop.eup %5927  ;;  %v3937_v39 = vmul.f32 1.442695, %v3448_v2  ;;  %v3939_v27 = vmul.f32 1.442695, %v3449_v29 }
 0x41c   : > { %v3941_v55 = vmul.f32 1.442695, %v3450_v20  ;;  %v1387_v42 = vmul.f32 %v13488_v10, %v738_v43  ;;  %vm2739_vm15 = vcmp.ge.f32.partialorder %v13820_v21, 0.0  ;;  %4266 = vadd.xlane.f32.xlu1 %v4265_v58  ;;  %v4389_v56 = vmul.f32 %v5928_v40, %v10329_v32  ;;  %v13822_v35 = vld [vmem:[#allocation349_spill] sm:$0xff]  ;;  %v13825_v32 = vld [vmem:[#allocation359_spill] sm:$0xff] }
 0x41d   : > { %5939 = vpow2.f32 %v3935_v62  ;;  %v1388_v14 = vmul.f32 %v13490_v36, %v739_v8  ;;  %v1697_v19 = vadd.f32 %v1386_v53, %v1385_v24  ;;  %v11664_v33 = vpop.eup %5929  ;;  %v2938_v2 = vsel %vm2738_vm14, %v13823_v12, %v13822_v35  ;;  %v13826_v62 = vld [vmem:[#allocation237_spill] sm:$0xff]  ;;  %v13827_v24 = vld [vmem:[#allocation238_spill] sm:$0xff]  ;;  %v13828_v40 = vld [vmem:[#allocation239_spill] sm:$0xff] }
 0x41e   : > { %13821 = vst [vmem:[#allocation7_spill] sm:$0xff] %v11664_v33  ;;  %5941 = vpow2.f32 %v3937_v39  ;;  %v3198_v43 = vmul.f32 %v13696_v23, %v13807_v37  ;;  %v1389_v29 = vmul.f32 %v13484_v18, %v740_v0  ;;  %v11673_v20 = vpop.eup %5931  ;;  %v4519_v58 = vmul.f32 %v13825_v32, %v4389_v56  ;;  %v13829_v35 = vld [vmem:[#allocation102_spill] sm:$0xff] }
 0x41f   : > { %13824 = vst [vmem:[#allocation8_spill] sm:$0xff] %v11673_v20  ;;  %v4520_v8 = vmul.f32 %v13826_v62, %v4389_v56  ;;  %v4521_v53 = vmul.f32 %v13827_v24, %v4389_v56  ;;  %v4522_v39 = vmul.f32 %v13828_v40, %v4389_v56  ;;  %v4268_v54 = vadd.f32 %v11673_v20, %v11664_v33  ;;  %v741_v56 = vld [vmem:[%s12342_s4 + $0x728] sm:$0xff]  ;;  %v743_v40 = vld [vmem:[%s12342_s4 + $0x738] sm:$0xff] }
 0x420   : > { %5943 = vpow2.f32 %v3939_v27  ;;  %v1698_v12 = vadd.f32 %v1697_v19, %v1387_v42  ;;  %v3451_v45 = vsub.f32 %v13829_v35, %v2938_v2  ;;  %v11682_v37 = vpop.eup %5933  ;;  %v11684_v0 = vadd.f32 %v4707_v46, %v4519_v58  ;;  %v742_v27 = vld [vmem:[%s12342_s4 + $0x730] sm:$0xff]  ;;  %v11698_v42 = vpop.xlane.xlu1 %4141  ;;  %v13846_v33 = vld [vmem:[#allocation47_spill] sm:$0xff] }
 0x421   : > { %13830 = vst [vmem:[#allocation9_spill] sm:$0xff] %v11682_v37  ;;  %v11686_v57 = vadd.f32 %v4776_v49, %v4520_v8  ;;  %v11688_v32 = vadd.f32 %v4845_v52, %v4521_v53  ;;  %v11690_v62 = vadd.f32 %v4914_v26, %v4522_v39  ;;  %v4269_v19 = vadd.f32 %v11682_v37, %v4268_v54  ;;  %v13831_v49 = vld [vmem:[#allocation200_spill] sm:$0xff]  ;;  %v13833_v26 = vld [vmem:[#allocation149_spill] sm:$0xff] }
 0x422   : > { %5945 = vpow2.f32 %v3941_v55  ;;  %v1699_v46 = vadd.f32 %v1698_v12, %v1388_v14  ;;  %v3452_v58 = vsub.f32 %v13831_v49, %v2938_v2  ;;  %v11702_v52 = vpop.eup %5935  ;;  %v3453_v8 = vsub.f32 %v13833_v26, %v2938_v2  ;;  %v13839_v26 = vld [vmem:[#allocation341_spill] sm:$0xff]  ;;  %v13845_v37 = vld [vmem:[#allocation272_spill] sm:$0xff] }
 0x423   : > { %13832 = vst [vmem:[#allocation325_spill] sm:$0xff] %v11702_v52  ;;  %v3454_v24 = vsub.f32 %v3198_v43, %v2938_v2  ;;  %v3943_v53 = vmul.f32 1.442695, %v3451_v45  ;;  %5947 = vrcp.f32 %v11453_v31  ;;  %v4270_v35 = vadd.f32 %v11702_v52, %v4269_v19  ;;  %v13834_v31 = vld [vmem:[#allocation194_spill] sm:$0xff] }
 0x424   : > { %v5938_v39 = vpop.eup %5937  ;;  %1700 = vadd.xlane.f32.xlu0 %v1699_v46  ;;  %v3945_v54 = vmul.f32 1.442695, %v3452_v58  ;;  %v1390_v55 = vmul.f32 %v13486_v22, %v741_v56  ;;  %v1391_v14 = vmul.f32 %v13488_v10, %v742_v27  ;;  %v3947_v45 = vmul.f32 1.442695, %v3453_v8  ;;  %v13835_v19 = vld [vmem:[#allocation350_spill] sm:$0xff]  ;;  %v13836_v46 = vld [vmem:[#allocation405_spill] sm:$0xff] }
 0x425   : > { %v11713_v12 = vmul.f32 %v5938_v39, %v10368_v15  ;;  %5949 = vpow2.f32 %v3943_v53  ;;  %v3949_v2 = vmul.f32 1.442695, %v3454_v24  ;;  %vm2740_vm0 = vcmp.ge.f32.partialorder %v13834_v31, 0.0  ;;  %4271 = vadd.xlane.f32.xlu1 %v4270_v35  ;;  %v13838_v15 = vld [vmem:[#allocation340_spill] sm:$0xff]  ;;  %v13840_v24 = vld [vmem:[#allocation54_spill] sm:$0xff]  ;;  %v11737_v39 = vpop.xlane.xlu1 %4146 }
 0x426   : > { %5951 = vpow2.f32 %v3945_v54  ;;  %v1392_v43 = vmul.f32 %v13490_v36, %v743_v40  ;;  %v1702_v49 = vadd.f32 %v1390_v55, %v1389_v29  ;;  %v2939_v56 = vsel %vm2739_vm15, %v13836_v46, %v13835_v19  ;;  %v13841_v29 = vld [vmem:[#allocation48_spill] sm:$0xff]  ;;  %v13843_v54 = vld [vmem:[#allocation17_spill] sm:$0xff] }
 0x427   : > { %v11721_v58 = vpop.eup %5939  ;;  %v2808_v27 = vmul.f32 %v13838_v15, %v13834_v31  ;;  %v11727_v8 = vmul.f32 %v13838_v15, %v13839_v26  ;;  %v11731_v53 = vmul.f32 %v13840_v24, %v13839_v26  ;;  %v11735_v40 = vmul.f32 %v13841_v29, %v13839_v26  ;;  %v13844_v46 = vld [vmem:[#allocation201_spill] sm:$0xff] }
 0x428   : > { %13837 = vst [vmem:[#allocation382_spill] sm:$0xff] %v11721_v58  ;;  %v11739_v35 = vpop.eup %5941  ;;  %v11743_v55 = vmul.f32 %v13838_v15, %v13843_v54  ;;  %5953 = vpow2.f32 %v3947_v45  ;;  %v1703_v19 = vadd.f32 %v1702_v49, %v1391_v14  ;;  %v3455_v52 = vsub.f32 %v13844_v46, %v2939_v56  ;;  %v744_v14 = vld [vmem:[%s12342_s4 + $0x740] sm:$0xff]  ;;  %v745_v45 = vld [vmem:[%s12342_s4 + $0x748] sm:$0xff] }
 0x429   : > { %13842 = vst [vmem:[#allocation78_spill] sm:$0xff] %v11739_v35  ;;  %vm2741_vm1 = vcmp.ge.f32.partialorder %v13839_v26, 0.0  ;;  %v11749_v20 = vmul.f32 %v13845_v37, %v13843_v54  ;;  %v11753_v7 = vmul.f32 %v13846_v33, %v13843_v54  ;;  %v4273_v51 = vadd.f32 %v11739_v35, %v11721_v58  ;;  %v13848_v49 = vld [vmem:[#allocation240_spill] sm:$0xff] }
 0x42a   : > { %v3202_v15 = vmul.f32 %v13696_v23, %v13820_v21  ;;  %v11765_v37 = vpop.eup %5943  ;;  %v4523_v33 = vmul.f32 %v13848_v49, %v11713_v12  ;;  %5955 = vpow2.f32 %v3949_v2  ;;  %v1704_v46 = vadd.f32 %v1703_v19, %v1392_v43  ;;  %v13850_v21 = vld [vmem:[#allocation203_spill] sm:$0xff]  ;;  %v11786_v49 = vpop.xlane.xlu1 %4151 }
 0x42b   : > { %13847 = vst [vmem:[#allocation176_spill] sm:$0xff] %v11765_v37  ;;  %v3456_v35 = vsub.f32 %v13849_v3, %v2939_v56  ;;  %v4274_v58 = vadd.f32 %v11765_v37, %v4273_v51  ;;  %v3457_v59 = vsub.f32 %v13850_v21, %v2939_v56  ;;  %v3951_v44 = vmul.f32 1.442695, %v3455_v52  ;;  %v747_v3 = vld [vmem:[%s12342_s4 + $0x758] sm:$0xff] }
 0x42c   : > { %v3458_v16 = vsub.f32 %v3202_v15, %v2939_v56  ;;  %v11775_v41 = vpop.eup %5945  ;;  %1705 = vadd.xlane.f32.xlu0 %v1704_v46  ;;  %5957 = vrcp.f32 %v11487_v34  ;;  %v1393_v51 = vmul.f32 %v13484_v18, %v744_v14  ;;  %v1394_v2 = vmul.f32 %v13486_v22, %v745_v45  ;;  %v13852_v56 = vld [vmem:[#allocation303_spill] sm:$0xff] }
 0x42d   : > { %13851 = vst [vmem:[#allocation127_spill] sm:$0xff] %v11775_v41  ;;  %v3953_v6 = vmul.f32 1.442695, %v3456_v35  ;;  %v5948_v43 = vpop.eup %5947  ;;  %v4275_v52 = vadd.f32 %v11775_v41, %v4274_v58  ;;  %v4524_v19 = vmul.f32 %v13852_v56, %v11713_v12  ;;  %5959 = vpow2.f32 %v3951_v44  ;;  %v13853_v35 = vld [vmem:[#allocation26_spill] sm:$0xff] }
 0x42e   : > { %v3955_v15 = vmul.f32 1.442695, %v3457_v59  ;;  %v11789_v34 = vmul.f32 %v5948_v43, %v13853_v35  ;;  %v3957_v46 = vmul.f32 1.442695, %v3458_v16  ;;  %v1395_v21 = vmul.f32 %v13488_v10, %v746_v28  ;;  %v13855_v59 = vld [vmem:[#allocation351_spill] sm:$0xff]  ;;  %v13857_v28 = vld [vmem:[#allocation360_spill] sm:$0xff] }
 0x42f   : > { %5961 = vpow2.f32 %v3953_v6  ;;  %v11792_v14 = vpop.eup %5949  ;;  %v11796_v45 = vmul.f32 %v13840_v24, %v13843_v54  ;;  %4276 = vadd.xlane.f32.xlu1 %v4275_v52  ;;  %v1396_v58 = vmul.f32 %v13490_v36, %v747_v3  ;;  %v1707_v44 = vadd.f32 %v1394_v2, %v1393_v51  ;;  %v13858_v24 = vld [vmem:[#allocation241_spill] sm:$0xff] }
 0x430   : > { %13854 = vst [vmem:[#allocation276_spill] sm:$0xff] %v11792_v14  ;;  %v2940_v56 = vsel %vm2740_vm0, %v2808_v27, %v13855_v59  ;;  %v11802_v43 = vpop.eup %5951  ;;  %v11806_v6 = vmul.f32 %v13841_v29, %v13843_v54  ;;  %v4525_v16 = vmul.f32 %v13857_v28, %v11713_v12  ;;  %v4526_v35 = vmul.f32 %v13858_v24, %v11713_v12  ;;  %v13859_v27 = vld [vmem:[#allocation204_spill] sm:$0xff]  ;;  %v13861_v28 = vld [vmem:[#allocation242_spill] sm:$0xff] }
 0x431   : > { %13856 = vst [vmem:[#allocation326_spill] sm:$0xff] %v11802_v43  ;;  %5963 = vpow2.f32 %v3955_v15  ;;  %v4709_v3 = vadd.f32 %v11684_v0, %v4523_v33  ;;  %v4278_v51 = vadd.f32 %v11802_v43, %v11792_v14  ;;  %v1708_v2 = vadd.f32 %v1707_v44, %v1395_v21  ;;  %v13862_v15 = vld [vmem:[#allocation205_spill] sm:$0xff]  ;;  %v13863_v44 = vld [vmem:[#allocation206_spill] sm:$0xff] }
 0x432   : > { %v3459_v52 = vsub.f32 %v13859_v27, %v2940_v56  ;;  %v11816_v59 = vpop.eup %5953  ;;  %vm2742_vm2 = vcmp.ge.f32.partialorder %v13843_v54, 0.0  ;;  %v4778_v29 = vadd.f32 %v11686_v57, %v4524_v19  ;;  %v4527_v41 = vmul.f32 %v13861_v28, %v11789_v34  ;;  %v11827_v27 = vpop.xlane.xlu1 %4156  ;;  %v13865_v19 = vld [vmem:[#allocation352_spill] sm:$0xff] }
 0x433   : > { %13860 = vst [vmem:[#allocation383_spill] sm:$0xff] %v11816_v59  ;;  %5965 = vpow2.f32 %v3957_v46  ;;  %v3206_v12 = vmul.f32 %v13696_v23, %v13834_v31  ;;  %v4279_v0 = vadd.f32 %v11816_v59, %v4278_v51  ;;  %v1709_v33 = vadd.f32 %v1708_v2, %v1396_v58 }
 0x434   : > { %v3460_v21 = vsub.f32 %v13862_v15, %v2940_v56  ;;  %v3461_v24 = vsub.f32 %v13863_v44, %v2940_v56  ;;  %v11829_v43 = vpop.eup %5955  ;;  %v3959_v57 = vmul.f32 1.442695, %v3459_v52  ;;  %5967 = vrcp.f32 %v11517_v47  ;;  %v13866_v15 = vld [vmem:[#allocation243_spill] sm:$0xff]  ;;  %v13867_v52 = vld [vmem:[#allocation353_spill] sm:$0xff] }
 0x435   : > { %13864 = vst [vmem:[#allocation79_spill] sm:$0xff] %v11829_v43  ;;  %v3462_v14 = vsub.f32 %v3206_v12, %v2940_v56  ;;  %v2941_v31 = vsel %vm2741_vm1, %v11727_v8, %v13865_v19  ;;  %v4280_v46 = vadd.f32 %v11829_v43, %v4279_v0  ;;  %1710 = vadd.xlane.f32.xlu0 %v1709_v33  ;;  %v13869_v8 = vld [vmem:[#allocation108_spill] sm:$0xff]  ;;  %v13876_v43 = vld [vmem:[#allocation245_spill] sm:$0xff] }
 0x436   : > { %v3961_v58 = vmul.f32 1.442695, %v3460_v21  ;;  %v3963_v51 = vmul.f32 1.442695, %v3461_v24  ;;  %v3210_v2 = vmul.f32 %v13696_v23, %v13839_v26  ;;  %v5958_v28 = vpop.eup %5957  ;;  %v4528_v56 = vmul.f32 %v13866_v15, %v11789_v34  ;;  %v752_v26 = vld [vmem:[%s12342_s4 + $0x780] sm:$0xff] }
 0x437   : > { %5969 = vpow2.f32 %v3959_v57  ;;  %v3463_v47 = vsub.f32 %v13867_v52, %v2941_v31  ;;  %v3464_v12 = vsub.f32 %v11731_v53, %v2941_v31  ;;  %v11843_v44 = vpop.eup %5959  ;;  %4281 = vadd.xlane.f32.xlu1 %v4280_v46  ;;  %v4392_v0 = vmul.f32 %v5958_v28, %v13869_v8  ;;  %v13871_v53 = vld [vmem:[#allocation244_spill] sm:$0xff]  ;;  %v753_v28 = vld [vmem:[%s12342_s4 + $0x788] sm:$0xff] }
 0x438   : > { %13868 = vst [vmem:[#allocation177_spill] sm:$0xff] %v11843_v44  ;;  %5971 = vpow2.f32 %v3961_v58  ;;  %v3965_v33 = vmul.f32 1.442695, %v3462_v14  ;;  %v3465_v21 = vsub.f32 %v11735_v40, %v2941_v31  ;;  %v4847_v57 = vadd.f32 %v11688_v32, %v4525_v16  ;;  %v754_v32 = vld [vmem:[%s12342_s4 + $0x790] sm:$0xff]  ;;  %v11864_v16 = vpop.xlane.xlu1 %4161 }
 0x439   : > { %v11850_v24 = vpop.eup %5961  ;;  %v4916_v19 = vadd.f32 %v11690_v62, %v4526_v35  ;;  %v4529_v15 = vmul.f32 %v13871_v53, %v11789_v34  ;;  %v3967_v46 = vmul.f32 1.442695, %v3463_v47  ;;  %5973 = vpow2.f32 %v3963_v51  ;;  %v13873_v35 = vld [vmem:[#allocation304_spill] sm:$0xff] }
 0x43a   : > { %13870 = vst [vmem:[#allocation128_spill] sm:$0xff] %v11850_v24  ;;  %v4283_v58 = vadd.f32 %v11850_v24, %v11843_v44  ;;  %v3466_v14 = vsub.f32 %v3210_v2, %v2941_v31  ;;  %v3969_v40 = vmul.f32 1.442695, %v3464_v12  ;;  %v4530_v52 = vmul.f32 %v13873_v35, %v11789_v34  ;;  %v13874_v2 = vld [vmem:[#allocation361_spill] sm:$0xff]  ;;  %v755_v24 = vld [vmem:[%s12342_s4 + $0x798] sm:$0xff] }
 0x43b   : > { %v11866_v62 = vpop.eup %5963  ;;  %v4710_v47 = vadd.f32 %v4709_v3, %v4527_v41  ;;  %v4779_v8 = vadd.f32 %v4778_v29, %v4528_v56  ;;  %v1401_v31 = vmul.f32 %v13484_v18, %v752_v26  ;;  %v4531_v12 = vmul.f32 %v13874_v2, %v4392_v0 }
 0x43c   : > { %13872 = vst [vmem:[#allocation277_spill] sm:$0xff] %v11866_v62  ;;  %v4284_v51 = vadd.f32 %v11866_v62, %v4283_v58  ;;  %5975 = vpow2.f32 %v3965_v33  ;;  %v3971_v53 = vmul.f32 1.442695, %v3465_v21  ;;  %v4532_v59 = vmul.f32 %v13876_v43, %v4392_v0  ;;  %v13877_v58 = vld [vmem:[#allocation246_spill] sm:$0xff]  ;;  %v11893_v35 = vpop.xlane.xlu1 %4166 }
 0x43d   : > { %v11876_v44 = vpop.eup %5965  ;;  %5977 = vpow2.f32 %v3967_v46  ;;  %v1402_v41 = vmul.f32 %v13486_v22, %v753_v28  ;;  %v1403_v34 = vmul.f32 %v13488_v10, %v754_v32  ;;  %v3973_v29 = vmul.f32 1.442695, %v3466_v14  ;;  %v13878_v32 = vld [vmem:[#allocation247_spill] sm:$0xff] }
 0x43e   : > { %13875 = vst [vmem:[#allocation28_spill] sm:$0xff] %v11876_v44  ;;  %v4285_v3 = vadd.f32 %v11876_v44, %v4284_v51  ;;  %5979 = vpow2.f32 %v3969_v40  ;;  %v2942_v56 = vsel %vm2742_vm2, %v11743_v55, %v11749_v20  ;;  %v5968_v33 = vpop.eup %5967  ;;  %v1404_v21 = vmul.f32 %v13490_v36, %v755_v24  ;;  %v13938_v44 = vld [vmem:[#allocation161_spill] sm:$0xff] }
 0x43f   : > { %v1717_v26 = vadd.f32 %v1402_v41, %v1401_v31  ;;  %v3214_v43 = vmul.f32 %v13696_v23, %v13843_v54  ;;  %v3467_v46 = vsub.f32 %v11753_v7, %v2942_v56  ;;  %v4533_v28 = vmul.f32 %v13877_v58, %v4392_v0  ;;  %v13881_v31 = vld [vmem:[#allocation257_spill] sm:$0xff] }
 0x440   : > { %4286 = vadd.xlane.f32.xlu1 %v4285_v3  ;;  %v4534_v40 = vmul.f32 %v13878_v32, %v4392_v0  ;;  %5981 = vpow2.f32 %v3971_v53  ;;  %v3468_v14 = vsub.f32 %v11796_v45, %v2942_v56  ;;  %v3469_v24 = vsub.f32 %v11806_v6, %v2942_v56  ;;  %v748_v6 = vld [vmem:[%s12342_s4 + $0x760] sm:$0xff]  ;;  %v11932_v58 = vpop.xlane.xlu1 %4171 }
 0x441   : > { %v11895_v20 = vpop.eup %5969  ;;  %5983 = vrcp.f32 %v11558_v30  ;;  %v1718_v55 = vadd.f32 %v1717_v26, %v1403_v34  ;;  %v3975_v23 = vmul.f32 1.442695, %v3467_v46  ;;  %v4848_v7 = vadd.f32 %v4847_v57, %v4529_v15  ;;  %v760_v57 = vld [vmem:[%s12342_s4 + $0x7c0] sm:$0xff] }
 0x442   : > { %13879 = vst [vmem:[#allocation327_spill] sm:$0xff] %v11895_v20  ;;  %v11899_v54 = vpop.eup %5971  ;;  %v4393_v51 = vmul.f32 %v5968_v33, %v13881_v31  ;;  %5985 = vpow2.f32 %v3973_v29  ;;  %v3470_v0 = vsub.f32 %v3214_v43, %v2942_v56  ;;  %v4917_v2 = vadd.f32 %v4916_v19, %v4530_v52  ;;  %v13884_v29 = vld [vmem:[#allocation248_spill] sm:$0xff]  ;;  %v13885_v33 = vld [vmem:[#allocation18_spill] sm:$0xff]  ;;  %v763_v31 = vld [vmem:[%s12342_s4 + $0x7d8] sm:$0xff] }
 0x443   : > { %13880 = vst [vmem:[#allocation384_spill] sm:$0xff] %v11899_v54  ;;  %v4288_v45 = vadd.f32 %v11899_v54, %v11895_v20  ;;  %v1719_v53 = vadd.f32 %v1718_v55, %v1404_v21  ;;  %v3977_v41 = vmul.f32 1.442695, %v3468_v14  ;;  %v11904_v3 = vpop.eup %5973  ;;  %v4711_v30 = vadd.f32 %v4710_v47, %v4531_v12  ;;  %v761_v47 = vld [vmem:[%s12342_s4 + $0x7c8] sm:$0xff]  ;;  %v756_v46 = vld [vmem:[%s12342_s4 + $0x7a0] sm:$0xff] }
 0x444   : > { %13882 = vst [vmem:[#allocation80_spill] sm:$0xff] %v11904_v3  ;;  %v4780_v34 = vadd.f32 %v4779_v8, %v4532_v59  ;;  %v4849_v26 = vadd.f32 %v4848_v7, %v4533_v28  ;;  %5987 = vpow2.f32 %v3975_v23  ;;  %v11912_v19 = vadd.f32 %v4917_v2, %v4534_v40  ;;  %v749_v59 = vld [vmem:[%s12342_s4 + $0x768] sm:$0xff]  ;;  %v762_v8 = vld [vmem:[%s12342_s4 + $0x7d0] sm:$0xff] }
 0x445   : > { %v4289_v15 = vadd.f32 %v11904_v3, %v4288_v45  ;;  %1720 = vadd.xlane.f32.xlu0 %v1719_v53  ;;  %5989 = vpow2.f32 %v3977_v41  ;;  %v3979_v52 = vmul.f32 1.442695, %v3469_v24  ;;  %v4535_v56 = vmul.f32 %v13884_v29, %v4393_v51  ;;  %v13887_v40 = vld [vmem:[#allocation362_spill] sm:$0xff]  ;;  %v13889_v45 = vld [vmem:[#allocation249_spill] sm:$0xff] }
 0x446   : > { %v11924_v12 = vpop.eup %5975  ;;  %v4536_v21 = vmul.f32 %v13885_v33, %v4393_v51  ;;  %v3981_v43 = vmul.f32 1.442695, %v3470_v0  ;;  %5991 = vrcp.f32 %v11587_v38  ;;  %v4537_v14 = vmul.f32 %v13887_v40, %v4393_v51  ;;  %v757_v38 = vld [vmem:[%s12342_s4 + $0x7a8] sm:$0xff] }
 0x447   : > { %13883 = vst [vmem:[#allocation178_spill] sm:$0xff] %v11924_v12  ;;  %v11934_v28 = vpop.eup %5977  ;;  %v4290_v32 = vadd.f32 %v11924_v12, %v4289_v15  ;;  %v1397_v55 = vmul.f32 %v13484_v18, %v748_v6  ;;  %v1409_v24 = vmul.f32 %v13484_v18, %v760_v57  ;;  %5993 = vpow2.f32 %v3979_v52  ;;  %v750_v6 = vld [vmem:[%s12342_s4 + $0x770] sm:$0xff]  ;;  %v13933_v12 = vld [vmem:[#allocation160_spill] sm:$0xff] }
 0x448   : > { %13886 = vst [vmem:[#allocation129_spill] sm:$0xff] %v11934_v28  ;;  %v11943_v23 = vpop.eup %5979  ;;  %v1398_v7 = vmul.f32 %v13486_v22, %v749_v59  ;;  %v1410_v0 = vmul.f32 %v13486_v22, %v761_v47  ;;  %v1411_v2 = vmul.f32 %v13488_v10, %v762_v8  ;;  %v4538_v53 = vmul.f32 %v13889_v45, %v4393_v51  ;;  %v758_v51 = vld [vmem:[%s12342_s4 + $0x7b0] sm:$0xff] }
 0x449   : > { %13888 = vst [vmem:[#allocation278_spill] sm:$0xff] %v11943_v23  ;;  %4291 = vadd.xlane.f32.xlu1 %v4290_v32  ;;  %v4293_v41 = vadd.f32 %v11943_v23, %v11934_v28  ;;  %5995 = vrcp.f32 %v11619_v17  ;;  %v1405_v57 = vmul.f32 %v13484_v18, %v756_v46  ;;  %v4712_v52 = vadd.f32 %v4711_v30, %v4535_v56  ;;  %v764_v17 = vld [vmem:[%s12342_s4 + $0x7e0] sm:$0xff]  ;;  %v765_v30 = vld [vmem:[%s12342_s4 + $0x7e8] sm:$0xff]  ;;  %v13936_v28 = vld [vmem:[#allocation311_spill] sm:$0xff] }
 0x44a   : > { %v11959_v15 = vpop.eup %5981  ;;  %5997 = vpow2.f32 %v3981_v43  ;;  %v1727_v59 = vadd.f32 %v1410_v0, %v1409_v24  ;;  %v1406_v47 = vmul.f32 %v13486_v22, %v757_v38  ;;  %v4781_v29 = vadd.f32 %v4780_v34, %v4536_v21  ;;  %v13892_v43 = vld [vmem:[#allocation309_spill] sm:$0xff]  ;;  %v751_v34 = vld [vmem:[%s12342_s4 + $0x778] sm:$0xff]  ;;  %v11981_v24 = vpop.xlane.xlu1 %4176 }
 0x44b   : > { %13890 = vst [vmem:[#allocation35_spill] sm:$0xff] %v11959_v15  ;;  %v5984_v8 = vpop.eup %5983  ;;  %v4294_v33 = vadd.f32 %v11959_v15, %v4293_v41  ;;  %v1412_v32 = vmul.f32 %v13490_v36, %v763_v31  ;;  %5999 = vrcp.f32 %v11658_v63  ;;  %v1399_v21 = vmul.f32 %v13488_v10, %v750_v6  ;;  %v759_v0 = vld [vmem:[%s12342_s4 + $0x7b8] sm:$0xff] }
 0x44c   : > { %v11974_v56 = vpop.eup %5985  ;;  %v4394_v46 = vmul.f32 %v5984_v8, %v13892_v43  ;;  %v1712_v40 = vadd.f32 %v1398_v7, %v1397_v55  ;;  %v1728_v63 = vadd.f32 %v1727_v59, %v1411_v2  ;;  %v4850_v38 = vadd.f32 %v4849_v26, %v4537_v14  ;;  %v766_v8 = vld [vmem:[%s12342_s4 + $0x7f0] sm:$0xff]  ;;  %v13895_v2 = vld [vmem:[#allocation251_spill] sm:$0xff]  ;;  %v11997_v59 = vpop.xlane.xlu0 %1590 }
 0x44d   : > { %13891 = vst [vmem:[#allocation328_spill] sm:$0xff] %v11974_v56  ;;  %v4295_v31 = vadd.f32 %v11974_v56, %v4294_v33  ;;  %v1407_v45 = vmul.f32 %v13488_v10, %v758_v51  ;;  %v1722_v41 = vadd.f32 %v1406_v47, %v1405_v57  ;;  %v13894_v55 = vld [vmem:[#allocation250_spill] sm:$0xff]  ;;  %v1413_v26 = vmul.f32 %v13484_v18, %v764_v17  ;;  %v13898_v17 = vld [vmem:[#allocation305_spill] sm:$0xff] }
 0x44e   : > { %v11991_v43 = vpop.eup %5987  ;;  %v4539_v7 = vmul.f32 %v13894_v55, %v4394_v46  ;;  %v4540_v6 = vmul.f32 %v13895_v2, %v4394_v46  ;;  %v1414_v14 = vmul.f32 %v13486_v22, %v765_v30  ;;  %v4919_v57 = vadd.f32 %v11912_v19, %v4538_v53  ;;  %v13897_v55 = vld [vmem:[#allocation252_spill] sm:$0xff]  ;;  %v13899_v19 = vld [vmem:[#allocation367_spill] sm:$0xff] }
 0x44f   : > { %13893 = vst [vmem:[#allocation385_spill] sm:$0xff] %v11991_v43  ;;  %v11999_v33 = vpop.eup %5989  ;;  %4296 = vadd.xlane.f32.xlu1 %v4295_v31  ;;  %v1400_v51 = vmul.f32 %v13490_v36, %v751_v34  ;;  %v1729_v47 = vadd.f32 %v1728_v63, %v1412_v32  ;;  %6001 = vrcp.f32 %v11698_v42  ;;  %v4541_v15 = vmul.f32 %v13897_v55, %v4394_v46 }
 0x450   : > { %13896 = vst [vmem:[#allocation81_spill] sm:$0xff] %v11999_v33  ;;  %v5992_v56 = vpop.eup %5991  ;;  %v1713_v2 = vadd.f32 %v1712_v40, %v1399_v21  ;;  %v1408_v18 = vmul.f32 %v13490_v36, %v759_v0  ;;  %v1415_v22 = vmul.f32 %v13488_v10, %v766_v8  ;;  %v4542_v30 = vmul.f32 %v13898_v17, %v4394_v46  ;;  %v12014_v21 = vpop.xlane.xlu1 %4181  ;;  %v13901_v46 = vld [vmem:[#allocation363_spill] sm:$0xff]  ;;  %v13902_v8 = vld [vmem:[#allocation253_spill] sm:$0xff]  ;;  %v13903_v17 = vld [vmem:[#allocation254_spill] sm:$0xff] }
 0x451   : > { %v4298_v23 = vadd.f32 %v11999_v33, %v11991_v43  ;;  %v4395_v53 = vmul.f32 %v5992_v56, %v13899_v19  ;;  %1730 = vadd.xlane.f32.xlu0 %v1729_v47  ;;  %v1723_v34 = vadd.f32 %v1722_v41, %v1407_v45  ;;  %v12011_v32 = vpop.eup %5993  ;;  %v4713_v42 = vadd.f32 %v4712_v52, %v4539_v7  ;;  %v13905_v41 = vld [vmem:[#allocation255_spill] sm:$0xff] }
 0x452   : > { %13900 = vst [vmem:[#allocation179_spill] sm:$0xff] %v12011_v32  ;;  %v4782_v63 = vadd.f32 %v4781_v29, %v4540_v6  ;;  %v1732_v31 = vadd.f32 %v1414_v14, %v1413_v26  ;;  %6003 = vrcp.f32 %v11737_v39  ;;  %v4851_v45 = vadd.f32 %v4850_v38, %v4541_v15  ;;  %v13906_v29 = vld [vmem:[#allocation62_spill] sm:$0xff]  ;;  %v12025_v39 = vpop.xlane.xlu0 %1595  ;;  %v13909_v15 = vld [vmem:[#allocation155_spill] sm:$0xff] }
 0x453   : > { %v5996_v40 = vpop.eup %5995  ;;  %v4299_v10 = vadd.f32 %v12011_v32, %v4298_v23  ;;  %v4543_v0 = vmul.f32 %v13901_v46, %v4395_v53  ;;  %v4544_v55 = vmul.f32 %v13902_v8, %v4395_v53  ;;  %v4545_v56 = vmul.f32 %v13903_v17, %v4395_v53  ;;  %v13907_v8 = vld [vmem:[#allocation306_spill] sm:$0xff]  ;;  %v13908_v32 = vld [vmem:[#allocation57_spill] sm:$0xff] }
 0x454   : > { %v12020_v47 = vpop.eup %5997  ;;  %v4546_v52 = vmul.f32 %v13905_v41, %v4395_v53  ;;  %v4396_v7 = vmul.f32 %v5996_v40, %v13906_v29  ;;  %6005 = vrcp.f32 %v11786_v49  ;;  %v4920_v26 = vadd.f32 %v4919_v57, %v4542_v30  ;;  %v13910_v40 = vld [vmem:[#allocation256_spill] sm:$0xff]  ;;  %v13911_v49 = vld [vmem:[#allocation162_spill] sm:$0xff]  ;;  %v767_v57 = vld [vmem:[%s12342_s4 + $0x7f8] sm:$0xff] }
 0x455   : > { %13904 = vst [vmem:[#allocation130_spill] sm:$0xff] %v12020_v47  ;;  %v6000_v6 = vpop.eup %5999  ;;  %v4300_v23 = vadd.f32 %v12020_v47, %v4299_v10  ;;  %v4714_v14 = vadd.f32 %v4713_v42, %v4543_v0  ;;  %v4783_v19 = vadd.f32 %v4782_v63, %v4544_v55  ;;  %v4852_v46 = vadd.f32 %v4851_v45, %v4545_v56  ;;  %v12036_v0 = vpop.xlane.xlu1 %4186  ;;  %v13913_v45 = vld [vmem:[#allocation364_spill] sm:$0xff]  ;;  %v13919_v47 = vld [vmem:[#allocation365_spill] sm:$0xff] }
 0x456   : > { %v4547_v17 = vmul.f32 %v13907_v8, %v4396_v7  ;;  %v4548_v33 = vmul.f32 %v13908_v32, %v4396_v7  ;;  %v4549_v38 = vmul.f32 %v13909_v15, %v4396_v7  ;;  %v1714_v53 = vadd.f32 %v1713_v2, %v1400_v51  ;;  %v13912_v32 = vld [vmem:[#allocation307_spill] sm:$0xff]  ;;  %v13914_v51 = vld [vmem:[#allocation58_spill] sm:$0xff] }
 0x457   : > { %4301 = vadd.xlane.f32.xlu1 %v4300_v23  ;;  %v4550_v41 = vmul.f32 %v13910_v40, %v4396_v7  ;;  %v4397_v29 = vmul.f32 %v6000_v6, %v13911_v49  ;;  %v4921_v30 = vadd.f32 %v4920_v26, %v4546_v52  ;;  %v13915_v7 = vld [vmem:[#allocation156_spill] sm:$0xff]  ;;  %v1724_v6 = vadd.f32 %v1723_v34, %v1408_v18  ;;  %v13916_v49 = vld [vmem:[#allocation65_spill] sm:$0xff]  ;;  %v12044_v26 = vpop.xlane.xlu0 %1600  ;;  %v13920_v18 = vld [vmem:[#allocation59_spill] sm:$0xff] }
 0x458   : > { %v4715_v42 = vadd.f32 %v4714_v14, %v4547_v17  ;;  %v4784_v63 = vadd.f32 %v4783_v19, %v4548_v33  ;;  %v4853_v10 = vadd.f32 %v4852_v46, %v4549_v38  ;;  %v1416_v15 = vmul.f32 %v13490_v36, %v767_v57  ;;  %v13917_v38 = vld [vmem:[#allocation109_spill] sm:$0xff]  ;;  %v13921_v36 = vld [vmem:[#allocation372_spill] sm:$0xff] }
 0x459   : > { %v6002_v55 = vpop.eup %6001  ;;  %v4551_v56 = vmul.f32 %v13912_v32, %v4397_v29  ;;  %v4552_v23 = vmul.f32 %v13913_v45, %v4397_v29  ;;  %v4553_v2 = vmul.f32 %v13914_v51, %v4397_v29  ;;  %v4554_v8 = vmul.f32 %v13915_v7, %v4397_v29  ;;  %v13918_v45 = vld [vmem:[#allocation308_spill] sm:$0xff] }
 0x45a   : > { %v1733_v40 = vadd.f32 %v1732_v31, %v1415_v22  ;;  %v4398_v52 = vmul.f32 %v6002_v55, %v13916_v49  ;;  %v4922_v46 = vadd.f32 %v4921_v30, %v4550_v41  ;;  %v13922_v41 = vld [vmem:[#allocation316_spill] sm:$0xff]  ;;  %v13925_v49 = vld [vmem:[#allocation258_spill] sm:$0xff]  ;;  %6007 = vrcp.f32 %v11827_v27 }
 0x45b   : > { %1715 = vadd.xlane.f32.xlu1 %v1714_v53  ;;  %v4716_v33 = vadd.f32 %v4715_v42, %v4551_v56  ;;  %v4785_v14 = vadd.f32 %v4784_v63, %v4552_v23  ;;  %v4854_v19 = vadd.f32 %v4853_v10, %v4553_v2  ;;  %v4192_v63 = vpop.xlane.xlu1 %4191  ;;  %v13923_v10 = vld [vmem:[#allocation157_spill] sm:$0xff]  ;;  %v13924_v23 = vld [vmem:[#allocation110_spill] sm:$0xff]  ;;  %6009 = vrcp.f32 %v11864_v16 }
 0x45c   : > { %v6004_v17 = vpop.eup %6003  ;;  %v4555_v32 = vmul.f32 %v13917_v38, %v4398_v52  ;;  %v4556_v51 = vmul.f32 %v13918_v45, %v4398_v52  ;;  %v4557_v29 = vmul.f32 %v13919_v47, %v4398_v52  ;;  %v4558_v34 = vmul.f32 %v13920_v18, %v4398_v52  ;;  %v13926_v38 = vld [vmem:[#allocation366_spill] sm:$0xff] }
 0x45d   : > { %v4399_v22 = vmul.f32 %v6004_v17, %v13921_v36  ;;  %v4923_v31 = vadd.f32 %v4922_v46, %v4554_v8  ;;  %v1734_v55 = vadd.f32 %v1733_v40, %v1416_v15  ;;  %v1606_v17 = vpop.xlane.xlu0 %1605  ;;  %v13927_v8 = vld [vmem:[#allocation60_spill] sm:$0xff]  ;;  %v13928_v15 = vld [vmem:[#allocation158_spill] sm:$0xff]  ;;  %6011 = vrcp.f32 %v11893_v35 }
 0x45e   : > { %v6006_v57 = vpop.eup %6005  ;;  %v4717_v7 = vadd.f32 %v4716_v33, %v4555_v32  ;;  %v4786_v53 = vadd.f32 %v4785_v14, %v4556_v51  ;;  %v4855_v42 = vadd.f32 %v4854_v19, %v4557_v29  ;;  %v13929_v33 = vld [vmem:[#allocation111_spill] sm:$0xff]  ;;  %6013 = vrcp.f32 %v11932_v58 }
 0x45f   : > { %1725 = vadd.xlane.f32.xlu1 %v1724_v6  ;;  %v4400_v30 = vmul.f32 %v6006_v57, %v13922_v41  ;;  %v4559_v56 = vmul.f32 %v13923_v10, %v4399_v22  ;;  %v4560_v2 = vmul.f32 %v13924_v23, %v4399_v22  ;;  %v4561_v47 = vmul.f32 %v13925_v49, %v4399_v22  ;;  %v13930_v19 = vld [vmem:[#allocation259_spill] sm:$0xff]  ;;  %v4197_v36 = vpop.xlane.xlu1 %4196 }
 0x460   : > { %v4562_v52 = vmul.f32 %v13926_v38, %v4399_v22  ;;  %v4924_v45 = vadd.f32 %v4923_v31, %v4558_v34  ;;  %6015 = vrcp.f32 %v11981_v24 }
 0x461   : > { %v4563_v46 = vmul.f32 %v13927_v8, %v4400_v30  ;;  %v4564_v40 = vmul.f32 %v13928_v15, %v4400_v30  ;;  %v4565_v14 = vmul.f32 %v13929_v33, %v4400_v30  ;;  %v4566_v6 = vmul.f32 %v13930_v19, %v4400_v30  ;;  %v1611_v34 = vpop.xlane.xlu0 %1610 }
 0x462   : > { %v4718_v32 = vadd.f32 %v4717_v7, %v4559_v56  ;;  %v4787_v51 = vadd.f32 %v4786_v53, %v4560_v2  ;;  %v4856_v29 = vadd.f32 %v4855_v42, %v4561_v47  ;;  %v4925_v18 = vadd.f32 %v4924_v45, %v4562_v52 }
 0x463   : > { %1735 = vadd.xlane.f32.xlu1 %v1734_v55  ;;  %v4202_v31 = vpop.xlane.xlu1 %4201  ;;  %6017 = vrcp.f32 %v12014_v21  ;;  %v13934_v21 = vld [vmem:[#allocation112_spill] sm:$0xff] }
 0x464   : > { %v4719_v57 = vadd.f32 %v4718_v32, %v4563_v46  ;;  %v4788_v41 = vadd.f32 %v4787_v51, %v4564_v40  ;;  %v4857_v10 = vadd.f32 %v4856_v29, %v4565_v14  ;;  %v4926_v22 = vadd.f32 %v4925_v18, %v4566_v6  ;;  %v6008_v14 = vpop.eup %6007  ;;  %v13931_v29 = vld [vmem:[#allocation310_spill] sm:$0xff]  ;;  %v13932_v18 = vld [vmem:[#allocation61_spill] sm:$0xff] }
 0x465   : > { %v12060_v23 = vpop.xlane.xlu0 %1615  ;;  %v6010_v6 = vpop.eup %6009  ;;  %v4401_v27 = vmul.f32 %v6008_v14, %v11997_v59  ;;  %6019 = vrcp.f32 %v12036_v0  ;;  %v13935_v14 = vld [vmem:[#allocation260_spill] sm:$0xff] }
 0x466   : > { %v4402_v51 = vmul.f32 %v6010_v6, %v12025_v39  ;;  %6021 = vrcp.f32 %v4192_v63  ;;  %v13937_v0 = vld [vmem:[#allocation368_spill] sm:$0xff] }
 0x467   : > { %v12062_v49 = vpop.xlane.xlu1 %4206  ;;  %v6012_v32 = vpop.eup %6011  ;;  %v4567_v24 = vmul.f32 %v13931_v29, %v4401_v27  ;;  %v4568_v43 = vmul.f32 %v13932_v18, %v4401_v27  ;;  %v4569_v3 = vmul.f32 %v13933_v12, %v4401_v27  ;;  %v4570_v54 = vmul.f32 %v13934_v21, %v4401_v27  ;;  %v13939_v21 = vld [vmem:[#allocation113_spill] sm:$0xff] }
 0x468   : > { %v6014_v58 = vpop.eup %6013  ;;  %v4403_v59 = vmul.f32 %v6012_v32, %v12044_v26  ;;  %v4571_v20 = vmul.f32 %v13935_v14, %v4402_v51  ;;  %v4572_v39 = vmul.f32 %v13936_v28, %v4402_v51  ;;  %v4573_v63 = vmul.f32 %v13937_v0, %v4402_v51  ;;  %v13940_v32 = vld [vmem:[#allocation261_spill] sm:$0xff] }
 0x469   : > { %v12064_v38 = vpop.xlane.xlu0 %1620  ;;  %v4574_v62 = vmul.f32 %v13938_v44, %v4402_v51  ;;  %v4404_v37 = vmul.f32 %v6014_v58, %v1606_v17  ;;  %6023 = vrcp.f32 %v4197_v36  ;;  %v4720_v18 = vadd.f32 %v4719_v57, %v4567_v24  ;;  %v13946_v24 = vld [vmem:[#allocation313_spill] sm:$0xff] }
 0x46a   : > { %v6016_v6 = vpop.eup %6015  ;;  %v4789_v25 = vadd.f32 %v4788_v41, %v4568_v43  ;;  %v4858_v12 = vadd.f32 %v4857_v10, %v4569_v3  ;;  %v4927_v60 = vadd.f32 %v4926_v22, %v4570_v54  ;;  %v4575_v26 = vmul.f32 %v13939_v21, %v4403_v59  ;;  %v13943_v43 = vld [vmem:[#allocation63_spill] sm:$0xff]  ;;  %v13944_v54 = vld [vmem:[#allocation114_spill] sm:$0xff] }
 0x46b   : > { %v12066_v8 = vpop.xlane.xlu1 %4211  ;;  %v4576_v14 = vmul.f32 %v13940_v32, %v4403_v59  ;;  %v4577_v28 = vmul.f32 %v13941_v4, %v4403_v59  ;;  %v4578_v9 = vmul.f32 %v13942_v50, %v4403_v59  ;;  %v4721_v44 = vadd.f32 %v4720_v18, %v4571_v20  ;;  %v13945_v22 = vld [vmem:[#allocation262_spill] sm:$0xff] }
 0x46c   : > { %v4790_v17 = vadd.f32 %v4789_v25, %v4572_v39  ;;  %v4405_v36 = vmul.f32 %v6016_v6, %v1611_v34  ;;  %6025 = vrcp.f32 %v4202_v31  ;;  %v4859_v51 = vadd.f32 %v4858_v12, %v4573_v63  ;;  %v13948_v39 = vld [vmem:[#allocation64_spill] sm:$0xff]  ;;  %v13949_v63 = vld [vmem:[#allocation163_spill] sm:$0xff]  ;;  %v13950_v12 = vld [vmem:[#allocation25_spill] sm:$0xff] }
 0x46d   : > { %v12068_v55 = vpop.xlane.xlu0 %1625  ;;  %v6018_v27 = vpop.eup %6017  ;;  %v4928_v57 = vadd.f32 %v4927_v60, %v4574_v62  ;;  %v4579_v3 = vmul.f32 %v13943_v43, %v4404_v37  ;;  %v4580_v41 = vmul.f32 %v13944_v54, %v4404_v37  ;;  %v4581_v58 = vmul.f32 %v13945_v22, %v4404_v37  ;;  %v13947_v60 = vld [vmem:[#allocation370_spill] sm:$0xff]  ;;  %v13955_v22 = vld [vmem:[#allocation165_spill] sm:$0xff] }
 0x46e   : > { %v4582_v21 = vmul.f32 %v13946_v24, %v4404_v37  ;;  %v4406_v4 = vmul.f32 %v6018_v27, %v12060_v23  ;;  %6027 = vrcp.f32 %v12062_v49  ;;  %v4722_v20 = vadd.f32 %v4721_v44, %v4575_v26  ;;  %v13951_v26 = vld [vmem:[#allocation115_spill] sm:$0xff]  ;;  %v13956_v24 = vld [vmem:[#allocation116_spill] sm:$0xff] }
 0x46f   : > { %v12070_v7 = vpop.xlane.xlu1 %4216  ;;  %v6020_v10 = vpop.eup %6019  ;;  %v4791_v25 = vadd.f32 %v4790_v17, %v4576_v14  ;;  %v4860_v34 = vadd.f32 %v4859_v51, %v4577_v28  ;;  %v4929_v31 = vadd.f32 %v4928_v57, %v4578_v9  ;;  %v4583_v62 = vmul.f32 %v13947_v60, %v4405_v36  ;;  %v13952_v17 = vld [vmem:[#allocation263_spill] sm:$0xff]  ;;  %v13953_v57 = vld [vmem:[#allocation314_spill] sm:$0xff] }
 0x470   : > { %v6022_v50 = vpop.eup %6021  ;;  %v4584_v6 = vmul.f32 %v13948_v39, %v4405_v36  ;;  %v4585_v18 = vmul.f32 %v13949_v63, %v4405_v36  ;;  %v4586_v32 = vmul.f32 %v13950_v12, %v4405_v36  ;;  %v4723_v37 = vadd.f32 %v4722_v20, %v4579_v3  ;;  %v13954_v36 = vld [vmem:[#allocation371_spill] sm:$0xff]  ;;  %v13957_v20 = vld [vmem:[#allocation264_spill] sm:$0xff] }
 0x471   : > { %v12072_v53 = vpop.xlane.xlu0 %1630  ;;  %v4792_v43 = vadd.f32 %v4791_v25, %v4580_v41  ;;  %v4407_v23 = vmul.f32 %v6020_v10, %v12064_v38  ;;  %6029 = vrcp.f32 %v12066_v8  ;;  %v4861_v27 = vadd.f32 %v4860_v34, %v4581_v58 }
 0x472   : > { %v4930_v9 = vadd.f32 %v4929_v31, %v4582_v21  ;;  %v4587_v14 = vmul.f32 %v13951_v26, %v4406_v4  ;;  %v4408_v28 = vmul.f32 %v6022_v50, %v12068_v55  ;;  %v4588_v51 = vmul.f32 %v13952_v17, %v4406_v4  ;;  %v13958_v31 = vld [vmem:[#allocation315_spill] sm:$0xff]  ;;  %v13963_v17 = vld [vmem:[#allocation373_spill] sm:$0xff] }
 0x473   : > { %v12074_v42 = vpop.xlane.xlu1 %4221  ;;  %v6024_v44 = vpop.eup %6023  ;;  %v4589_v54 = vmul.f32 %v13953_v57, %v4406_v4  ;;  %v4590_v3 = vmul.f32 %v13954_v36, %v4406_v4  ;;  %6031 = vrcp.f32 %v12070_v7  ;;  %v4724_v38 = vadd.f32 %v4723_v37, %v4583_v62  ;;  %v13964_v57 = vld [vmem:[#allocation67_spill] sm:$0xff] }
 0x474   : > { %v4793_v41 = vadd.f32 %v4792_v43, %v4584_v6  ;;  %v4862_v8 = vadd.f32 %v4861_v27, %v4585_v18  ;;  %v4931_v10 = vadd.f32 %v4930_v9, %v4586_v32  ;;  %v4591_v58 = vmul.f32 %v13955_v22, %v4407_v23  ;;  %v13959_v6 = vld [vmem:[#allocation66_spill] sm:$0xff]  ;;  %v13961_v43 = vld [vmem:[#allocation117_spill] sm:$0xff] }
 0x475   : > { %v12076_v30 = vpop.xlane.xlu0 %1635  ;;  %v4592_v21 = vmul.f32 %v13956_v24, %v4407_v23  ;;  %v4593_v25 = vmul.f32 %v13957_v20, %v4407_v23  ;;  %v4725_v34 = vadd.f32 %v4724_v38, %v4587_v14  ;;  %v4594_v60 = vmul.f32 %v13958_v31, %v4407_v23  ;;  %v13960_v32 = vld [vmem:[#allocation166_spill] sm:$0xff]  ;;  %v13962_v9 = vld [vmem:[#allocation265_spill] sm:$0xff] }
 0x476   : > { %v6026_v50 = vpop.eup %6025  ;;  %v4409_v4 = vmul.f32 %v6024_v44, %v12072_v53  ;;  %6033 = vrcp.f32 %v12074_v42  ;;  %v4794_v7 = vadd.f32 %v4793_v41, %v4588_v51  ;;  %v4863_v62 = vadd.f32 %v4862_v8, %v4589_v54  ;;  %v13966_v41 = vld [vmem:[#allocation118_spill] sm:$0xff] }
 0x477   : > { %v12078_v56 = vpop.xlane.xlu1 %4226  ;;  %v4932_v39 = vadd.f32 %v4931_v10, %v4590_v3  ;;  %v4595_v63 = vmul.f32 %v13959_v6, %v4408_v28  ;;  %v4596_v37 = vmul.f32 %v13960_v32, %v4408_v28  ;;  %v4597_v27 = vmul.f32 %v13961_v43, %v4408_v28  ;;  %v13965_v3 = vld [vmem:[#allocation167_spill] sm:$0xff] }
 0x478   : > { %v6028_v12 = vpop.eup %6027  ;;  %v4598_v26 = vmul.f32 %v13962_v9, %v4408_v28  ;;  %6035 = vrcp.f32 %v12078_v56  ;;  %v4726_v23 = vadd.f32 %v4725_v34, %v4591_v58  ;;  %v4795_v53 = vadd.f32 %v4794_v7, %v4592_v21  ;;  %v13967_v21 = vld [vmem:[#allocation266_spill] sm:$0xff]  ;;  %v13972_v32 = vld [vmem:[#allocation119_spill] sm:$0xff] }
 0x479   : > { %v12080_v2 = vpop.xlane.xlu0 %1640  ;;  %v4410_v42 = vmul.f32 %v6026_v50, %v12076_v30  ;;  %v4864_v14 = vadd.f32 %v4863_v62, %v4593_v25  ;;  %v4933_v44 = vadd.f32 %v4932_v39, %v4594_v60  ;;  %v4599_v51 = vmul.f32 %v13963_v17, %v4409_v4  ;;  %v13968_v25 = vld [vmem:[#allocation317_spill] sm:$0xff]  ;;  %v13969_v34 = vld [vmem:[#allocation374_spill] sm:$0xff] }
 0x47a   : > { %v4600_v54 = vmul.f32 %v13964_v57, %v4409_v4  ;;  %v4601_v38 = vmul.f32 %v13965_v3, %v4409_v4  ;;  %v4602_v8 = vmul.f32 %v13966_v41, %v4409_v4  ;;  %v4411_v10 = vmul.f32 %v6028_v12, %v12080_v2  ;;  %v13970_v60 = vld [vmem:[#allocation70_spill] sm:$0xff]  ;;  %v13977_v3 = vld [vmem:[#allocation169_spill] sm:$0xff] }
 0x47b   : > { %v12082_v47 = vpop.xlane.xlu1 %4231  ;;  %v6030_v36 = vpop.eup %6029  ;;  %v4727_v28 = vadd.f32 %v4726_v23, %v4595_v63  ;;  %v4796_v22 = vadd.f32 %v4795_v53, %v4596_v37  ;;  %v4865_v30 = vadd.f32 %v4864_v14, %v4597_v27  ;;  %v4934_v58 = vadd.f32 %v4933_v44, %v4598_v26  ;;  %v13971_v63 = vld [vmem:[#allocation168_spill] sm:$0xff]  ;;  %v13973_v27 = vld [vmem:[#allocation267_spill] sm:$0xff]  ;;  %v13974_v26 = vld [vmem:[#allocation318_spill] sm:$0xff] }
 0x47c   : > { %6037 = vrcp.f32 %v12082_v47  ;;  %v4603_v20 = vmul.f32 %v13967_v21, %v4410_v42  ;;  %v4604_v50 = vmul.f32 %v13968_v25, %v4410_v42  ;;  %v4605_v31 = vmul.f32 %v13969_v34, %v4410_v42  ;;  %v13980_v21 = vld [vmem:[#allocation319_spill] sm:$0xff] }
 0x47d   : > { %v12084_v52 = vpop.xlane.xlu0 %1645  ;;  %v6032_v24 = vpop.eup %6031  ;;  %v4606_v7 = vmul.f32 %v13970_v60, %v4410_v42  ;;  %v4728_v2 = vadd.f32 %v4727_v28, %v4599_v51  ;;  %v4797_v62 = vadd.f32 %v4796_v22, %v4600_v54  ;;  %v4866_v39 = vadd.f32 %v4865_v30, %v4601_v38  ;;  %v13975_v51 = vld [vmem:[#allocation375_spill] sm:$0xff] }
 0x47e   : > { %v4412_v47 = vmul.f32 %v6030_v36, %v12084_v52  ;;  %v4935_v6 = vadd.f32 %v4934_v58, %v4602_v8  ;;  %v4607_v12 = vmul.f32 %v13971_v63, %v4411_v10  ;;  %v4608_v37 = vmul.f32 %v13972_v32, %v4411_v10  ;;  %v13976_v54 = vld [vmem:[#allocation71_spill] sm:$0xff]  ;;  %v13979_v58 = vld [vmem:[#allocation268_spill] sm:$0xff] }
 0x47f   : > { %v12086_v45 = vpop.xlane.xlu1 %4236  ;;  %v4609_v9 = vmul.f32 %v13973_v27, %v4411_v10  ;;  %v4610_v23 = vmul.f32 %v13974_v26, %v4411_v10  ;;  %v4729_v42 = vadd.f32 %v4728_v2, %v4603_v20  ;;  %v4798_v14 = vadd.f32 %v4797_v62, %v4604_v50  ;;  %v13981_v50 = vld [vmem:[#allocation376_spill] sm:$0xff]  ;;  %v13983_v26 = vld [vmem:[#allocation170_spill] sm:$0xff] }
 0x480   : > { %6039 = vrcp.f32 %v12086_v45  ;;  %v6034_v43 = vpop.eup %6033  ;;  %v4867_v52 = vadd.f32 %v4866_v39, %v4605_v31  ;;  %v4936_v44 = vadd.f32 %v4935_v6, %v4606_v7  ;;  %v4611_v57 = vmul.f32 %v13975_v51, %v4412_v47  ;;  %v13982_v31 = vld [vmem:[#allocation72_spill] sm:$0xff] }
 0x481   : > { %v12088_v46 = vpop.xlane.xlu0 %1650  ;;  %v4612_v36 = vmul.f32 %v13976_v54, %v4412_v47  ;;  %v4613_v38 = vmul.f32 %v13977_v3, %v4412_v47  ;;  %v4730_v41 = vadd.f32 %v4729_v42, %v4607_v12  ;;  %v4799_v8 = vadd.f32 %v4798_v14, %v4608_v37  ;;  %v13986_v51 = vld [vmem:[#allocation320_spill] sm:$0xff] }
 0x482   : > { %v4413_v53 = vmul.f32 %v6032_v24, %v12088_v46  ;;  %v6036_v17 = vpop.eup %6035  ;;  %v13978_v46 = vld [vmem:[#allocation120_spill] sm:$0xff]  ;;  %v4868_v22 = vadd.f32 %v4867_v52, %v4609_v9  ;;  %v4937_v30 = vadd.f32 %v4936_v44, %v4610_v23 }
 0x483   : > { %v12092_v15 = vpop.xlane.xlu1 %4241  ;;  %v4614_v10 = vmul.f32 %v13978_v46, %v4412_v47  ;;  %v4731_v7 = vadd.f32 %v4730_v41, %v4611_v57  ;;  %v4800_v2 = vadd.f32 %v4799_v8, %v4612_v36  ;;  %v13988_v36 = vld [vmem:[#allocation73_spill] sm:$0xff] }
 0x484   : > { %6041 = vrcp.f32 %v12092_v15  ;;  %v4615_v24 = vmul.f32 %v13979_v58, %v4413_v53  ;;  %v4616_v20 = vmul.f32 %v13980_v21, %v4413_v53  ;;  %v4617_v34 = vmul.f32 %v13981_v50, %v4413_v53 }
 0x485   : > { %v12094_v40 = vpop.xlane.xlu0 %1655  ;;  %v4618_v60 = vmul.f32 %v13982_v31, %v4413_v53  ;;  %v4938_v62 = vadd.f32 %v4937_v30, %v4614_v10  ;;  %v13984_v53 = vld [vmem:[#allocation121_spill] sm:$0xff]  ;;  %v13990_v30 = vld [vmem:[#allocation122_spill] sm:$0xff] }
 0x486   : > { %v4414_v15 = vmul.f32 %v6034_v43, %v12094_v40  ;;  %v6038_v25 = vpop.eup %6037  ;;  %v4869_v40 = vadd.f32 %v4868_v22, %v4613_v38  ;;  %v4732_v32 = vadd.f32 %v4731_v7, %v4615_v24  ;;  %v13994_v7 = vld [vmem:[#allocation74_spill] sm:$0xff] }
 0x487   : > { %v4939_v27 = vadd.f32 %v4938_v62, %v4618_v60  ;;  %v13993_v60 = vld [vmem:[#allocation378_spill] sm:$0xff] }
 0x488   : > { %v12098_v33 = vpop.xlane.xlu1 %4246  ;;  %v4619_v47 = vmul.f32 %v11147_v61, %v4414_v15  ;;  %v4620_v39 = vmul.f32 %v11164_v5, %v4414_v15  ;;  %v4621_v6 = vmul.f32 %v11170_v11, %v4414_v15  ;;  %v4622_v37 = vmul.f32 %v11177_v13, %v4414_v15  ;;  %v13989_v15 = vld [vmem:[#allocation171_spill] sm:$0xff] }
 0x489   : > { %v12101_v19 = vpop.xlane.xlu0 %1660  ;;  %6043 = vrcp.f32 %v12098_v33  ;;  %v4870_v43 = vadd.f32 %v4869_v40, %v4617_v34 }
 0x48a   : > { %v4415_v33 = vmul.f32 %v6036_v17, %v12101_v19  ;;  %v6040_v12 = vpop.eup %6039  ;;  %v4733_v13 = vadd.f32 %v4732_v32, %v4619_v47  ;;  %v4940_v44 = vadd.f32 %v4939_v27, %v4622_v37  ;;  %v13985_v17 = vld [vmem:[#allocation269_spill] sm:$0xff]  ;;  %v13995_v47 = vld [vmem:[#allocation172_spill] sm:$0xff]  ;;  %v13997_v37 = vld [vmem:[#allocation271_spill] sm:$0xff] }
 0x48b   : > { %v4871_v14 = vadd.f32 %v4870_v43, %v4621_v6 }
 0x48c   : > { %v4623_v9 = vmul.f32 %v11188_v1, %v4415_v33  ;;  %v4624_v11 = vmul.f32 %v11206_v48, %v4415_v33  ;;  %v4625_v23 = vmul.f32 %v13983_v26, %v4415_v33  ;;  %v4626_v42 = vmul.f32 %v13984_v53, %v4415_v33  ;;  %v13987_v48 = vld [vmem:[#allocation377_spill] sm:$0xff]  ;;  %v13999_v26 = vld [vmem:[#allocation379_spill] sm:$0xff] }
 0x48d   : > { %v12109_v35 = vpop.xlane.xlu0 %1665 }
 0x48e   : > { %v4416_v19 = vmul.f32 %v6038_v25, %v12109_v35  ;;  %v6042_v5 = vpop.eup %6041  ;;  %v4734_v41 = vadd.f32 %v4733_v13, %v4623_v9  ;;  %v4872_v46 = vadd.f32 %v4871_v14, %v4625_v23  ;;  %v4941_v10 = vadd.f32 %v4940_v44, %v4626_v42  ;;  %v13991_v25 = vld [vmem:[#allocation270_spill] sm:$0xff]  ;;  %v14000_v23 = vld [vmem:[#allocation75_spill] sm:$0xff]  ;;  %v14001_v44 = vld [vmem:[#allocation173_spill] sm:$0xff] }
 0x490   : > { %v12105_v16 = vpop.xlane.xlu1 %4251  ;;  %v4627_v1 = vmul.f32 %v13985_v17, %v4416_v19  ;;  %v4628_v57 = vmul.f32 %v13986_v51, %v4416_v19  ;;  %v4629_v54 = vmul.f32 %v13987_v48, %v4416_v19  ;;  %v4630_v3 = vmul.f32 %v13988_v36, %v4416_v19 }
 0x491   : > { %v12126_v0 = vpop.xlane.xlu0 %1670  ;;  %6045 = vrcp.f32 %v12105_v16  ;;  %v4801_v16 = vadd.f32 %v4800_v2, %v4616_v20 }
 0x492   : > { %v4735_v21 = vadd.f32 %v4734_v41, %v4627_v1  ;;  %v4873_v31 = vadd.f32 %v4872_v46, %v4629_v54  ;;  %v4942_v62 = vadd.f32 %v4941_v10, %v4630_v3  ;;  %v14002_v1 = vld [vmem:[#allocation124_spill] sm:$0xff]  ;;  %v14003_v54 = vld [vmem:[#allocation273_spill] sm:$0xff] }
 0x493   : > { %v4802_v35 = vadd.f32 %v4801_v16, %v4620_v39  ;;  %v6044_v52 = vpop.eup %6043  ;;  %v13996_v39 = vld [vmem:[#allocation123_spill] sm:$0xff]  ;;  %v13998_v16 = vld [vmem:[#allocation322_spill] sm:$0xff]  ;;  %v14005_v10 = vld [vmem:[#allocation380_spill] sm:$0xff] }
 0x495   : > { %v12142_v49 = vpop.xlane.xlu0 %1675  ;;  %v4803_v8 = vadd.f32 %v4802_v35, %v4624_v11 }
 0x496   : > { %v4418_v38 = vmul.f32 %v6042_v5, %v12142_v49  ;;  %v13992_v49 = vld [vmem:[#allocation321_spill] sm:$0xff] }
 0x497   : > { %v4804_v20 = vadd.f32 %v4803_v8, %v4628_v57  ;;  %v14004_v8 = vld [vmem:[#allocation323_spill] sm:$0xff] }
 0x498   : > { %v12120_v29 = vpop.xlane.xlu1 %4256  ;;  %v4635_v33 = vmul.f32 %v13993_v60, %v4418_v38  ;;  %v4636_v2 = vmul.f32 %v13994_v7, %v4418_v38 }
 0x499   : > { %v12159_v18 = vpop.xlane.xlu0 %1680  ;;  %6047 = vrcp.f32 %v12120_v29  ;;  %v4417_v29 = vmul.f32 %v6040_v12, %v12126_v0 }
 0x49a   : > { %v4419_v24 = vmul.f32 %v6044_v52, %v12159_v18  ;;  %v4637_v18 = vmul.f32 %v13995_v47, %v4418_v38  ;;  %v14012_v47 = vld [vmem:[#allocation77_spill] sm:$0xff] }
 0x49b   : > { %v6046_v0 = vpop.eup %6045  ;;  %v4631_v22 = vmul.f32 %v13989_v15, %v4417_v29  ;;  %v4632_v58 = vmul.f32 %v13990_v30, %v4417_v29  ;;  %v4633_v50 = vmul.f32 %v13991_v25, %v4417_v29  ;;  %v4634_v34 = vmul.f32 %v13992_v49, %v4417_v29  ;;  %v14006_v15 = vld [vmem:[#allocation76_spill] sm:$0xff]  ;;  %v14007_v30 = vld [vmem:[#allocation174_spill] sm:$0xff] }
 0x49c   : > { %v4639_v19 = vmul.f32 %v13997_v37, %v4419_v24  ;;  %v4640_v43 = vmul.f32 %v13998_v16, %v4419_v24  ;;  %v4642_v53 = vmul.f32 %v14000_v23, %v4419_v24 }
 0x49d   : > { %v12178_v4 = vpop.xlane.xlu0 %1685  ;;  %v4736_v12 = vadd.f32 %v4735_v21, %v4631_v22  ;;  %v4805_v32 = vadd.f32 %v4804_v20, %v4632_v58  ;;  %v4874_v5 = vadd.f32 %v4873_v31, %v4633_v50  ;;  %v4943_v11 = vadd.f32 %v4942_v62, %v4634_v34  ;;  %v14008_v50 = vld [vmem:[#allocation125_spill] sm:$0xff]  ;;  %v14009_v31 = vld [vmem:[#allocation274_spill] sm:$0xff] }
 0x49e   : > { %v4420_v6 = vmul.f32 %v6046_v0, %v12178_v4 }
 0x49f   : > { %v4737_v42 = vadd.f32 %v4736_v12, %v4635_v33  ;;  %v4806_v13 = vadd.f32 %v4805_v32, %v4636_v2  ;;  %v4875_v29 = vadd.f32 %v4874_v5, %v4637_v18  ;;  %v14010_v33 = vld [vmem:[#allocation324_spill] sm:$0xff]  ;;  %v14013_v12 = vld [vmem:[#allocation175_spill] sm:$0xff] }
 0x4a0   : > { %v4643_v17 = vmul.f32 %v14001_v44, %v4420_v6  ;;  %v4644_v51 = vmul.f32 %v14002_v1, %v4420_v6  ;;  %v4645_v36 = vmul.f32 %v14003_v54, %v4420_v6  ;;  %v4646_v46 = vmul.f32 %v14004_v8, %v4420_v6 }
 0x4a1   : > { %v12134_v59 = vpop.xlane.xlu1 %4261  ;;  %v12196_v28 = vpop.xlane.xlu0 %1690  ;;  %v4738_v57 = vadd.f32 %v4737_v42, %v4639_v19  ;;  %v4807_v48 = vadd.f32 %v4806_v13, %v4640_v43  ;;  %v14014_v19 = vld [vmem:[#allocation126_spill] sm:$0xff]  ;;  %v14015_v43 = vld [vmem:[#allocation275_spill] sm:$0xff] }
 0x4a2   : > { %6049 = vrcp.f32 %v12134_v59  ;;  %v14017_v42 = vld [vmem:[#allocation7_spill] sm:$0xff] }
 0x4a3   : > { %v6048_v40 = vpop.eup %6047  ;;  %v4739_v20 = vadd.f32 %v4738_v57, %v4643_v17  ;;  %v4808_v25 = vadd.f32 %v4807_v48, %v4644_v51  ;;  %v14020_v17 = vld [vmem:[#allocation325_spill] sm:$0xff] }
 0x4a4   : > { %v4421_v35 = vmul.f32 %v6048_v40, %v12196_v28  ;;  %v14011_v40 = vld [vmem:[#allocation381_spill] sm:$0xff] }
 0x4a6   : > { %v4647_v0 = vmul.f32 %v14005_v10, %v4421_v35  ;;  %v4648_v22 = vmul.f32 %v14006_v15, %v4421_v35  ;;  %v4649_v58 = vmul.f32 %v14007_v30, %v4421_v35  ;;  %v4650_v49 = vmul.f32 %v14008_v50, %v4421_v35 }
 0x4a8   : > { %v12213_v61 = vpop.xlane.xlu0 %1695 }
 0x4a9   : > { %v12153_v55 = vpop.xlane.xlu1 %4266 }
 0x4aa   : > { %6051 = vrcp.f32 %v12153_v55 }
 0x4ac   : > { %v6050_v9 = vpop.eup %6049 }
 0x4ad   : > { %v4422_v3 = vmul.f32 %v6050_v9, %v12213_v61 }
 0x4af   : > { %v4651_v60 = vmul.f32 %v14009_v31, %v4422_v3  ;;  %v4653_v62 = vmul.f32 %v14011_v40, %v4422_v3  ;;  %v14027_v40 = vld [vmem:[#allocation383_spill] sm:$0xff] }
 0x4b1   : > { %v1701_v55 = vpop.xlane.xlu0 %1700 }
 0x4b2   : > { %v12172_v56 = vpop.xlane.xlu1 %4271 }
 0x4b3   : > { %6053 = vrcp.f32 %v12172_v56  ;;  %v4638_v56 = vmul.f32 %v13996_v39, %v4418_v38  ;;  %v4740_v39 = vadd.f32 %v4739_v20, %v4647_v0 }
 0x4b4   : > { %v6052_v4 = vpop.eup %6051 }
 0x4b5   : > { %v4944_v52 = vadd.f32 %v4943_v11, %v4638_v56  ;;  %v4809_v56 = vadd.f32 %v4808_v25, %v4648_v22  ;;  %v4741_v11 = vadd.f32 %v4740_v39, %v4651_v60 }
 0x4b7   : > { %v4945_v41 = vadd.f32 %v4944_v52, %v4642_v53  ;;  %v14019_v52 = vld [vmem:[#allocation9_spill] sm:$0xff] }
 0x4b9   : > { %v1706_v14 = vpop.xlane.xlu0 %1705  ;;  %v4946_v2 = vadd.f32 %v4945_v41, %v4646_v46  ;;  %v14022_v41 = vld [vmem:[#allocation78_spill] sm:$0xff]  ;;  %v14023_v46 = vld [vmem:[#allocation176_spill] sm:$0xff] }
 0x4bb   : > { %v4947_v37 = vadd.f32 %v4946_v2, %v4650_v49 }
 0x4bc   : > { %v12188_v45 = vpop.xlane.xlu1 %4276 }
 0x4bd   : > { %6055 = vrcp.f32 %v12188_v45  ;;  %v4641_v45 = vmul.f32 %v13999_v26, %v4419_v24  ;;  %v6054_v28 = vpop.eup %6053  ;;  %v4423_v24 = vmul.f32 %v6052_v4, %v1701_v55  ;;  %v4654_v55 = vmul.f32 %v14012_v47, %v4422_v3  ;;  %v14016_v26 = vld [vmem:[#allocation6_spill] sm:$0xff]  ;;  %v14018_v4 = vld [vmem:[#allocation8_spill] sm:$0xff]  ;;  %v14028_v47 = vld [vmem:[#allocation79_spill] sm:$0xff] }
 0x4be   : > { %v4424_v18 = vmul.f32 %v6054_v28, %v1706_v14  ;;  %v14024_v28 = vld [vmem:[#allocation127_spill] sm:$0xff] }
 0x4bf   : > { %v4876_v38 = vadd.f32 %v4875_v29, %v4641_v45  ;;  %v4655_v32 = vmul.f32 %v14013_v12, %v4423_v24  ;;  %v4656_v16 = vmul.f32 %v14014_v19, %v4423_v24  ;;  %v4657_v9 = vmul.f32 %v14015_v43, %v4423_v24  ;;  %v14031_v12 = vld [vmem:[#allocation277_spill] sm:$0xff] }
 0x4c0   : > { %v4658_v45 = vmul.f32 %v14016_v26, %v4423_v24  ;;  %v4948_v53 = vadd.f32 %v4947_v37, %v4654_v55  ;;  %v4659_v13 = vmul.f32 %v14017_v42, %v4424_v18  ;;  %v4660_v29 = vmul.f32 %v14018_v4, %v4424_v18  ;;  %v14032_v37 = vld [vmem:[#allocation28_spill] sm:$0xff]  ;;  %v14033_v26 = vld [vmem:[#allocation129_spill] sm:$0xff]  ;;  %v14034_v4 = vld [vmem:[#allocation327_spill] sm:$0xff] }
 0x4c1   : > { %v4877_v34 = vadd.f32 %v4876_v38, %v4645_v36  ;;  %v4742_v14 = vadd.f32 %v4741_v11, %v4655_v32  ;;  %v4661_v44 = vmul.f32 %v14019_v52, %v4424_v18  ;;  %v4662_v1 = vmul.f32 %v14020_v17, %v4424_v18  ;;  %v14021_v36 = vld [vmem:[#allocation382_spill] sm:$0xff]  ;;  %v14029_v18 = vld [vmem:[#allocation177_spill] sm:$0xff]  ;;  %v14035_v52 = vld [vmem:[#allocation384_spill] sm:$0xff] }
 0x4c2   : > { %v1711_v7 = vpop.xlane.xlu0 %1710  ;;  %v4949_v38 = vadd.f32 %v4948_v53, %v4658_v45  ;;  %v14036_v17 = vld [vmem:[#allocation80_spill] sm:$0xff] }
 0x4c3   : > { %v4878_v6 = vadd.f32 %v4877_v34, %v4649_v58  ;;  %v4743_v15 = vadd.f32 %v4742_v14, %v4659_v13 }
 0x4c4   : > { %v12207_v63 = vpop.xlane.xlu1 %4281 }
 0x4c5   : > { %v4879_v23 = vadd.f32 %v4878_v6, %v4653_v62 }
 0x4c7   : > { %v6056_v61 = vpop.eup %6055  ;;  %v4880_v54 = vadd.f32 %v4879_v23, %v4657_v9 }
 0x4c8   : > { %v4425_v5 = vmul.f32 %v6056_v61, %v1711_v7  ;;  %v14026_v7 = vld [vmem:[#allocation326_spill] sm:$0xff] }
 0x4c9   : > { %v4881_v24 = vadd.f32 %v4880_v54, %v4661_v44  ;;  %v14038_v54 = vld [vmem:[#allocation278_spill] sm:$0xff] }
 0x4ca   : > { %v4664_v8 = vmul.f32 %v14022_v41, %v4425_v5  ;;  %v4666_v10 = vmul.f32 %v14024_v28, %v4425_v5  ;;  %v14040_v41 = vld [vmem:[#allocation328_spill] sm:$0xff] }
 0x4cd   : > { %v4287_v59 = vpop.xlane.xlu1 %4286 }
 0x4ce   : > { %6057 = vrcp.f32 %v4287_v59  ;;  %v4652_v59 = vmul.f32 %v14010_v33, %v4422_v3  ;;  %v4663_v3 = vmul.f32 %v14021_v36, %v4425_v5  ;;  %v14025_v33 = vld [vmem:[#allocation276_spill] sm:$0xff] }
 0x4d0   : > { %v4744_v50 = vadd.f32 %v4743_v15, %v4663_v3  ;;  %v14039_v3 = vld [vmem:[#allocation35_spill] sm:$0xff]  ;;  %v14041_v15 = vld [vmem:[#allocation385_spill] sm:$0xff] }
 0x4d2   : > { %v1721_v35 = vpop.xlane.xlu0 %1720 }
 0x4d6   : > { %v4292_v27 = vpop.xlane.xlu1 %4291 }
 0x4d8   : > { %v6058_v57 = vpop.eup %6057 }
 0x4d9   : > { %v4427_v20 = vmul.f32 %v6058_v57, %v1721_v35 }
 0x4db   : > { %v4671_v39 = vmul.f32 %v14029_v18, %v4427_v20  ;;  %v4673_v32 = vmul.f32 %v14031_v12, %v4427_v20  ;;  %v4674_v19 = vmul.f32 %v14032_v37, %v4427_v20 }
 0x4dc   : > { %v4297_v21 = vpop.xlane.xlu1 %4296 }
 0x4dd   : > { %6059 = vrcp.f32 %v4297_v21  ;;  %v4950_v21 = vadd.f32 %v4949_v38, %v4662_v1 }
 0x4de   : > { %6061 = vrcp.f32 %v12207_v63  ;;  %v4810_v63 = vadd.f32 %v4809_v56, %v4652_v59  ;;  %v1731_v22 = vpop.xlane.xlu0 %1730  ;;  %v14030_v56 = vld [vmem:[#allocation128_spill] sm:$0xff] }
 0x4df   : > { %6063 = vrcp.f32 %v4292_v27  ;;  %v4665_v27 = vmul.f32 %v14023_v46, %v4425_v5  ;;  %v4951_v31 = vadd.f32 %v4950_v21, %v4666_v10  ;;  %v4672_v6 = vmul.f32 %v14030_v56, %v4427_v20  ;;  %v14044_v20 = vld [vmem:[#allocation130_spill] sm:$0xff] }
 0x4e0   : > { %v4811_v48 = vadd.f32 %v4810_v63, %v4656_v16 }
 0x4e1   : > { %v4882_v34 = vadd.f32 %v4881_v24, %v4665_v27  ;;  %v14043_v24 = vld [vmem:[#allocation179_spill] sm:$0xff] }
 0x4e2   : > { %v4812_v58 = vadd.f32 %v4811_v48, %v4660_v29 }
 0x4e4   : > { %v4302_v51 = vpop.xlane.xlu1 %4301  ;;  %v4813_v61 = vadd.f32 %v4812_v58, %v4664_v8 }
 0x4e5   : > { %6065 = vrcp.f32 %v4302_v51  ;;  %v14037_v51 = vld [vmem:[#allocation178_spill] sm:$0xff] }
 0x4e7   : > { %v6060_v0 = vpop.eup %6059 }
 0x4e8   : > { %v6062_v30 = vpop.eup %6061  ;;  %v1716_v25 = vpop.xlane.xlu1 %1715  ;;  %v4429_v60 = vmul.f32 %v6060_v0, %v1731_v22 }
 0x4e9   : > { %v4426_v49 = vmul.f32 %v6062_v30, %v1716_v25  ;;  %v6064_v43 = vpop.eup %6063  ;;  %v14042_v30 = vld [vmem:[#allocation81_spill] sm:$0xff] }
 0x4ea   : > { %v4679_v45 = vmul.f32 %v14033_v26, %v4429_v60  ;;  %v4680_v36 = vmul.f32 %v14038_v54, %v4429_v60  ;;  %v4681_v38 = vmul.f32 %v14039_v3, %v4429_v60  ;;  %v4682_v8 = vmul.f32 %v14040_v41, %v4429_v60 }
 0x4eb   : > { %v4667_v59 = vmul.f32 %v14025_v33, %v4426_v49  ;;  %v4668_v2 = vmul.f32 %v14026_v7, %v4426_v49  ;;  %v4669_v62 = vmul.f32 %v14027_v40, %v4426_v49  ;;  %v4670_v55 = vmul.f32 %v14028_v47, %v4426_v49 }
 0x4ec   : > { %v1726_v16 = vpop.xlane.xlu1 %1725 }
 0x4ed   : > { %v4745_v9 = vadd.f32 %v4744_v50, %v4667_v59  ;;  %v4814_v5 = vadd.f32 %v4813_v61, %v4668_v2  ;;  %v4883_v11 = vadd.f32 %v4882_v34, %v4669_v62  ;;  %v4952_v63 = vadd.f32 %v4951_v31, %v4670_v55 }
 0x4ee   : > { %v4428_v23 = vmul.f32 %v6064_v43, %v1726_v16 }
 0x4ef   : > { %v6066_v53 = vpop.eup %6065  ;;  %v4746_v42 = vadd.f32 %v4745_v9, %v4671_v39  ;;  %v4815_v13 = vadd.f32 %v4814_v5, %v4672_v6  ;;  %v4884_v35 = vadd.f32 %v4883_v11, %v4673_v32  ;;  %v4953_v14 = vadd.f32 %v4952_v63, %v4674_v19 }
 0x4f0   : > { %v4675_v29 = vmul.f32 %v14034_v4, %v4428_v23  ;;  %v4676_v44 = vmul.f32 %v14035_v52, %v4428_v23  ;;  %v4677_v1 = vmul.f32 %v14036_v17, %v4428_v23  ;;  %v4678_v57 = vmul.f32 %v14037_v51, %v4428_v23  ;;  %v1736_v48 = vpop.xlane.xlu1 %1735 }
 0x4f1   : > { %v4430_v46 = vmul.f32 %v6066_v53, %v1736_v48 }
 0x4f2   : > { %v4747_v27 = vadd.f32 %v4746_v42, %v4675_v29  ;;  %v4816_v28 = vadd.f32 %v4815_v13, %v4676_v44  ;;  %v4885_v10 = vadd.f32 %v4884_v35, %v4677_v1  ;;  %v4954_v0 = vadd.f32 %v4953_v14, %v4678_v57 }
 0x4f3   : > { %v4683_v22 = vmul.f32 %v14041_v15, %v4430_v46  ;;  %v4684_v58 = vmul.f32 %v14042_v30, %v4430_v46  ;;  %v4685_v21 = vmul.f32 %v14043_v24, %v4430_v46  ;;  %v4686_v25 = vmul.f32 %v14044_v20, %v4430_v46 }
 0x4f4   : > { %v4748_v50 = vadd.f32 %v4747_v27, %v4679_v45  ;;  %v4817_v49 = vadd.f32 %v4816_v28, %v4680_v36  ;;  %v4886_v61 = vadd.f32 %v4885_v10, %v4681_v38  ;;  %v4955_v34 = vadd.f32 %v4954_v0, %v4682_v8  ;;  %v14045_v0 = vld [vmem:[#allocation5_spill] sm:$0xff] }
 0x4f5   : > { %v6134_v46 = vmov 1966171168  }
 0x4f6   : > { %v4749_v31 = vadd.f32 %v4748_v50, %v4683_v22  ;;  %v4818_v33 = vadd.f32 %v4817_v49, %v4684_v58  ;;  %v4887_v60 = vadd.f32 %v4886_v61, %v4685_v21  ;;  %v4956_v59 = vadd.f32 %v4955_v34, %v4686_v25 }
 0x4f7   : > { %v4997_v27 = vunpack.c.l.s4 %v6134_v46  ;;  %v14046_v61 = vlaneseq }
 0x4f8   : > { %v4750_v7 = vrot.slane %v4749_v31, 4  ;;  %v4819_v2 = vrot.slane %v4818_v33, 4  ;;  %v4888_v40 = vrot.slane %v4887_v60, 4  ;;  %v4957_v62 = vrot.slane %v4956_v59, 4 }
 0x4f9   : > { %v4998_v28 = vunpack.c.0.s8 %v4997_v27  ;;  %vm5021_vm3 = vcmp.lt.s32.totalorder %v14046_v61, 512 }
 0x4fa   : > { %v4751_v47 = vadd.f32 %v4750_v7, %v4749_v31  ;;  %v4820_v55 = vadd.f32 %v4819_v2, %v4818_v33  ;;  %v4889_v18 = vadd.f32 %v4888_v40, %v4887_v60  ;;  %v4958_v39 = vadd.f32 %v4957_v62, %v4956_v59 }
 0x4fb   : > { %v5001_v15 = vsub.s32 %v4998_v28, %v14045_v0 }
 0x4fc   : > { %v4752_v56 = vrot.slane %v4751_v47, 2  ;;  %v4821_v6 = vrot.slane %v4820_v55, 2  ;;  %v4890_v12 = vrot.slane %v4889_v18, 2  ;;  %v4959_v32 = vrot.slane %v4958_v39, 2 }
 0x4fe   : > { %v4753_v37 = vadd.f32 %v4752_v56, %v4751_v47  ;;  %v4822_v19 = vadd.f32 %v4821_v6, %v4820_v55  ;;  %v4891_v16 = vadd.f32 %v4890_v12, %v4889_v18  ;;  %v4960_v43 = vadd.f32 %v4959_v32, %v4958_v39 }
 0x500   : > { %v4754_v9 = vrot.slane %v4753_v37, 1  ;;  %v4823_v5 = vrot.slane %v4822_v19, 1  ;;  %v4892_v11 = vrot.slane %v4891_v16, 1  ;;  %v4961_v45 = vrot.slane %v4960_v43, 1 }
 0x502   : > { %v4755_v63 = vadd.f32 %v4754_v9, %v4753_v37  ;;  %v4824_v26 = vadd.f32 %v4823_v5, %v4822_v19  ;;  %v4893_v23 = vadd.f32 %v4892_v11, %v4891_v16  ;;  %v4962_v42 = vadd.f32 %v4961_v45, %v4960_v43 }
 0x504   : > { %v4963_v53 = vadd.f32 %v4824_v26, %v4755_v63 }
 0x506   : > { %v4964_v13 = vadd.f32 %v4963_v53, %v4893_v23 }
 0x508   : > { %v4965_v35 = vadd.f32 %v4964_v13, %v4962_v42 }
 0x50a   : > { %4966 = vadd.xlane.f32.xlu0 %v4965_v35 }
 0x597   : > { %v4967_v14 = vpop.xlane.xlu0 %4966 }
 0x598   : > { %v4969_v4 = vmul.f32 0.001953125, %v4967_v14 }
 0x59a   : > { %v4970_v29 = vsub.f32 %v4755_v63, %v4969_v4  ;;  %v4971_v52 = vsub.f32 %v4824_v26, %v4969_v4  ;;  %v4972_v44 = vsub.f32 %v4893_v23, %v4969_v4  ;;  %v4973_v17 = vsub.f32 %v4962_v42, %v4969_v4 }
 0x59c   : > { %v4974_v1 = vmul.f32 %v4970_v29, %v4970_v29  ;;  %v4975_v51 = vmul.f32 %v4971_v52, %v4971_v52  ;;  %v4976_v57 = vmul.f32 %v4972_v44, %v4972_v44  ;;  %v4977_v54 = vmul.f32 %v4973_v17, %v4973_v17 }
 0x59e   : > { %v4978_v48 = vadd.f32 %v4975_v51, %v4974_v1 }
 0x5a0   : > { %v4979_v36 = vadd.f32 %v4978_v48, %v4976_v57 }
 0x5a2   : > { %v4980_v3 = vadd.f32 %v4979_v36, %v4977_v54 }
 0x5a4   : > { %4981 = vadd.xlane.f32.xlu1 %v4980_v3 }
 0x631   : > { %v4982_v38 = vpop.xlane.xlu1 %4981 }
 0x632   : > { %v4983_v41 = vmul.f32 0.001953125, %v4982_v38 }
 0x634   : > { %v4984_v8 = vadd.f32 1e-05, %v4983_v41 }
 0x636   : > { %6067 = vrsqrt.f32 %v4984_v8 }
 0x640   : > { %v6068_v10 = vpop.eup %6067 }
 0x641   : > { %v4986_v22 = vmul.f32 %v6068_v10, %v4970_v29  ;;  %v4987_v30 = vmul.f32 %v6068_v10, %v4971_v52  ;;  %v4988_v58 = vmul.f32 %v6068_v10, %v4972_v44  ;;  %v4989_v24 = vmul.f32 %v6068_v10, %v4973_v17 }
 0x643   : > { %v4994_v21 = vcombine.low %v4986_v22, %v4987_v30  ;;  %v4995_v20 = vcombine.low %v4988_v58, %v4989_v24 }
 0x645   : > { %v5002_v25 = vrot.slane %v4994_v21, %v5001_v15  ;;  %v5009_v50 = vrot.slane %v4995_v20, %v5001_v15 }
 0x647   : > { %v5010_v49 = vcombine.low %v5002_v25, %v5009_v50 }
 0x649   : > { %v5017_v34 = vrot.slane %v5010_v49, %v5001_v15 }
 0x64b   : > { %5023 = vst.msk [vmem:[%s230_s26] sm:$0xf] %vm5021_vm3, %v5017_v34 }
 0x64c   : > { %6082 = shalt.err (!%p6079_p3)
}
 0x64d   : > { %s6083_s11 = scalar_lea.hbm %s12296_s15, 64  ;;  %s6087_s13 = scalar_lea.hbm %s12343_s5, 128 }
 0x64e   : > { %p6084_p4 = scmp.ne.s32.totalorder %s12296_s15, %s6083_s11  ;;  %p6088_p9 = scmp.lt.u32.totalorder %s12296_s15, %s12343_s5 }
 0x64f   : > { %p6089_p10 = scmp.lt.u32.totalorder %s6087_s13, %s6083_s11  ;;  %p6091_p12 = scmp.lt.u32.totalorder %s6083_s11, %s12296_s15 }
 0x650   : > { %p6085_p7 = pnand %p6084_p4, %p6204_p5 }
 0x651   : > { %p6090_p11 = por %p6089_p10, %p6088_p9 }
 0x652   : > { %p6086_p8 = pneg %p6085_p7 }
 0x653   : > { %p6092_p13 = por %p6091_p12, %p6090_p11 }
 0x655   : > { %p6093_p0 = pnand %p6092_p13, %p6086_p8 }
 0x657   : > { %6096 = shalt.err (!%p6093_p0)
}
 0x658   : > { %5384 = dma.vmem_to_hbm [thread:$0]  (%p6204_p5), %s12298_s23, 64, %s12296_s15, %s5025_s6  }
 0x659 PF: > { %p5390_p1 = scmp.ge.s32.totalorder %s6131_s21, 2  ;;  %s5051_s17 = sand.u32 1, %s6119_s18  }
 0x65a   : > { %s5052_s26 = scalar_lea.sflag [#allocation3], %s5051_s17 }
 0x65b   : > { %p5387_p2 = pnand %p5390_p1, %p6208_p6 }
 0x65d   : > { %6114 = dma.done.wait (!%p5387_p2), %s5052_s26, 64  }
 0x65e   : > { %6116 = vsyncadd (!%p5387_p2), %s5052_s26, 4294967232  ;;  %p15_p3 = scmp.ge.s32.totalorder %s6191_s24, 4   ;;  %s14047_s18 = smov %s6123_s19 }
 0x65f   : > { %s14048_s19 = smov %s6127_s20  ;;  %s14049_s20 = smov %s6202_s27 }
 0x660   : > { %s14050_s21 = smov %s6191_s24  ;;  %17 = sbr.rel (!%p15_p3) target bundleno = 3 (0x3), region = 78 }
 0x667   :  { %5057 = vsyncpa [#allocation3], 1 }
 0x668   :  { %5059 = vsyncpa [#allocation3 + $0x1], 1 }

</bundles_post_ra>
